<compile_context>
chip_gen: v7x
topology: tpu7x:2x2x1
jax: 0.10.0
libtpu: 0.0.40
codegen_flags: <defaults>
</compile_context>

<pallas_src>
import math

import jax
import jax.numpy as jnp
from jax import lax
from jax.experimental import pallas as pl
from jax.experimental.pallas import tpu as pltpu


# ----- module config (SigmoidBin.__init__ defaults) -----
BIN_COUNT = 10
LENGTH = BIN_COUNT + 1                        # 11
VMIN = 0.0
VMAX = 1.0
SCALE = float(VMAX - VMIN)                    # 1.0
REG_SCALE = 2.0
STEP = SCALE / BIN_COUNT                      # 0.1
BIN_START = VMIN + SCALE / 2.0 / BIN_COUNT    # 0.05 ; bins[i] = BIN_START + STEP*i
USE_FW_REGRESSION = True

_M_PAD = 16                                   # sublane-aligned row count for the identity LHS
_SUB_ROWS = 512                               # rows per in-kernel sub-chunk (vreg pressure)
_TILE_ROWS_BIG = 8192                         # rows per grid step for large inputs
_TILE_ROWS_MED = 2048                         # mid-size inputs: keep >= 2 steps for v7x


def sigmoid_bin_kernel(pred_ref, out_ref):
    """pred_ref: (tile_rows, LENGTH) f32/bf16; out_ref: (1, tile_rows) f32 (lane-dense)."""
    tile_rows = pred_ref.shape[0]
    dt = pred_ref.dtype

    # (16, LENGTH) identity-like selector (rows 11..15 are zero).  1.0/0.0 are exact in
    # bf16/f32, so the "transpose" matmul reproduces the inputs exactly.
    eye = (lax.broadcasted_iota(jnp.int32, (_M_PAD, LENGTH), 0) ==
           lax.broadcasted_iota(jnp.int32, (_M_PAD, LENGTH), 1)).astype(dt)

    for r0 in range(0, tile_rows, _SUB_ROWS):                     # static unroll
        rows = min(_SUB_ROWS, tile_rows - r0)
        chunk = pred_ref[r0:r0 + rows, :]                         # (rows, LENGTH)

        # MXU identity transpose: ct[j, m] = chunk[m, j]  (rows land on lanes).
        # Contraction is over the LENGTH axis, so garbage in padded tail rows of a
        # partial last block stays confined to its own (discarded) output column.
        ct = lax.dot_general(
            eye, chunk,
            dimension_numbers=(((1,), (1,)), ((), ())),
            preferred_element_type=jnp.float32,
            precision=lax.Precision.HIGHEST)                      # (16, rows) f32

        # forward() applies no sigmoid to the regression logit.
        pred_reg = (ct[0:1, :] * REG_SCALE - REG_SCALE / 2.0) * STEP      # (1, rows)
        pred_bin = ct[1:1 + BIN_COUNT, :]                                 # (BIN_COUNT, rows)

        # torch.max tie-break: first maximal bin index (via where + sublane-min).
        maxv = jnp.max(pred_bin, axis=0, keepdims=True)                   # (1, rows)
        sub_iota = lax.broadcasted_iota(jnp.int32, pred_bin.shape, 0).astype(jnp.float32)
        bin_idx = jnp.min(jnp.where(pred_bin == maxv, sub_iota, float(BIN_COUNT)),
                          axis=0, keepdims=True)                          # (1, rows) f32

        # bins[i] = BIN_START + STEP*i -> gather is pure arithmetic (no bins input).
        bin_bias = BIN_START + STEP * bin_idx
        result = pred_reg + bin_bias if USE_FW_REGRESSION else bin_bias
        out_ref[:, r0:r0 + rows] = jnp.clip(result, VMIN, VMAX)           # lane-dense store


def _launch(pred2d, tile_rows):
    n_rows = pred2d.shape[0]
    grid = pl.cdiv(n_rows, tile_rows)
    return pl.pallas_call(
        sigmoid_bin_kernel,
        out_shape=jax.ShapeDtypeStruct((grid, tile_rows), jnp.float32),
        grid_spec=pltpu.PrefetchScalarGridSpec(
            num_scalar_prefetch=0,
            grid=(grid,),
            in_specs=[pl.BlockSpec((tile_rows, LENGTH), lambda i: (i, 0))],
            out_specs=pl.BlockSpec((1, tile_rows), lambda i: (i, 0)),
        ),
        compiler_params=pltpu.CompilerParams(
            dimension_semantics=("parallel",),
            vmem_limit_bytes=32 * 1024 * 1024),
    )(pred2d)


@jax.jit
def sigmoid_bin_forward(pred):
    assert pred.shape[-1] == LENGTH, (
        "pred.shape[-1]=%d is not equal to length=%d" % (pred.shape[-1], LENGTH))

    lead_shape = pred.shape[:-1]
    n = math.prod(lead_shape)
    if n == 0:
        return jnp.zeros(lead_shape, jnp.float32)

    pred2d = pred.reshape(n, LENGTH)           # free reshape; keep the producer's dtype

    if n >= 4 * _TILE_ROWS_BIG:
        tile_rows = _TILE_ROWS_BIG             # big tiles, still >= 4 parallel steps
    elif n >= 2 * _TILE_ROWS_MED:
        tile_rows = _TILE_ROWS_MED             # mid size: >= 2 steps (v7x has 2 TCs)
    else:
        tile_rows = n                          # single block == full array, no padding

    out = _launch(pred2d, tile_rows)           # (grid, tile_rows) f32

    flat = out.reshape(-1)                     # row-major: element i == result for row i
    if flat.shape[0] != n:                     # ragged tail (garbage columns) -> small slice
        flat = flat[:n]
    return flat.reshape(lead_shape)


def _make_bins():
    # torch.range(start, end + 1e-4, step) -> BIN_START + STEP*i, i = 0..BIN_COUNT-1
    return BIN_START + STEP * jnp.arange(BIN_COUNT, dtype=jnp.float32)


def _reference(pred):
    pred = pred.astype(jnp.float32)
    pred_reg = (pred[..., 0] * REG_SCALE - REG_SCALE / 2.0) * STEP
    pred_bin = pred[..., 1:1 + BIN_COUNT]
    bin_idx = jnp.argmax(pred_bin, axis=-1)
    bin_bias = _make_bins()[bin_idx]
    result = pred_reg + bin_bias if USE_FW_REGRESSION else bin_bias
    return jnp.clip(result, VMIN, VMAX)


if __name__ == "__main__":
    key = jax.random.PRNGKey(0)
    k1, k2, k3 = jax.random.split(key, 3)

    def _mk(k, shape):
        # Quantize to a bf16-exact grid so the identity-matmul transpose is bit-exact
        # regardless of the compiler's f32 matmul pass count (keeps the check tight).
        x = jax.random.normal(k, shape, dtype=jnp.float32)
        return jnp.clip(jnp.round(x * 64.0) / 64.0, -3.5, 3.5)

    # YOLO-ish head: (batch=2, anchors=4, H=16, W=16) predictions of width length=11.
    pred = _mk(k1, (2, 4, 16, 16, LENGTH))
    out = sigmoid_bin_forward(pred)
    jax.block_until_ready(out)
    assert out.shape == pred.shape[:-1]
    assert jnp.allclose(out, _reference(pred), atol=1e-4, rtol=1e-4), \
        "mismatch vs reference (single block)"

    # Ragged multi-tile path: n=5000 -> 3 grid steps with a partial last block.
    pred_big = _mk(k2, (5, 1000, LENGTH))
    out_big = sigmoid_bin_forward(pred_big)
    jax.block_until_ready(out_big)
    assert out_big.shape == pred_big.shape[:-1]
    assert jnp.allclose(out_big, _reference(pred_big), atol=1e-4, rtol=1e-4), \
        "mismatch vs reference (multi-tile ragged)"

    # Tiny ragged input (single, non-lane-aligned block).
    pred_small = _mk(k3, (3, 5, LENGTH))
    out_small = sigmoid_bin_forward(pred_small)
    jax.block_until_ready(out_small)
    assert out_small.shape == pred_small.shape[:-1]
    assert jnp.allclose(out_small, _reference(pred_small), atol=1e-4, rtol=1e-4), \
        "mismatch vs reference (tiny)"

    # bf16 inputs feed the MXU directly (f32 accumulate) -- no in-kernel cast pass.
    pred_bf16 = pred.astype(jnp.bfloat16)
    out_bf16 = sigmoid_bin_forward(pred_bf16)
    jax.block_until_ready(out_bf16)
    assert jnp.allclose(out_bf16, _reference(pred_bf16), atol=1e-4, rtol=1e-4), \
        "mismatch vs reference (bf16)"

    print("KERNEL_OK")
</pallas_src>

<mosaic_0001>
module attributes {stable_mosaic.version = 11 : i64} {
  func.func @sigmoid_bin_kernel(%arg0: i32, %arg1: memref<2048x11xf32, #tpu.memory_space<vmem>>, %arg2: memref<1x2048xf32, #tpu.memory_space<vmem>>) attributes {dimension_semantics = [#tpu.dimension_semantics<parallel>], iteration_bounds = array<i64: 1>, scalar_prefetch = 0 : i64, scratch_operands = 0 : i64, tpu.core_type = #tpu.core_type<tc>, window_params = [{transform_indices = @transform_0, window_bounds = array<i64: 2048, 11>}, {transform_indices = @transform_1, window_bounds = array<i64: 1, 2048>}]} {
    %0 = tpu.iota {dimensions = array<i32: 0>} : vector<16x11xi32>
    %1 = tpu.iota {dimensions = array<i32: 1>} : vector<16x11xi32>
    %2 = arith.cmpi eq, %0, %1 : vector<16x11xi32>
    %3 = arith.extui %2 : vector<16x11xi1> to vector<16x11xi32>
    %4 = arith.sitofp %3 : vector<16x11xi32> to vector<16x11xf32>
    %c0 = arith.constant 0 : index
    %c0_0 = arith.constant 0 : index
    %5 = vector.load %arg1[%c0, %c0_0] : memref<2048x11xf32, #tpu.memory_space<vmem>>, vector<512x11xf32>
    %cst = arith.constant dense<0.000000e+00> : vector<16x512xf32>
    %6 = tpu.matmul %4, %5, %cst {dimension_numbers = #tpu.dot_dimension_numbers<[1], [1], [0], [0], [0, 0, 1, 0], [], []>, precision = #tpu.contract_precision<fp32>} : vector<16x11xf32>, vector<512x11xf32>, vector<16x512xf32> -> vector<16x512xf32>
    %7 = vector.extract_strided_slice %6 {offsets = [0, 0], sizes = [1, 512], strides = [1, 1]} : vector<16x512xf32> to vector<1x512xf32>
    %cst_1 = arith.constant 2.000000e+00 : f32
    %8 = vector.broadcast %cst_1 : f32 to vector<1x512xf32>
    %9 = arith.mulf %7, %8 : vector<1x512xf32>
    %cst_2 = arith.constant 1.000000e+00 : f32
    %10 = vector.broadcast %cst_2 : f32 to vector<1x512xf32>
    %11 = arith.subf %9, %10 : vector<1x512xf32>
    %cst_3 = arith.constant 1.000000e-01 : f32
    %12 = vector.broadcast %cst_3 : f32 to vector<1x512xf32>
    %13 = arith.mulf %11, %12 : vector<1x512xf32>
    %14 = vector.extract_strided_slice %6 {offsets = [1, 0], sizes = [10, 512], strides = [1, 1]} : vector<16x512xf32> to vector<10x512xf32>
    %cst_4 = arith.constant dense<0xFF800000> : vector<512xf32>
    %15 = vector.multi_reduction <maximumf>, %14, %cst_4 [0] : vector<10x512xf32> to vector<512xf32>
    %16 = vector.shape_cast %15 : vector<512xf32> to vector<1x512xf32>
    %17 = tpu.iota {dimensions = array<i32: 0>} : vector<10x512xi32>
    %18 = arith.sitofp %17 : vector<10x512xi32> to vector<10x512xf32>
    %19 = vector.broadcast %16 : vector<1x512xf32> to vector<10x512xf32>
    %20 = arith.cmpf oeq, %14, %19 : vector<10x512xf32>
    %cst_5 = arith.constant 1.000000e+01 : f32
    %21 = vector.broadcast %cst_5 : f32 to vector<10x512xf32>
    %22 = arith.select %20, %18, %21 : vector<10x512xi1>, vector<10x512xf32>
    %cst_6 = arith.constant dense<0x7F800000> : vector<512xf32>
    %23 = vector.multi_reduction <minimumf>, %22, %cst_6 [0] : vector<10x512xf32> to vector<512xf32>
    %24 = vector.shape_cast %23 : vector<512xf32> to vector<1x512xf32>
    %cst_7 = arith.constant 1.000000e-01 : f32
    %25 = vector.broadcast %cst_7 : f32 to vector<1x512xf32>
    %26 = arith.mulf %25, %24 : vector<1x512xf32>
    %cst_8 = arith.constant 5.000000e-02 : f32
    %27 = vector.broadcast %cst_8 : f32 to vector<1x512xf32>
    %28 = arith.addf %27, %26 : vector<1x512xf32>
    %29 = arith.addf %13, %28 : vector<1x512xf32>
    %cst_9 = arith.constant 0.000000e+00 : f32
    %cst_10 = arith.constant 1.000000e+00 : f32
    %30 = vector.broadcast %cst_9 : f32 to vector<1x512xf32>
    %31 = arith.maximumf %30, %29 : vector<1x512xf32>
    %32 = vector.broadcast %cst_10 : f32 to vector<1x512xf32>
    %33 = arith.minimumf %32, %31 : vector<1x512xf32>
    %c0_11 = arith.constant 0 : index
    %c0_12 = arith.constant 0 : index
    %34 = vector.load %arg2[%c0_11, %c0_12] : memref<1x2048xf32, #tpu.memory_space<vmem>>, vector<1x512xf32>
    tpu.vector_store %arg2[%c0_11, %c0_12], %33 {strides = array<i32>} : memref<1x2048xf32, #tpu.memory_space<vmem>>, vector<1x512xf32>,
    %c512 = arith.constant 512 : index
    %c0_13 = arith.constant 0 : index
    %35 = vector.load %arg1[%c512, %c0_13] : memref<2048x11xf32, #tpu.memory_space<vmem>>, vector<512x11xf32>
    %cst_14 = arith.constant dense<0.000000e+00> : vector<16x512xf32>
    %36 = tpu.matmul %4, %35, %cst_14 {dimension_numbers = #tpu.dot_dimension_numbers<[1], [1], [0], [0], [0, 0, 1, 0], [], []>, precision = #tpu.contract_precision<fp32>} : vector<16x11xf32>, vector<512x11xf32>, vector<16x512xf32> -> vector<16x512xf32>
    %37 = vector.extract_strided_slice %36 {offsets = [0, 0], sizes = [1, 512], strides = [1, 1]} : vector<16x512xf32> to vector<1x512xf32>
    %cst_15 = arith.constant 2.000000e+00 : f32
    %38 = vector.broadcast %cst_15 : f32 to vector<1x512xf32>
    %39 = arith.mulf %37, %38 : vector<1x512xf32>
    %cst_16 = arith.constant 1.000000e+00 : f32
    %40 = vector.broadcast %cst_16 : f32 to vector<1x512xf32>
    %41 = arith.subf %39, %40 : vector<1x512xf32>
    %cst_17 = arith.constant 1.000000e-01 : f32
    %42 = vector.broadcast %cst_17 : f32 to vector<1x512xf32>
    %43 = arith.mulf %41, %42 : vector<1x512xf32>
    %44 = vector.extract_strided_slice %36 {offsets = [1, 0], sizes = [10, 512], strides = [1, 1]} : vector<16x512xf32> to vector<10x512xf32>
    %cst_18 = arith.constant dense<0xFF800000> : vector<512xf32>
    %45 = vector.multi_reduction <maximumf>, %44, %cst_18 [0] : vector<10x512xf32> to vector<512xf32>
    %46 = vector.shape_cast %45 : vector<512xf32> to vector<1x512xf32>
    %47 = tpu.iota {dimensions = array<i32: 0>} : vector<10x512xi32>
    %48 = arith.sitofp %47 : vector<10x512xi32> to vector<10x512xf32>
    %49 = vector.broadcast %46 : vector<1x512xf32> to vector<10x512xf32>
    %50 = arith.cmpf oeq, %44, %49 : vector<10x512xf32>
    %cst_19 = arith.constant 1.000000e+01 : f32
    %51 = vector.broadcast %cst_19 : f32 to vector<10x512xf32>
    %52 = arith.select %50, %48, %51 : vector<10x512xi1>, vector<10x512xf32>
    %cst_20 = arith.constant dense<0x7F800000> : vector<512xf32>
    %53 = vector.multi_reduction <minimumf>, %52, %cst_20 [0] : vector<10x512xf32> to vector<512xf32>
    %54 = vector.shape_cast %53 : vector<512xf32> to vector<1x512xf32>
    %cst_21 = arith.constant 1.000000e-01 : f32
    %55 = vector.broadcast %cst_21 : f32 to vector<1x512xf32>
    %56 = arith.mulf %55, %54 : vector<1x512xf32>
    %cst_22 = arith.constant 5.000000e-02 : f32
    %57 = vector.broadcast %cst_22 : f32 to vector<1x512xf32>
    %58 = arith.addf %57, %56 : vector<1x512xf32>
    %59 = arith.addf %43, %58 : vector<1x512xf32>
    %cst_23 = arith.constant 0.000000e+00 : f32
    %cst_24 = arith.constant 1.000000e+00 : f32
    %60 = vector.broadcast %cst_23 : f32 to vector<1x512xf32>
    %61 = arith.maximumf %60, %59 : vector<1x512xf32>
    %62 = vector.broadcast %cst_24 : f32 to vector<1x512xf32>
    %63 = arith.minimumf %62, %61 : vector<1x512xf32>
    %c0_25 = arith.constant 0 : index
    %c512_26 = arith.constant 512 : index
    %64 = vector.load %arg2[%c0_25, %c512_26] : memref<1x2048xf32, #tpu.memory_space<vmem>>, vector<1x512xf32>
    tpu.vector_store %arg2[%c0_25, %c512_26], %63 {strides = array<i32>} : memref<1x2048xf32, #tpu.memory_space<vmem>>, vector<1x512xf32>,
    %c1024 = arith.constant 1024 : index
    %c0_27 = arith.constant 0 : index
    %65 = vector.load %arg1[%c1024, %c0_27] : memref<2048x11xf32, #tpu.memory_space<vmem>>, vector<512x11xf32>
    %cst_28 = arith.constant dense<0.000000e+00> : vector<16x512xf32>
    %66 = tpu.matmul %4, %65, %cst_28 {dimension_numbers = #tpu.dot_dimension_numbers<[1], [1], [0], [0], [0, 0, 1, 0], [], []>, precision = #tpu.contract_precision<fp32>} : vector<16x11xf32>, vector<512x11xf32>, vector<16x512xf32> -> vector<16x512xf32>
    %67 = vector.extract_strided_slice %66 {offsets = [0, 0], sizes = [1, 512], strides = [1, 1]} : vector<16x512xf32> to vector<1x512xf32>
    %cst_29 = arith.constant 2.000000e+00 : f32
    %68 = vector.broadcast %cst_29 : f32 to vector<1x512xf32>
    %69 = arith.mulf %67, %68 : vector<1x512xf32>
    %cst_30 = arith.constant 1.000000e+00 : f32
    %70 = vector.broadcast %cst_30 : f32 to vector<1x512xf32>
    %71 = arith.subf %69, %70 : vector<1x512xf32>
    %cst_31 = arith.constant 1.000000e-01 : f32
    %72 = vector.broadcast %cst_31 : f32 to vector<1x512xf32>
    %73 = arith.mulf %71, %72 : vector<1x512xf32>
    %74 = vector.extract_strided_slice %66 {offsets = [1, 0], sizes = [10, 512], strides = [1, 1]} : vector<16x512xf32> to vector<10x512xf32>
    %cst_32 = arith.constant dense<0xFF800000> : vector<512xf32>
    %75 = vector.multi_reduction <maximumf>, %74, %cst_32 [0] : vector<10x512xf32> to vector<512xf32>
    %76 = vector.shape_cast %75 : vector<512xf32> to vector<1x512xf32>
    %77 = tpu.iota {dimensions = array<i32: 0>} : vector<10x512xi32>
    %78 = arith.sitofp %77 : vector<10x512xi32> to vector<10x512xf32>
    %79 = vector.broadcast %76 : vector<1x512xf32> to vector<10x512xf32>
    %80 = arith.cmpf oeq, %74, %79 : vector<10x512xf32>
    %cst_33 = arith.constant 1.000000e+01 : f32
    %81 = vector.broadcast %cst_33 : f32 to vector<10x512xf32>
    %82 = arith.select %80, %78, %81 : vector<10x512xi1>, vector<10x512xf32>
    %cst_34 = arith.constant dense<0x7F800000> : vector<512xf32>
    %83 = vector.multi_reduction <minimumf>, %82, %cst_34 [0] : vector<10x512xf32> to vector<512xf32>
    %84 = vector.shape_cast %83 : vector<512xf32> to vector<1x512xf32>
    %cst_35 = arith.constant 1.000000e-01 : f32
    %85 = vector.broadcast %cst_35 : f32 to vector<1x512xf32>
    %86 = arith.mulf %85, %84 : vector<1x512xf32>
    %cst_36 = arith.constant 5.000000e-02 : f32
    %87 = vector.broadcast %cst_36 : f32 to vector<1x512xf32>
    %88 = arith.addf %87, %86 : vector<1x512xf32>
    %89 = arith.addf %73, %88 : vector<1x512xf32>
    %cst_37 = arith.constant 0.000000e+00 : f32
    %cst_38 = arith.constant 1.000000e+00 : f32
    %90 = vector.broadcast %cst_37 : f32 to vector<1x512xf32>
    %91 = arith.maximumf %90, %89 : vector<1x512xf32>
    %92 = vector.broadcast %cst_38 : f32 to vector<1x512xf32>
    %93 = arith.minimumf %92, %91 : vector<1x512xf32>
    %c0_39 = arith.constant 0 : index
    %c1024_40 = arith.constant 1024 : index
    %94 = vector.load %arg2[%c0_39, %c1024_40] : memref<1x2048xf32, #tpu.memory_space<vmem>>, vector<1x512xf32>
    tpu.vector_store %arg2[%c0_39, %c1024_40], %93 {strides = array<i32>} : memref<1x2048xf32, #tpu.memory_space<vmem>>, vector<1x512xf32>,
    %c1536 = arith.constant 1536 : index
    %c0_41 = arith.constant 0 : index
    %95 = vector.load %arg1[%c1536, %c0_41] : memref<2048x11xf32, #tpu.memory_space<vmem>>, vector<512x11xf32>
    %cst_42 = arith.constant dense<0.000000e+00> : vector<16x512xf32>
    %96 = tpu.matmul %4, %95, %cst_42 {dimension_numbers = #tpu.dot_dimension_numbers<[1], [1], [0], [0], [0, 0, 1, 0], [], []>, precision = #tpu.contract_precision<fp32>} : vector<16x11xf32>, vector<512x11xf32>, vector<16x512xf32> -> vector<16x512xf32>
    %97 = vector.extract_strided_slice %96 {offsets = [0, 0], sizes = [1, 512], strides = [1, 1]} : vector<16x512xf32> to vector<1x512xf32>
    %cst_43 = arith.constant 2.000000e+00 : f32
    %98 = vector.broadcast %cst_43 : f32 to vector<1x512xf32>
    %99 = arith.mulf %97, %98 : vector<1x512xf32>
    %cst_44 = arith.constant 1.000000e+00 : f32
    %100 = vector.broadcast %cst_44 : f32 to vector<1x512xf32>
    %101 = arith.subf %99, %100 : vector<1x512xf32>
    %cst_45 = arith.constant 1.000000e-01 : f32
    %102 = vector.broadcast %cst_45 : f32 to vector<1x512xf32>
    %103 = arith.mulf %101, %102 : vector<1x512xf32>
    %104 = vector.extract_strided_slice %96 {offsets = [1, 0], sizes = [10, 512], strides = [1, 1]} : vector<16x512xf32> to vector<10x512xf32>
    %cst_46 = arith.constant dense<0xFF800000> : vector<512xf32>
    %105 = vector.multi_reduction <maximumf>, %104, %cst_46 [0] : vector<10x512xf32> to vector<512xf32>
    %106 = vector.shape_cast %105 : vector<512xf32> to vector<1x512xf32>
    %107 = tpu.iota {dimensions = array<i32: 0>} : vector<10x512xi32>
    %108 = arith.sitofp %107 : vector<10x512xi32> to vector<10x512xf32>
    %109 = vector.broadcast %106 : vector<1x512xf32> to vector<10x512xf32>
    %110 = arith.cmpf oeq, %104, %109 : vector<10x512xf32>
    %cst_47 = arith.constant 1.000000e+01 : f32
    %111 = vector.broadcast %cst_47 : f32 to vector<10x512xf32>
    %112 = arith.select %110, %108, %111 : vector<10x512xi1>, vector<10x512xf32>
    %cst_48 = arith.constant dense<0x7F800000> : vector<512xf32>
    %113 = vector.multi_reduction <minimumf>, %112, %cst_48 [0] : vector<10x512xf32> to vector<512xf32>
    %114 = vector.shape_cast %113 : vector<512xf32> to vector<1x512xf32>
    %cst_49 = arith.constant 1.000000e-01 : f32
    %115 = vector.broadcast %cst_49 : f32 to vector<1x512xf32>
    %116 = arith.mulf %115, %114 : vector<1x512xf32>
    %cst_50 = arith.constant 5.000000e-02 : f32
    %117 = vector.broadcast %cst_50 : f32 to vector<1x512xf32>
    %118 = arith.addf %117, %116 : vector<1x512xf32>
    %119 = arith.addf %103, %118 : vector<1x512xf32>
    %cst_51 = arith.constant 0.000000e+00 : f32
    %cst_52 = arith.constant 1.000000e+00 : f32
    %120 = vector.broadcast %cst_51 : f32 to vector<1x512xf32>
    %121 = arith.maximumf %120, %119 : vector<1x512xf32>
    %122 = vector.broadcast %cst_52 : f32 to vector<1x512xf32>
    %123 = arith.minimumf %122, %121 : vector<1x512xf32>
    %c0_53 = arith.constant 0 : index
    %c1536_54 = arith.constant 1536 : index
    %124 = vector.load %arg2[%c0_53, %c1536_54] : memref<1x2048xf32, #tpu.memory_space<vmem>>, vector<1x512xf32>
    tpu.vector_store %arg2[%c0_53, %c1536_54], %123 {strides = array<i32>} : memref<1x2048xf32, #tpu.memory_space<vmem>>, vector<1x512xf32>,
    return
  }
  func.func @transform_0(%arg0: i32) -> (i32, i32) {
    %c0_i32 = arith.constant 0 : i32
    %c0_i32_0 = arith.constant 0 : i32
    return %arg0, %c0_i32 : i32, i32
  }
  func.func @transform_1(%arg0: i32) -> (i32, i32) {
    %c0_i32 = arith.constant 0 : i32
    %c0_i32_0 = arith.constant 0 : i32
    return %arg0, %c0_i32 : i32, i32
  }
}

</mosaic_0001>

<bundles_post_ra>
// kernel: sigmoid_bin_forward.1
= control target key start
LH: loop header
LB: loop body
LE: loop exit
PB: predicated region body
PF: predicated region fallthrough
CT: control target
= control target key end

     0   :  { %vm83_vm0 = vcmask 89088   ;;  %vm2102_vm3 = vcmask 1047553   ;;  %vm2104_vm4 = vcmask 1042432   ;;  %vm2152_vm5 = vcmask 1040384   ;;  %s17847_s0 = inlined_call_operand.vmem [shape: f32[2048,11], index: 0, kind: input, shape index: {}]   ;;  %s17848_s1 = inlined_call_operand.vmem [shape: f32[1,2048], index: 1, kind: output, shape index: {}]  }
   0x1   :  { %v35_v0 = vld [vmem:[%s17847_s0 + $0x80] sm:$0xff]  ;;  %v36_v1 = vld [vmem:[%s17847_s0 + $0x88] sm:$0xff]  ;;  %v37_v19 = vld [vmem:[%s17847_s0 + $0x90] sm:$0xff] }
   0x2   :  { %v67_v2 = vld [vmem:[%s17847_s0 + $0x180] sm:$0xff]  ;;  %v139_v3 = vsel %vm83_vm0, %v35_v0, 0  ;;  %v142_v4 = vsel %vm83_vm0, %v36_v1, 0  ;;  %v68_v5 = vld [vmem:[%s17847_s0 + $0x188] sm:$0xff]  ;;  %v38_v20 = vld [vmem:[%s17847_s0 + $0x98] sm:$0xff]  ;;  %v145_v31 = vsel %vm83_vm0, %v37_v19, 0 }
   0x3   :  { %v235_v6 = vsel %vm83_vm0, %v67_v2, 0  ;;  %v19_v7 = vld [vmem:[%s17847_s0] sm:$0xff]  ;;  %v20_v8 = vld [vmem:[%s17847_s0 + $0x8] sm:$0xff]  ;;  %v331_v9 = vand.u32 4294901760, %v139_v3  ;;  %v334_v10 = vand.u32 4294901760, %v142_v4  ;;  %v238_v11 = vsel %vm83_vm0, %v68_v5, 0 }
   0x4   :  { %v1235_v12 = vand.u32 4294901760, %v235_v6  ;;  %v51_v13 = vld [vmem:[%s17847_s0 + $0x100] sm:$0xff]  ;;  %v52_v14 = vld [vmem:[%s17847_s0 + $0x108] sm:$0xff]  ;;  %v1238_v15 = vand.u32 4294901760, %v238_v11  ;;  %v91_v16 = vsel %vm83_vm0, %v19_v7, 0  ;;  %v94_v17 = vsel %vm83_vm0, %v20_v8, 0 }
   0x5   :  { %v187_v18 = vsel %vm83_vm0, %v51_v13, 0  ;;  %v12443_v21 = vpack.c.bf16 %v334_v10, %v331_v9  ;;  %v12445_v22 = vsub.f32 %v139_v3, %v331_v9  ;;  %v12447_v24 = vsub.f32 %v142_v4, %v334_v10  ;;  %v69_v28 = vld [vmem:[%s17847_s0 + $0x190] sm:$0xff]  ;;  %v70_v33 = vld [vmem:[%s17847_s0 + $0x198] sm:$0xff]  ;;  %v39_v54 = vld [vmem:[%s17847_s0 + $0xa0] sm:$0xff] }
   0x6   :  { %v12449_v25 = vpack.c.bf16 %v1238_v15, %v1235_v12  ;;  %v283_v26 = vand.u32 4294901760, %v91_v16  ;;  %v286_v27 = vand.u32 4294901760, %v94_v17  ;;  %v190_v29 = vsel %vm83_vm0, %v52_v14, 0  ;;  %v21_v42 = vld [vmem:[%s17847_s0 + $0x10] sm:$0xff]  ;;  %v22_v43 = vld [vmem:[%s17847_s0 + $0x18] sm:$0xff]  ;;  %v40_v55 = vld [vmem:[%s17847_s0 + $0xa8] sm:$0xff] }
   0x7   :  { %18742 = vst [vmem:[#allocation2_spill] sm:$0xff] %v12443_v21  ;;  %18743 = vst [vmem:[#allocation3_spill] sm:$0xff] %v12447_v24  ;;  %10697 = vmatprep.subr.bf16.mxu0 %v12443_v21  ;;  %v1187_v30 = vand.u32 4294901760, %v187_v18  ;;  %v148_v32 = vsel %vm83_vm0, %v38_v20, 0  ;;  %v12462_v34 = vsub.f32 %v235_v6, %v1235_v12  ;;  %v12464_v35 = vsub.f32 %v238_v11, %v1238_v15  ;;  %v53_v44 = vld [vmem:[%s17847_s0 + $0x110] sm:$0xff]  ;;  %v54_v53 = vld [vmem:[%s17847_s0 + $0x118] sm:$0xff] }
   0x8   :  { %18744 = vst [vmem:[#allocation4_spill] sm:$0xff] %v12449_v25  ;;  %10889 = vmatprep.subr.bf16.mxu1 %v12449_v25  ;;  %v12466_v36 = vpack.c.bf16 %v286_v27, %v283_v26  ;;  %v1190_v37 = vand.u32 4294901760, %v190_v29  ;;  %v12468_v38 = vsub.f32 %v91_v16, %v283_v26  ;;  %v337_v39 = vand.u32 4294901760, %v145_v31  ;;  %v71_v0 = vld [vmem:[%s17847_s0 + $0x1a0] sm:$0xff]  ;;  %v72_v5 = vld [vmem:[%s17847_s0 + $0x1a8] sm:$0xff] }
   0x9   :  { %18745 = vst [vmem:[#allocation5_spill] sm:$0xff] %v12462_v34  ;;  %18746 = vst [vmem:[#allocation6_spill] sm:$0xff] %v12464_v35  ;;  %v340_v40 = vand.u32 4294901760, %v148_v32  ;;  %v241_v41 = vsel %vm83_vm0, %v69_v28, 0  ;;  %v12481_v45 = vsub.f32 %v94_v17, %v286_v27  ;;  %v244_v47 = vsel %vm83_vm0, %v70_v33, 0  ;;  %v23_v14 = vld [vmem:[%s17847_s0 + $0x20] sm:$0xff] }
   0xa   :  { %18747 = vst [vmem:[#allocation7_spill] sm:$0xff] %v12466_v36  ;;  %18748 = vst [vmem:[#allocation8_spill] sm:$0xff] %v12468_v38  ;;  %10699 = vmatpush3.bf16.xpose.msra.mxu0 %v12466_v36  ;;  %v12483_v46 = vpack.c.bf16 %v1190_v37, %v1187_v30  ;;  %v1241_v48 = vand.u32 4294901760, %v241_v41  ;;  %v12486_v49 = vsub.f32 %v187_v18, %v1187_v30  ;;  %v1244_v52 = vand.u32 4294901760, %v244_v47  ;;  %v24_v15 = vld [vmem:[%s17847_s0 + $0x28] sm:$0xff]  ;;  %v55_v16 = vld [vmem:[%s17847_s0 + $0x120] sm:$0xff] }
   0xb   :  { %18749 = vst [vmem:[#allocation9_spill] sm:$0xff] %v12481_v45  ;;  %v12488_v50 = vsub.f32 %v190_v29, %v1190_v37  ;;  %v12490_v51 = vpack.c.bf16 %v340_v40, %v337_v39  ;;  %v12502_v56 = vsub.f32 %v145_v31, %v337_v39  ;;  %v97_v57 = vsel %vm83_vm0, %v21_v42, 0  ;;  %v56_v30 = vld [vmem:[%s17847_s0 + $0x128] sm:$0xff]  ;;  %v41_v31 = vld [vmem:[%s17847_s0 + $0xb0] sm:$0xff]  ;;  %v62_v36 = vld [vmem:[%s17847_s0 + $0x158] sm:$0xff] }
   0xc   :  { %18750 = vst [vmem:[#allocation10_spill] sm:$0xff] %v12483_v46  ;;  %18751 = vst [vmem:[#allocation11_spill] sm:$0xff] %v12486_v49  ;;  %10891 = vmatpush3.bf16.xpose.msra.mxu1 %v12483_v46  ;;  %v100_v58 = vsel %vm83_vm0, %v22_v43, 0  ;;  %v193_v59 = vsel %vm83_vm0, %v53_v44, 0  ;;  %v12508_v60 = vsub.f32 %v148_v32, %v340_v40  ;;  %v12510_v61 = vpack.c.bf16 %v1244_v52, %v1241_v48  ;;  %v42_v32 = vld [vmem:[%s17847_s0 + $0xb8] sm:$0xff]  ;;  %v29_v46 = vld [vmem:[%s17847_s0 + $0x50] sm:$0xff] }
   0xd   :  { %18752 = vst [vmem:[#allocation12_spill] sm:$0xff] %v12488_v50  ;;  %18753 = vst [vmem:[#allocation13_spill] sm:$0xff] %v12490_v51  ;;  %10701 = vmatprep.subr.bf16.mxu0 %v12490_v51  ;;  %v289_v62 = vand.u32 4294901760, %v97_v57  ;;  %v292_v63 = vand.u32 4294901760, %v100_v58  ;;  %v196_v1 = vsel %vm83_vm0, %v54_v53, 0  ;;  %v1193_v2 = vand.u32 4294901760, %v193_v59 }
   0xe   :  { %18754 = vst [vmem:[#allocation14_spill] sm:$0xff] %v12502_v56  ;;  %18755 = vst [vmem:[#allocation15_spill] sm:$0xff] %v12508_v60  ;;  %v151_v3 = vsel %vm83_vm0, %v39_v54, 0  ;;  %v154_v4 = vsel %vm83_vm0, %v40_v55, 0  ;;  %10893 = vmatprep.subr.bf16.mxu1 %v12510_v61  ;;  %v12522_v6 = vsub.f32 %v241_v41, %v1241_v48  ;;  %v12524_v7 = vsub.f32 %v244_v47, %v1244_v52  ;;  %v73_v47 = vld [vmem:[%s17847_s0 + $0x1b0] sm:$0xff]  ;;  %v74_v55 = vld [vmem:[%s17847_s0 + $0x1b8] sm:$0xff] }
   0xf   :  { %18756 = vst [vmem:[#allocation16_spill] sm:$0xff] %v12510_v61  ;;  %v12526_v8 = vpack.c.bf16 %v292_v63, %v289_v62  ;;  %v1196_v9 = vand.u32 4294901760, %v196_v1  ;;  %v12528_v10 = vsub.f32 %v97_v57, %v289_v62  ;;  %v343_v11 = vand.u32 4294901760, %v151_v3 }
  0x10   :  { %18757 = vst [vmem:[#allocation17_spill] sm:$0xff] %v12522_v6  ;;  %18758 = vst [vmem:[#allocation18_spill] sm:$0xff] %v12524_v7  ;;  %v346_v12 = vand.u32 4294901760, %v154_v4  ;;  %v247_v13 = vsel %vm83_vm0, %v71_v0, 0  ;;  %v12540_v17 = vsub.f32 %v100_v58, %v292_v63  ;;  %v250_v19 = vsel %vm83_vm0, %v72_v5, 0  ;;  %v57_v5 = vld [vmem:[%s17847_s0 + $0x130] sm:$0xff] }
  0x11   :  { %18759 = vst [vmem:[#allocation19_spill] sm:$0xff] %v12526_v8  ;;  %18760 = vst [vmem:[#allocation20_spill] sm:$0xff] %v12528_v10  ;;  %v12542_v18 = vpack.c.bf16 %v1196_v9, %v1193_v2  ;;  %v1247_v20 = vand.u32 4294901760, %v247_v13  ;;  %v12546_v26 = vsub.f32 %v193_v59, %v1193_v2  ;;  %v12548_v27 = vsub.f32 %v196_v1, %v1196_v9 }
  0x12   :  { %18761 = vst [vmem:[#allocation21_spill] sm:$0xff] %v12540_v17  ;;  %10703 = vmatpush3.bf16.xpose.msra.mxu0 %v12526_v8  ;;  %v12550_v28 = vpack.c.bf16 %v346_v12, %v343_v11  ;;  %v1250_v29 = vand.u32 4294901760, %v250_v19  ;;  %v12561_v33 = vsub.f32 %v151_v3, %v343_v11  ;;  %v103_v37 = vsel %vm83_vm0, %v23_v14, 0  ;;  %v25_v3 = vld [vmem:[%s17847_s0 + $0x30] sm:$0xff] }
  0x13   :  { %18762 = vst [vmem:[#allocation22_spill] sm:$0xff] %v12542_v18  ;;  %18763 = vst [vmem:[#allocation23_spill] sm:$0xff] %v12546_v26  ;;  %v106_v39 = vsel %vm83_vm0, %v24_v15, 0  ;;  %v199_v40 = vsel %vm83_vm0, %v55_v16, 0  ;;  %v12568_v41 = vsub.f32 %v154_v4, %v346_v12  ;;  %v295_v43 = vand.u32 4294901760, %v103_v37  ;;  %v26_v4 = vld [vmem:[%s17847_s0 + $0x38] sm:$0xff] }
  0x14   :  { %18764 = vst [vmem:[#allocation24_spill] sm:$0xff] %v12548_v27  ;;  %18765 = vst [vmem:[#allocation25_spill] sm:$0xff] %v12550_v28  ;;  %10895 = vmatpush3.bf16.xpose.msra.mxu1 %v12542_v18  ;;  %10705 = vmatprep.subr.bf16.mxu0 %v12550_v28  ;;  %v12570_v42 = vpack.c.bf16 %v1250_v29, %v1247_v20  ;;  %v298_v44 = vand.u32 4294901760, %v106_v39  ;;  %v202_v48 = vsel %vm83_vm0, %v56_v30, 0  ;;  %v1199_v52 = vand.u32 4294901760, %v199_v40  ;;  %v44_v30 = vld [vmem:[%s17847_s0 + $0xc8] sm:$0xff] }
  0x15   :  { %18766 = vst [vmem:[#allocation26_spill] sm:$0xff] %v12561_v33  ;;  %18767 = vst [vmem:[#allocation27_spill] sm:$0xff] %v12568_v41  ;;  %v157_v53 = vsel %vm83_vm0, %v41_v31, 0  ;;  %v160_v54 = vsel %vm83_vm0, %v42_v32, 0  ;;  %v12582_v57 = vsub.f32 %v247_v13, %v1247_v20  ;;  %v12584_v58 = vsub.f32 %v250_v19, %v1250_v29  ;;  %v58_v20 = vld [vmem:[%s17847_s0 + $0x138] sm:$0xff]  ;;  %v43_v29 = vld [vmem:[%s17847_s0 + $0xc0] sm:$0xff] }
  0x16   :  { %18768 = vst [vmem:[#allocation28_spill] sm:$0xff] %v12570_v42  ;;  %10897 = vmatprep.subr.bf16.mxu1 %v12570_v42  ;;  %v12586_v59 = vpack.c.bf16 %v298_v44, %v295_v43  ;;  %v1202_v62 = vand.u32 4294901760, %v202_v48  ;;  %v12588_v63 = vsub.f32 %v103_v37, %v295_v43  ;;  %v349_v0 = vand.u32 4294901760, %v157_v53  ;;  %v77_v8 = vld [vmem:[%s17847_s0 + $0x1d0] sm:$0xff] }
  0x17   :  { %18769 = vst [vmem:[#allocation29_spill] sm:$0xff] %v12582_v57  ;;  %18770 = vst [vmem:[#allocation30_spill] sm:$0xff] %v12584_v58  ;;  %v352_v1 = vand.u32 4294901760, %v160_v54  ;;  %v253_v2 = vsel %vm83_vm0, %v73_v47, 0  ;;  %v12600_v9 = vsub.f32 %v106_v39, %v298_v44  ;;  %v256_v12 = vsel %vm83_vm0, %v74_v55, 0 }
  0x18   :  { %18771 = vst [vmem:[#allocation31_spill] sm:$0xff] %v12586_v59  ;;  %18772 = vst [vmem:[#allocation32_spill] sm:$0xff] %v12588_v63  ;;  %v12602_v11 = vpack.c.bf16 %v1202_v62, %v1199_v52  ;;  %v1253_v13 = vand.u32 4294901760, %v253_v2  ;;  %v12605_v14 = vsub.f32 %v199_v40, %v1199_v52  ;;  %v12607_v15 = vsub.f32 %v202_v48, %v1202_v62  ;;  %v75_v48 = vld [vmem:[%s17847_s0 + $0x1c0] sm:$0xff] }
  0x19   :  { %18773 = vst [vmem:[#allocation33_spill] sm:$0xff] %v12600_v9  ;;  %v12609_v16 = vpack.c.bf16 %v352_v1, %v349_v0  ;;  %v1256_v19 = vand.u32 4294901760, %v256_v12  ;;  %v12621_v31 = vsub.f32 %v157_v53, %v349_v0  ;;  %v109_v32 = vsel %vm83_vm0, %v25_v3, 0 }
  0x1a   :  { %18774 = vst [vmem:[#allocation34_spill] sm:$0xff] %v12602_v11  ;;  %18775 = vst [vmem:[#allocation35_spill] sm:$0xff] %v12605_v14  ;;  %10707 = vmatpush3.bf16.xpose.msra.mxu0 %v12586_v59  ;;  %v112_v37 = vsel %vm83_vm0, %v26_v4, 0  ;;  %v205_v39 = vsel %vm83_vm0, %v57_v5, 0  ;;  %v12627_v40 = vsub.f32 %v160_v54, %v352_v1  ;;  %v301_v44 = vand.u32 4294901760, %v109_v32  ;;  %v76_v54 = vld [vmem:[%s17847_s0 + $0x1c8] sm:$0xff] }
  0x1b   :  { %18776 = vst [vmem:[#allocation36_spill] sm:$0xff] %v12607_v15  ;;  %18777 = vst [vmem:[#allocation37_spill] sm:$0xff] %v12609_v16  ;;  %10709 = vmatprep.subr.bf16.mxu0 %v12609_v16  ;;  %v12629_v43 = vpack.c.bf16 %v1256_v19, %v1253_v13  ;;  %v304_v47 = vand.u32 4294901760, %v112_v37  ;;  %v208_v52 = vsel %vm83_vm0, %v58_v20, 0  ;;  %v1205_v53 = vand.u32 4294901760, %v205_v39  ;;  %v60_v59 = vld [vmem:[%s17847_s0 + $0x148] sm:$0xff] }
  0x1c   :  { %18778 = vst [vmem:[#allocation38_spill] sm:$0xff] %v12621_v31  ;;  %18779 = vst [vmem:[#allocation39_spill] sm:$0xff] %v12627_v40  ;;  %10899 = vmatpush3.bf16.xpose.msra.mxu1 %v12602_v11  ;;  %v163_v55 = vsel %vm83_vm0, %v43_v29, 0  ;;  %v166_v62 = vsel %vm83_vm0, %v44_v30, 0  ;;  %v12642_v0 = vsub.f32 %v253_v2, %v1253_v13  ;;  %v12644_v1 = vsub.f32 %v256_v12, %v1256_v19  ;;  %v27_v30 = vld [vmem:[%s17847_s0 + $0x40] sm:$0xff]  ;;  %v28_v2 = vld [vmem:[%s17847_s0 + $0x48] sm:$0xff] }
  0x1d   :  { %18780 = vst [vmem:[#allocation40_spill] sm:$0xff] %v12629_v43  ;;  %10901 = vmatprep.subr.bf16.mxu1 %v12629_v43  ;;  %v12646_v3 = vpack.c.bf16 %v304_v47, %v301_v44  ;;  %v1208_v4 = vand.u32 4294901760, %v208_v52  ;;  %v12648_v5 = vsub.f32 %v109_v32, %v301_v44  ;;  %v355_v20 = vand.u32 4294901760, %v163_v55  ;;  %v59_v12 = vld [vmem:[%s17847_s0 + $0x140] sm:$0xff] }
  0x1e   :  { %18781 = vst [vmem:[#allocation41_spill] sm:$0xff] %v12642_v0  ;;  %18782 = vst [vmem:[#allocation42_spill] sm:$0xff] %v12644_v1  ;;  %v358_v23 = vand.u32 4294901760, %v166_v62  ;;  %v259_v29 = vsel %vm83_vm0, %v75_v48, 0  ;;  %v12660_v13 = vsub.f32 %v112_v37, %v304_v47  ;;  %v12662_v19 = vsub.f32 %v205_v39, %v1205_v53  ;;  %v45_v37 = vld [vmem:[%s17847_s0 + $0xd0] sm:$0xff]  ;;  %v46_v39 = vld [vmem:[%s17847_s0 + $0xd8] sm:$0xff] }
  0x1f   :  { %18783 = vst [vmem:[#allocation43_spill] sm:$0xff] %v12646_v3  ;;  %18784 = vst [vmem:[#allocation44_spill] sm:$0xff] %v12648_v5  ;;  %v262_v32 = vsel %vm83_vm0, %v76_v54, 0  ;;  %v1259_v44 = vand.u32 4294901760, %v259_v29  ;;  %v12665_v48 = vpack.c.bf16 %v1208_v4, %v1205_v53  ;;  %v12667_v43 = vsub.f32 %v208_v52, %v1208_v4 }
  0x20   :  { %18785 = vst [vmem:[#allocation45_spill] sm:$0xff] %v12660_v13  ;;  %18786 = vst [vmem:[#allocation46_spill] sm:$0xff] %v12662_v19  ;;  %v12669_v11 = vpack.c.bf16 %v358_v23, %v355_v20  ;;  %v1262_v16 = vand.u32 4294901760, %v262_v32  ;;  %v12680_v47 = vsub.f32 %v163_v55, %v355_v20  ;;  %v115_v52 = vsel %vm83_vm0, %v27_v30, 0 }
  0x21   :  { %18787 = vst [vmem:[#allocation47_spill] sm:$0xff] %v12665_v48  ;;  %18788 = vst [vmem:[#allocation48_spill] sm:$0xff] %v12667_v43  ;;  %v118_v53 = vsel %vm83_vm0, %v28_v2, 0  ;;  %v211_v54 = vsel %vm83_vm0, %v59_v12, 0  ;;  %v12686_v4 = vsub.f32 %v166_v62, %v358_v23  ;;  %v307_v18 = vand.u32 4294901760, %v115_v52  ;;  %v78_v23 = vld [vmem:[%s17847_s0 + $0x1d8] sm:$0xff] }
  0x22   :  { %18789 = vst [vmem:[#allocation49_spill] sm:$0xff] %v12669_v11  ;;  %18790 = vst [vmem:[#allocation50_spill] sm:$0xff] %v12680_v47  ;;  %10711 = vmatpush3.bf16.xpose.msra.mxu0 %v12646_v3  ;;  %v12688_v42 = vpack.c.bf16 %v1262_v16, %v1259_v44  ;;  %v310_v28 = vand.u32 4294901760, %v118_v53  ;;  %v214_v55 = vsel %vm83_vm0, %v60_v59, 0  ;;  %v1211_v20 = vand.u32 4294901760, %v211_v54 }
  0x23   :  { %18791 = vst [vmem:[#allocation51_spill] sm:$0xff] %v12686_v4  ;;  %10713 = vmatprep.subr.bf16.mxu0 %v12669_v11  ;;  %v169_v30 = vsel %vm83_vm0, %v45_v37, 0  ;;  %v172_v2 = vsel %vm83_vm0, %v46_v39, 0  ;;  %v12701_v62 = vsub.f32 %v259_v29, %v1259_v44  ;;  %v12703_v12 = vsub.f32 %v262_v32, %v1262_v16  ;;  %v30_v16 = vld [vmem:[%s17847_s0 + $0x58] sm:$0xff]  ;;  %v61_v29 = vld [vmem:[%s17847_s0 + $0x150] sm:$0xff] }
  0x24   :  { %18792 = vst [vmem:[#allocation52_spill] sm:$0xff] %v12688_v42  ;;  %10903 = vmatpush3.bf16.xpose.msra.mxu1 %v12665_v48  ;;  %v12705_v3 = vpack.c.bf16 %v310_v28, %v307_v18  ;;  %v1214_v11 = vand.u32 4294901760, %v214_v55  ;;  %v12708_v59 = vsub.f32 %v115_v52, %v307_v18  ;;  %v361_v37 = vand.u32 4294901760, %v169_v30 }
  0x25   :  { %18793 = vst [vmem:[#allocation53_spill] sm:$0xff] %v12701_v62  ;;  %18794 = vst [vmem:[#allocation54_spill] sm:$0xff] %v12703_v12  ;;  %10905 = vmatprep.subr.bf16.mxu1 %v12688_v42  ;;  %v364_v61 = vand.u32 4294901760, %v172_v2  ;;  %v265_v39 = vsel %vm83_vm0, %v77_v8, 0  ;;  %v12720_v32 = vsub.f32 %v118_v53, %v310_v28  ;;  %v12722_v18 = vsub.f32 %v211_v54, %v1211_v20  ;;  %v47_v28 = vld [vmem:[%s17847_s0 + $0xe0] sm:$0xff]  ;;  %v48_v53 = vld [vmem:[%s17847_s0 + $0xe8] sm:$0xff] }
  0x26   :  { %18795 = vst [vmem:[#allocation55_spill] sm:$0xff] %v12705_v3  ;;  %18796 = vst [vmem:[#allocation56_spill] sm:$0xff] %v12708_v59  ;;  %v268_v44 = vsel %vm83_vm0, %v78_v23, 0  ;;  %v1265_v52 = vand.u32 4294901760, %v265_v39  ;;  %v12725_v8 = vpack.c.bf16 %v1214_v11, %v1211_v20  ;;  %v12727_v42 = vsub.f32 %v214_v55, %v1214_v11  ;;  %v33_v59 = vld [vmem:[%s17847_s0 + $0x70] sm:$0xff] }
  0x27   :  { %18797 = vst [vmem:[#allocation57_spill] sm:$0xff] %v12720_v32  ;;  %18798 = vst [vmem:[#allocation58_spill] sm:$0xff] %v12722_v18  ;;  %v12729_v48 = vpack.c.bf16 %v364_v61, %v361_v37  ;;  %v1268_v51 = vand.u32 4294901760, %v268_v44  ;;  %v12740_v54 = vsub.f32 %v169_v30, %v361_v37  ;;  %v121_v11 = vsel %vm83_vm0, %v29_v46, 0  ;;  %v79_v18 = vld [vmem:[%s17847_s0 + $0x1e0] sm:$0xff] }
  0x28   :  { %18799 = vst [vmem:[#allocation59_spill] sm:$0xff] %v12725_v8  ;;  %18800 = vst [vmem:[#allocation60_spill] sm:$0xff] %v12727_v42  ;;  %v124_v55 = vsel %vm83_vm0, %v30_v16, 0  ;;  %v217_v20 = vsel %vm83_vm0, %v61_v29, 0  ;;  %v12745_v23 = vsub.f32 %v172_v2, %v364_v61  ;;  %v313_v21 = vand.u32 4294901760, %v121_v11  ;;  %v80_v61 = vld [vmem:[%s17847_s0 + $0x1e8] sm:$0xff] }
  0x29   :  { %18801 = vst [vmem:[#allocation61_spill] sm:$0xff] %v12729_v48  ;;  %18802 = vst [vmem:[#allocation62_spill] sm:$0xff] %v12740_v54  ;;  %v12747_v25 = vpack.c.bf16 %v1268_v51, %v1265_v52  ;;  %v316_v42 = vand.u32 4294901760, %v124_v55  ;;  %v220_v30 = vsel %vm83_vm0, %v62_v36, 0  ;;  %v1217_v37 = vand.u32 4294901760, %v217_v20  ;;  %v31_v32 = vld [vmem:[%s17847_s0 + $0x60] sm:$0xff] }
  0x2a   :  { %18803 = vst [vmem:[#allocation63_spill] sm:$0xff] %v12745_v23  ;;  %10715 = vmatpush3.bf16.xpose.msra.mxu0 %v12705_v3  ;;  %v175_v46 = vsel %vm83_vm0, %v47_v28, 0  ;;  %v178_v16 = vsel %vm83_vm0, %v48_v53, 0  ;;  %v12760_v2 = vsub.f32 %v265_v39, %v1265_v52  ;;  %v12762_v29 = vsub.f32 %v268_v44, %v1268_v51  ;;  %v32_v51 = vld [vmem:[%s17847_s0 + $0x68] sm:$0xff]  ;;  %v63_v39 = vld [vmem:[%s17847_s0 + $0x160] sm:$0xff] }
  0x2b   :  { %18804 = vst [vmem:[#allocation64_spill] sm:$0xff] %v12747_v25  ;;  %10717 = vmatprep.subr.bf16.mxu0 %v12729_v48  ;;  %v12764_v23 = vpack.c.bf16 %v316_v42, %v313_v21  ;;  %v1220_v3 = vand.u32 4294901760, %v220_v30  ;;  %v12767_v36 = vsub.f32 %v121_v11, %v313_v21  ;;  %v367_v28 = vand.u32 4294901760, %v175_v46 }
  0x2c   :  { %18805 = vst [vmem:[#allocation65_spill] sm:$0xff] %v12760_v2  ;;  %18806 = vst [vmem:[#allocation66_spill] sm:$0xff] %v12762_v29  ;;  %10907 = vmatpush3.bf16.xpose.msra.mxu1 %v12725_v8  ;;  %v370_v54 = vand.u32 4294901760, %v178_v16  ;;  %v271_v53 = vsel %vm83_vm0, %v79_v18, 0  ;;  %v12780_v21 = vsub.f32 %v124_v55, %v316_v42  ;;  %v12782_v44 = vsub.f32 %v217_v20, %v1217_v37  ;;  %v64_v29 = vld [vmem:[%s17847_s0 + $0x168] sm:$0xff]  ;;  %v49_v42 = vld [vmem:[%s17847_s0 + $0xf0] sm:$0xff] }
  0x2d   :  { %18807 = vst [vmem:[#allocation67_spill] sm:$0xff] %v12764_v23  ;;  %18808 = vst [vmem:[#allocation68_spill] sm:$0xff] %v12767_v36  ;;  %10909 = vmatprep.subr.bf16.mxu1 %v12747_v25  ;;  %v274_v18 = vsel %vm83_vm0, %v80_v61, 0  ;;  %v1271_v52 = vand.u32 4294901760, %v271_v53  ;;  %v12785_v11 = vpack.c.bf16 %v1220_v3, %v1217_v37  ;;  %v12787_v8 = vsub.f32 %v220_v30, %v1220_v3  ;;  %v50_v55 = vld [vmem:[%s17847_s0 + $0xf8] sm:$0xff] }
  0x2e   :  { %18809 = vst [vmem:[#allocation69_spill] sm:$0xff] %v12780_v21  ;;  %18810 = vst [vmem:[#allocation70_spill] sm:$0xff] %v12782_v44  ;;  %v12789_v48 = vpack.c.bf16 %v370_v54, %v367_v28  ;;  %v1274_v36 = vand.u32 4294901760, %v274_v18  ;;  %v12800_v20 = vsub.f32 %v175_v46, %v367_v28  ;;  %v127_v3 = vsel %vm83_vm0, %v31_v32, 0  ;;  %v81_v21 = vld [vmem:[%s17847_s0 + $0x1f0] sm:$0xff] }
  0x2f   :  { %18811 = vst [vmem:[#allocation71_spill] sm:$0xff] %v12785_v11  ;;  %18812 = vst [vmem:[#allocation72_spill] sm:$0xff] %v12787_v8  ;;  %v130_v30 = vsel %vm83_vm0, %v32_v51, 0  ;;  %v223_v37 = vsel %vm83_vm0, %v63_v39, 0  ;;  %v12805_v61 = vsub.f32 %v178_v16, %v370_v54  ;;  %v319_v8 = vand.u32 4294901760, %v127_v3  ;;  %v82_v54 = vld [vmem:[%s17847_s0 + $0x1f8] sm:$0xff] }
  0x30   :  { %18813 = vst [vmem:[#allocation73_spill] sm:$0xff] %v12789_v48  ;;  %18814 = vst [vmem:[#allocation74_spill] sm:$0xff] %v12800_v20  ;;  %v12807_v25 = vpack.c.bf16 %v1274_v36, %v1271_v52  ;;  %v322_v44 = vand.u32 4294901760, %v130_v30  ;;  %v226_v2 = vsel %vm83_vm0, %v64_v29, 0  ;;  %v1223_v46 = vand.u32 4294901760, %v223_v37 }
  0x31   :  { %18815 = vst [vmem:[#allocation75_spill] sm:$0xff] %v12805_v61  ;;  %v181_v28 = vsel %vm83_vm0, %v49_v42, 0  ;;  %v184_v32 = vsel %vm83_vm0, %v50_v55, 0  ;;  %v12819_v16 = vsub.f32 %v271_v53, %v1271_v52  ;;  %v12821_v51 = vsub.f32 %v274_v18, %v1274_v36  ;;  %v34_v36 = vld [vmem:[%s17847_s0 + $0x78] sm:$0xff]  ;;  %v65_v53 = vld [vmem:[%s17847_s0 + $0x170] sm:$0xff] }
  0x32   :  { %18816 = vst [vmem:[#allocation76_spill] sm:$0xff] %v12807_v25  ;;  %10719 = vmatpush3.bf16.xpose.msra.mxu0 %v12764_v23  ;;  %v12823_v39 = vpack.c.bf16 %v322_v44, %v319_v8  ;;  %v1226_v61 = vand.u32 4294901760, %v226_v2  ;;  %v12826_v29 = vsub.f32 %v127_v3, %v319_v8  ;;  %v373_v42 = vand.u32 4294901760, %v181_v28 }
  0x33   :  { %18817 = vst [vmem:[#allocation77_spill] sm:$0xff] %v12819_v16  ;;  %18818 = vst [vmem:[#allocation78_spill] sm:$0xff] %v12821_v51  ;;  %10721 = vmatprep.subr.bf16.mxu0 %v12789_v48  ;;  %v376_v20 = vand.u32 4294901760, %v184_v32  ;;  %v277_v55 = vsel %vm83_vm0, %v81_v21, 0  ;;  %v12839_v8 = vsub.f32 %v130_v30, %v322_v44  ;;  %v12843_v52 = vsub.f32 %v223_v37, %v1223_v46 }
  0x34   :  { %18819 = vst [vmem:[#allocation79_spill] sm:$0xff] %v12823_v39  ;;  %18820 = vst [vmem:[#allocation80_spill] sm:$0xff] %v12826_v29  ;;  %10911 = vmatpush3.bf16.xpose.msra.mxu1 %v12785_v11  ;;  %v12841_v18 = vpack.c.bf16 %v1226_v61, %v1223_v46  ;;  %v280_v21 = vsel %vm83_vm0, %v82_v54, 0  ;;  %v12847_v3 = vsub.f32 %v226_v2, %v1226_v61  ;;  %v1277_v23 = vand.u32 4294901760, %v277_v55  ;;  %v66_v11 = vld [vmem:[%s17847_s0 + $0x178] sm:$0xff] }
  0x35   :  { %18821 = vst [vmem:[#allocation81_spill] sm:$0xff] %v12839_v8  ;;  %18823 = vst [vmem:[#allocation83_spill] sm:$0xff] %v12843_v52  ;;  %10913 = vmatprep.subr.bf16.mxu1 %v12807_v25  ;;  %v12849_v48 = vpack.c.bf16 %v376_v20, %v373_v42  ;;  %v1280_v29 = vand.u32 4294901760, %v280_v21  ;;  %v12854_v44 = vsub.f32 %v181_v28, %v373_v42  ;;  %v133_v30 = vsel %vm83_vm0, %v33_v59, 0 }
  0x36   :  { %18822 = vst [vmem:[#allocation82_spill] sm:$0xff] %v12841_v18  ;;  %18824 = vst [vmem:[#allocation84_spill] sm:$0xff] %v12847_v3  ;;  %v136_v37 = vsel %vm83_vm0, %v34_v36, 0  ;;  %v229_v46 = vsel %vm83_vm0, %v65_v53, 0  ;;  %v12859_v54 = vsub.f32 %v184_v32, %v376_v20  ;;  %v12861_v2 = vsub.f32 %v277_v55, %v1277_v23 }
  0x37   :  { %18825 = vst [vmem:[#allocation85_spill] sm:$0xff] %v12849_v48  ;;  %v325_v61 = vand.u32 4294901760, %v133_v30  ;;  %v328_v25 = vand.u32 4294901760, %v136_v37  ;;  %v12864_v3 = vsel %vm83_vm0, %v66_v11, 0  ;;  %v1229_v52 = vand.u32 4294901760, %v229_v46 }
  0x38   :  { %v18826_v8 = vlaneseq  ;;  %v12872_v59 = vpack.c.bf16 %v1280_v29, %v1277_v23  ;;  %v12874_v42 = vsub.f32 %v280_v21, %v1280_v29  ;;  %v17921_v32 = vand.u32 4294901760, %v12864_v3 }
  0x39   :  { %v12876_v20 = vpack.c.bf16 %v328_v25, %v325_v61  ;;  %v12880_v55 = vsub.f32 %v133_v30, %v325_v61  ;;  %v17930_v11 = vand.u32 4294901760, %v12445_v22  ;;  %v17931_v36 = vand.u32 4294901760, %v12447_v24 }
  0x3a   :  { %v12867_v51 = vshrl.u32 %v18826_v8, 7  ;;  %v12870_v28 = vand.u32 127, %v18826_v8  ;;  %18829 = vst [vmem:[#allocation88_spill] sm:$0xff] %v12872_v59  ;;  %10723 = vmatpush3.bf16.xpose.msra.mxu0 %v12823_v39  ;;  %v12887_v23 = vsub.f32 %v136_v37, %v328_v25  ;;  %v12891_v29 = vpack.c.bf16 %v17921_v32, %v1229_v52 }
  0x3b   :  { %18830 = vst [vmem:[#allocation89_spill] sm:$0xff] %v12876_v20  ;;  %10725 = vmatprep.subr.bf16.mxu0 %v12849_v48  ;;  %v17922_v53 = vmov 0.0   ;;  %v17936_v30 = vand.u32 4294901760, %v12462_v34  ;;  %v517_v25 = vsub.f32 %v12445_v22, %v17930_v11  ;;  %v524_v37 = vsub.f32 %v12447_v24, %v17931_v36 }
  0x3c   :  { %18827 = vst [vmem:[#allocation86_spill] sm:$0xff] %v12867_v51  ;;  %18828 = vst [vmem:[#allocation87_spill] sm:$0xff] %v12870_v28  ;;  %vm13_vm1 = vcmp.eq.s32.totalorder %v12867_v51, %v12870_v28  ;;  %10915 = vmatpush3.bf16.xpose.msra.mxu1 %v12841_v18  ;;  %v17939_v32 = vand.u32 4294901760, %v12464_v35  ;;  %v17945_v18 = vand.u32 4294901760, %v12468_v38  ;;  %v17948_v48 = vand.u32 4294901760, %v12481_v45 }
  0x3d   :  { %18831 = vst [vmem:[#allocation90_spill] sm:$0xff] %v12891_v29  ;;  %v12894_v21 = vsel %vm13_vm1, 1.0, %v17922_v53  ;;  %10917 = vmatprep.subr.bf16.mxu1 %v12872_v59  ;;  %v1421_v8 = vsub.f32 %v12462_v34, %v17936_v30  ;;  %v518_v39 = vand.u32 4294901760, %v517_v25  ;;  %v525_v11 = vand.u32 4294901760, %v524_v37 }
  0x3e   :  { %18832 = vst [vmem:[#allocation91_spill] sm:$0xff] %v12894_v21  ;;  %v85_v61 = vsel %vm83_vm0, %v12894_v21, 0  ;;  %v1428_v36 = vsub.f32 %v12464_v35, %v17939_v32  ;;  %v17950_v21 = vand.u32 4294901760, %v12486_v49  ;;  %v405_v30 = vsub.f32 %v12468_v38, %v17945_v18 }
  0x3f   :  { %v12908_v53 = vsub.f32 %v85_v61, %v85_v61  ;;  %v1422_v61 = vand.u32 4294901760, %v1421_v8  ;;  %v412_v34 = vsub.f32 %v12481_v45, %v17948_v48  ;;  %v10728_v25 = vpack.c.bf16 %v525_v11, %v518_v39 }
  0x40   :  { %v1429_v37 = vand.u32 4294901760, %v1428_v36  ;;  %v1309_v32 = vsub.f32 %v12486_v49, %v17950_v21  ;;  %v17949_v35 = vand.u32 4294901760, %v12488_v50  ;;  %v12932_v28 = vsub.f32 %v229_v46, %v1229_v52 }
  0x41   :  { %18833 = vst [vmem:[#allocation92_spill] sm:$0xff] %v12908_v53  ;;  %v12920_v59 = vand.u32 4294901760, %v12908_v53  ;;  %v406_v24 = vand.u32 4294901760, %v405_v30  ;;  %v17952_v18 = vand.u32 4294901760, %v12502_v56  ;;  %v413_v48 = vand.u32 4294901760, %v412_v34 }
  0x42   :  { %10727 = vmatpush3.bf16.xpose.msra.mxu0 %v12876_v20  ;;  %v10920_v38 = vpack.c.bf16 %v1429_v37, %v1422_v61  ;;  %v1316_v39 = vsub.f32 %v12488_v50, %v17949_v35  ;;  %v17951_v11 = vand.u32 4294901760, %v12508_v60  ;;  %v1310_v52 = vand.u32 4294901760, %v1309_v32 }
  0x43   :  { %18834 = vst [vmem:[#allocation93_spill] sm:$0xff] %v12920_v59  ;;  %v382_v8 = vsub.f32 %v12908_v53, %v12920_v59  ;;  %10729 = vmatprep.subr.bf16.mxu0 %v10728_v25  ;;  %v531_v46 = vsub.f32 %v12502_v56, %v17952_v18  ;;  %v17955_v30 = vand.u32 4294901760, %v12522_v6  ;;  %v17958_v37 = vand.u32 4294901760, %v12524_v7 }
  0x44   :  { %10919 = vmatpush3.bf16.xpose.msra.mxu1 %v12891_v29  ;;  %v1317_v61 = vand.u32 4294901760, %v1316_v39  ;;  %v538_v34 = vsub.f32 %v12508_v60, %v17951_v11  ;;  %v17962_v35 = vand.u32 4294901760, %v12540_v17  ;;  %v17966_v39 = vand.u32 4294901760, %v12546_v26 }
  0x45   :  { %v12942_v36 = vand.u32 4294901760, %v382_v8  ;;  %v17961_v8 = vand.u32 4294901760, %v12528_v10  ;;  %v532_v32 = vand.u32 4294901760, %v531_v46  ;;  %v1435_v25 = vsub.f32 %v12522_v6, %v17955_v30  ;;  %10921 = vmatprep.subr.bf16.mxu1 %v10920_v38 }
  0x46   :  { %v10730_v21 = vpack.c.bf16 %v413_v48, %v406_v24  ;;  %v539_v11 = vand.u32 4294901760, %v538_v34  ;;  %v1442_v18 = vsub.f32 %v12524_v7, %v17958_v37  ;;  %v426_v30 = vsub.f32 %v12540_v17, %v17962_v35 }
  0x47   :  { %18835 = vst [vmem:[#allocation94_spill] sm:$0xff] %v12942_v36  ;;  %9000 = vmatprep.mubr.f32.mxu0 %v12942_v36  ;;  %9216 = vmatprep.mubr.f32.mxu1 %v12942_v36  ;;  %v419_v29 = vsub.f32 %v12528_v10, %v17961_v8  ;;  %v1436_v46 = vand.u32 4294901760, %v1435_v25  ;;  %v1323_v20 = vsub.f32 %v12546_v26, %v17966_v39  ;;  %v17965_v24 = vand.u32 4294901760, %v12548_v27 }
  0x48   :  { %v10922_v38 = vpack.c.bf16 %v1317_v61, %v1310_v52  ;;  %v10732_v48 = vpack.c.bf16 %v539_v11, %v532_v32  ;;  %v1443_v34 = vand.u32 4294901760, %v1442_v18  ;;  %v17970_v37 = vand.u32 4294901760, %v12561_v33 }
  0x49   :  { %9001 = vmatmul.mubr.f32.vlgmr.msra.gmra.mrb[0].mxu0 %v12942_v36  ;;  %v420_v59 = vand.u32 4294901760, %v419_v29  ;;  %v427_v8 = vand.u32 4294901760, %v426_v30  ;;  %v1330_v25 = vsub.f32 %v12548_v27, %v17965_v24  ;;  %v17968_v35 = vand.u32 4294901760, %v12568_v41 }
  0x4a   :  { %10731 = vmatpush3.bf16.xpose.msra.mxu0 %v10730_v21  ;;  %v10924_v53 = vpack.c.bf16 %v1443_v34, %v1436_v46  ;;  %v545_v52 = vsub.f32 %v12561_v33, %v17970_v37  ;;  %v17967_v18 = vand.u32 4294901760, %v12582_v57  ;;  %v17969_v11 = vand.u32 4294901760, %v12584_v58 }
  0x4b   :  { %9217 = vmatmul.mubr.f32.vlgmr.msra.gmra.mrb[0].mxu1 %v12942_v36  ;;  %10733 = vmatprep.subr.bf16.mxu0 %v10732_v48  ;;  %v1324_v29 = vand.u32 4294901760, %v1323_v20  ;;  %v1331_v30 = vand.u32 4294901760, %v1330_v25  ;;  %v552_v61 = vsub.f32 %v12568_v41, %v17968_v35  ;;  %v17971_v21 = vand.u32 4294901760, %v12588_v63 }
  0x4c   :  { %10923 = vmatpush3.bf16.xpose.msra.mxu1 %v10922_v38  ;;  %v546_v32 = vand.u32 4294901760, %v545_v52  ;;  %v1449_v46 = vsub.f32 %v12582_v57, %v17967_v18  ;;  %v1456_v34 = vsub.f32 %v12584_v58, %v17969_v11  ;;  %v17978_v48 = vand.u32 4294901760, %v12600_v9 }
  0x4d   :  { %10925 = vmatprep.subr.bf16.mxu1 %v10924_v53  ;;  %v10734_v20 = vpack.c.bf16 %v427_v8, %v420_v59  ;;  %v553_v25 = vand.u32 4294901760, %v552_v61  ;;  %v433_v24 = vsub.f32 %v12588_v63, %v17971_v21  ;;  %v17972_v38 = vand.u32 4294901760, %v12605_v14 }
  0x4e   :  { %v1450_v52 = vand.u32 4294901760, %v1449_v46  ;;  %v1457_v39 = vand.u32 4294901760, %v1456_v34  ;;  %v440_v18 = vsub.f32 %v12600_v9, %v17978_v48  ;;  %v17973_v35 = vand.u32 4294901760, %v12607_v15 }
  0x4f   :  { %v10926_v11 = vpack.c.bf16 %v1331_v30, %v1324_v29  ;;  %v10736_v37 = vpack.c.bf16 %v553_v25, %v546_v32  ;;  %v1337_v59 = vsub.f32 %v12605_v14, %v17972_v38  ;;  %v17976_v53 = vand.u32 4294901760, %v12621_v31 }
  0x50   :  { %v10928_v8 = vpack.c.bf16 %v1457_v39, %v1450_v52  ;;  %v434_v61 = vand.u32 4294901760, %v433_v24  ;;  %v1344_v46 = vsub.f32 %v12607_v15, %v17973_v35  ;;  %v17974_v34 = vand.u32 4294901760, %v12627_v40 }
  0x51   :  { %v441_v21 = vand.u32 4294901760, %v440_v18  ;;  %v559_v29 = vsub.f32 %v12621_v31, %v17976_v53  ;;  %v17975_v30 = vand.u32 4294901760, %v12642_v0  ;;  %v17977_v32 = vand.u32 4294901760, %v12644_v1 }
  0x52   :  { %10735 = vmatpush3.bf16.xpose.msra.mxu0 %v10734_v20  ;;  %v1338_v25 = vand.u32 4294901760, %v1337_v59  ;;  %v1345_v38 = vand.u32 4294901760, %v1344_v46  ;;  %v566_v39 = vsub.f32 %v12627_v40, %v17974_v34  ;;  %v17981_v24 = vand.u32 4294901760, %v12648_v5 }
  0x53   :  { %10737 = vmatprep.subr.bf16.mxu0 %v10736_v37  ;;  %v560_v52 = vand.u32 4294901760, %v559_v29  ;;  %v1463_v18 = vsub.f32 %v12642_v0, %v17975_v30  ;;  %v1470_v35 = vsub.f32 %v12644_v1, %v17977_v32  ;;  %v17987_v20 = vand.u32 4294901760, %v12660_v13 }
  0x54   :  { %v18836_v59 = vand.u32 4294901760, %v12864_v3  ;;  %10927 = vmatpush3.bf16.xpose.msra.mxu1 %v10926_v11  ;;  %v567_v34 = vand.u32 4294901760, %v566_v39  ;;  %v447_v37 = vsub.f32 %v12648_v5, %v17981_v24  ;;  %v17985_v29 = vand.u32 4294901760, %v12662_v19 }
  0x55   :  { %10929 = vmatprep.subr.bf16.mxu1 %v10928_v8  ;;  %v1464_v30 = vand.u32 4294901760, %v1463_v18  ;;  %v1471_v53 = vand.u32 4294901760, %v1470_v35  ;;  %v454_v32 = vsub.f32 %v12660_v13, %v17987_v20  ;;  %v17984_v48 = vand.u32 4294901760, %v12667_v43 }
  0x56   :  { %v13032_v46 = vsub.f32 %v12864_v3, %v18836_v59  ;;  %v10738_v36 = vpack.c.bf16 %v441_v21, %v434_v61  ;;  %v10930_v3 = vpack.c.bf16 %v1345_v38, %v1338_v25  ;;  %v1351_v11 = vsub.f32 %v12662_v19, %v17985_v29 }
  0x57   :  { %v17986_v39 = vand.u32 4294901760, %v12680_v47  ;;  %v10740_v59 = vpack.c.bf16 %v567_v34, %v560_v52  ;;  %v448_v24 = vand.u32 4294901760, %v447_v37  ;;  %v455_v5 = vand.u32 4294901760, %v454_v32  ;;  %v18837_v32 = vld [vmem:[#allocation56_spill] sm:$0xff] }
  0x58   :  { %v17988_v8 = vand.u32 4294901760, %v12686_v4  ;;  %v1358_v35 = vsub.f32 %v12667_v43, %v17984_v48  ;;  %v17991_v38 = vand.u32 4294901760, %v12701_v62  ;;  %v17994_v61 = vand.u32 4294901760, %v12703_v12 }
  0x59   :  { %v573_v21 = vsub.f32 %v12680_v47, %v17986_v39  ;;  %v10932_v25 = vpack.c.bf16 %v1471_v53, %v1464_v30  ;;  %v1352_v18 = vand.u32 4294901760, %v1351_v11  ;;  %v17997_v52 = vand.u32 4294901760, %v18837_v32  ;;  %v18838_v39 = vld [vmem:[#allocation57_spill] sm:$0xff] }
  0x5a   :  { %v580_v34 = vsub.f32 %v12686_v4, %v17988_v8  ;;  %10739 = vmatpush3.bf16.xpose.msra.mxu0 %v10738_v36  ;;  %v1477_v48 = vsub.f32 %v12701_v62, %v17991_v38  ;;  %v1484_v29 = vsub.f32 %v12703_v12, %v17994_v61  ;;  %v17999_v20 = vand.u32 4294901760, %v18838_v39  ;;  %v18839_v8 = vld [vmem:[#allocation58_spill] sm:$0xff]  ;;  %v18840_v62 = vld [vmem:[#allocation60_spill] sm:$0xff] }
  0x5b   :  { %v574_v37 = vand.u32 4294901760, %v573_v21  ;;  %10741 = vmatprep.subr.bf16.mxu0 %v10740_v59  ;;  %v10742_v53 = vpack.c.bf16 %v455_v5, %v448_v24  ;;  %v461_v11 = vsub.f32 %v18837_v32, %v17997_v52  ;;  %v18001_v36 = vand.u32 4294901760, %v18839_v8  ;;  %v18841_v24 = vld [vmem:[#allocation62_spill] sm:$0xff] }
  0x5c   :  { %v581_v30 = vand.u32 4294901760, %v580_v34  ;;  %10931 = vmatpush3.bf16.xpose.msra.mxu1 %v10930_v3  ;;  %v1359_v21 = vand.u32 4294901760, %v1358_v35  ;;  %v1478_v4 = vand.u32 4294901760, %v1477_v48  ;;  %v468_v38 = vsub.f32 %v18838_v39, %v17999_v20  ;;  %v18842_v3 = vld [vmem:[#allocation63_spill] sm:$0xff] }
  0x5d   :  { %v18005_v61 = vand.u32 4294901760, %v18840_v62  ;;  %10933 = vmatprep.subr.bf16.mxu1 %v10932_v25  ;;  %v1485_v59 = vand.u32 4294901760, %v1484_v29  ;;  %v1365_v5 = vsub.f32 %v18839_v8, %v18001_v36  ;;  %v18006_v34 = vand.u32 4294901760, %v18841_v24  ;;  %v18843_v29 = vld [vmem:[#allocation65_spill] sm:$0xff] }
  0x5e   :  { %v10744_v12 = vpack.c.bf16 %v581_v30, %v574_v37  ;;  %v462_v52 = vand.u32 4294901760, %v461_v11  ;;  %v469_v32 = vand.u32 4294901760, %v468_v38  ;;  %v18009_v35 = vand.u32 4294901760, %v18842_v3  ;;  %v18844_v30 = vld [vmem:[#allocation66_spill] sm:$0xff]  ;;  %v18845_v11 = vld [vmem:[#allocation68_spill] sm:$0xff] }
  0x5f   :  { %v1372_v48 = vsub.f32 %v18840_v62, %v18005_v61  ;;  %v1366_v20 = vand.u32 4294901760, %v1365_v5  ;;  %v587_v25 = vsub.f32 %v18841_v24, %v18006_v34  ;;  %v18011_v37 = vand.u32 4294901760, %v18843_v29  ;;  %v18846_v24 = vld [vmem:[#allocation69_spill] sm:$0xff] }
  0x60   :  { %v18013_v39 = vand.u32 4294901760, %v18844_v30  ;;  %v10934_v36 = vpack.c.bf16 %v1359_v21, %v1352_v18  ;;  %v594_v38 = vsub.f32 %v18842_v3, %v18009_v35  ;;  %v18015_v47 = vand.u32 4294901760, %v18845_v11  ;;  %v18847_v35 = vld [vmem:[#allocation70_spill] sm:$0xff] }
  0x61   :  { %v1373_v8 = vand.u32 4294901760, %v1372_v48  ;;  %v10936_v61 = vpack.c.bf16 %v1485_v59, %v1478_v4  ;;  %v1491_v5 = vsub.f32 %v18843_v29, %v18011_v37  ;;  %v18016_v62 = vand.u32 4294901760, %v18846_v24  ;;  %v18848_v29 = vld [vmem:[#allocation72_spill] sm:$0xff] }
  0x62   :  { %v1498_v34 = vsub.f32 %v18844_v30, %v18013_v39  ;;  %10743 = vmatpush3.bf16.xpose.msra.mxu0 %v10742_v53  ;;  %v10746_v18 = vpack.c.bf16 %v469_v32, %v462_v52  ;;  %v588_v21 = vand.u32 4294901760, %v587_v25  ;;  %v475_v48 = vsub.f32 %v18845_v11, %v18015_v47  ;;  %v18849_v52 = vld [vmem:[#allocation74_spill] sm:$0xff] }
  0x63   :  { %v18017_v3 = vand.u32 4294901760, %v18847_v35  ;;  %10745 = vmatprep.subr.bf16.mxu0 %v10744_v12  ;;  %v10938_v4 = vpack.c.bf16 %v1373_v8, %v1366_v20  ;;  %v595_v59 = vand.u32 4294901760, %v594_v38  ;;  %v482_v37 = vsub.f32 %v18846_v24, %v18016_v62  ;;  %v18850_v8 = vld [vmem:[#allocation75_spill] sm:$0xff] }
  0x64   :  { %v18020_v39 = vand.u32 4294901760, %v18848_v29  ;;  %10935 = vmatpush3.bf16.xpose.msra.mxu1 %v10934_v36  ;;  %v1492_v30 = vand.u32 4294901760, %v1491_v5  ;;  %v1499_v53 = vand.u32 4294901760, %v1498_v34  ;;  %v18021_v25 = vand.u32 4294901760, %v18849_v52  ;;  %v18851_v5 = vld [vmem:[#allocation78_spill] sm:$0xff] }
  0x65   :  { %v1379_v32 = vsub.f32 %v18847_v35, %v18017_v3  ;;  %10937 = vmatprep.subr.bf16.mxu1 %v10936_v61  ;;  %v476_v47 = vand.u32 4294901760, %v475_v48  ;;  %v483_v12 = vand.u32 4294901760, %v482_v37  ;;  %v18025_v38 = vand.u32 4294901760, %v18850_v8  ;;  %v18852_v37 = vld [vmem:[#allocation80_spill] sm:$0xff] }
  0x66   :  { %v1386_v20 = vsub.f32 %v18848_v29, %v18020_v39  ;;  %v601_v36 = vsub.f32 %v18849_v52, %v18021_v25  ;;  %v18027_v34 = vand.u32 4294901760, %v12819_v16  ;;  %v18032_v3 = vand.u32 4294901760, %v18851_v5  ;;  %v18853_v52 = vld [vmem:[#allocation81_spill] sm:$0xff] }
  0x67   :  { %v1380_v62 = vand.u32 4294901760, %v1379_v32  ;;  %v10748_v35 = vpack.c.bf16 %v595_v59, %v588_v21  ;;  %v608_v61 = vsub.f32 %v18850_v8, %v18025_v38  ;;  %v18041_v48 = vand.u32 4294901760, %v18852_v37 }
  0x68   :  { %v1387_v24 = vand.u32 4294901760, %v1386_v20  ;;  %v602_v39 = vand.u32 4294901760, %v601_v36  ;;  %v1505_v32 = vsub.f32 %v12819_v16, %v18027_v34  ;;  %v1512_v25 = vsub.f32 %v18851_v5, %v18032_v3  ;;  %v18854_v20 = vld [vmem:[#allocation83_spill] sm:$0xff]  ;;  %v18855_v16 = vld [vmem:[#allocation84_spill] sm:$0xff] }
  0x69   :  { %v18039_v29 = vand.u32 4294901760, %v18853_v52  ;;  %v10940_v11 = vpack.c.bf16 %v1499_v53, %v1492_v30  ;;  %v609_v21 = vand.u32 4294901760, %v608_v61  ;;  %v489_v59 = vsub.f32 %v18852_v37, %v18041_v48 }
  0x6a   :  { %v18035_v38 = vand.u32 4294901760, %v18854_v20  ;;  %10747 = vmatpush3.bf16.xpose.msra.mxu0 %v10746_v18  ;;  %v10750_v36 = vpack.c.bf16 %v483_v12, %v476_v47  ;;  %v10942_v8 = vpack.c.bf16 %v1387_v24, %v1380_v62  ;;  %v18034_v43 = vand.u32 4294901760, %v18855_v16 }
  0x6b   :  { %v496_v34 = vsub.f32 %v18853_v52, %v18039_v29  ;;  %10749 = vmatprep.subr.bf16.mxu0 %v10748_v35  ;;  %v1506_v3 = vand.u32 4294901760, %v1505_v32  ;;  %v1513_v5 = vand.u32 4294901760, %v1512_v25  ;;  %v18037_v53 = vand.u32 4294901760, %v12854_v44 }
  0x6c   :  { %v1393_v30 = vsub.f32 %v18854_v20, %v18035_v38  ;;  %10939 = vmatpush3.bf16.xpose.msra.mxu1 %v10938_v4  ;;  %v10752_v61 = vpack.c.bf16 %v609_v21, %v602_v39  ;;  %v490_v18 = vand.u32 4294901760, %v489_v59  ;;  %v1400_v47 = vsub.f32 %v18855_v16, %v18034_v43 }
  0x6d   :  { %v18036_v62 = vand.u32 4294901760, %v12859_v54  ;;  %10941 = vmatprep.subr.bf16.mxu1 %v10940_v11  ;;  %v497_v24 = vand.u32 4294901760, %v496_v34  ;;  %v615_v35 = vsub.f32 %v12854_v44, %v18037_v53  ;;  %v18038_v25 = vand.u32 4294901760, %v12861_v2 }
  0x6e   :  { %v18040_v12 = vand.u32 4294901760, %v12874_v42  ;;  %v1394_v32 = vand.u32 4294901760, %v1393_v30  ;;  %v1401_v4 = vand.u32 4294901760, %v1400_v47  ;;  %v18044_v21 = vand.u32 4294901760, %v12880_v55 }
  0x6f   :  { %v622_v39 = vsub.f32 %v12859_v54, %v18036_v62  ;;  %v616_v59 = vand.u32 4294901760, %v615_v35  ;;  %v1519_v11 = vsub.f32 %v12861_v2, %v18038_v25  ;;  %v18042_v43 = vand.u32 4294901760, %v12887_v23 }
  0x70   :  { %v1526_v34 = vsub.f32 %v12874_v42, %v18040_v12  ;;  %v10944_v38 = vpack.c.bf16 %v1513_v5, %v1506_v3  ;;  %v13165_v47 = vsub.f32 %v12880_v55, %v18044_v21  ;;  %v18043_v62 = vand.u32 4294901760, %v12932_v28  ;;  %v18861_v21 = vld [vmem:[#allocation8_spill] sm:$0xff] }
  0x71   :  { %v623_v30 = vand.u32 4294901760, %v622_v39  ;;  %v1520_v35 = vand.u32 4294901760, %v1519_v11  ;;  %v510_v25 = vsub.f32 %v12887_v23, %v18042_v43  ;;  %v18047_v29 = vand.u32 4294901760, %v13032_v46  ;;  %v18857_v43 = vld [vmem:[#allocation3_spill] sm:$0xff] }
  0x72   :  { %v1527_v53 = vand.u32 4294901760, %v1526_v34  ;;  %10751 = vmatpush3.bf16.xpose.msra.mxu0 %v10750_v36  ;;  %v10754_v12 = vpack.c.bf16 %v497_v24, %v490_v18  ;;  %v10946_v48 = vpack.c.bf16 %v1401_v4, %v1394_v32  ;;  %v1407_v3 = vsub.f32 %v12932_v28, %v18043_v62  ;;  %v18858_v24 = vld [vmem:[#allocation87_spill] sm:$0xff]  ;;  %v18859_v32 = vld [vmem:[#allocation5_spill] sm:$0xff]  ;;  %v18860_v4 = vld [vmem:[#allocation6_spill] sm:$0xff] }
  0x73   :  { %v13176_v5 = vadd.s32 8, %v12867_v51  ;;  %10753 = vmatprep.subr.bf16.mxu0 %v10752_v61  ;;  %v10756_v39 = vpack.c.bf16 %v623_v30, %v616_v59  ;;  %v504_v11 = vand.u32 4294901760, %v13165_v47  ;;  %v1414_v34 = vsub.f32 %v13032_v46, %v18047_v29 }
  0x74   :  { %v10760_v36 = vpack.c.bf16 %v18857_v43, %v12445_v22  ;;  %10943 = vmatpush3.bf16.xpose.msra.mxu1 %v10942_v8  ;;  %v10948_v18 = vpack.c.bf16 %v1527_v53, %v1520_v35  ;;  %v10952_v62 = vpack.c.bf16 %v18860_v4, %v18859_v32  ;;  %v10762_v61 = vpack.c.bf16 %v12481_v45, %v18861_v21  ;;  %v18885_v45 = vld [vmem:[#allocation75_spill] sm:$0xff] }
  0x75   :  { %18856 = vst [vmem:[#allocation80_spill] sm:$0xff] %v13176_v5  ;;  %vm14_vm2 = vcmp.eq.s32.totalorder %v13176_v5, %v18858_v24  ;;  %10945 = vmatprep.subr.bf16.mxu1 %v10944_v38  ;;  %v511_v59 = vand.u32 4294901760, %v510_v25  ;;  %v1408_v30 = vand.u32 4294901760, %v1407_v3  ;;  %v18862_v47 = vmov 0.0  }
  0x76   :  { %v13191_v51 = vsel %vm14_vm2, 1.0, %v18862_v47  ;;  %v10954_v29 = vpack.c.bf16 %v12488_v50, %v12486_v49  ;;  %v10764_v53 = vpack.c.bf16 %v12508_v60, %v12502_v56  ;;  %v10956_v35 = vpack.c.bf16 %v12524_v7, %v12522_v6  ;;  %v18874_v6 = vld [vmem:[#allocation58_spill] sm:$0xff]  ;;  %v18875_v49 = vld [vmem:[#allocation60_spill] sm:$0xff] }
  0x77   :  { %18863 = vst [vmem:[#allocation81_spill] sm:$0xff] %v13191_v51  ;;  %v88_v8 = vsel %vm83_vm0, %v13191_v51, 0  ;;  %v10766_v38 = vpack.c.bf16 %v12540_v17, %v12528_v10  ;;  %v1415_v25 = vand.u32 4294901760, %v1414_v34  ;;  %v10958_v24 = vpack.c.bf16 %v12548_v27, %v12546_v26  ;;  %v18866_v26 = vld [vmem:[#allocation44_spill] sm:$0xff] }
  0x78   :  { %v13203_v3 = vsub.f32 %v88_v8, %v88_v8  ;;  %v10768_v47 = vpack.c.bf16 %v12568_v41, %v12561_v33  ;;  %v10960_v5 = vpack.c.bf16 %v12584_v58, %v12582_v57  ;;  %v10770_v50 = vpack.c.bf16 %v12600_v9, %v12588_v63  ;;  %v18867_v58 = vld [vmem:[#allocation48_spill] sm:$0xff]  ;;  %v18868_v9 = vld [vmem:[#allocation50_spill] sm:$0xff]  ;;  %v18869_v63 = vld [vmem:[#allocation51_spill] sm:$0xff] }
  0x79   :  { %v10962_v7 = vpack.c.bf16 %v12607_v15, %v12605_v14  ;;  %v10772_v34 = vpack.c.bf16 %v12627_v40, %v12621_v31  ;;  %v10964_v27 = vpack.c.bf16 %v12644_v1, %v12642_v0  ;;  %v10774_v41 = vpack.c.bf16 %v12660_v13, %v18866_v26  ;;  %v18870_v15 = vld [vmem:[#allocation53_spill] sm:$0xff]  ;;  %v18871_v14 = vld [vmem:[#allocation54_spill] sm:$0xff]  ;;  %v18872_v40 = vld [vmem:[#allocation56_spill] sm:$0xff] }
  0x7a   :  { %18864 = vst [vmem:[#allocation83_spill] sm:$0xff] %v13203_v3  ;;  %v13218_v8 = vand.u32 4294901760, %v13203_v3  ;;  %v10966_v57 = vpack.c.bf16 %v18867_v58, %v12662_v19  ;;  %10755 = vmatpush3.bf16.xpose.msra.mxu0 %v10754_v12  ;;  %v10776_v33 = vpack.c.bf16 %v18869_v63, %v18868_v9  ;;  %v10968_v17 = vpack.c.bf16 %v18871_v14, %v18870_v15  ;;  %v18873_v31 = vld [vmem:[#allocation57_spill] sm:$0xff]  ;;  %v18876_v26 = vld [vmem:[#allocation62_spill] sm:$0xff]  ;;  %v18877_v1 = vld [vmem:[#allocation63_spill] sm:$0xff] }
  0x7b   :  { %v10778_v10 = vpack.c.bf16 %v18873_v31, %v18872_v40  ;;  %v10970_v60 = vpack.c.bf16 %v18875_v49, %v18874_v6  ;;  %10757 = vmatprep.subr.bf16.mxu0 %v10756_v39  ;;  %v10780_v58 = vpack.c.bf16 %v18877_v1, %v18876_v26  ;;  %v18878_v12 = vld [vmem:[#allocation65_spill] sm:$0xff]  ;;  %v18879_v19 = vld [vmem:[#allocation66_spill] sm:$0xff]  ;;  %v18880_v63 = vld [vmem:[#allocation68_spill] sm:$0xff] }
  0x7c   :  { %18865 = vst [vmem:[#allocation84_spill] sm:$0xff] %v13218_v8  ;;  %v393_v13 = vsub.f32 %v13203_v3, %v13218_v8  ;;  %v10972_v0 = vpack.c.bf16 %v18879_v19, %v18878_v12  ;;  %v18881_v9 = vld [vmem:[#allocation69_spill] sm:$0xff]  ;;  %10947 = vmatpush3.bf16.xpose.msra.mxu1 %v10946_v48  ;;  %v18882_v14 = vld [vmem:[#allocation70_spill] sm:$0xff]  ;;  %v18883_v15 = vld [vmem:[#allocation72_spill] sm:$0xff]  ;;  %v10786_v8 = vpack.c.bf16 %v18853_v52, %v18852_v37 }
  0x7d   :  { %v10782_v56 = vpack.c.bf16 %v18881_v9, %v18880_v63  ;;  %v10974_v31 = vpack.c.bf16 %v18883_v15, %v18882_v14  ;;  %v18884_v40 = vld [vmem:[#allocation74_spill] sm:$0xff]  ;;  %v18886_v39 = vld [vmem:[#allocation77_spill] sm:$0xff]  ;;  %10949 = vmatprep.subr.bf16.mxu1 %v10948_v18  ;;  %v10978_v19 = vpack.c.bf16 %v18855_v16, %v18854_v20  ;;  %v10788_v48 = vpack.c.bf16 %v12859_v54, %v12854_v44  ;;  %v18889_v18 = vld [vmem:[#allocation91_spill] sm:$0xff] }
  0x7e   :  { %v10784_v49 = vpack.c.bf16 %v18885_v45, %v18884_v40  ;;  %v18887_v6 = vld [vmem:[#allocation78_spill] sm:$0xff]  ;;  %v13250_v1 = vand.u32 4294901760, %v393_v13  ;;  %v10980_v15 = vpack.c.bf16 %v12874_v42, %v12861_v2  ;;  %v10758_v14 = vpack.c.bf16 %v511_v59, %v504_v11  ;;  %v18913_v11 = vld [vmem:[#allocation64_spill] sm:$0xff]  ;;  %v18916_v59 = vld [vmem:[#allocation71_spill] sm:$0xff] }
  0x7f   :  { %v10976_v21 = vpack.c.bf16 %v18887_v6, %v18886_v39  ;;  %v10790_v45 = vpack.c.bf16 %v12887_v23, %v12880_v55  ;;  %v10982_v6 = vpack.c.bf16 %v13032_v46, %v12932_v28  ;;  %v10950_v13 = vpack.c.bf16 %v1415_v25, %v1408_v30  ;;  %v18917_v30 = vld [vmem:[#allocation76_spill] sm:$0xff] }
  0x80   :  { %18888 = vst [vmem:[#allocation3_spill] sm:$0xff] %v13250_v1  ;;  %9002 = vmatprep.mubr.f32.mxu0 %v13250_v1  ;;  %9218 = vmatprep.mubr.f32.mxu1 %v13250_v1  ;;  %v18921_v25 = vld [vmem:[#allocation88_spill] sm:$0xff] }
  0x81   :  { %9003 = vmatmul.mubr.f32.gmra.mrb[2].mxu0 %v13250_v1  ;;  %9219 = vmatmul.mubr.f32.gmra.mrb[2].mxu1 %v13250_v1  ;;  %v18928_v1 = vld [vmem:[#allocation8_spill] sm:$0xff] }
  0x82   :  { %9036 = vmatprep.mubr.msk.f32.mxu0 %vm83_vm0, %v18889_v18  ;;  %9252 = vmatprep.mubr.msk.f32.mxu1 %vm83_vm0, %v18889_v18 }
  0x83   :  { %10759 = vmatpush3.bf16.xpose.msra.mxu0 %v10758_v14  ;;  %v18890_v14 = vld [vmem:[#allocation92_spill] sm:$0xff] }
  0x84   :  { %10761 = vmatprep.subr.bf16.mxu0 %v10760_v36  ;;  %10951 = vmatpush3.bf16.xpose.msra.mxu1 %v10950_v13  ;;  %v18914_v36 = vld [vmem:[#allocation67_spill] sm:$0xff] }
  0x85   :  { %10953 = vmatprep.subr.bf16.mxu1 %v10952_v62  ;;  %v18910_v62 = vld [vmem:[#allocation55_spill] sm:$0xff] }
  0x8a   :  { %9037 = vmatmul.mubr.msk.f32.vlgmr.msra.gmra.mrb[0].mxu0 %vm83_vm0, %v18889_v18 }
  0x8b   :  { %10763 = vmatpush3.bf16.xpose.msra.mxu0 %v10762_v61  ;;  %9038 = vmatprep.mubr.msk.f32.mxu0 %vm83_vm0, %v13191_v51  ;;  %v18915_v61 = vld [vmem:[#allocation73_spill] sm:$0xff] }
  0x8c   :  { %9253 = vmatmul.mubr.msk.f32.vlgmr.msra.gmra.mrb[0].mxu1 %vm83_vm0, %v18889_v18  ;;  %10765 = vmatprep.subr.bf16.mxu0 %v10764_v53  ;;  %v18918_v53 = vld [vmem:[#allocation79_spill] sm:$0xff] }
  0x8d   :  { %10955 = vmatpush3.bf16.xpose.msra.mxu1 %v10954_v29  ;;  %9254 = vmatprep.mubr.msk.f32.mxu1 %vm83_vm0, %v13191_v51  ;;  %v18909_v29 = vld [vmem:[#allocation52_spill] sm:$0xff] }
  0x8e   :  { %10957 = vmatprep.subr.bf16.mxu1 %v10956_v35  ;;  %9039 = vmatmul.mubr.msk.f32.gmra.mrb[2].mxu0 %vm83_vm0, %v13191_v51  ;;  %v18919_v35 = vld [vmem:[#allocation85_spill] sm:$0xff] }
  0x8f   :  { %9072 = vmatprep.mubr.f32.mxu0 %v18890_v14 }
  0x90   :  { %9255 = vmatmul.mubr.msk.f32.gmra.mrb[2].mxu1 %vm83_vm0, %v13191_v51 }
  0x91   :  { %9288 = vmatprep.mubr.f32.mxu1 %v18890_v14 }
  0x93   :  { %10767 = vmatpush3.bf16.xpose.msra.mxu0 %v10766_v38  ;;  %v18920_v38 = vld [vmem:[#allocation82_spill] sm:$0xff] }
  0x94   :  { %10769 = vmatprep.subr.bf16.mxu0 %v10768_v47  ;;  %v18923_v47 = vand.u32 4294901760, %v18857_v43  ;;  %v18934_v43 = vld [vmem:[#allocation15_spill] sm:$0xff] }
  0x95   :  { %10959 = vmatpush3.bf16.xpose.msra.mxu1 %v10958_v24  ;;  %v18922_v24 = vand.u32 4294901760, %v12445_v22  ;;  %v18932_v22 = vld [vmem:[#allocation14_spill] sm:$0xff] }
  0x96   :  { %10961 = vmatprep.subr.bf16.mxu1 %v10960_v5  ;;  %v18912_v5 = vld [vmem:[#allocation59_spill] sm:$0xff] }
  0x9b   :  { %10771 = vmatpush3.bf16.xpose.msra.mxu0 %v10770_v50  ;;  %v18891_v50 = vld [vmem:[#allocation2_spill] sm:$0xff] }
  0x9c   :  { %10773 = vmatprep.subr.bf16.mxu0 %v10772_v34  ;;  %v10824_v34 = vpack.c.bf16 %v18923_v47, %v18922_v24  ;;  %v18935_v24 = vand.u32 4294901760, %v18934_v43 }
  0x9d   :  { %10963 = vmatpush3.bf16.xpose.msra.mxu1 %v10962_v7  ;;  %v18892_v7 = vld [vmem:[#allocation4_spill] sm:$0xff] }
  0x9e   :  { %10965 = vmatprep.subr.bf16.mxu1 %v10964_v27  ;;  %v18900_v27 = vld [vmem:[#allocation22_spill] sm:$0xff] }
  0xa3   :  { %10775 = vmatpush3.bf16.xpose.msra.mxu0 %v10774_v41  ;;  %v18902_v41 = vld [vmem:[#allocation31_spill] sm:$0xff] }
  0xa4   :  { %10777 = vmatprep.subr.bf16.mxu0 %v10776_v33  ;;  %v18901_v33 = vld [vmem:[#allocation28_spill] sm:$0xff] }
  0xa5   :  { %10967 = vmatpush3.bf16.xpose.msra.mxu1 %v10966_v57  ;;  %v18903_v57 = vld [vmem:[#allocation37_spill] sm:$0xff] }
  0xa6   :  { %10969 = vmatprep.subr.bf16.mxu1 %v10968_v17  ;;  %v18899_v17 = vld [vmem:[#allocation25_spill] sm:$0xff] }
  0xab   :  { %10779 = vmatpush3.bf16.xpose.msra.mxu0 %v10778_v10  ;;  %v18893_v10 = vld [vmem:[#allocation7_spill] sm:$0xff] }
  0xac   :  { %10781 = vmatprep.subr.bf16.mxu0 %v10780_v58  ;;  %v18904_v58 = vld [vmem:[#allocation34_spill] sm:$0xff] }
  0xad   :  { %10971 = vmatpush3.bf16.xpose.msra.mxu1 %v10970_v60  ;;  %v18897_v60 = vld [vmem:[#allocation93_spill] sm:$0xff] }
  0xae   :  { %10973 = vmatprep.subr.bf16.mxu1 %v10972_v0  ;;  %v18907_v0 = vld [vmem:[#allocation49_spill] sm:$0xff] }
  0xb3   :  { %10783 = vmatpush3.bf16.xpose.msra.mxu0 %v10782_v56  ;;  %v18895_v56 = vld [vmem:[#allocation10_spill] sm:$0xff] }
  0xb4   :  { %10785 = vmatprep.subr.bf16.mxu0 %v10784_v49  ;;  %v18894_v49 = vld [vmem:[#allocation13_spill] sm:$0xff] }
  0xb5   :  { %10975 = vmatpush3.bf16.xpose.msra.mxu1 %v10974_v31  ;;  %v18906_v31 = vld [vmem:[#allocation43_spill] sm:$0xff] }
  0xb6   :  { %10977 = vmatprep.subr.bf16.mxu1 %v10976_v21  ;;  %v18911_v21 = vld [vmem:[#allocation61_spill] sm:$0xff] }
  0xbb   :  { %10787 = vmatpush3.bf16.xpose.msra.mxu0 %v10786_v8  ;;  %v18924_v8 = vand.u32 4294901760, %v18859_v32  ;;  %v18936_v32 = vld [vmem:[#allocation11_spill] sm:$0xff] }
  0xbc   :  { %10789 = vmatprep.subr.bf16.mxu0 %v10788_v48  ;;  %v18925_v48 = vand.u32 4294901760, %v18860_v4  ;;  %v18938_v4 = vld [vmem:[#allocation12_spill] sm:$0xff] }
  0xbd   :  { %10979 = vmatpush3.bf16.xpose.msra.mxu1 %v10978_v19  ;;  %v18908_v19 = vld [vmem:[#allocation47_spill] sm:$0xff] }
  0xbe   :  { %10981 = vmatprep.subr.bf16.mxu1 %v10980_v15  ;;  %v18905_v15 = vld [vmem:[#allocation40_spill] sm:$0xff]  ;;  %v11016_v13 = vpack.c.bf16 %v18925_v48, %v18924_v8  ;;  %v18939_v8 = vand.u32 4294901760, %v18938_v4 }
  0xbf   :  { %v18955_v4 = vld [vmem:[#allocation24_spill] sm:$0xff] }
  0xc3   :  { %10791 = vmatpush3.bf16.xpose.msra.mxu0 %v10790_v45  ;;  %v18896_v45 = vld [vmem:[#allocation16_spill] sm:$0xff] }
  0xc4   :  { %10793 = vmatprep.subr.bf16.mxu0 %v18891_v50 }
  0xc5   :  { %10983 = vmatpush3.bf16.xpose.msra.mxu1 %v10982_v6  ;;  %v18898_v6 = vld [vmem:[#allocation19_spill] sm:$0xff] }
  0xc6   :  { %10985 = vmatprep.subr.bf16.mxu1 %v18892_v7 }
  0xca   :  { %9073 = vmatmul.mubr.f32.vlgmr.msra.gmra.mrb[0].mxu0 %v18890_v14 }
  0xcb   :  { %10795 = vmatpush3.bf16.xpose.msra.mxu0 %v18893_v10  ;;  %9074 = vmatprep.mubr.f32.mxu0 %v13203_v3 }
  0xcc   :  { %9289 = vmatmul.mubr.f32.vlgmr.msra.gmra.mrb[0].mxu1 %v18890_v14  ;;  %10797 = vmatprep.subr.bf16.mxu0 %v18894_v49  ;;  %v18927_v14 = vld [vmem:[#allocation90_spill] sm:$0xff] }
  0xcd   :  { %10987 = vmatpush3.bf16.xpose.msra.mxu1 %v18895_v56  ;;  %9290 = vmatprep.mubr.f32.mxu1 %v13203_v3 }
  0xce   :  { %10989 = vmatprep.subr.bf16.mxu1 %v18896_v45  ;;  %9075 = vmatmul.mubr.f32.gmra.mrb[2].mxu0 %v13203_v3 }
  0xcf   :  { %9108 = vmatprep.mubr.f32.mxu0 %v18897_v60 }
  0xd0   :  { %9291 = vmatmul.mubr.f32.gmra.mrb[2].mxu1 %v13203_v3  ;;  %v18926_v3 = vld [vmem:[#allocation89_spill] sm:$0xff] }
  0xd1   :  { %9324 = vmatprep.mubr.f32.mxu1 %v18897_v60 }
  0xd3   :  { %10799 = vmatpush3.bf16.xpose.msra.mxu0 %v18898_v6 }
  0xd4   :  { %10801 = vmatprep.subr.bf16.mxu0 %v18899_v17 }
  0xd5   :  { %10991 = vmatpush3.bf16.xpose.msra.mxu1 %v18900_v27 }
  0xd6   :  { %10993 = vmatprep.subr.bf16.mxu1 %v18901_v33 }
  0xdb   :  { %10803 = vmatpush3.bf16.xpose.msra.mxu0 %v18902_v41 }
  0xdc   :  { %10805 = vmatprep.subr.bf16.mxu0 %v18903_v57 }
  0xdd   :  { %10995 = vmatpush3.bf16.xpose.msra.mxu1 %v18904_v58 }
  0xde   :  { %10997 = vmatprep.subr.bf16.mxu1 %v18905_v15 }
  0xe3   :  { %10807 = vmatpush3.bf16.xpose.msra.mxu0 %v18906_v31 }
  0xe4   :  { %10809 = vmatprep.subr.bf16.mxu0 %v18907_v0 }
  0xe5   :  { %10999 = vmatpush3.bf16.xpose.msra.mxu1 %v18908_v19 }
  0xe6   :  { %11001 = vmatprep.subr.bf16.mxu1 %v18909_v29 }
  0xeb   :  { %10811 = vmatpush3.bf16.xpose.msra.mxu0 %v18910_v62 }
  0xec   :  { %10813 = vmatprep.subr.bf16.mxu0 %v18911_v21 }
  0xed   :  { %11003 = vmatpush3.bf16.xpose.msra.mxu1 %v18912_v5 }
  0xee   :  { %11005 = vmatprep.subr.bf16.mxu1 %v18913_v11 }
  0xf3   :  { %10815 = vmatpush3.bf16.xpose.msra.mxu0 %v18914_v36 }
  0xf4   :  { %10817 = vmatprep.subr.bf16.mxu0 %v18915_v61 }
  0xf5   :  { %11007 = vmatpush3.bf16.xpose.msra.mxu1 %v18916_v59  ;;  %v18937_v59 = vand.u32 4294901760, %v18936_v32 }
  0xf6   :  { %11009 = vmatprep.subr.bf16.mxu1 %v18917_v30  ;;  %v18933_v30 = vand.u32 4294901760, %v18932_v22 }
  0xf7   :  { %v11018_v48 = vpack.c.bf16 %v18939_v8, %v18937_v59  ;;  %v18945_v59 = vld [vmem:[#allocation20_spill] sm:$0xff]  ;;  %v18956_v8 = vand.u32 4294901760, %v18955_v4 }
  0xf8   :  { %v10828_v47 = vpack.c.bf16 %v18935_v24, %v18933_v30  ;;  %v18946_v30 = vand.u32 4294901760, %v18945_v59 }
  0xfb   :  { %10819 = vmatpush3.bf16.xpose.msra.mxu0 %v18918_v53 }
  0xfc   :  { %10821 = vmatprep.subr.bf16.mxu0 %v18919_v35  ;;  %v18930_v35 = vld [vmem:[#allocation9_spill] sm:$0xff] }
  0xfd   :  { %11011 = vmatpush3.bf16.xpose.msra.mxu1 %v18920_v38  ;;  %v18929_v38 = vand.u32 4294901760, %v18928_v1 }
  0xfe   :  { %11013 = vmatprep.subr.bf16.mxu1 %v18921_v25  ;;  %v18931_v25 = vand.u32 4294901760, %v18930_v35  ;;  %v18944_v35 = vld [vmem:[#allocation84_spill] sm:$0xff] }
 0x100   :  { %v10826_v53 = vpack.c.bf16 %v18931_v25, %v18929_v38  ;;  %v18947_v38 = vld [vmem:[#allocation21_spill] sm:$0xff] }
 0x101   :  { %v18948_v25 = vand.u32 4294901760, %v18947_v38  ;;  %v18961_v38 = vld [vmem:[#allocation32_spill] sm:$0xff] }
 0x103   :  { %10823 = vmatpush3.bf16.xpose.msra.mxu0 %v18926_v3  ;;  %v10830_v22 = vpack.c.bf16 %v18948_v25, %v18946_v30  ;;  %v18962_v25 = vand.u32 4294901760, %v18961_v38 }
 0x104   :  { %10825 = vmatprep.subr.bf16.mxu0 %v10824_v34  ;;  %v18940_v34 = vld [vmem:[#allocation17_spill] sm:$0xff] }
 0x105   :  { %11015 = vmatpush3.bf16.xpose.msra.mxu1 %v18927_v14  ;;  %v18941_v14 = vand.u32 4294901760, %v18940_v34  ;;  %v18957_v34 = vld [vmem:[#allocation29_spill] sm:$0xff] }
 0x106   :  { %11017 = vmatprep.subr.bf16.mxu1 %v11016_v13  ;;  %v18942_v13 = vld [vmem:[#allocation18_spill] sm:$0xff] }
 0x107   :  { %v18943_v3 = vand.u32 4294901760, %v18942_v13  ;;  %v18958_v13 = vand.u32 4294901760, %v18957_v34  ;;  %v18971_v34 = vld [vmem:[#allocation36_spill] sm:$0xff] }
 0x108   :  { %v18972_v61 = vand.u32 4294901760, %v18971_v34  ;;  %v18987_v34 = vld [vmem:[#allocation48_spill] sm:$0xff] }
 0x109   :  { %v11020_v1 = vpack.c.bf16 %v18943_v3, %v18941_v14  ;;  %v18949_v3 = vld [vmem:[#allocation26_spill] sm:$0xff] }
 0x10a   :  { %9109 = vmatmul.mubr.f32.vlgmr.msra.gmra.mrb[0].mxu0 %v18897_v60  ;;  %v18950_v14 = vand.u32 4294901760, %v18949_v3  ;;  %v18963_v3 = vld [vmem:[#allocation33_spill] sm:$0xff] }
 0x10b   :  { %10827 = vmatpush3.bf16.xpose.msra.mxu0 %v10826_v53  ;;  %9110 = vmatprep.mubr.f32.mxu0 %v18944_v35  ;;  %v18951_v53 = vld [vmem:[#allocation27_spill] sm:$0xff] }
 0x10c   :  { %9325 = vmatmul.mubr.f32.vlgmr.msra.gmra.mrb[0].mxu1 %v18897_v60  ;;  %10829 = vmatprep.subr.bf16.mxu0 %v10828_v47  ;;  %v18952_v43 = vand.u32 4294901760, %v18951_v53  ;;  %v18953_v47 = vld [vmem:[#allocation23_spill] sm:$0xff] }
 0x10d   :  { %11019 = vmatpush3.bf16.xpose.msra.mxu1 %v11018_v48  ;;  %9326 = vmatprep.mubr.f32.mxu1 %v18944_v35  ;;  %v18954_v32 = vand.u32 4294901760, %v18953_v47 }
 0x10e   :  { %11021 = vmatprep.subr.bf16.mxu1 %v11020_v1  ;;  %9111 = vmatmul.mubr.f32.gmra.mrb[2].mxu0 %v18944_v35  ;;  %v10832_v24 = vpack.c.bf16 %v18952_v43, %v18950_v14  ;;  %v18959_v1 = vld [vmem:[#allocation30_spill] sm:$0xff]  ;;  %v18964_v14 = vand.u32 4294901760, %v18963_v3 }
 0x10f   :  { %9144 = vmatprep.mubr.msk.f32.mxu0 %vm83_vm0, %v18889_v18  ;;  %v11022_v48 = vpack.c.bf16 %v18956_v8, %v18954_v32  ;;  %v18960_v59 = vand.u32 4294901760, %v18959_v1  ;;  %v18965_v43 = vld [vmem:[#allocation38_spill] sm:$0xff]  ;;  %v18967_v32 = vld [vmem:[#allocation39_spill] sm:$0xff] }
 0x110   :  { %9327 = vmatmul.mubr.f32.gmra.mrb[2].mxu1 %v18944_v35  ;;  %v10834_v53 = vpack.c.bf16 %v18964_v14, %v18962_v25  ;;  %v18966_v47 = vand.u32 4294901760, %v18965_v43  ;;  %v18968_v4 = vand.u32 4294901760, %v18967_v32  ;;  %v18969_v35 = vld [vmem:[#allocation35_spill] sm:$0xff]  ;;  %v18979_v25 = vld [vmem:[#allocation45_spill] sm:$0xff]  ;;  %v18981_v43 = vld [vmem:[#allocation50_spill] sm:$0xff] }
 0x111   :  { %9360 = vmatprep.mubr.msk.f32.mxu1 %vm83_vm0, %v18889_v18  ;;  %v11024_v30 = vpack.c.bf16 %v18960_v59, %v18958_v13  ;;  %v18970_v60 = vand.u32 4294901760, %v18969_v35  ;;  %v18973_v13 = vld [vmem:[#allocation41_spill] sm:$0xff]  ;;  %v18980_v3 = vand.u32 4294901760, %v18979_v25  ;;  %v18983_v35 = vld [vmem:[#allocation51_spill] sm:$0xff] }
 0x112   :  { %v10836_v8 = vpack.c.bf16 %v18968_v4, %v18966_v47  ;;  %v18982_v47 = vand.u32 4294901760, %v18981_v43  ;;  %v18984_v32 = vand.u32 4294901760, %v18983_v35  ;;  %v18997_v43 = vand.u32 4294901760, %v18876_v26 }
 0x113   :  { %10831 = vmatpush3.bf16.xpose.msra.mxu0 %v10830_v22  ;;  %v11026_v1 = vpack.c.bf16 %v18972_v61, %v18970_v60  ;;  %v18974_v22 = vand.u32 4294901760, %v18973_v13  ;;  %v18985_v60 = vld [vmem:[#allocation46_spill] sm:$0xff]  ;;  %v18988_v13 = vand.u32 4294901760, %v18987_v34  ;;  %v19002_v34 = vld [vmem:[#allocation60_spill] sm:$0xff]  ;;  %v19008_v26 = vand.u32 4294901760, %v18881_v9 }
 0x114   :  { %10833 = vmatprep.subr.bf16.mxu0 %v10832_v24  ;;  %v18975_v24 = vld [vmem:[#allocation42_spill] sm:$0xff]  ;;  %v10840_v4 = vpack.c.bf16 %v18984_v32, %v18982_v47  ;;  %v18986_v61 = vand.u32 4294901760, %v18985_v60  ;;  %v18998_v47 = vld [vmem:[#allocation63_spill] sm:$0xff]  ;;  %v19020_v9 = vand.u32 4294901760, %v18853_v52  ;;  %v19027_v52 = vand.u32 4294901760, %v12880_v55 }
 0x115   :  { %11023 = vmatpush3.bf16.xpose.msra.mxu1 %v11022_v48  ;;  %v18976_v48 = vand.u32 4294901760, %v18975_v24  ;;  %v18999_v35 = vand.u32 4294901760, %v18998_v47  ;;  %v19000_v60 = vld [vmem:[#allocation58_spill] sm:$0xff] }
 0x116   :  { %11025 = vmatprep.subr.bf16.mxu1 %v11024_v30  ;;  %v18977_v30 = vld [vmem:[#allocation44_spill] sm:$0xff]  ;;  %v11030_v24 = vpack.c.bf16 %v18988_v13, %v18986_v61  ;;  %v19001_v61 = vand.u32 4294901760, %v19000_v60  ;;  %v19003_v13 = vand.u32 4294901760, %v19002_v34  ;;  %v19021_v34 = vand.u32 4294901760, %v12854_v44  ;;  %v2272_v55 = vld [vmem:[%s17847_s0 + $0x280] sm:$0xff] }
 0x117   :  { %v11028_v59 = vpack.c.bf16 %v18976_v48, %v18974_v22  ;;  %v18978_v38 = vand.u32 4294901760, %v18977_v30  ;;  %v18989_v22 = vld [vmem:[#allocation53_spill] sm:$0xff]  ;;  %v10844_v32 = vpack.c.bf16 %v18999_v35, %v18997_v43  ;;  %v19028_v44 = vand.u32 4294901760, %v12887_v23  ;;  %v2273_v23 = vld [vmem:[%s17847_s0 + $0x288] sm:$0xff] }
 0x119   :  { %v10838_v14 = vpack.c.bf16 %v18980_v3, %v18978_v38  ;;  %v18995_v38 = vld [vmem:[#allocation57_spill] sm:$0xff] }
 0x11a   :  { %v18996_v25 = vand.u32 4294901760, %v18995_v38 }
 0x11b   :  { %10835 = vmatpush3.bf16.xpose.msra.mxu0 %v10834_v53  ;;  %v18990_v53 = vand.u32 4294901760, %v18989_v22  ;;  %v11034_v22 = vpack.c.bf16 %v19003_v13, %v19001_v61  ;;  %v19022_v13 = vand.u32 4294901760, %v12859_v54  ;;  %v10854_v54 = vpack.c.bf16 %v19028_v44, %v19027_v52  ;;  %v2291_v52 = vld [vmem:[%s17847_s0 + $0x318] sm:$0xff] }
 0x11c   :  { %10837 = vmatprep.subr.bf16.mxu0 %v10836_v8  ;;  %v18991_v8 = vld [vmem:[#allocation54_spill] sm:$0xff] }
 0x11d   :  { %11027 = vmatpush3.bf16.xpose.msra.mxu1 %v11026_v1  ;;  %v18992_v1 = vand.u32 4294901760, %v18991_v8  ;;  %v19007_v8 = vand.u32 4294901760, %v18880_v63  ;;  %v19019_v63 = vand.u32 4294901760, %v18852_v37  ;;  %v19029_v37 = vand.u32 4294901760, %v12932_v28  ;;  %v19032_v28 = vld [vmem:[#allocation71_spill] sm:$0xff] }
 0x11e   :  { %11029 = vmatprep.subr.bf16.mxu1 %v11028_v59  ;;  %v18993_v59 = vld [vmem:[#allocation56_spill] sm:$0xff] }
 0x11f   :  { %v11032_v48 = vpack.c.bf16 %v18992_v1, %v18990_v53  ;;  %v18994_v30 = vand.u32 4294901760, %v18993_v59  ;;  %v10846_v1 = vpack.c.bf16 %v19008_v26, %v19007_v8  ;;  %v19010_v59 = vld [vmem:[#allocation75_spill] sm:$0xff]  ;;  %v2307_v26 = vld [vmem:[%s17847_s0 + $0x398] sm:$0xff] }
 0x121   :  { %v10842_v3 = vpack.c.bf16 %v18996_v25, %v18994_v30  ;;  %v19011_v30 = vand.u32 4294901760, %v19010_v59  ;;  %v19012_v25 = vld [vmem:[#allocation70_spill] sm:$0xff] }
 0x122   :  { %v19013_v43 = vand.u32 4294901760, %v19012_v25 }
 0x123   :  { %10839 = vmatpush3.bf16.xpose.msra.mxu0 %v10838_v14  ;;  %v19004_v14 = vand.u32 4294901760, %v18878_v12  ;;  %v19014_v12 = vld [vmem:[#allocation72_spill] sm:$0xff] }
 0x124   :  { %10841 = vmatprep.subr.bf16.mxu0 %v10840_v4  ;;  %v19005_v4 = vld [vmem:[#allocation66_spill] sm:$0xff]  ;;  %v19015_v47 = vand.u32 4294901760, %v19014_v12  ;;  %v19040_v12 = vld [vmem:[#allocation89_spill] sm:$0xff] }
 0x125   :  { %11031 = vmatpush3.bf16.xpose.msra.mxu1 %v11030_v24  ;;  %v19006_v24 = vand.u32 4294901760, %v19005_v4 }
 0x126   :  { %11033 = vmatprep.subr.bf16.mxu1 %v11032_v48  ;;  %v19009_v48 = vand.u32 4294901760, %v18884_v40  ;;  %v11038_v35 = vpack.c.bf16 %v19015_v47, %v19013_v43  ;;  %v10850_v40 = vpack.c.bf16 %v19020_v9, %v19019_v63  ;;  %v19042_v63 = vld [vmem:[#allocation90_spill] sm:$0xff] }
 0x127   :  { %v11036_v53 = vpack.c.bf16 %v19006_v24, %v19004_v14  ;;  %v19023_v14 = vand.u32 4294901760, %v18854_v20  ;;  %v19025_v24 = vand.u32 4294901760, %v12861_v2  ;;  %v19030_v20 = vand.u32 4294901760, %v13032_v46  ;;  %v19031_v2 = vld [vmem:[#allocation73_spill] sm:$0xff]  ;;  %v2304_v46 = vld [vmem:[%s17847_s0 + $0x380] sm:$0xff] }
 0x128   :  { %v10848_v38 = vpack.c.bf16 %v19011_v30, %v19009_v48 }
 0x12b   :  { %10843 = vmatpush3.bf16.xpose.msra.mxu0 %v10842_v3  ;;  %v19016_v3 = vand.u32 4294901760, %v18886_v39  ;;  %v19024_v39 = vand.u32 4294901760, %v18855_v16  ;;  %v11046_v16 = vpack.c.bf16 %v19030_v20, %v19029_v37  ;;  %v2308_v20 = vld [vmem:[%s17847_s0 + $0x3a0] sm:$0xff] }
 0x12c   :  { %10845 = vmatprep.subr.bf16.mxu0 %v10844_v32  ;;  %v19017_v32 = vld [vmem:[#allocation78_spill] sm:$0xff] }
 0x12d   :  { %11035 = vmatpush3.bf16.xpose.msra.mxu1 %v11034_v22  ;;  %v19018_v60 = vand.u32 4294901760, %v19017_v32  ;;  %v10852_v22 = vpack.c.bf16 %v19022_v13, %v19021_v34  ;;  %v11042_v4 = vpack.c.bf16 %v19024_v39, %v19023_v14  ;;  %v2474_v32 = vsel %vm83_vm0, %v2307_v26, 0  ;;  %v2258_v34 = vld [vmem:[%s17847_s0 + $0x210] sm:$0xff]  ;;  %v2259_v13 = vld [vmem:[%s17847_s0 + $0x218] sm:$0xff] }
 0x12e   :  { %11037 = vmatprep.subr.bf16.mxu1 %v11036_v53  ;;  %v19026_v53 = vand.u32 4294901760, %v12874_v42  ;;  %v19033_v42 = vld [vmem:[#allocation76_spill] sm:$0xff]  ;;  %v3474_v39 = vand.u32 4294901760, %v2474_v32  ;;  %v13632_v37 = vsel %vm83_vm0, %v2259_v13, 0  ;;  %v2279_v26 = vld [vmem:[%s17847_s0 + $0x2b8] sm:$0xff] }
 0x12f   :  { %v11040_v61 = vpack.c.bf16 %v19018_v60, %v19016_v3 }
 0x130   :  { %v11044_v8 = vpack.c.bf16 %v19026_v53, %v19025_v24  ;;  %v2276_v24 = vld [vmem:[%s17847_s0 + $0x2a0] sm:$0xff]  ;;  %v2277_v53 = vld [vmem:[%s17847_s0 + $0x2a8] sm:$0xff] }
 0x133   :  { %10847 = vmatpush3.bf16.xpose.msra.mxu0 %v10846_v1 }
 0x134   :  { %10849 = vmatprep.subr.bf16.mxu0 %v10848_v38 }
 0x135   :  { %11039 = vmatpush3.bf16.xpose.msra.mxu1 %v11038_v35 }
 0x136   :  { %11041 = vmatprep.subr.bf16.mxu1 %v11040_v61 }
 0x13b   :  { %10851 = vmatpush3.bf16.xpose.msra.mxu0 %v10850_v40 }
 0x13c   :  { %10853 = vmatprep.subr.bf16.mxu0 %v10852_v22 }
 0x13d   :  { %11043 = vmatpush3.bf16.xpose.msra.mxu1 %v11042_v4  ;;  %v2290_v4 = vld [vmem:[%s17847_s0 + $0x310] sm:$0xff] }
 0x13e   :  { %11045 = vmatprep.subr.bf16.mxu1 %v11044_v8 }
 0x143   :  { %10855 = vmatpush3.bf16.xpose.msra.mxu0 %v10854_v54  ;;  %v13629_v54 = vsel %vm83_vm0, %v2258_v34, 0  ;;  %v19049_v34 = vld [vmem:[#allocation94_spill] sm:$0xff] }
 0x144   :  { %10857 = vmatprep.subr.bf16.mxu0 %v18891_v50  ;;  %v2305_v50 = vld [vmem:[%s17847_s0 + $0x388] sm:$0xff] }
 0x145   :  { %11047 = vmatpush3.bf16.xpose.msra.mxu1 %v11046_v16  ;;  %v2309_v16 = vld [vmem:[%s17847_s0 + $0x3a8] sm:$0xff] }
 0x146   :  { %11049 = vmatprep.subr.bf16.mxu1 %v18892_v7  ;;  %v13517_v7 = vsel %vm83_vm0, %v2272_v55, 0  ;;  %v13653_v55 = vsel %vm83_vm0, %v2277_v53, 0 }
 0x14a   :  { %9145 = vmatmul.mubr.msk.f32.vlgmr.msra.gmra.mrb[0].mxu0 %vm83_vm0, %v18889_v18 }
 0x14b   :  { %10859 = vmatpush3.bf16.xpose.msra.mxu0 %v18893_v10  ;;  %9146 = vmatprep.mubr.msk.f32.mxu0 %vm83_vm0, %v13191_v51  ;;  %v13520_v10 = vsel %vm83_vm0, %v2273_v23, 0 }
 0x14c   :  { %9361 = vmatmul.mubr.msk.f32.vlgmr.msra.gmra.mrb[0].mxu1 %vm83_vm0, %v18889_v18  ;;  %10861 = vmatprep.subr.bf16.mxu0 %v18894_v49  ;;  %v19034_v49 = vld [vmem:[#allocation79_spill] sm:$0xff] }
 0x14d   :  { %11051 = vmatpush3.bf16.xpose.msra.mxu1 %v18895_v56  ;;  %9362 = vmatprep.mubr.msk.f32.mxu1 %vm83_vm0, %v13191_v51  ;;  %v2465_v56 = vsel %vm83_vm0, %v2304_v46, 0 }
 0x14e   :  { %11053 = vmatprep.subr.bf16.mxu1 %v18896_v45  ;;  %9147 = vmatmul.mubr.msk.f32.gmra.mrb[2].mxu0 %vm83_vm0, %v13191_v51  ;;  %v2468_v45 = vsel %vm83_vm0, %v2305_v50, 0  ;;  %v13661_v50 = vsub.f32 %v2474_v32, %v3474_v39  ;;  %v2292_v32 = vld [vmem:[%s17847_s0 + $0x320] sm:$0xff] }
 0x14f   :  { %9180 = vmatprep.mubr.msk.f32.mxu0 %vm83_vm0, %v18889_v18 }
 0x150   :  { %9363 = vmatmul.mubr.msk.f32.gmra.mrb[2].mxu1 %vm83_vm0, %v13191_v51 }
 0x151   :  { %9396 = vmatprep.mubr.msk.f32.mxu1 %vm83_vm0, %v18889_v18 }
 0x153   :  { %10863 = vmatpush3.bf16.xpose.msra.mxu0 %v18898_v6  ;;  %v19035_v6 = vld [vmem:[#allocation85_spill] sm:$0xff] }
 0x154   :  { %10865 = vmatprep.subr.bf16.mxu0 %v18899_v17  ;;  %v18102_v17 = vand.u32 4294901760, %v13517_v7 }
 0x155   :  { %11055 = vmatpush3.bf16.xpose.msra.mxu1 %v18900_v27  ;;  %v18099_v27 = vand.u32 4294901760, %v13520_v10 }
 0x156   :  { %11057 = vmatprep.subr.bf16.mxu1 %v18901_v33  ;;  %v2256_v33 = vld [vmem:[%s17847_s0 + $0x200] sm:$0xff] }
 0x15b   :  { %10867 = vmatpush3.bf16.xpose.msra.mxu0 %v18902_v41  ;;  %v2257_v41 = vld [vmem:[%s17847_s0 + $0x208] sm:$0xff] }
 0x15c   :  { %10869 = vmatprep.subr.bf16.mxu0 %v18903_v57  ;;  %v19036_v57 = vld [vmem:[#allocation82_spill] sm:$0xff] }
 0x15d   :  { %11059 = vmatpush3.bf16.xpose.msra.mxu1 %v18904_v58  ;;  %v19037_v58 = vld [vmem:[#allocation88_spill] sm:$0xff] }
 0x15e   :  { %11061 = vmatprep.subr.bf16.mxu1 %v18905_v15  ;;  %v3465_v15 = vand.u32 4294901760, %v2465_v56 }
 0x160   :  { %v13583_v47 = vsub.f32 %v2465_v56, %v3465_v15  ;;  %v18088_v56 = vand.u32 4294901760, %v13629_v54 }
 0x162   :  { %19041 = vst [vmem:[#allocation6_spill] sm:$0xff] %v13583_v47 }
 0x163   :  { %10871 = vmatpush3.bf16.xpose.msra.mxu0 %v18906_v31  ;;  %v3468_v31 = vand.u32 4294901760, %v2468_v45 }
 0x164   :  { %10873 = vmatprep.subr.bf16.mxu0 %v18907_v0  ;;  %v2288_v0 = vld [vmem:[%s17847_s0 + $0x300] sm:$0xff] }
 0x165   :  { %11063 = vmatpush3.bf16.xpose.msra.mxu1 %v18908_v19  ;;  %v2274_v19 = vld [vmem:[%s17847_s0 + $0x290] sm:$0xff]  ;;  %v13567_v1 = vsel %vm83_vm0, %v2288_v0, 0  ;;  %v13575_v30 = vpack.c.bf16 %v3468_v31, %v3465_v15  ;;  %v13585_v35 = vsub.f32 %v2468_v45, %v3468_v31  ;;  %v18087_v45 = vand.u32 4294901760, %v13632_v37  ;;  %v2261_v0 = vld [vmem:[%s17847_s0 + $0x228] sm:$0xff] }
 0x166   :  { %11065 = vmatprep.subr.bf16.mxu1 %v18909_v29  ;;  %v2275_v29 = vld [vmem:[%s17847_s0 + $0x298] sm:$0xff]  ;;  %v13570_v48 = vsel %vm83_vm0, %v2274_v19, 0  ;;  %v18096_v9 = vand.u32 4294901760, %v13567_v1 }
 0x167   :  { %v13573_v59 = vsel %vm83_vm0, %v2275_v29, 0  ;;  %19039 = vst [vmem:[#allocation5_spill] sm:$0xff] %v13575_v30  ;;  %v18090_v60 = vand.u32 4294901760, %v13570_v48 }
 0x168   :  { %v18089_v61 = vand.u32 4294901760, %v13573_v59 }
 0x16a   :  { %v13626_v44 = vpack.c.bf16 %v18089_v61, %v18090_v60 }
 0x16b   :  { %10875 = vmatpush3.bf16.xpose.msra.mxu0 %v18910_v62  ;;  %v13546_v62 = vsel %vm83_vm0, %v2256_v33, 0  ;;  %v2480_v33 = vsel %vm83_vm0, %v2309_v16, 0 }
 0x16c   :  { %10877 = vmatprep.subr.bf16.mxu0 %v18911_v21  ;;  %v13549_v21 = vsel %vm83_vm0, %v2257_v41, 0  ;;  %v18098_v38 = vand.u32 4294901760, %v13546_v62  ;;  %19044 = vst [vmem:[#allocation65_spill] sm:$0xff] %v13626_v44 }
 0x16d   :  { %11067 = vmatpush3.bf16.xpose.msra.mxu1 %v18912_v5  ;;  %v2289_v5 = vld [vmem:[%s17847_s0 + $0x308] sm:$0xff]  ;;  %v18097_v25 = vand.u32 4294901760, %v13549_v21 }
 0x16e   :  { %11069 = vmatprep.subr.bf16.mxu1 %v18913_v11  ;;  %v13558_v11 = vpack.c.bf16 %v18099_v27, %v18102_v17  ;;  %v13580_v43 = vsel %vm83_vm0, %v2289_v5, 0  ;;  %v3480_v5 = vand.u32 4294901760, %v2480_v33  ;;  %v2297_v17 = vld [vmem:[%s17847_s0 + $0x348] sm:$0xff] }
 0x16f   :  { %v18093_v40 = vand.u32 4294901760, %v13580_v43  ;;  %v13617_v8 = vpack.c.bf16 %v18097_v25, %v18098_v38 }
 0x170   :  { %19038 = vst [vmem:[#allocation87_spill] sm:$0xff] %v13558_v11 }
 0x171   :  { %19043 = vst [vmem:[#allocation62_spill] sm:$0xff] %v13617_v8 }
 0x173   :  { %10879 = vmatpush3.bf16.xpose.msra.mxu0 %v18914_v36  ;;  %v2306_v36 = vld [vmem:[%s17847_s0 + $0x390] sm:$0xff] }
 0x174   :  { %10881 = vmatprep.subr.bf16.mxu0 %v19031_v2  ;;  %v2471_v3 = vsel %vm83_vm0, %v2306_v36, 0  ;;  %v13644_v2 = vpack.c.bf16 %v18093_v40, %v18096_v9  ;;  %v2278_v36 = vld [vmem:[%s17847_s0 + $0x2b0] sm:$0xff] }
 0x175   :  { %11071 = vmatpush3.bf16.xpose.msra.mxu1 %v19032_v28  ;;  %v3471_v14 = vand.u32 4294901760, %v2471_v3  ;;  %v13647_v28 = vsel %vm83_vm0, %v2290_v4, 0  ;;  %v2311_v4 = vld [vmem:[%s17847_s0 + $0x3b8] sm:$0xff] }
 0x176   :  { %11073 = vmatprep.subr.bf16.mxu1 %v19033_v42  ;;  %19045 = vst [vmem:[#allocation68_spill] sm:$0xff] %v13644_v2  ;;  %v13650_v42 = vsel %vm83_vm0, %v2276_v24, 0  ;;  %v18086_v15 = vand.u32 4294901760, %v13647_v28  ;;  %v2486_v22 = vsel %vm83_vm0, %v2311_v4, 0 }
 0x177   :  { %v13657_v23 = vpack.c.bf16 %v3474_v39, %v3471_v14  ;;  %v13659_v46 = vsub.f32 %v2471_v3, %v3471_v14  ;;  %v18084_v41 = vand.u32 4294901760, %v13650_v42  ;;  %v13725_v14 = vsel %vm83_vm0, %v2261_v0, 0  ;;  %v2310_v39 = vld [vmem:[%s17847_s0 + $0x3b0] sm:$0xff] }
 0x178   :  { %v13752_v0 = vsel %vm83_vm0, %v2292_v32, 0 }
 0x179   :  { %19046 = vst [vmem:[#allocation69_spill] sm:$0xff] %v13657_v23  ;;  %19047 = vst [vmem:[#allocation74_spill] sm:$0xff] %v13659_v46 }
 0x17b   :  { %10883 = vmatpush3.bf16.xpose.msra.mxu0 %v19034_v49  ;;  %v13664_v49 = vsel %vm83_vm0, %v2291_v52, 0  ;;  %v13742_v52 = vsel %vm83_vm0, %v2278_v36, 0  ;;  %v18091_v36 = vand.u32 4294901760, %v13725_v14 }
 0x17c   :  { %10885 = vmatprep.subr.bf16.mxu0 %v19035_v6  ;;  %v2477_v6 = vsel %vm83_vm0, %v2308_v20, 0  ;;  %v18085_v31 = vand.u32 4294901760, %v13664_v49  ;;  %v13745_v20 = vsel %vm83_vm0, %v2279_v26, 0  ;;  %v2483_v26 = vsel %vm83_vm0, %v2310_v39, 0  ;;  %v2263_v39 = vld [vmem:[%s17847_s0 + $0x238] sm:$0xff] }
 0x17d   :  { %11075 = vmatpush3.bf16.xpose.msra.mxu1 %v19036_v57  ;;  %v18083_v57 = vand.u32 4294901760, %v13653_v55  ;;  %v3477_v29 = vand.u32 4294901760, %v2477_v6  ;;  %v18095_v32 = vand.u32 4294901760, %v13742_v52  ;;  %v13806_v60 = vsel %vm83_vm0, %v2263_v39, 0 }
 0x17e   :  { %11077 = vmatprep.subr.bf16.mxu1 %v19037_v58  ;;  %v2260_v58 = vld [vmem:[%s17847_s0 + $0x220] sm:$0xff]  ;;  %v13737_v24 = vpack.c.bf16 %v18085_v31, %v18086_v15 }
 0x17f   :  { %v13707_v3 = vsel %vm83_vm0, %v2260_v58, 0  ;;  %v13722_v13 = vpack.c.bf16 %v18083_v57, %v18084_v41  ;;  %v13739_v53 = vsub.f32 %v2477_v6, %v3477_v29  ;;  %v13748_v16 = vpack.c.bf16 %v3480_v5, %v3477_v29  ;;  %v2262_v29 = vld [vmem:[%s17847_s0 + $0x230] sm:$0xff]  ;;  %v2280_v15 = vld [vmem:[%s17847_s0 + $0x2c0] sm:$0xff] }
 0x180   :  { %19051 = vst [vmem:[#allocation4_spill] sm:$0xff] %v13737_v24  ;;  %v18092_v58 = vand.u32 4294901760, %v13707_v3  ;;  %v13758_v6 = vsub.f32 %v2480_v33, %v3480_v5  ;;  %v18101_v33 = vand.u32 4294901760, %v13752_v0  ;;  %v3483_v57 = vand.u32 4294901760, %v2483_v26 }
 0x181   :  { %19050 = vst [vmem:[#allocation2_spill] sm:$0xff] %v13722_v13  ;;  %19052 = vst [vmem:[#allocation7_spill] sm:$0xff] %v13739_v53  ;;  %v3486_v41 = vand.u32 4294901760, %v2486_v22  ;;  %v13779_v31 = vsel %vm83_vm0, %v2262_v29, 0  ;;  %v2295_v29 = vld [vmem:[%s17847_s0 + $0x338] sm:$0xff] }
 0x182   :  { %19053 = vst [vmem:[#allocation13_spill] sm:$0xff] %v13748_v16  ;;  %19054 = vst [vmem:[#allocation10_spill] sm:$0xff] %v13758_v6  ;;  %v13791_v4 = vpack.c.bf16 %v18091_v36, %v18092_v58  ;;  %v2312_v36 = vld [vmem:[%s17847_s0 + $0x3c0] sm:$0xff]  ;;  %v2313_v58 = vld [vmem:[%s17847_s0 + $0x3c8] sm:$0xff]  ;;  %v13829_v25 = vsub.f32 %v2483_v26, %v3483_v57  ;;  %v13835_v27 = vsel %vm83_vm0, %v2295_v29, 0 }
 0x183   :  { %10887 = vmatpush3.bf16.xpose.msra.mxu0 %v19040_v12  ;;  %v13704_v12 = vpack.c.bf16 %v18087_v45, %v18088_v56  ;;  %v2281_v45 = vld [vmem:[%s17847_s0 + $0x2c8] sm:$0xff]  ;;  %v2294_v56 = vld [vmem:[%s17847_s0 + $0x330] sm:$0xff]  ;;  %v13827_v9 = vpack.c.bf16 %v3486_v41, %v3483_v57  ;;  %v2283_v26 = vld [vmem:[%s17847_s0 + $0x2d8] sm:$0xff] }
 0x184   :  { %11081 = vmatprep.subr.bf16.mxu0 %v13558_v11  ;;  %19055 = vst [vmem:[#allocation16_spill] sm:$0xff] %v13791_v4  ;;  %v13825_v39 = vsel %vm83_vm0, %v2281_v45, 0  ;;  %19059 = vst [vmem:[#allocation28_spill] sm:$0xff] %v13829_v25  ;;  %v13832_v38 = vsel %vm83_vm0, %v2294_v56, 0  ;;  %v13845_v45 = vsel %vm83_vm0, %v2313_v58, 0  ;;  %v2265_v58 = vld [vmem:[%s17847_s0 + $0x248] sm:$0xff] }
 0x185   :  { %11079 = vmatpush3.bf16.xpose.msra.mxu1 %v19042_v63  ;;  %19048 = vst [vmem:[#allocation77_spill] sm:$0xff] %v13704_v12  ;;  %v2293_v63 = vld [vmem:[%s17847_s0 + $0x328] sm:$0xff]  ;;  %19058 = vst [vmem:[#allocation22_spill] sm:$0xff] %v13827_v9  ;;  %v19062_v29 = vand.u32 4294901760, %v13825_v39 }
 0x186   :  { %11273 = vmatprep.subr.bf16.mxu1 %v13575_v30  ;;  %v13755_v19 = vsel %vm83_vm0, %v2293_v63, 0  ;;  %v18094_v63 = vand.u32 4294901760, %v13745_v20 }
 0x187   :  { %v18100_v5 = vand.u32 4294901760, %v13755_v19 }
 0x188   :  { %v13803_v61 = vpack.c.bf16 %v18094_v63, %v18095_v32  ;;  %v18108_v63 = vand.u32 4294901760, %v13779_v31  ;;  %v13822_v32 = vsel %vm83_vm0, %v2280_v15, 0  ;;  %v18107_v15 = vand.u32 4294901760, %v13806_v60 }
 0x189   :  { %v13818_v40 = vpack.c.bf16 %v18100_v5, %v18101_v33  ;;  %v13838_v5 = vsub.f32 %v2486_v22, %v3486_v41  ;;  %v13842_v33 = vsel %vm83_vm0, %v2312_v36, 0  ;;  %v18115_v56 = vand.u32 4294901760, %v13822_v32  ;;  %v2264_v41 = vld [vmem:[%s17847_s0 + $0x240] sm:$0xff]  ;;  %v2282_v22 = vld [vmem:[%s17847_s0 + $0x2d0] sm:$0xff] }
 0x18a   :  { %9181 = vmatmul.mubr.msk.f32.vlgmr.msra.gmra.mrb[0].mxu0 %vm83_vm0, %v18889_v18  ;;  %19056 = vst [vmem:[#allocation19_spill] sm:$0xff] %v13803_v61  ;;  %v13874_v57 = vpack.c.bf16 %v18107_v15, %v18108_v63  ;;  %v2296_v36 = vld [vmem:[%s17847_s0 + $0x340] sm:$0xff]  ;;  %v13892_v15 = vsel %vm83_vm0, %v2265_v58, 0  ;;  %v2314_v63 = vld [vmem:[%s17847_s0 + $0x3d0] sm:$0xff]  ;;  %v13910_v58 = vsel %vm83_vm0, %v2283_v26, 0 }
 0x18b   :  { %11083 = vmatpush3.bf16.xpose.msra.mxu0 %v13617_v8  ;;  %9182 = vmatprep.mubr.msk.f32.mxu0 %vm83_vm0, %v13191_v51  ;;  %19057 = vst [vmem:[#allocation25_spill] sm:$0xff] %v13818_v40  ;;  %19060 = vst [vmem:[#allocation31_spill] sm:$0xff] %v13838_v5  ;;  %v13928_v26 = vsel %vm83_vm0, %v2314_v63, 0  ;;  %v19074_v63 = vand.u32 4294901760, %v13546_v62  ;;  %v2316_v8 = vld [vmem:[%s17847_s0 + $0x3e0] sm:$0xff] }
 0x18c   :  { %9397 = vmatmul.mubr.msk.f32.vlgmr.msra.gmra.mrb[0].mxu1 %vm83_vm0, %v18889_v18  ;;  %11085 = vmatprep.subr.bf16.mxu0 %v13626_v44  ;;  %19061 = vst [vmem:[#allocation37_spill] sm:$0xff] %v13874_v57 }
 0x18d   :  { %11275 = vmatpush3.bf16.xpose.msra.mxu1 %v13644_v2  ;;  %9398 = vmatprep.mubr.msk.f32.mxu1 %vm83_vm0, %v13191_v51 }
 0x18e   :  { %9183 = vmatmul.mubr.msk.f32.gmra.mrb[2].mxu0 %vm83_vm0, %v13191_v51  ;;  %11277 = vmatprep.subr.bf16.mxu1 %v13657_v23  ;;  %v13922_v23 = vsel %vm83_vm0, %v2297_v17, 0 }
 0x18f   :  { %9432 = vmatprep.mubr.f32.mxu0 %v19049_v34 }
 0x190   :  { %9399 = vmatmul.mubr.msk.f32.gmra.mrb[2].mxu1 %vm83_vm0, %v13191_v51  ;;  %v19099_v51 = vand.u32 4294901760, %v13647_v28 }
 0x191   :  { %9648 = vmatprep.mubr.f32.mxu1 %v19049_v34 }
 0x192   :  { %v14049_v18 = vsub.f32 %v13647_v28, %v19099_v51  ;;  %v14067_v51 = vsel %vm83_vm0, %v2316_v8, 0 }
 0x193   :  { %11087 = vmatpush3.bf16.xpose.msra.mxu0 %v13704_v12  ;;  %v13919_v12 = vsel %vm83_vm0, %v2296_v36, 0  ;;  %v2266_v36 = vld [vmem:[%s17847_s0 + $0x250] sm:$0xff] }
 0x194   :  { %11089 = vmatprep.subr.bf16.mxu0 %v13722_v13 }
 0x195   :  { %11279 = vmatpush3.bf16.xpose.msra.mxu1 %v13737_v24  ;;  %v19068_v24 = vand.u32 4294901760, %v13845_v45 }
 0x196   :  { %11281 = vmatprep.subr.bf16.mxu1 %v13748_v16  ;;  %v19065_v16 = vand.u32 4294901760, %v13835_v27 }
 0x19b   :  { %11091 = vmatpush3.bf16.xpose.msra.mxu0 %v13791_v4  ;;  %v19064_v4 = vand.u32 4294901760, %v13832_v38 }
 0x19c   :  { %11093 = vmatprep.subr.bf16.mxu0 %v13803_v61  ;;  %v2315_v61 = vld [vmem:[%s17847_s0 + $0x3d8] sm:$0xff] }
 0x19d   :  { %11283 = vmatpush3.bf16.xpose.msra.mxu1 %v13818_v40  ;;  %v13889_v40 = vsel %vm83_vm0, %v2264_v41, 0  ;;  %v13907_v41 = vsel %vm83_vm0, %v2282_v22, 0  ;;  %v13931_v22 = vsel %vm83_vm0, %v2315_v61, 0  ;;  %v13949_v61 = vsub.f32 %v13546_v62, %v19074_v63 }
 0x19e   :  { %11285 = vmatprep.subr.bf16.mxu1 %v13827_v9  ;;  %v13886_v9 = vpack.c.bf16 %v19062_v29, %v18115_v56  ;;  %v13904_v29 = vpack.c.bf16 %v19065_v16, %v19064_v4  ;;  %v19067_v56 = vand.u32 4294901760, %v13842_v33  ;;  %v19072_v16 = vand.u32 4294901760, %v13520_v10 }
 0x19f   :  { %v19077_v62 = vand.u32 4294901760, %v13567_v1 }
 0x1a0   :  { %19063 = vst [vmem:[#allocation34_spill] sm:$0xff] %v13886_v9  ;;  %19066 = vst [vmem:[#allocation40_spill] sm:$0xff] %v13904_v29  ;;  %v13916_v13 = vpack.c.bf16 %v19068_v24, %v19067_v56  ;;  %v19070_v24 = vand.u32 4294901760, %v13517_v7  ;;  %v13944_v4 = vsub.f32 %v13520_v10, %v19072_v16  ;;  %v2267_v10 = vld [vmem:[%s17847_s0 + $0x258] sm:$0xff]  ;;  %v19075_v16 = vand.u32 4294901760, %v13549_v21 }
 0x1a1   :  { %v13968_v63 = vsub.f32 %v13567_v1, %v19077_v62  ;;  %v19081_v1 = vand.u32 4294901760, %v13570_v48 }
 0x1a2   :  { %19069 = vst [vmem:[#allocation43_spill] sm:$0xff] %v13916_v13  ;;  %v13936_v56 = vsub.f32 %v13517_v7, %v19070_v24  ;;  %19073 = vst [vmem:[#allocation47_spill] sm:$0xff] %v13944_v4  ;;  %v13963_v17 = vsub.f32 %v13549_v21, %v19075_v16  ;;  %v2285_v21 = vld [vmem:[%s17847_s0 + $0x2e8] sm:$0xff]  ;;  %v19079_v16 = vand.u32 4294901760, %v13580_v43  ;;  %v19083_v7 = vand.u32 4294901760, %v13573_v59 }
 0x1a3   :  { %11095 = vmatpush3.bf16.xpose.msra.mxu0 %v13874_v57  ;;  %19078 = vst [vmem:[#allocation55_spill] sm:$0xff] %v13968_v63  ;;  %v13987_v62 = vsub.f32 %v13570_v48, %v19081_v1  ;;  %v19086_v57 = vand.u32 4294901760, %v13892_v15  ;;  %v2299_v48 = vld [vmem:[%s17847_s0 + $0x358] sm:$0xff]  ;;  %v14044_v11 = vsel %vm83_vm0, %v2285_v21, 0  ;;  %v19106_v21 = vand.u32 4294901760, %v13653_v55 }
 0x1a4   :  { %19071 = vst [vmem:[#allocation49_spill] sm:$0xff] %v13936_v56  ;;  %11097 = vmatprep.subr.bf16.mxu0 %v13886_v9  ;;  %19076 = vst [vmem:[#allocation52_spill] sm:$0xff] %v13963_v17  ;;  %v13982_v9 = vsub.f32 %v13580_v43, %v19079_v16  ;;  %v13992_v24 = vsub.f32 %v13573_v59, %v19083_v7  ;;  %v2298_v43 = vld [vmem:[%s17847_s0 + $0x350] sm:$0xff]  ;;  %v19088_v16 = vand.u32 4294901760, %v13629_v54  ;;  %v19089_v59 = vand.u32 4294901760, %v13907_v41 }
 0x1a5   :  { %11287 = vmatpush3.bf16.xpose.msra.mxu1 %v13904_v29  ;;  %v2284_v29 = vld [vmem:[%s17847_s0 + $0x2e0] sm:$0xff]  ;;  %19082 = vst [vmem:[#allocation59_spill] sm:$0xff] %v13987_v62  ;;  %v19090_v7 = vand.u32 4294901760, %v13910_v58  ;;  %19098 = vst [vmem:[#allocation11_spill] sm:$0xff] %v14044_v11 }
 0x1a6   :  { %11289 = vmatprep.subr.bf16.mxu1 %v13916_v13  ;;  %19080 = vst [vmem:[#allocation61_spill] sm:$0xff] %v13982_v9  ;;  %19084 = vst [vmem:[#allocation64_spill] sm:$0xff] %v13992_v24  ;;  %v19085_v13 = vand.u32 4294901760, %v13889_v40  ;;  %v14009_v1 = vsub.f32 %v13629_v54, %v19088_v16  ;;  %v2317_v54 = vld [vmem:[%s17847_s0 + $0x3e8] sm:$0xff]  ;;  %v19093_v16 = vand.u32 4294901760, %v13632_v37 }
 0x1a7   :  { %v14015_v44 = vpack.c.bf16 %v19090_v7, %v19089_v59  ;;  %v19094_v59 = vand.u32 4294901760, %v13919_v12  ;;  %v14070_v28 = vsel %vm83_vm0, %v2317_v54, 0  ;;  %v14088_v54 = vsub.f32 %v13653_v55, %v19106_v21  ;;  %v2269_v55 = vld [vmem:[%s17847_s0 + $0x268] sm:$0xff] }
 0x1a8   :  { %v13998_v2 = vpack.c.bf16 %v19086_v57, %v19085_v13  ;;  %v14018_v13 = vsel %vm83_vm0, %v2266_v36, 0  ;;  %v14021_v57 = vsel %vm83_vm0, %v2267_v10, 0  ;;  %v14032_v30 = vsub.f32 %v13632_v37, %v19093_v16  ;;  %19103 = vst [vmem:[#allocation17_spill] sm:$0xff] %v14070_v28 }
 0x1a9   :  { %19091 = vst [vmem:[#allocation8_spill] sm:$0xff] %v14015_v44  ;;  %19092 = vst [vmem:[#allocation9_spill] sm:$0xff] %v14021_v57  ;;  %v19095_v36 = vand.u32 4294901760, %v13922_v23  ;;  %v14041_v10 = vsel %vm83_vm0, %v2284_v29, 0  ;;  %v19100_v37 = vand.u32 4294901760, %v13928_v26  ;;  %v19101_v16 = vand.u32 4294901760, %v13931_v22 }
 0x1aa   :  { %19087 = vst [vmem:[#allocation67_spill] sm:$0xff] %v13998_v2  ;;  %19097 = vst [vmem:[#allocation15_spill] sm:$0xff] %v14041_v10  ;;  %v14061_v29 = vsel %vm83_vm0, %v2299_v48, 0  ;;  %v19105_v48 = vand.u32 4294901760, %v13650_v42  ;;  %v19110_v21 = vand.u32 4294901760, %v13725_v14 }
 0x1ab   :  { %v14038_v7 = vpack.c.bf16 %v19095_v36, %v19094_v59  ;;  %v14055_v5 = vpack.c.bf16 %v19101_v16, %v19100_v37  ;;  %v14058_v59 = vsel %vm83_vm0, %v2298_v43, 0  ;;  %11099 = vmatpush3.bf16.xpose.msra.mxu0 %v13998_v2  ;;  %v19104_v37 = vand.u32 4294901760, %v13664_v49  ;;  %19107 = vst [vmem:[#allocation18_spill] sm:$0xff] %v14088_v54  ;;  %v2286_v36 = vld [vmem:[%s17847_s0 + $0x2f0] sm:$0xff] }
 0x1ac   :  { %v14080_v16 = vsub.f32 %v13650_v42, %v19105_v48  ;;  %11101 = vmatprep.subr.bf16.mxu0 %v14015_v44  ;;  %v19108_v2 = vand.u32 4294901760, %v13707_v3  ;;  %v2268_v48 = vld [vmem:[%s17847_s0 + $0x260] sm:$0xff]  ;;  %v14107_v8 = vsub.f32 %v13725_v14, %v19110_v21  ;;  %v2287_v14 = vld [vmem:[%s17847_s0 + $0x2f8] sm:$0xff]  ;;  %v19114_v21 = vand.u32 4294901760, %v13755_v19 }
 0x1ad   :  { %19096 = vst [vmem:[#allocation14_spill] sm:$0xff] %v14038_v7  ;;  %19102 = vst [vmem:[#allocation12_spill] sm:$0xff] %v14055_v5  ;;  %v14075_v43 = vsub.f32 %v13664_v49, %v19104_v37  ;;  %11291 = vmatpush3.bf16.xpose.msra.mxu1 %v14038_v7  ;;  %v19118_v42 = vand.u32 4294901760, %v13745_v20  ;;  %v19121_v44 = vand.u32 4294901760, %v14021_v57 }
 0x1ae   :  { %v14093_v49 = vsub.f32 %v13707_v3, %v19108_v2  ;;  %19111 = vst [vmem:[#allocation21_spill] sm:$0xff] %v14107_v8  ;;  %v19112_v2 = vand.u32 4294901760, %v13752_v0  ;;  %11293 = vmatprep.subr.bf16.mxu1 %v14055_v5  ;;  %v14126_v7 = vsub.f32 %v13755_v19, %v19114_v21  ;;  %v19120_v5 = vand.u32 4294901760, %v14018_v13  ;;  %v2300_v19 = vld [vmem:[%s17847_s0 + $0x360] sm:$0xff] }
 0x1af   :  { %v14136_v37 = vsub.f32 %v13745_v20, %v19118_v42  ;;  %v19123_v21 = vand.u32 4294901760, %v13779_v31  ;;  %v19125_v20 = vand.u32 4294901760, %v14041_v10  ;;  %v19126_v42 = vand.u32 4294901760, %v14044_v11 }
 0x1b0   :  { %19109 = vst [vmem:[#allocation20_spill] sm:$0xff] %v14093_v49  ;;  %v14112_v3 = vsub.f32 %v13752_v0, %v19112_v2  ;;  %19115 = vst [vmem:[#allocation27_spill] sm:$0xff] %v14126_v7  ;;  %v19116_v0 = vand.u32 4294901760, %v13742_v52  ;;  %v14142_v25 = vpack.c.bf16 %v19121_v44, %v19120_v5  ;;  %v14162_v44 = vsel %vm83_vm0, %v2268_v48, 0  ;;  %v2318_v7 = vld [vmem:[%s17847_s0 + $0x3f0] sm:$0xff] }
 0x1b1   :  { %19119 = vst [vmem:[#allocation24_spill] sm:$0xff] %v14136_v37  ;;  %v14159_v57 = vpack.c.bf16 %v19126_v42, %v19125_v20  ;;  %19128 = vst [vmem:[#allocation33_spill] sm:$0xff] %v14162_v44  ;;  %v14165_v5 = vsel %vm83_vm0, %v2269_v55, 0  ;;  %v19132_v20 = vand.u32 4294901760, %v14058_v59  ;;  %v19133_v48 = vand.u32 4294901760, %v14061_v29 }
 0x1b2   :  { %19113 = vst [vmem:[#allocation26_spill] sm:$0xff] %v14112_v3  ;;  %v14131_v2 = vsub.f32 %v13742_v52, %v19116_v0  ;;  %19122 = vst [vmem:[#allocation29_spill] sm:$0xff] %v14142_v25  ;;  %v2301_v52 = vld [vmem:[%s17847_s0 + $0x368] sm:$0xff]  ;;  %v14153_v0 = vsub.f32 %v13779_v31, %v19123_v21  ;;  %v2319_v31 = vld [vmem:[%s17847_s0 + $0x3f8] sm:$0xff]  ;;  %v19130_v21 = vand.u32 4294901760, %v13806_v60  ;;  %v14185_v55 = vsel %vm83_vm0, %v2286_v36, 0 }
 0x1b3   :  { %19127 = vst [vmem:[#allocation32_spill] sm:$0xff] %v14159_v57  ;;  %19129 = vst [vmem:[#allocation38_spill] sm:$0xff] %v14165_v5  ;;  %v14182_v42 = vpack.c.bf16 %v19133_v48, %v19132_v20  ;;  %v19137_v10 = vand.u32 4294901760, %v13832_v38  ;;  %v14202_v20 = vsel %vm83_vm0, %v2300_v19, 0  ;;  %v14205_v36 = vsel %vm83_vm0, %v2301_v52, 0  ;;  %11103 = vmatpush3.bf16.xpose.msra.mxu0 %v14142_v25  ;;  %v2270_v52 = vld [vmem:[%s17847_s0 + $0x270] sm:$0xff] }
 0x1b4   :  { %19117 = vst [vmem:[#allocation23_spill] sm:$0xff] %v14131_v2  ;;  %19124 = vst [vmem:[#allocation30_spill] sm:$0xff] %v14153_v0  ;;  %v14176_v11 = vsub.f32 %v13806_v60, %v19130_v21  ;;  %v14188_v0 = vsel %vm83_vm0, %v2287_v14, 0  ;;  %v19139_v60 = vand.u32 4294901760, %v14067_v51  ;;  %v19140_v21 = vand.u32 4294901760, %v14070_v28  ;;  %11105 = vmatprep.subr.bf16.mxu0 %v14159_v57  ;;  %v2271_v48 = vld [vmem:[%s17847_s0 + $0x278] sm:$0xff] }
 0x1b5   :  { %19134 = vst [vmem:[#allocation35_spill] sm:$0xff] %v14182_v42  ;;  %19135 = vst [vmem:[#allocation36_spill] sm:$0xff] %v14185_v55  ;;  %v14193_v3 = vsub.f32 %v13832_v38, %v19137_v10  ;;  %v14211_v38 = vsel %vm83_vm0, %v2318_v7, 0  ;;  %v14214_v10 = vsel %vm83_vm0, %v2319_v31, 0  ;;  %v19143_v7 = vand.u32 4294901760, %v13835_v27  ;;  %11295 = vmatpush3.bf16.xpose.msra.mxu1 %v14182_v42 }
 0x1b6   :  { %19131 = vst [vmem:[#allocation39_spill] sm:$0xff] %v14176_v11  ;;  %19136 = vst [vmem:[#allocation41_spill] sm:$0xff] %v14188_v0  ;;  %v14199_v11 = vpack.c.bf16 %v19140_v21, %v19139_v60  ;;  %v19145_v31 = vand.u32 4294901760, %v13822_v32  ;;  %v19147_v19 = vand.u32 4294901760, %v13825_v39  ;;  %v19149_v42 = vand.u32 4294901760, %v13842_v33  ;;  %v2303_v60 = vld [vmem:[%s17847_s0 + $0x378] sm:$0xff] }
 0x1b7   :  { %19138 = vst [vmem:[#allocation42_spill] sm:$0xff] %v14193_v3  ;;  %19142 = vst [vmem:[#allocation45_spill] sm:$0xff] %v14214_v10  ;;  %v14227_v14 = vsub.f32 %v13835_v27, %v19143_v7  ;;  %v19151_v7 = vand.u32 4294901760, %v14162_v44  ;;  %v19152_v27 = vand.u32 4294901760, %v14165_v5  ;;  %v19159_v5 = vand.u32 4294901760, %v13845_v45 }
 0x1b8   :  { %19141 = vst [vmem:[#allocation44_spill] sm:$0xff] %v14199_v11  ;;  %v14232_v57 = vsub.f32 %v13822_v32, %v19145_v31  ;;  %11297 = vmatprep.subr.bf16.mxu1 %v14199_v11  ;;  %v2302_v32 = vld [vmem:[%s17847_s0 + $0x370] sm:$0xff]  ;;  %v14251_v21 = vsub.f32 %v13825_v39, %v19147_v19  ;;  %v14256_v11 = vsub.f32 %v13842_v33, %v19149_v42  ;;  %v14265_v31 = vsel %vm83_vm0, %v2270_v52, 0 }
 0x1b9   :  { %19144 = vst [vmem:[#allocation50_spill] sm:$0xff] %v14227_v14  ;;  %v14262_v25 = vpack.c.bf16 %v19152_v27, %v19151_v7  ;;  %v19154_v39 = vand.u32 4294901760, %v14185_v55  ;;  %v19155_v19 = vand.u32 4294901760, %v14188_v0  ;;  %v14277_v33 = vsel %vm83_vm0, %v2271_v48, 0 }
 0x1ba   :  { %19146 = vst [vmem:[#allocation51_spill] sm:$0xff] %v14232_v57  ;;  %19148 = vst [vmem:[#allocation46_spill] sm:$0xff] %v14251_v21  ;;  %v19157_v42 = vand.u32 4294901760, %v13936_v56  ;;  %v19158_v52 = vand.u32 4294901760, %v13944_v4  ;;  %v14288_v44 = vsub.f32 %v13845_v45, %v19159_v5  ;;  %v19160_v0 = vand.u32 4294901760, %v13889_v40 }
 0x1bb   :  { %19150 = vst [vmem:[#allocation48_spill] sm:$0xff] %v14256_v11  ;;  %19153 = vst [vmem:[#allocation53_spill] sm:$0xff] %v14262_v25  ;;  %v14274_v28 = vpack.c.bf16 %v19155_v19, %v19154_v39  ;;  %v19161_v48 = vand.u32 4294901760, %v14202_v20  ;;  %v19162_v19 = vand.u32 4294901760, %v14205_v36  ;;  %v14311_v5 = vsel %vm83_vm0, %v2303_v60, 0  ;;  %11107 = vmatpush3.bf16.xpose.msra.mxu0 %v14262_v25 }
 0x1bc   :  { %v2747_v27 = vsub.f32 %v13936_v56, %v19157_v42  ;;  %v2754_v7 = vsub.f32 %v13944_v4, %v19158_v52  ;;  %v14293_v39 = vsub.f32 %v13889_v40, %v19160_v0  ;;  %v14302_v42 = vsel %vm83_vm0, %v2302_v32, 0 }
 0x1bd   :  { %19156 = vst [vmem:[#allocation54_spill] sm:$0xff] %v14274_v28  ;;  %v14299_v55 = vpack.c.bf16 %v19162_v19, %v19161_v48  ;;  %v19164_v52 = vand.u32 4294901760, %v14211_v38  ;;  %v19165_v4 = vand.u32 4294901760, %v14214_v10  ;;  %v19167_v40 = vand.u32 4294901760, %v13583_v47  ;;  %11109 = vmatprep.subr.bf16.mxu0 %v14274_v28 }
 0x1be   :  { %v19168_v56 = vand.u32 4294901760, %v13585_v35  ;;  %v2748_v60 = vand.u32 4294901760, %v2747_v27  ;;  %v2755_v10 = vand.u32 4294901760, %v2754_v7  ;;  %v19172_v32 = vand.u32 4294901760, %v14277_v33 }
 0x1bf   :  { %19163 = vst [vmem:[#allocation56_spill] sm:$0xff] %v14299_v55  ;;  %v14308_v45 = vpack.c.bf16 %v19165_v4, %v19164_v52  ;;  %v3651_v0 = vsub.f32 %v13583_v47, %v19167_v40  ;;  %11299 = vmatpush3.bf16.xpose.msra.mxu1 %v14299_v55  ;;  %v19169_v47 = vand.u32 4294901760, %v13892_v15  ;;  %v19174_v4 = vand.u32 4294901760, %v13949_v61 }
 0x1c0   :  { %v3658_v48 = vsub.f32 %v13585_v35, %v19168_v56  ;;  %v19171_v56 = vand.u32 4294901760, %v14265_v31  ;;  %v19176_v7 = vand.u32 4294901760, %v13919_v12 }
 0x1c1   :  { %19166 = vst [vmem:[#allocation57_spill] sm:$0xff] %v14308_v45  ;;  %11301 = vmatprep.subr.bf16.mxu1 %v14308_v45  ;;  %v3652_v52 = vand.u32 4294901760, %v3651_v0  ;;  %v14338_v40 = vsub.f32 %v13892_v15, %v19169_v47  ;;  %v2635_v0 = vsub.f32 %v13949_v61, %v19174_v4  ;;  %v11112_v47 = vpack.c.bf16 %v2755_v10, %v2748_v60 }
 0x1c2   :  { %v3659_v28 = vand.u32 4294901760, %v3658_v48  ;;  %v14344_v19 = vpack.c.bf16 %v19172_v32, %v19171_v56  ;;  %v19175_v48 = vand.u32 4294901760, %v13963_v17  ;;  %v14355_v45 = vsub.f32 %v13919_v12, %v19176_v7 }
 0x1c3   :  { %19170 = vst [vmem:[#allocation63_spill] sm:$0xff] %v14338_v40  ;;  %v19178_v15 = vand.u32 4294901760, %v13987_v62  ;;  %v19179_v32 = vand.u32 4294901760, %v13992_v24  ;;  %v19180_v4 = vand.u32 4294901760, %v13922_v23  ;;  %v19185_v10 = vand.u32 4294901760, %v13968_v63 }
 0x1c4   :  { %19173 = vst [vmem:[#allocation58_spill] sm:$0xff] %v14344_v19  ;;  %v2642_v27 = vsub.f32 %v13963_v17, %v19175_v48  ;;  %19177 = vst [vmem:[#allocation60_spill] sm:$0xff] %v14355_v45  ;;  %v19182_v48 = vand.u32 4294901760, %v14302_v42  ;;  %v19183_v17 = vand.u32 4294901760, %v14311_v5  ;;  %v19186_v7 = vand.u32 4294901760, %v13982_v9  ;;  %11111 = vmatpush3.bf16.xpose.msra.mxu0 %v14344_v19  ;;  %v19207_v19 = vld [vmem:[#allocation27_spill] sm:$0xff] }
 0x1c5   :  { %v2761_v55 = vsub.f32 %v13987_v62, %v19178_v15  ;;  %v2768_v56 = vsub.f32 %v13992_v24, %v19179_v32  ;;  %v14366_v25 = vsub.f32 %v13922_v23, %v19180_v4  ;;  %v3539_v60 = vsub.f32 %v13968_v63, %v19185_v10  ;;  %11113 = vmatprep.subr.bf16.mxu0 %v11112_v47 }
 0x1c6   :  { %v14372_v12 = vpack.c.bf16 %v19183_v17, %v19182_v48  ;;  %v3546_v15 = vsub.f32 %v13982_v9, %v19186_v7  ;;  %v19187_v32 = vand.u32 4294901760, %v13907_v41  ;;  %v11304_v23 = vpack.c.bf16 %v3659_v28, %v3652_v52 }
 0x1c7   :  { %19181 = vst [vmem:[#allocation66_spill] sm:$0xff] %v14366_v25  ;;  %v19189_v4 = vand.u32 4294901760, %v13659_v46  ;;  %v19190_v17 = vand.u32 4294901760, %v13661_v50  ;;  %v2636_v10 = vand.u32 4294901760, %v2635_v0  ;;  %v2643_v63 = vand.u32 4294901760, %v2642_v27 }
 0x1c8   :  { %19184 = vst [vmem:[#allocation75_spill] sm:$0xff] %v14372_v12  ;;  %v14383_v24 = vsub.f32 %v13907_v41, %v19187_v32  ;;  %v2762_v41 = vand.u32 4294901760, %v2761_v55  ;;  %v2769_v32 = vand.u32 4294901760, %v2768_v56  ;;  %v18213_v28 = vand.u32 4294901760, %v14080_v16  ;;  %11303 = vmatpush3.bf16.xpose.msra.mxu1 %v14372_v12 }
 0x1c9   :  { %v3665_v62 = vsub.f32 %v13659_v46, %v19189_v4  ;;  %v3672_v48 = vsub.f32 %v13661_v50, %v19190_v17  ;;  %v3540_v4 = vand.u32 4294901760, %v3539_v60  ;;  %v3547_v46 = vand.u32 4294901760, %v3546_v15  ;;  %11305 = vmatprep.subr.bf16.mxu1 %v11304_v23 }
 0x1ca   :  { %19188 = vst [vmem:[#allocation70_spill] sm:$0xff] %v14383_v24  ;;  %v18214_v0 = vand.u32 4294901760, %v14075_v43  ;;  %v19191_v47 = vand.u32 4294901760, %v13910_v58  ;;  %v11114_v52 = vpack.c.bf16 %v2643_v63, %v2636_v10  ;;  %v19193_v60 = vand.u32 4294901760, %v14009_v1 }
 0x1cb   :  { %v3666_v27 = vand.u32 4294901760, %v3665_v62  ;;  %v3673_v7 = vand.u32 4294901760, %v3672_v48  ;;  %v19194_v17 = vand.u32 4294901760, %v14032_v30  ;;  %v19195_v62 = vand.u32 4294901760, %v13928_v26  ;;  %9433 = vmatmul.mubr.f32.vlgmr.msra.gmra.mrb[4].mxu0 %v19049_v34 }
 0x1cc   :  { %v14404_v56 = vsub.f32 %v13910_v58, %v19191_v47  ;;  %v2649_v15 = vsub.f32 %v14009_v1, %v19193_v60  ;;  %v11116_v55 = vpack.c.bf16 %v2769_v32, %v2762_v41  ;;  %v2775_v58 = vsub.f32 %v14080_v16, %v18213_v28  ;;  %11115 = vmatpush3.bf16.xpose.msra.mxu0 %v11114_v52 }
 0x1cd   :  { %v2656_v23 = vsub.f32 %v14032_v30, %v19194_v17  ;;  %v14415_v48 = vsub.f32 %v13928_v26, %v19195_v62  ;;  %v19197_v63 = vand.u32 4294901760, %v14088_v54  ;;  %v19198_v47 = vand.u32 4294901760, %v13931_v22 }
 0x1ce   :  { %19192 = vst [vmem:[#allocation72_spill] sm:$0xff] %v14404_v56  ;;  %v11306_v17 = vpack.c.bf16 %v3547_v46, %v3540_v4  ;;  %v19200_v9 = vand.u32 4294901760, %v14049_v18  ;;  %v3560_v41 = vsub.f32 %v14075_v43, %v18214_v0  ;;  %v19201_v32 = vand.u32 4294901760, %v14018_v13  ;;  %11117 = vmatprep.subr.bf16.mxu0 %v11116_v55 }
 0x1cf   :  { %19196 = vst [vmem:[#allocation78_spill] sm:$0xff] %v14415_v48  ;;  %v2782_v10 = vsub.f32 %v14088_v54, %v19197_v63  ;;  %v14426_v60 = vsub.f32 %v13931_v22, %v19198_v47  ;;  %v11308_v63 = vpack.c.bf16 %v3673_v7, %v3666_v27  ;;  %v19203_v22 = vand.u32 4294901760, %v13739_v53  ;;  %9649 = vmatmul.mubr.f32.vlgmr.msra.gmra.mrb[4].mxu1 %v19049_v34  ;;  %v19208_v34 = vld [vmem:[#allocation28_spill] sm:$0xff] }
 0x1d0   :  { %v3553_v26 = vsub.f32 %v14049_v18, %v19200_v9  ;;  %v14437_v62 = vsub.f32 %v14018_v13, %v19201_v32  ;;  %v19204_v4 = vand.u32 4294901760, %v13758_v6  ;;  %v2650_v47 = vand.u32 4294901760, %v2649_v15  ;;  %v19205_v13 = vld [vmem:[#allocation3_spill] sm:$0xff]  ;;  %11307 = vmatpush3.bf16.xpose.msra.mxu1 %v11306_v17  ;;  %v19206_v15 = vld [vmem:[#allocation26_spill] sm:$0xff]  ;;  %v19210_v32 = vld [vmem:[#allocation9_spill] sm:$0xff] }
 0x1d1   :  { %19199 = vst [vmem:[#allocation73_spill] sm:$0xff] %v14426_v60  ;;  %v3679_v46 = vsub.f32 %v13739_v53, %v19203_v22  ;;  %v2657_v28 = vand.u32 4294901760, %v2656_v23  ;;  %9434 = vmatprep.mubr.f32.mxu0 %v19205_v13  ;;  %v2776_v7 = vand.u32 4294901760, %v2775_v58  ;;  %v2783_v27 = vand.u32 4294901760, %v2782_v10  ;;  %9650 = vmatprep.mubr.f32.mxu1 %v19205_v13  ;;  %v19209_v58 = vld [vmem:[#allocation31_spill] sm:$0xff] }
 0x1d2   :  { %19202 = vst [vmem:[#allocation71_spill] sm:$0xff] %v14437_v62  ;;  %v3686_v9 = vsub.f32 %v13758_v6, %v19204_v4  ;;  %v3554_v4 = vand.u32 4294901760, %v3553_v26  ;;  %v3561_v52 = vand.u32 4294901760, %v3560_v41  ;;  %11309 = vmatprep.subr.bf16.mxu1 %v11308_v63  ;;  %9435 = vmatmul.mubr.f32.gmra.mrb[6].mxu0 %v19205_v13  ;;  %v19211_v22 = vand.u32 4294901760, %v19210_v32 }
 0x1d3   :  { %v3680_v12 = vand.u32 4294901760, %v3679_v46  ;;  %v11118_v26 = vpack.c.bf16 %v2657_v28, %v2650_v47  ;;  %v19213_v41 = vand.u32 4294901760, %v14093_v49  ;;  %v19214_v63 = vand.u32 4294901760, %v14107_v8  ;;  %9651 = vmatmul.mubr.f32.gmra.mrb[6].mxu1 %v19205_v13 }
 0x1d4   :  { %v3687_v53 = vand.u32 4294901760, %v3686_v9  ;;  %v14461_v17 = vsub.f32 %v19210_v32, %v19211_v22  ;;  %v19215_v9 = vld [vmem:[#allocation91_spill] sm:$0xff]  ;;  %v19216_v10 = vand.u32 4294901760, %v14058_v59  ;;  %v11120_v23 = vpack.c.bf16 %v2783_v27, %v2776_v7 }
 0x1d5   :  { %v2663_v0 = vsub.f32 %v14093_v49, %v19213_v41  ;;  %v2670_v46 = vsub.f32 %v14107_v8, %v19214_v63  ;;  %9468 = vmatprep.mubr.msk.f32.mxu0 %vm83_vm0, %v19215_v9  ;;  %v19218_v32 = vand.u32 4294901760, %v14131_v2  ;;  %v19219_v47 = vand.u32 4294901760, %v14136_v37  ;;  %9684 = vmatprep.mubr.msk.f32.mxu1 %vm83_vm0, %v19215_v9 }
 0x1d6   :  { %19212 = vst [vmem:[#allocation76_spill] sm:$0xff] %v14461_v17  ;;  %v14474_v55 = vsub.f32 %v14058_v59, %v19216_v10  ;;  %v19220_v41 = vand.u32 4294901760, %v14061_v29  ;;  %v11310_v8 = vpack.c.bf16 %v3561_v52, %v3554_v4  ;;  %v19222_v59 = vand.u32 4294901760, %v19206_v15  ;;  %11119 = vmatpush3.bf16.xpose.msra.mxu0 %v11118_v26 }
 0x1d7   :  { %v2789_v28 = vsub.f32 %v14131_v2, %v19218_v32  ;;  %v2796_v22 = vsub.f32 %v14136_v37, %v19219_v47  ;;  %v19223_v27 = vand.u32 4294901760, %v19207_v19  ;;  %v19224_v32 = vld [vmem:[#allocation15_spill] sm:$0xff]  ;;  %v11312_v37 = vpack.c.bf16 %v3687_v53, %v3680_v12  ;;  %11121 = vmatprep.subr.bf16.mxu0 %v11120_v23 }
 0x1d8   :  { %19217 = vst [vmem:[#allocation79_spill] sm:$0xff] %v14474_v55  ;;  %v14486_v63 = vsub.f32 %v14061_v29, %v19220_v41  ;;  %v3567_v7 = vsub.f32 %v19206_v15, %v19222_v59  ;;  %v19225_v47 = vand.u32 4294901760, %v19224_v32  ;;  %v19227_v29 = vand.u32 4294901760, %v19208_v34  ;;  %v19230_v2 = vld [vmem:[#allocation39_spill] sm:$0xff]  ;;  %11311 = vmatpush3.bf16.xpose.msra.mxu1 %v11310_v8 }
 0x1d9   :  { %v3574_v10 = vsub.f32 %v19207_v19, %v19223_v27  ;;  %v19228_v52 = vand.u32 4294901760, %v19209_v58  ;;  %v2664_v59 = vand.u32 4294901760, %v2663_v0  ;;  %v2671_v27 = vand.u32 4294901760, %v2670_v46  ;;  %v19229_v19 = vld [vmem:[#allocation30_spill] sm:$0xff]  ;;  %11313 = vmatprep.subr.bf16.mxu1 %v11312_v37 }
 0x1da   :  { %19221 = vst [vmem:[#allocation85_spill] sm:$0xff] %v14486_v63  ;;  %v14499_v13 = vsub.f32 %v19224_v32, %v19225_v47  ;;  %v3693_v4 = vsub.f32 %v19208_v34, %v19227_v29  ;;  %v18236_v15 = vand.u32 4294901760, %v19229_v19  ;;  %v18237_v49 = vand.u32 4294901760, %v19230_v2 }
 0x1db   :  { %v3700_v41 = vsub.f32 %v19209_v58, %v19228_v52  ;;  %v2790_v6 = vand.u32 4294901760, %v2789_v28  ;;  %v2797_v32 = vand.u32 4294901760, %v2796_v22  ;;  %v3568_v47 = vand.u32 4294901760, %v3567_v7  ;;  %v19231_v28 = vld [vmem:[#allocation11_spill] sm:$0xff] }
 0x1dc   :  { %19226 = vst [vmem:[#allocation82_spill] sm:$0xff] %v14499_v13  ;;  %v3575_v29 = vand.u32 4294901760, %v3574_v10  ;;  %v18238_v34 = vand.u32 4294901760, %v14193_v3  ;;  %v18241_v26 = vand.u32 4294901760, %v14227_v14  ;;  %v3694_v0 = vand.u32 4294901760, %v3693_v4 }
 0x1dd   :  { %v3701_v46 = vand.u32 4294901760, %v3700_v41  ;;  %v18244_v52 = vand.u32 4294901760, %v14256_v11  ;;  %v19232_v22 = vand.u32 4294901760, %v19231_v28  ;;  %v11122_v12 = vpack.c.bf16 %v2671_v27, %v2664_v59 }
 0x1de   :  { %v2677_v8 = vsub.f32 %v19229_v19, %v18236_v15  ;;  %v2684_v37 = vsub.f32 %v19230_v2, %v18237_v49  ;;  %v19234_v7 = vand.u32 4294901760, %v14067_v51  ;;  %v11124_v4 = vpack.c.bf16 %v2797_v32, %v2790_v6  ;;  %v19241_v32 = vld [vmem:[#allocation33_spill] sm:$0xff] }
 0x1df   :  { %v14518_v53 = vsub.f32 %v19231_v28, %v19232_v22  ;;  %v19236_v41 = vand.u32 4294901760, %v14232_v57  ;;  %v19237_v59 = vand.u32 4294901760, %v14251_v21  ;;  %v19238_v22 = vld [vmem:[#allocation17_spill] sm:$0xff]  ;;  %v11314_v49 = vpack.c.bf16 %v3575_v29, %v3568_v47  ;;  %11123 = vmatpush3.bf16.xpose.msra.mxu0 %v11122_v12 }
 0x1e0   :  { %v14529_v10 = vsub.f32 %v14067_v51, %v19234_v7  ;;  %v19239_v15 = vand.u32 4294901760, %v19238_v22  ;;  %v3581_v51 = vsub.f32 %v14193_v3, %v18238_v34  ;;  %v3588_v6 = vsub.f32 %v14227_v14, %v18241_v26  ;;  %11125 = vmatprep.subr.bf16.mxu0 %v11124_v4 }
 0x1e1   :  { %19233 = vst [vmem:[#allocation88_spill] sm:$0xff] %v14518_v53  ;;  %v2803_v28 = vsub.f32 %v14232_v57, %v19236_v41  ;;  %v2810_v27 = vsub.f32 %v14251_v21, %v19237_v59  ;;  %v19242_v7 = vand.u32 4294901760, %v19241_v32  ;;  %v11316_v59 = vpack.c.bf16 %v3701_v46, %v3694_v0  ;;  %11315 = vmatpush3.bf16.xpose.msra.mxu1 %v11314_v49 }
 0x1e2   :  { %19235 = vst [vmem:[#allocation89_spill] sm:$0xff] %v14529_v10  ;;  %v14540_v23 = vsub.f32 %v19238_v22, %v19239_v15  ;;  %v3707_v15 = vsub.f32 %v14256_v11, %v18244_v52  ;;  %v19244_v47 = vand.u32 4294901760, %v14288_v44  ;;  %v2678_v22 = vand.u32 4294901760, %v2677_v8 }
 0x1e3   :  { %v14551_v41 = vsub.f32 %v19241_v32, %v19242_v7  ;;  %v2685_v34 = vand.u32 4294901760, %v2684_v37  ;;  %v18247_v3 = vand.u32 4294901760, %v14293_v39  ;;  %v18248_v26 = vand.u32 4294901760, %v14338_v40  ;;  %11317 = vmatprep.subr.bf16.mxu1 %v11316_v59 }
 0x1e4   :  { %19240 = vst [vmem:[#allocation90_spill] sm:$0xff] %v14540_v23  ;;  %v3714_v29 = vsub.f32 %v14288_v44, %v19244_v47  ;;  %v2804_v14 = vand.u32 4294901760, %v2803_v28  ;;  %v2811_v32 = vand.u32 4294901760, %v2810_v27  ;;  %v3582_v7 = vand.u32 4294901760, %v3581_v51  ;;  %v19245_v28 = vld [vmem:[#allocation38_spill] sm:$0xff] }
 0x1e5   :  { %19243 = vst [vmem:[#allocation31_spill] sm:$0xff] %v14551_v41  ;;  %v3589_v52 = vand.u32 4294901760, %v3588_v6  ;;  %v18249_v11 = vand.u32 4294901760, %v14355_v45  ;;  %v18250_v12 = vand.u32 4294901760, %v14366_v25  ;;  %v3708_v8 = vand.u32 4294901760, %v3707_v15 }
 0x1e6   :  { %v3715_v37 = vand.u32 4294901760, %v3714_v29  ;;  %v18253_v47 = vand.u32 4294901760, %v14415_v48  ;;  %v18256_v4 = vand.u32 4294901760, %v14426_v60  ;;  %v19246_v27 = vand.u32 4294901760, %v19245_v28 }
 0x1e7   :  { %v11126_v46 = vpack.c.bf16 %v2685_v34, %v2678_v22  ;;  %v2691_v49 = vsub.f32 %v14293_v39, %v18247_v3  ;;  %v2698_v51 = vsub.f32 %v14338_v40, %v18248_v26  ;;  %v19248_v6 = vand.u32 4294901760, %v14202_v20 }
 0x1e8   :  { %v14570_v0 = vsub.f32 %v19245_v28, %v19246_v27  ;;  %v11128_v15 = vpack.c.bf16 %v2811_v32, %v2804_v14  ;;  %v19250_v29 = vand.u32 4294901760, %v14383_v24  ;;  %v19251_v34 = vand.u32 4294901760, %v14404_v56  ;;  %v19254_v32 = vld [vmem:[#allocation36_spill] sm:$0xff] }
 0x1e9   :  { %v14581_v59 = vsub.f32 %v14202_v20, %v19248_v6  ;;  %v19252_v27 = vand.u32 4294901760, %v14205_v36  ;;  %v11318_v26 = vpack.c.bf16 %v3589_v52, %v3582_v7  ;;  %v3595_v20 = vsub.f32 %v14355_v45, %v18249_v11  ;;  %11127 = vmatpush3.bf16.xpose.msra.mxu0 %v11126_v46 }
 0x1ea   :  { %19247 = vst [vmem:[#allocation9_spill] sm:$0xff] %v14570_v0  ;;  %v2817_v28 = vsub.f32 %v14383_v24, %v19250_v29  ;;  %v2824_v22 = vsub.f32 %v14404_v56, %v19251_v34  ;;  %v3602_v14 = vsub.f32 %v14366_v25, %v18250_v12  ;;  %v19255_v6 = vand.u32 4294901760, %v19254_v32  ;;  %11129 = vmatprep.subr.bf16.mxu0 %v11128_v15 }
 0x1eb   :  { %19249 = vst [vmem:[#allocation91_spill] sm:$0xff] %v14581_v59  ;;  %v14592_v3 = vsub.f32 %v14205_v36, %v19252_v27  ;;  %v11320_v34 = vpack.c.bf16 %v3715_v37, %v3708_v8  ;;  %v3721_v36 = vsub.f32 %v14415_v48, %v18253_v47  ;;  %v3728_v52 = vsub.f32 %v14426_v60, %v18256_v4 }
 0x1ec   :  { %v14603_v29 = vsub.f32 %v19254_v32, %v19255_v6  ;;  %v2692_v7 = vand.u32 4294901760, %v2691_v49  ;;  %v2699_v27 = vand.u32 4294901760, %v2698_v51  ;;  %v18257_v11 = vand.u32 4294901760, %v14437_v62  ;;  %11319 = vmatpush3.bf16.xpose.msra.mxu1 %v11318_v26 }
 0x1ed   :  { %19253 = vst [vmem:[#allocation15_spill] sm:$0xff] %v14592_v3  ;;  %v18258_v12 = vand.u32 4294901760, %v14461_v17  ;;  %v2818_v25 = vand.u32 4294901760, %v2817_v28  ;;  %v2825_v32 = vand.u32 4294901760, %v2824_v22  ;;  %v3596_v6 = vand.u32 4294901760, %v3595_v20  ;;  %11321 = vmatprep.subr.bf16.mxu1 %v11320_v34  ;;  %v19257_v28 = vld [vmem:[#allocation41_spill] sm:$0xff] }
 0x1ee   :  { %19256 = vst [vmem:[#allocation30_spill] sm:$0xff] %v14603_v29  ;;  %v3603_v47 = vand.u32 4294901760, %v3602_v14  ;;  %v18259_v48 = vand.u32 4294901760, %v14474_v55  ;;  %v18260_v46 = vand.u32 4294901760, %v14486_v63  ;;  %v3722_v49 = vand.u32 4294901760, %v3721_v36 }
 0x1ef   :  { %v3729_v51 = vand.u32 4294901760, %v3728_v52  ;;  %v18263_v4 = vand.u32 4294901760, %v14529_v10  ;;  %v19258_v22 = vand.u32 4294901760, %v19257_v28  ;;  %v11130_v37 = vpack.c.bf16 %v2699_v27, %v2692_v7 }
 0x1f0   :  { %v2705_v26 = vsub.f32 %v14437_v62, %v18257_v11  ;;  %v2712_v20 = vsub.f32 %v14461_v17, %v18258_v12  ;;  %v19260_v14 = vand.u32 4294901760, %v14211_v38  ;;  %v11132_v36 = vpack.c.bf16 %v2825_v32, %v2818_v25 }
 0x1f1   :  { %v14622_v8 = vsub.f32 %v19257_v28, %v19258_v22  ;;  %v19262_v52 = vand.u32 4294901760, %v14499_v13  ;;  %v19263_v7 = vand.u32 4294901760, %v14518_v53  ;;  %v19264_v22 = vld [vmem:[#allocation45_spill] sm:$0xff]  ;;  %v11322_v12 = vpack.c.bf16 %v3603_v47, %v3596_v6  ;;  %11131 = vmatpush3.bf16.xpose.msra.mxu0 %v11130_v37 }
 0x1f2   :  { %v14633_v34 = vsub.f32 %v14211_v38, %v19260_v14  ;;  %v19265_v11 = vand.u32 4294901760, %v19264_v22  ;;  %v3609_v38 = vsub.f32 %v14474_v55, %v18259_v48  ;;  %v3616_v25 = vsub.f32 %v14486_v63, %v18260_v46  ;;  %11133 = vmatprep.subr.bf16.mxu0 %v11132_v36 }
 0x1f3   :  { %19259 = vst [vmem:[#allocation39_spill] sm:$0xff] %v14622_v8  ;;  %v2831_v28 = vsub.f32 %v14499_v13, %v19262_v52  ;;  %v2838_v27 = vsub.f32 %v14518_v53, %v19263_v7  ;;  %v19267_v32 = vand.u32 4294901760, %v14265_v31  ;;  %v11324_v52 = vpack.c.bf16 %v3729_v51, %v3722_v49 }
 0x1f4   :  { %19261 = vst [vmem:[#allocation11_spill] sm:$0xff] %v14633_v34  ;;  %v14644_v15 = vsub.f32 %v19264_v22, %v19265_v11  ;;  %v3735_v11 = vsub.f32 %v14529_v10, %v18263_v4  ;;  %v19269_v47 = vand.u32 4294901760, %v14540_v23  ;;  %v2706_v7 = vand.u32 4294901760, %v2705_v26  ;;  %11323 = vmatpush3.bf16.xpose.msra.mxu1 %v11322_v12 }
 0x1f5   :  { %v14655_v14 = vsub.f32 %v14265_v31, %v19267_v32  ;;  %v2713_v22 = vand.u32 4294901760, %v2712_v20  ;;  %v18271_v48 = vand.u32 4294901760, %v14551_v41  ;;  %v18266_v46 = vand.u32 4294901760, %v14570_v0  ;;  %11325 = vmatprep.subr.bf16.mxu1 %v11324_v52 }
 0x1f6   :  { %19266 = vst [vmem:[#allocation17_spill] sm:$0xff] %v14644_v15  ;;  %v3742_v6 = vsub.f32 %v14540_v23, %v19269_v47  ;;  %v2832_v63 = vand.u32 4294901760, %v2831_v28  ;;  %v2839_v31 = vand.u32 4294901760, %v2838_v27  ;;  %v18268_v49 = vand.u32 4294901760, %v14603_v29 }
 0x1f7   :  { %19268 = vst [vmem:[#allocation33_spill] sm:$0xff] %v14655_v14  ;;  %v3610_v32 = vand.u32 4294901760, %v3609_v38  ;;  %v3617_v4 = vand.u32 4294901760, %v3616_v25  ;;  %v18267_v10 = vand.u32 4294901760, %v14581_v59  ;;  %v18269_v37 = vand.u32 4294901760, %v14592_v3 }
 0x1f8   :  { %v3736_v26 = vand.u32 4294901760, %v3735_v11  ;;  %v3743_v20 = vand.u32 4294901760, %v3742_v6  ;;  %v18270_v47 = vand.u32 4294901760, %v14633_v34  ;;  %v18272_v36 = vand.u32 4294901760, %v14644_v15 }
 0x1f9   :  { %v19270_v28 = vand.u32 4294901760, %v14277_v33  ;;  %v11134_v51 = vpack.c.bf16 %v2713_v22, %v2706_v7  ;;  %v2719_v12 = vsub.f32 %v14551_v41, %v18271_v48  ;;  %v2726_v38 = vsub.f32 %v14570_v0, %v18266_v46 }
 0x1fa   :  { %v19272_v25 = vand.u32 4294901760, %v14302_v42  ;;  %v11136_v11 = vpack.c.bf16 %v2839_v31, %v2832_v63  ;;  %v19274_v6 = vand.u32 4294901760, %v14622_v8  ;;  %v19275_v22 = vand.u32 4294901760, %v14311_v5 }
 0x1fb   :  { %v14674_v27 = vsub.f32 %v14277_v33, %v19270_v28  ;;  %v2845_v33 = vsub.f32 %v14603_v29, %v18268_v49  ;;  %v11326_v46 = vpack.c.bf16 %v3617_v4, %v3610_v32  ;;  %v3630_v63 = vsub.f32 %v14592_v3, %v18269_v37  ;;  %11135 = vmatpush3.bf16.xpose.msra.mxu0 %v11134_v51 }
 0x1fc   :  { %v14685_v52 = vsub.f32 %v14302_v42, %v19272_v25  ;;  %v2852_v7 = vsub.f32 %v14622_v8, %v19274_v6  ;;  %v14696_v28 = vsub.f32 %v14311_v5, %v19275_v22  ;;  %v3623_v42 = vsub.f32 %v14581_v59, %v18267_v10  ;;  %11137 = vmatprep.subr.bf16.mxu0 %v11136_v11 }
 0x1fd   :  { %19271 = vst [vmem:[#allocation38_spill] sm:$0xff] %v14674_v27  ;;  %v11328_v31 = vpack.c.bf16 %v3743_v20, %v3736_v26  ;;  %v3749_v25 = vsub.f32 %v14633_v34, %v18270_v47  ;;  %v3756_v6 = vsub.f32 %v14644_v15, %v18272_v36  ;;  %v2720_v5 = vand.u32 4294901760, %v2719_v12  ;;  %11327 = vmatpush3.bf16.xpose.msra.mxu1 %v11326_v46 }
 0x1fe   :  { %19273 = vst [vmem:[#allocation36_spill] sm:$0xff] %v14685_v52  ;;  %19276 = vst [vmem:[#allocation41_spill] sm:$0xff] %v14696_v28  ;;  %v2727_v4 = vand.u32 4294901760, %v2726_v38  ;;  %v18276_v32 = vand.u32 4294901760, %v14655_v14  ;;  %v18275_v22 = vand.u32 4294901760, %v14674_v27  ;;  %v2846_v10 = vand.u32 4294901760, %v2845_v33 }
 0x1ff   :  { %v2853_v49 = vand.u32 4294901760, %v2852_v7  ;;  %v3624_v26 = vand.u32 4294901760, %v3623_v42  ;;  %v3631_v20 = vand.u32 4294901760, %v3630_v63  ;;  %v18274_v37 = vand.u32 4294901760, %v14685_v52  ;;  %11329 = vmatprep.subr.bf16.mxu1 %v11328_v31 }
 0x200   :  { %v18273_v47 = vand.u32 4294901760, %v14696_v28  ;;  %v3750_v48 = vand.u32 4294901760, %v3749_v25  ;;  %v3757_v36 = vand.u32 4294901760, %v3756_v6  ;;  %v11138_v51 = vpack.c.bf16 %v2727_v4, %v2720_v5 }
 0x201   :  { %v2733_v12 = vsub.f32 %v14655_v14, %v18276_v32  ;;  %v2740_v38 = vsub.f32 %v14674_v27, %v18275_v22  ;;  %v11140_v11 = vpack.c.bf16 %v2853_v49, %v2846_v10  ;;  %v11330_v46 = vpack.c.bf16 %v3631_v20, %v3624_v26  ;;  %v19277_v10 = vld [vmem:[#allocation49_spill] sm:$0xff]  ;;  %v19278_v49 = vld [vmem:[#allocation47_spill] sm:$0xff]  ;;  %v19279_v20 = vld [vmem:[#allocation6_spill] sm:$0xff] }
 0x202   :  { %v3637_v33 = vsub.f32 %v14685_v52, %v18274_v37  ;;  %v3644_v7 = vsub.f32 %v14696_v28, %v18273_v47  ;;  %v11332_v42 = vpack.c.bf16 %v3757_v36, %v3750_v48  ;;  %v11144_v4 = vpack.c.bf16 %v19278_v49, %v19277_v10  ;;  %v19281_v48 = vld [vmem:[#allocation52_spill] sm:$0xff]  ;;  %v19297_v32 = vld [vmem:[#allocation26_spill] sm:$0xff] }
 0x203   :  { %11139 = vmatpush3.bf16.xpose.msra.mxu0 %v11138_v51  ;;  %v2734_v63 = vand.u32 4294901760, %v2733_v12  ;;  %v2741_v31 = vand.u32 4294901760, %v2740_v38  ;;  %v19280_v47 = vpack.c.bf16 %v13585_v35, %v19279_v20  ;;  %v11146_v36 = vpack.c.bf16 %v19281_v48, %v13949_v61  ;;  %v19282_v51 = vld [vmem:[#allocation59_spill] sm:$0xff]  ;;  %v19283_v12 = vld [vmem:[#allocation64_spill] sm:$0xff] }
 0x204   :  { %11141 = vmatprep.subr.bf16.mxu0 %v11140_v11  ;;  %v3638_v25 = vand.u32 4294901760, %v3637_v33  ;;  %v3645_v6 = vand.u32 4294901760, %v3644_v7  ;;  %v11148_v38 = vpack.c.bf16 %v19283_v12, %v19282_v51  ;;  %v19284_v11 = vld [vmem:[#allocation55_spill] sm:$0xff]  ;;  %v19286_v7 = vld [vmem:[#allocation81_spill] sm:$0xff]  ;;  %v19296_v37 = vld [vmem:[#allocation24_spill] sm:$0xff] }
 0x205   :  { %11331 = vmatpush3.bf16.xpose.msra.mxu1 %v11330_v46  ;;  %v11142_v5 = vpack.c.bf16 %v2741_v31, %v2734_v63  ;;  %v19285_v46 = vld [vmem:[#allocation61_spill] sm:$0xff]  ;;  %v11150_v63 = vpack.c.bf16 %v14032_v30, %v14009_v1  ;;  %v19289_v31 = vld [vmem:[#allocation92_spill] sm:$0xff] }
 0x206   :  { %11333 = vmatprep.subr.bf16.mxu1 %v11332_v42  ;;  %v11334_v26 = vpack.c.bf16 %v3645_v6, %v3638_v25  ;;  %v11338_v33 = vpack.c.bf16 %v19285_v46, %v19284_v11  ;;  %v11152_v25 = vpack.c.bf16 %v14088_v54, %v14080_v16  ;;  %v11342_v6 = vpack.c.bf16 %v14075_v43, %v14049_v18 }
 0x20b   :  { %11143 = vmatpush3.bf16.xpose.msra.mxu0 %v11142_v5  ;;  %v19290_v5 = vld [vmem:[#allocation10_spill] sm:$0xff] }
 0x20c   :  { %11145 = vmatprep.subr.bf16.mxu0 %v11144_v4  ;;  %v19291_v4 = vld [vmem:[#allocation7_spill] sm:$0xff] }
 0x20d   :  { %11335 = vmatpush3.bf16.xpose.msra.mxu1 %v11334_v26  ;;  %v19292_v26 = vpack.c.bf16 %v19290_v5, %v19291_v4 }
 0x20e   :  { %11337 = vmatprep.subr.bf16.mxu1 %v19280_v47  ;;  %v19287_v47 = vld [vmem:[#allocation74_spill] sm:$0xff] }
 0x20f   :  { %v19288_v42 = vpack.c.bf16 %v13661_v50, %v19287_v47 }
 0x212   :  { %9469 = vmatmul.mubr.msk.f32.vlgmr.msra.gmra.mrb[4].mxu0 %vm83_vm0, %v19215_v9 }
 0x213   :  { %11147 = vmatpush3.bf16.xpose.msra.mxu0 %v11146_v36  ;;  %9470 = vmatprep.mubr.msk.f32.mxu0 %vm83_vm0, %v19286_v7  ;;  %v19293_v36 = vld [vmem:[#allocation20_spill] sm:$0xff] }
 0x214   :  { %9685 = vmatmul.mubr.msk.f32.vlgmr.msra.gmra.mrb[4].mxu1 %vm83_vm0, %v19215_v9  ;;  %11149 = vmatprep.subr.bf16.mxu0 %v11148_v38  ;;  %v19294_v38 = vld [vmem:[#allocation21_spill] sm:$0xff] }
 0x215   :  { %11339 = vmatpush3.bf16.xpose.msra.mxu1 %v11338_v33  ;;  %9686 = vmatprep.mubr.msk.f32.mxu1 %vm83_vm0, %v19286_v7  ;;  %v11154_v33 = vpack.c.bf16 %v19294_v38, %v19293_v36  ;;  %v19301_v38 = vld [vmem:[#allocation42_spill] sm:$0xff] }
 0x216   :  { %11341 = vmatprep.subr.bf16.mxu1 %v19288_v42  ;;  %9471 = vmatmul.mubr.msk.f32.gmra.mrb[6].mxu0 %vm83_vm0, %v19286_v7  ;;  %v19295_v42 = vld [vmem:[#allocation23_spill] sm:$0xff]  ;;  %v19302_v36 = vld [vmem:[#allocation50_spill] sm:$0xff] }
 0x217   :  { %9504 = vmatprep.mubr.f32.mxu0 %v19289_v31  ;;  %v11156_v22 = vpack.c.bf16 %v19296_v37, %v19295_v42  ;;  %v11350_v5 = vpack.c.bf16 %v19302_v36, %v19301_v38  ;;  %v19303_v37 = vld [vmem:[#allocation48_spill] sm:$0xff] }
 0x218   :  { %9687 = vmatmul.mubr.msk.f32.gmra.mrb[6].mxu1 %vm83_vm0, %v19286_v7  ;;  %v19298_v7 = vld [vmem:[#allocation27_spill] sm:$0xff]  ;;  %v11352_v42 = vpack.c.bf16 %v14288_v44, %v19303_v37 }
 0x219   :  { %9720 = vmatprep.mubr.f32.mxu1 %v19289_v31  ;;  %v11346_v54 = vpack.c.bf16 %v19298_v7, %v19297_v32 }
 0x21b   :  { %11151 = vmatpush3.bf16.xpose.msra.mxu0 %v11150_v63  ;;  %v19299_v63 = vld [vmem:[#allocation28_spill] sm:$0xff] }
 0x21c   :  { %11153 = vmatprep.subr.bf16.mxu0 %v11152_v25  ;;  %v19300_v25 = vpack.c.bf16 %v19209_v58, %v19299_v63 }
 0x21d   :  { %11343 = vmatpush3.bf16.xpose.msra.mxu1 %v11342_v6  ;;  %v11158_v6 = vpack.c.bf16 %v19230_v2, %v19229_v19 }
 0x21e   :  { %11345 = vmatprep.subr.bf16.mxu1 %v19292_v26  ;;  %v11160_v26 = vpack.c.bf16 %v14251_v21, %v14232_v57  ;;  %v19305_v21 = vld [vmem:[#allocation78_spill] sm:$0xff] }
 0x21f   :  { %v11356_v57 = vpack.c.bf16 %v14426_v60, %v19305_v21 }
 0x223   :  { %11155 = vmatpush3.bf16.xpose.msra.mxu0 %v11154_v33  ;;  %v19304_v33 = vld [vmem:[#allocation66_spill] sm:$0xff] }
 0x224   :  { %11157 = vmatprep.subr.bf16.mxu0 %v11156_v22  ;;  %v11164_v22 = vpack.c.bf16 %v14404_v56, %v14383_v24  ;;  %v19307_v56 = vld [vmem:[#allocation89_spill] sm:$0xff] }
 0x225   :  { %11347 = vmatpush3.bf16.xpose.msra.mxu1 %v11346_v54  ;;  %v11162_v54 = vpack.c.bf16 %v14338_v40, %v14293_v39  ;;  %v11360_v24 = vpack.c.bf16 %v14540_v23, %v19307_v56  ;;  %v19326_v23 = vld [vmem:[#allocation40_spill] sm:$0xff] }
 0x226   :  { %11349 = vmatprep.subr.bf16.mxu1 %v19300_v25  ;;  %v11354_v25 = vpack.c.bf16 %v19304_v33, %v14355_v45 }
 0x22b   :  { %11159 = vmatpush3.bf16.xpose.msra.mxu0 %v11158_v6  ;;  %v19306_v6 = vld [vmem:[#allocation85_spill] sm:$0xff] }
 0x22c   :  { %11161 = vmatprep.subr.bf16.mxu0 %v11160_v26  ;;  %v11358_v26 = vpack.c.bf16 %v19306_v6, %v14474_v55  ;;  %v19327_v6 = vld [vmem:[#allocation43_spill] sm:$0xff] }
 0x22d   :  { %11351 = vmatpush3.bf16.xpose.msra.mxu1 %v11350_v5  ;;  %v11166_v5 = vpack.c.bf16 %v14461_v17, %v14437_v62 }
 0x22e   :  { %11353 = vmatprep.subr.bf16.mxu1 %v11352_v42  ;;  %v11168_v42 = vpack.c.bf16 %v14518_v53, %v14499_v13  ;;  %v19329_v53 = vld [vmem:[#allocation80_spill] sm:$0xff] }
 0x22f   :  { %v2141_v13 = vcvt.s32.f32 %v19329_v53 }
 0x233   :  { %11163 = vmatpush3.bf16.xpose.msra.mxu0 %v11162_v54  ;;  %v11170_v54 = vpack.c.bf16 %v14570_v0, %v14551_v41 }
 0x234   :  { %11165 = vmatprep.subr.bf16.mxu0 %v11164_v22  ;;  %v11362_v22 = vpack.c.bf16 %v14592_v3, %v14581_v59  ;;  %v19310_v3 = vld [vmem:[#allocation62_spill] sm:$0xff] }
 0x235   :  { %11355 = vmatpush3.bf16.xpose.msra.mxu1 %v11354_v25  ;;  %v11364_v25 = vpack.c.bf16 %v14644_v15, %v14633_v34 }
 0x236   :  { %11357 = vmatprep.subr.bf16.mxu1 %v11356_v57  ;;  %v11172_v57 = vpack.c.bf16 %v14622_v8, %v14603_v29  ;;  %v19325_v29 = vld [vmem:[#allocation34_spill] sm:$0xff] }
 0x23b   :  { %11167 = vmatpush3.bf16.xpose.msra.mxu0 %v11166_v5  ;;  %v11174_v5 = vpack.c.bf16 %v14674_v27, %v14655_v14  ;;  %v19324_v14 = vld [vmem:[#allocation37_spill] sm:$0xff] }
 0x23c   :  { %11169 = vmatprep.subr.bf16.mxu0 %v11168_v42  ;;  %v19308_v42 = vld [vmem:[#allocation87_spill] sm:$0xff] }
 0x23d   :  { %11359 = vmatpush3.bf16.xpose.msra.mxu1 %v11358_v26  ;;  %v19309_v26 = vld [vmem:[#allocation5_spill] sm:$0xff] }
 0x23e   :  { %11361 = vmatprep.subr.bf16.mxu1 %v11360_v24  ;;  %v11366_v24 = vpack.c.bf16 %v14696_v28, %v14685_v52 }
 0x243   :  { %11171 = vmatpush3.bf16.xpose.msra.mxu0 %v11170_v54  ;;  %v19311_v54 = vld [vmem:[#allocation83_spill] sm:$0xff] }
 0x244   :  { %11173 = vmatprep.subr.bf16.mxu0 %v11172_v57  ;;  %v19312_v57 = vld [vmem:[#allocation65_spill] sm:$0xff] }
 0x245   :  { %11363 = vmatpush3.bf16.xpose.msra.mxu1 %v11362_v22  ;;  %v19313_v22 = vld [vmem:[#allocation68_spill] sm:$0xff] }
 0x246   :  { %11365 = vmatprep.subr.bf16.mxu1 %v11364_v25  ;;  %v19314_v25 = vld [vmem:[#allocation69_spill] sm:$0xff] }
 0x24b   :  { %11175 = vmatpush3.bf16.xpose.msra.mxu0 %v11174_v5  ;;  %v19315_v5 = vld [vmem:[#allocation93_spill] sm:$0xff] }
 0x24c   :  { %11177 = vmatprep.subr.bf16.mxu0 %v19308_v42 }
 0x24d   :  { %11367 = vmatpush3.bf16.xpose.msra.mxu1 %v11366_v24  ;;  %v19316_v24 = vld [vmem:[#allocation77_spill] sm:$0xff] }
 0x24e   :  { %11369 = vmatprep.subr.bf16.mxu1 %v19309_v26  ;;  %v19321_v26 = vld [vmem:[#allocation19_spill] sm:$0xff] }
 0x252   :  { %9505 = vmatmul.mubr.f32.vlgmr.msra.gmra.mrb[4].mxu0 %v19289_v31 }
 0x253   :  { %11179 = vmatpush3.bf16.xpose.msra.mxu0 %v19310_v3  ;;  %9506 = vmatprep.mubr.f32.mxu0 %v19311_v54  ;;  %v19317_v3 = vld [vmem:[#allocation2_spill] sm:$0xff] }
 0x254   :  { %9721 = vmatmul.mubr.f32.vlgmr.msra.gmra.mrb[4].mxu1 %v19289_v31  ;;  %11181 = vmatprep.subr.bf16.mxu0 %v19312_v57  ;;  %v19318_v31 = vld [vmem:[#allocation4_spill] sm:$0xff]  ;;  %v19319_v57 = vld [vmem:[#allocation13_spill] sm:$0xff] }
 0x255   :  { %11371 = vmatpush3.bf16.xpose.msra.mxu1 %v19313_v22  ;;  %9722 = vmatprep.mubr.f32.mxu1 %v19311_v54  ;;  %v19320_v22 = vld [vmem:[#allocation16_spill] sm:$0xff] }
 0x256   :  { %11373 = vmatprep.subr.bf16.mxu1 %v19314_v25  ;;  %9507 = vmatmul.mubr.f32.gmra.mrb[6].mxu0 %v19311_v54  ;;  %v19322_v25 = vld [vmem:[#allocation25_spill] sm:$0xff] }
 0x257   :  { %9540 = vmatprep.mubr.f32.mxu0 %v19315_v5 }
 0x258   :  { %9723 = vmatmul.mubr.f32.gmra.mrb[6].mxu1 %v19311_v54  ;;  %v19323_v54 = vld [vmem:[#allocation22_spill] sm:$0xff] }
 0x259   :  { %9756 = vmatprep.mubr.f32.mxu1 %v19315_v5 }
 0x25b   :  { %11183 = vmatpush3.bf16.xpose.msra.mxu0 %v19316_v24 }
 0x25c   :  { %11185 = vmatprep.subr.bf16.mxu0 %v19317_v3 }
 0x25d   :  { %11375 = vmatpush3.bf16.xpose.msra.mxu1 %v19318_v31  ;;  %v14829_v42 = vpop.f32.mrb[0].mxu0 }
 0x25e   :  { %11377 = vmatprep.subr.bf16.mxu1 %v19319_v57  ;;  %v14831_v28 = vpop.f32.mrb[1].mxu0 }
 0x25f   :  { %v14834_v24 = vpop.f32.mrb[0].mxu1 }
 0x260   :  { %v14836_v3 = vpop.f32.mrb[1].mxu1  ;;  %v2122_v15 = vsel %vm2102_vm3, %v14834_v24, -inf }
 0x261   :  { %v1181_v31 = vpop.f32.mrb[2].mxu0  ;;  %v2131_v0 = vsel %vm2102_vm3, %v14836_v3, -inf }
 0x262   :  { %v14841_v57 = vpop.f32.mrb[3].mxu0 }
 0x263   :  { %11187 = vmatpush3.bf16.xpose.msra.mxu0 %v19320_v22  ;;  %v2103_v22 = vsel %vm2102_vm3, %v14829_v42, -inf  ;;  %v2085_v27 = vpop.f32.mrb[2].mxu1 }
 0x264   :  { %11189 = vmatprep.subr.bf16.mxu0 %v19321_v26  ;;  %v2105_v26 = vsel %vm2104_vm4, %v1181_v31, -inf  ;;  %v2123_v34 = vsel %vm2104_vm4, %v2085_v27, -inf  ;;  %v14851_v8 = vpop.f32.mrb[3].mxu1 }
 0x265   :  { %11379 = vmatpush3.bf16.xpose.msra.mxu1 %v19322_v25  ;;  %v2113_v25 = vsel %vm2102_vm3, %v14831_v28, -inf  ;;  %v2106_v52 = vmax.f32 %v2103_v22, %v2105_v26  ;;  %v2124_v22 = vmax.f32 %v2122_v15, %v2123_v34  ;;  %v2132_v41 = vsel %vm2104_vm4, %v14851_v8, -inf }
 0x266   :  { %11381 = vmatprep.subr.bf16.mxu1 %v19323_v54  ;;  %v2114_v54 = vsel %vm2104_vm4, %v14841_v57, -inf  ;;  %v2133_v56 = vmax.f32 %v2131_v0, %v2132_v41  ;;  %v19331_v41 = vld [vmem:[#allocation67_spill] sm:$0xff] }
 0x267   :  { %v2115_v59 = vmax.f32 %v2113_v25, %v2114_v54  ;;  %v2107_v26 = vrot.slane %v2106_v52, 4  ;;  %v19328_v54 = vld [vmem:[#allocation86_spill] sm:$0xff] }
 0x268   :  { %v2140_v25 = vcvt.s32.f32 %v19328_v54  ;;  %v2134_v62 = vrot.slane %v2133_v56, 4 }
 0x269   :  { %v2108_v55 = vmax.f32 %v2106_v52, %v2107_v26  ;;  %v19332_v26 = vld [vmem:[#allocation8_spill] sm:$0xff] }
 0x26a   :  { %v2135_v34 = vmax.f32 %v2133_v56, %v2134_v62  ;;  %v14862_v45 = vrot.slane %v2140_v25, 7 }
 0x26b   :  { %11191 = vmatpush3.bf16.xpose.msra.mxu0 %v19324_v14  ;;  %v2116_v14 = vrot.slane %v2115_v59, 4  ;;  %v2109_v60 = vrot.slane %v2108_v55, 2 }
 0x26c   :  { %11193 = vmatprep.subr.bf16.mxu0 %v19325_v29  ;;  %v2125_v29 = vrot.slane %v2124_v22, 4  ;;  %19330 = vst [vmem:[#allocation45_spill] sm:$0xff] %v14862_v45  ;;  %v2136_v52 = vrot.slane %v2135_v34, 2 }
 0x26d   :  { %11383 = vmatpush3.bf16.xpose.msra.mxu1 %v19326_v23  ;;  %v2117_v17 = vmax.f32 %v2115_v59, %v2116_v14  ;;  %v2110_v33 = vmax.f32 %v2108_v55, %v2109_v60  ;;  %v2154_v23 = vrot.slane %v2141_v13, 7  ;;  %v19333_v59 = vld [vmem:[#allocation14_spill] sm:$0xff] }
 0x26e   :  { %11385 = vmatprep.subr.bf16.mxu1 %v19327_v6  ;;  %v2126_v21 = vmax.f32 %v2124_v22, %v2125_v29  ;;  %v2137_v29 = vmax.f32 %v2135_v34, %v2136_v52  ;;  %v19334_v22 = vld [vmem:[#allocation12_spill] sm:$0xff] }
 0x26f   :  { %v2118_v15 = vrot.slane %v2117_v17, 2  ;;  %v2111_v53 = vrot.slane %v2110_v33, 1  ;;  %v14869_v60 = vsel %vm2152_vm5, %v14862_v45, %v2154_v23 }
 0x270   :  { %v2127_v40 = vrot.slane %v2126_v21, 2  ;;  %19335 = vst [vmem:[#allocation49_spill] sm:$0xff] %v14869_v60 }
 0x271   :  { %v2119_v0 = vmax.f32 %v2117_v17, %v2118_v15  ;;  %v2112_v56 = vmax.f32 %v2110_v33, %v2111_v53  ;;  %v2138_v17 = vrot.slane %v2137_v29, 1  ;;  %v19336_v33 = vld [vmem:[#allocation29_spill] sm:$0xff] }
 0x272   :  { %v2128_v6 = vmax.f32 %v2126_v21, %v2127_v40 }
 0x273   :  { %11195 = vmatpush3.bf16.xpose.msra.mxu0 %v19331_v41  ;;  %v2120_v14 = vrot.slane %v2119_v0, 1  ;;  %vm2142_vm6 = vcmp.eq.f32.partialorder %v14829_v42, %v2112_v56  ;;  %vm2146_vm7 = vcmp.eq.f32.partialorder %v1181_v31, %v2112_v56 }
 0x274   :  { %11197 = vmatprep.subr.bf16.mxu0 %v19332_v26  ;;  %v2129_v62 = vrot.slane %v2128_v6, 1  ;;  %v2158_v25 = vsel %vm2142_vm6, %v14862_v45, 10.0  ;;  %v2162_v21 = vsel %vm2146_vm7, %v14869_v60, 10.0 }
 0x275   :  { %11387 = vmatpush3.bf16.xpose.msra.mxu1 %v19333_v59  ;;  %v2121_v13 = vmax.f32 %v2119_v0, %v2120_v14  ;;  %v2166_v40 = vsel %vm2102_vm3, %v2158_v25, inf  ;;  %v2167_v23 = vsel %vm2104_vm4, %v2162_v21, inf  ;;  %v19337_v0 = vld [vmem:[#allocation32_spill] sm:$0xff] }
 0x276   :  { %11389 = vmatprep.subr.bf16.mxu1 %v19334_v22  ;;  %v2130_v55 = vmax.f32 %v2128_v6, %v2129_v62  ;;  %v2168_v31 = vmin.f32 %v2166_v40, %v2167_v23  ;;  %v19339_v25 = vld [vmem:[#allocation44_spill] sm:$0xff] }
 0x277   :  { %vm2143_vm8 = vcmp.eq.f32.partialorder %v14831_v28, %v2121_v13  ;;  %vm2147_vm9 = vcmp.eq.f32.partialorder %v14841_v57, %v2121_v13 }
 0x278   :  { %vm2144_vm10 = vcmp.eq.f32.partialorder %v14834_v24, %v2130_v55  ;;  %vm2148_vm11 = vcmp.eq.f32.partialorder %v2085_v27, %v2130_v55  ;;  %v2159_v34 = vsel %vm2143_vm8, %v14862_v45, 10.0  ;;  %v2163_v53 = vsel %vm2147_vm9, %v14869_v60, 10.0  ;;  %v19338_v27 = vld [vmem:[#allocation35_spill] sm:$0xff] }
 0x279   :  { %v2160_v6 = vsel %vm2144_vm10, %v14862_v45, 10.0  ;;  %v2164_v15 = vsel %vm2148_vm11, %v14869_v60, 10.0  ;;  %v2175_v14 = vsel %vm2102_vm3, %v2159_v34, inf  ;;  %v2169_v56 = vrot.slane %v2168_v31, 4 }
 0x27a   :  { %v2184_v57 = vsel %vm2102_vm3, %v2160_v6, inf  ;;  %v2185_v52 = vsel %vm2104_vm4, %v2164_v15, inf  ;;  %v2176_v13 = vsel %vm2104_vm4, %v2163_v53, inf  ;;  %v2139_v55 = vmax.f32 %v2137_v29, %v2138_v17  ;;  %v19340_v53 = vld [vmem:[#allocation53_spill] sm:$0xff] }
 0x27b   :  { %11199 = vmatpush3.bf16.xpose.msra.mxu0 %v19336_v33  ;;  %v2186_v62 = vmin.f32 %v2184_v57, %v2185_v52  ;;  %v2177_v21 = vmin.f32 %v2175_v14, %v2176_v13  ;;  %v2170_v40 = vmin.f32 %v2168_v31, %v2169_v56  ;;  %v2090_v31 = vmul.f32 2.0, %v14829_v42 }
 0x27c   :  { %11201 = vmatprep.subr.bf16.mxu0 %v19337_v0  ;;  %vm2145_vm12 = vcmp.eq.f32.partialorder %v14836_v3, %v2139_v55  ;;  %vm2149_vm13 = vcmp.eq.f32.partialorder %v14851_v8, %v2139_v55  ;;  %v19341_v8 = vld [vmem:[#allocation54_spill] sm:$0xff] }
 0x27d   :  { %11391 = vmatpush3.bf16.xpose.msra.mxu1 %v19338_v27  ;;  %v2187_v23 = vrot.slane %v2186_v62, 4  ;;  %v2178_v6 = vrot.slane %v2177_v21, 4  ;;  %v2161_v15 = vsel %vm2145_vm12, %v14862_v45, 10.0  ;;  %v2165_v34 = vsel %vm2149_vm13, %v14869_v60, 10.0  ;;  %v19342_v45 = vld [vmem:[#allocation56_spill] sm:$0xff]  ;;  %v19343_v60 = vld [vmem:[#allocation57_spill] sm:$0xff] }
 0x27e   :  { %11393 = vmatprep.subr.bf16.mxu1 %v19339_v25  ;;  %v2171_v27 = vrot.slane %v2170_v40, 2  ;;  %v2193_v57 = vsel %vm2102_vm3, %v2161_v15, inf  ;;  %v2194_v29 = vsel %vm2104_vm4, %v2165_v34, inf }
 0x27f   :  { %v2188_v0 = vmin.f32 %v2186_v62, %v2187_v23  ;;  %v2179_v17 = vmin.f32 %v2177_v21, %v2178_v6  ;;  %v2195_v52 = vmin.f32 %v2193_v57, %v2194_v29  ;;  %v2092_v62 = vmul.f32 2.0, %v14834_v24 }
 0x280   :  { %v2172_v14 = vmin.f32 %v2170_v40, %v2171_v27  ;;  %v2091_v21 = vmul.f32 2.0, %v14831_v28  ;;  %v8916_v57 = vadd.f32 -1.0, %v2090_v31  ;;  %v19344_v40 = vand.u32 4294901760, %v19277_v10 }
 0x281   :  { %v2189_v56 = vrot.slane %v2188_v0, 2  ;;  %v2180_v13 = vrot.slane %v2179_v17, 2  ;;  %v2196_v55 = vrot.slane %v2195_v52, 4  ;;  %v19345_v29 = vand.u32 4294901760, %v19278_v49 }
 0x282   :  { %v2173_v23 = vrot.slane %v2172_v14, 1  ;;  %v19346_v24 = vand.u32 4294901760, %v19279_v20  ;;  %v2093_v28 = vmul.f32 2.0, %v14836_v3  ;;  %v8917_v31 = vadd.f32 -1.0, %v2091_v21 }
 0x283   :  { %11203 = vmatpush3.bf16.xpose.msra.mxu0 %v19340_v53  ;;  %v2190_v15 = vmin.f32 %v2188_v0, %v2189_v56  ;;  %v2181_v6 = vmin.f32 %v2179_v17, %v2180_v13  ;;  %v2197_v34 = vmin.f32 %v2195_v52, %v2196_v55  ;;  %v19347_v0 = vand.u32 4294901760, %v13585_v35  ;;  %v19348_v55 = vld [vmem:[#allocation58_spill] sm:$0xff]  ;;  %v19349_v35 = vld [vmem:[#allocation75_spill] sm:$0xff] }
 0x284   :  { %11205 = vmatprep.subr.bf16.mxu0 %v19341_v8  ;;  %v2174_v42 = vmin.f32 %v2172_v14, %v2173_v23  ;;  %v11208_v8 = vpack.c.bf16 %v19345_v29, %v19344_v40  ;;  %v2098_v10 = vmul.f32 0.1, %v8916_v57  ;;  %v12395_v29 = vmov 1966171168  }
 0x285   :  { %11395 = vmatpush3.bf16.xpose.msra.mxu1 %v19342_v45  ;;  %v2191_v27 = vrot.slane %v2190_v15, 1  ;;  %v2182_v53 = vrot.slane %v2181_v6, 1  ;;  %v2198_v45 = vrot.slane %v2197_v34, 2  ;;  %v11400_v56 = vpack.c.bf16 %v19347_v0, %v19346_v24 }
 0x286   :  { %11397 = vmatprep.subr.bf16.mxu1 %v19343_v60  ;;  %v8918_v60 = vadd.f32 -1.0, %v2092_v62  ;;  %v2202_v17 = vmul.f32 0.1, %v2174_v42  ;;  %v2229_v20 = vunpack.c.l.s4 %v12395_v29  ;;  %v8919_v24 = vadd.f32 -1.0, %v2093_v28 }
 0x287   :  { %v2192_v52 = vmin.f32 %v2190_v15, %v2191_v27  ;;  %v2183_v14 = vmin.f32 %v2181_v6, %v2182_v53  ;;  %v2199_v13 = vmin.f32 %v2197_v34, %v2198_v45  ;;  %v2099_v15 = vmul.f32 0.1, %v8917_v31 }
 0x288   :  { %v2206_v49 = vadd.f32 0.05, %v2202_v17  ;;  %v2100_v62 = vmul.f32 0.1, %v8918_v60  ;;  %v19350_v21 = vand.u32 4294901760, %v13949_v61  ;;  %v19351_v6 = vand.u32 4294901760, %v19281_v48 }
 0x289   :  { %v2204_v23 = vmul.f32 0.1, %v2192_v52  ;;  %v2203_v40 = vmul.f32 0.1, %v2183_v14  ;;  %v2200_v25 = vrot.slane %v2199_v13, 1  ;;  %v19352_v27 = vand.u32 4294901760, %v19282_v51 }
 0x28a   :  { %v2210_v3 = vadd.f32 %v2206_v49, %v2098_v10  ;;  %v11210_v34 = vpack.c.bf16 %v19351_v6, %v19350_v21  ;;  %v19353_v0 = vand.u32 4294901760, %v19283_v12  ;;  %v19354_v52 = vand.u32 4294901760, %v19284_v11 }
 0x28b   :  { %11207 = vmatpush3.bf16.xpose.msra.mxu0 %v19348_v55  ;;  %v2208_v42 = vadd.f32 0.05, %v2204_v23  ;;  %v2207_v53 = vadd.f32 0.05, %v2203_v40  ;;  %v2201_v45 = vmin.f32 %v2199_v13, %v2200_v25  ;;  %v2101_v25 = vmul.f32 0.1, %v8919_v24 }
 0x28c   :  { %11209 = vmatprep.subr.bf16.mxu0 %v11208_v8  ;;  %v2214_v8 = vmax.f32 %v2210_v3, 0.0  ;;  %v11212_v17 = vpack.c.bf16 %v19353_v0, %v19352_v27  ;;  %v2230_v14 = vunpack.c.0.s8 %v2229_v20  ;;  %v19356_v61 = vand.u32 4294901760, %v19287_v47  ;;  %v19358_v23 = vld [vmem:[#allocation84_spill] sm:$0xff] }
 0x28d   :  { %11399 = vmatpush3.bf16.xpose.msra.mxu1 %v19349_v35  ;;  %v2212_v57 = vadd.f32 %v2208_v42, %v2100_v62  ;;  %v2211_v60 = vadd.f32 %v2207_v53, %v2099_v15  ;;  %v2205_v28 = vmul.f32 0.1, %v2201_v45  ;;  %v19357_v48 = vand.u32 4294901760, %v13661_v50  ;;  %v19363_v42 = vld [vmem:[#allocation18_spill] sm:$0xff] }
 0x28e   :  { %11401 = vmatprep.subr.bf16.mxu1 %v11400_v56  ;;  %v19355_v56 = vand.u32 4294901760, %v19285_v46  ;;  %v2218_v51 = vmin.f32 %v2214_v8, 1.0  ;;  %v14936_v47 = vsub.s32 %v2230_v14, %v19328_v54  ;;  %v19360_v20 = vand.u32 4294901760, %v14009_v1  ;;  %v19368_v1 = vld [vmem:[#allocation10_spill] sm:$0xff] }
 0x28f   :  { %v11404_v13 = vpack.c.bf16 %v19357_v48, %v19356_v61  ;;  %v2216_v10 = vmax.f32 %v2212_v57, 0.0  ;;  %v2215_v12 = vmax.f32 %v2211_v60, 0.0  ;;  %v2209_v49 = vadd.f32 0.05, %v2205_v28 }
 0x290   :  { %v11402_v31 = vpack.c.bf16 %v19355_v56, %v19354_v52  ;;  %19359 = vst [vmem:[#allocation47_spill] sm:$0xff] %v14936_v47  ;;  %v19361_v62 = vand.u32 4294901760, %v14032_v30  ;;  %v19362_v3 = vand.u32 4294901760, %v14080_v16  ;;  %v19364_v15 = vand.u32 4294901760, %v19363_v42  ;;  %v19378_v56 = vld [vmem:[#allocation23_spill] sm:$0xff] }
 0x291   :  { %v2219_v11 = vmin.f32 %v2215_v12, 1.0  ;;  %v2213_v46 = vadd.f32 %v2209_v49, %v2101_v25  ;;  %v2220_v50 = vmin.f32 %v2216_v10, 1.0  ;;  %v19365_v45 = vand.u32 4294901760, %v14049_v18  ;;  %v19380_v25 = vld [vmem:[#allocation24_spill] sm:$0xff] }
 0x292   :  { %9541 = vmatmul.mubr.f32.vlgmr.msra.gmra.mrb[4].mxu0 %v19315_v5  ;;  %v11214_v24 = vpack.c.bf16 %v19361_v62, %v19360_v20  ;;  %v11216_v54 = vpack.c.bf16 %v19364_v15, %v19362_v3  ;;  %v19366_v21 = vand.u32 4294901760, %v14075_v43  ;;  %v19367_v30 = vand.u32 4294901760, %v19291_v4  ;;  %v19370_v43 = vld [vmem:[#allocation20_spill] sm:$0xff] }
 0x293   :  { %11211 = vmatpush3.bf16.xpose.msra.mxu0 %v11210_v34  ;;  %9542 = vmatprep.mubr.f32.mxu0 %v19358_v23  ;;  %v2226_v40 = vcombine.low %v2218_v51, %v2219_v11  ;;  %v2217_v29 = vmax.f32 %v2213_v46, 0.0  ;;  %v19369_v34 = vand.u32 4294901760, %v19368_v1  ;;  %v19371_v0 = vand.u32 4294901760, %v19370_v43 }
 0x294   :  { %9757 = vmatmul.mubr.f32.vlgmr.msra.gmra.mrb[4].mxu1 %v19315_v5  ;;  %11213 = vmatprep.subr.bf16.mxu0 %v11212_v17  ;;  %v11406_v6 = vpack.c.bf16 %v19366_v21, %v19365_v45  ;;  %v19372_v17 = vld [vmem:[#allocation21_spill] sm:$0xff]  ;;  %v19374_v52 = vlaneseq  ;;  %v19375_v4 = vmov 0  ;;  %v19381_v14 = vand.u32 4294901760, %v19380_v25  ;;  %v19399_v45 = vld [vmem:[#allocation70_spill] sm:$0xff]  ;;  %v4528_v5 = vld [vmem:[%s17847_s0 + $0x5d0] sm:$0xff] }
 0x295   :  { %11403 = vmatpush3.bf16.xpose.msra.mxu1 %v11402_v31  ;;  %9758 = vmatprep.mubr.f32.mxu1 %v19358_v23  ;;  %v2221_v53 = vmin.f32 %v2217_v29, 1.0  ;;  %v11408_v8 = vpack.c.bf16 %v19369_v34, %v19367_v30  ;;  %v2234_v16 = vrot.slane %v2226_v40, %v14936_v47  ;;  %v19373_v60 = vand.u32 4294901760, %v19372_v17  ;;  %v19390_v40 = vld [vmem:[#allocation46_spill] sm:$0xff]  ;;  %v19403_v30 = vld [vmem:[#allocation60_spill] sm:$0xff] }
 0x296   :  { %11405 = vmatprep.subr.bf16.mxu1 %v11404_v13  ;;  %9543 = vmatmul.mubr.f32.gmra.mrb[6].mxu0 %v19358_v23  ;;  %vm14967_vm14 = vcmp.lt.s32.totalorder %v19374_v52, 512  ;;  %v19379_v31 = vand.u32 4294901760, %v19378_v56  ;;  %v19382_v13 = vand.u32 4294901760, %v19297_v32  ;;  %v19383_v51 = vand.u32 4294901760, %v19298_v7  ;;  %v19417_v56 = vld [vmem:[#allocation88_spill] sm:$0xff] }
 0x297   :  { %9576 = vmatprep.mubr.msk.f32.mxu0 %vm83_vm0, %v19215_v9  ;;  %v2227_v57 = vcombine.low %v2220_v50, %v2221_v53  ;;  %v11218_v28 = vpack.c.bf16 %v19373_v60, %v19371_v0  ;;  %v19376_v4 = vsel %vm14967_vm14, 4294967295, %v19375_v4  ;;  %v19384_v12 = vand.u32 4294901760, %v19299_v63  ;;  %v19388_v50 = vld [vmem:[#allocation51_spill] sm:$0xff]  ;;  %v19413_v0 = vld [vmem:[#allocation76_spill] sm:$0xff] }
 0x298   :  { %9759 = vmatmul.mubr.f32.gmra.mrb[6].mxu1 %v19358_v23  ;;  %19377 = vst [vmem:[#allocation6_spill] sm:$0xff] %v19376_v4  ;;  %v11220_v61 = vpack.c.bf16 %v19381_v14, %v19379_v31  ;;  %v11410_v10 = vpack.c.bf16 %v19383_v51, %v19382_v13  ;;  %v19385_v49 = vand.u32 4294901760, %v19209_v58  ;;  %v19386_v32 = vand.u32 4294901760, %v19229_v19  ;;  %v19397_v19 = vld [vmem:[#allocation63_spill] sm:$0xff] }
 0x299   :  { %9792 = vmatprep.mubr.msk.f32.mxu1 %vm83_vm0, %v19215_v9  ;;  %v2241_v27 = vrot.slane %v2227_v57, %v14936_v47  ;;  %v19387_v7 = vand.u32 4294901760, %v19230_v2  ;;  %v19389_v63 = vand.u32 4294901760, %v19388_v50  ;;  %v19391_v58 = vand.u32 4294901760, %v19390_v40  ;;  %v19409_v57 = vld [vmem:[#allocation73_spill] sm:$0xff]  ;;  %v19419_v14 = vld [vmem:[#allocation79_spill] sm:$0xff] }
 0x29a   :  { %v11412_v11 = vpack.c.bf16 %v19385_v49, %v19384_v12  ;;  %v19392_v20 = vand.u32 4294901760, %v19301_v38  ;;  %v19393_v62 = vand.u32 4294901760, %v19302_v36  ;;  %v19394_v3 = vand.u32 4294901760, %v19303_v37  ;;  %v19401_v38 = vld [vmem:[#allocation72_spill] sm:$0xff]  ;;  %v19405_v37 = vld [vmem:[#allocation66_spill] sm:$0xff]  ;;  %v19429_v50 = vld [vmem:[#allocation9_spill] sm:$0xff] }
 0x29b   :  { %11215 = vmatpush3.bf16.xpose.msra.mxu0 %v11214_v24  ;;  %v2242_v18 = vcombine.low %v2234_v16, %v2241_v27  ;;  %v11222_v46 = vpack.c.bf16 %v19387_v7, %v19386_v32  ;;  %v11224_v29 = vpack.c.bf16 %v19391_v58, %v19389_v63  ;;  %v19395_v42 = vand.u32 4294901760, %v14288_v44  ;;  %v19425_v49 = vld [vmem:[#allocation90_spill] sm:$0xff]  ;;  %v19427_v7 = vld [vmem:[#allocation31_spill] sm:$0xff] }
 0x29c   :  { %11217 = vmatprep.subr.bf16.mxu0 %v11216_v54  ;;  %v11414_v24 = vpack.c.bf16 %v19393_v62, %v19392_v20  ;;  %v19396_v2 = vand.u32 4294901760, %v14293_v39  ;;  %v19398_v54 = vand.u32 4294901760, %v19397_v19  ;;  %v19400_v21 = vand.u32 4294901760, %v19399_v45  ;;  %v19411_v39 = vld [vmem:[#allocation71_spill] sm:$0xff]  ;;  %v19431_v58 = vld [vmem:[#allocation30_spill] sm:$0xff]  ;;  %v19441_v45 = vld [vmem:[#allocation17_spill] sm:$0xff] }
 0x29d   :  { %11407 = vmatpush3.bf16.xpose.msra.mxu1 %v11406_v6  ;;  %v2249_v48 = vrot.slane %v2242_v18, %v14936_v47  ;;  %v11416_v15 = vpack.c.bf16 %v19395_v42, %v19394_v3  ;;  %v19402_v6 = vand.u32 4294901760, %v19401_v38  ;;  %v19404_v1 = vand.u32 4294901760, %v19403_v30  ;;  %v19433_v20 = vld [vmem:[#allocation39_spill] sm:$0xff]  ;;  %v19445_v30 = vld [vmem:[#allocation38_spill] sm:$0xff] }
 0x29e   :  { %11409 = vmatprep.subr.bf16.mxu1 %v11408_v8  ;;  %v11226_v53 = vpack.c.bf16 %v19398_v54, %v19396_v2  ;;  %v19406_v34 = vand.u32 4294901760, %v19405_v37  ;;  %v19407_v8 = vld [vmem:[#allocation78_spill] sm:$0xff]  ;;  %v19410_v27 = vand.u32 4294901760, %v19409_v57  ;;  %v19412_v43 = vand.u32 4294901760, %v19411_v39  ;;  %v19435_v3 = vld [vmem:[#allocation91_spill] sm:$0xff] }
 0x29f   :  { %2255 = vst.msk [vmem:[%s17848_s1] sm:$0xf] %vm14967_vm14, %v2249_v48  ;;  %v11228_v36 = vpack.c.bf16 %v19402_v6, %v19400_v21  ;;  %v19408_v16 = vand.u32 4294901760, %v19407_v8  ;;  %v19414_v17 = vand.u32 4294901760, %v19413_v0  ;;  %v19418_v31 = vand.u32 4294901760, %v19417_v56  ;;  %v19421_v48 = vld [vmem:[#allocation85_spill] sm:$0xff] }
 0x2a0   :  { %v11418_v44 = vpack.c.bf16 %v19406_v34, %v19404_v1  ;;  %v19422_v13 = vand.u32 4294901760, %v19421_v48  ;;  %v19430_v63 = vand.u32 4294901760, %v19429_v50  ;;  %v19434_v62 = vand.u32 4294901760, %v19433_v20  ;;  %v19439_v54 = vld [vmem:[#allocation11_spill] sm:$0xff]  ;;  %v19443_v6 = vld [vmem:[#allocation33_spill] sm:$0xff]  ;;  %v19447_v34 = vld [vmem:[#allocation36_spill] sm:$0xff] }
 0x2a1   :  { %v11420_v18 = vpack.c.bf16 %v19410_v27, %v19408_v16  ;;  %v11230_v60 = vpack.c.bf16 %v19414_v17, %v19412_v43  ;;  %v19436_v42 = vand.u32 4294901760, %v19435_v3  ;;  %v19442_v21 = vand.u32 4294901760, %v19441_v45  ;;  %v19449_v8 = vld [vmem:[#allocation41_spill] sm:$0xff]  ;;  %v19451_v27 = vld [vmem:[#allocation87_spill] sm:$0xff]  ;;  %v19453_v39 = vld [vmem:[#allocation62_spill] sm:$0xff] }
 0x2a2   :  { %v19446_v1 = vand.u32 4294901760, %v19445_v30  ;;  %v19450_v16 = vand.u32 4294901760, %v19449_v8  ;;  %v19454_v43 = vld [vmem:[#allocation81_spill] sm:$0xff]  ;;  %v19456_v17 = vld [vmem:[#allocation68_spill] sm:$0xff]  ;;  %v19465_v48 = vld [vmem:[#allocation22_spill] sm:$0xff] }
 0x2a3   :  { %11219 = vmatpush3.bf16.xpose.msra.mxu0 %v11218_v28  ;;  %v19415_v28 = vld [vmem:[#allocation82_spill] sm:$0xff]  ;;  %v19455_v0 = vld [vmem:[#allocation65_spill] sm:$0xff]  ;;  %v19460_v56 = vld [vmem:[#allocation4_spill] sm:$0xff] }
 0x2a4   :  { %11221 = vmatprep.subr.bf16.mxu0 %v11220_v61  ;;  %v19416_v52 = vand.u32 4294901760, %v19415_v28  ;;  %v19420_v61 = vand.u32 4294901760, %v19419_v14  ;;  %v19458_v28 = vld [vmem:[#allocation77_spill] sm:$0xff]  ;;  %v19463_v14 = vld [vmem:[#allocation19_spill] sm:$0xff]  ;;  %v4470_v20 = vld [vmem:[%s17847_s0 + $0x400] sm:$0xff] }
 0x2a5   :  { %11411 = vmatpush3.bf16.xpose.msra.mxu1 %v11410_v10  ;;  %v19423_v10 = vld [vmem:[#allocation89_spill] sm:$0xff]  ;;  %v4502_v3 = vld [vmem:[%s17847_s0 + $0x500] sm:$0xff]  ;;  %v15142_v45 = vsel %vm83_vm0, %v4470_v20, 0 }
 0x2a6   :  { %11413 = vmatprep.subr.bf16.mxu1 %v11412_v11  ;;  %v11232_v25 = vpack.c.bf16 %v19418_v31, %v19416_v52  ;;  %v11422_v51 = vpack.c.bf16 %v19422_v13, %v19420_v61  ;;  %v19424_v12 = vand.u32 4294901760, %v19423_v10  ;;  %v19426_v11 = vand.u32 4294901760, %v19425_v49  ;;  %v19459_v52 = vld [vmem:[#allocation2_spill] sm:$0xff]  ;;  %v19461_v31 = vld [vmem:[#allocation13_spill] sm:$0xff]  ;;  %v19468_v10 = vld [vmem:[#allocation40_spill] sm:$0xff] }
 0x2a7   :  { %v19464_v61 = vld [vmem:[#allocation25_spill] sm:$0xff]  ;;  %v19470_v49 = vld [vmem:[#allocation32_spill] sm:$0xff] }
 0x2a8   :  { %v11424_v32 = vpack.c.bf16 %v19426_v11, %v19424_v12  ;;  %v19466_v13 = vld [vmem:[#allocation37_spill] sm:$0xff]  ;;  %v19469_v12 = vld [vmem:[#allocation43_spill] sm:$0xff] }
 0x2a9   :  { %v19471_v11 = vld [vmem:[#allocation35_spill] sm:$0xff] }
 0x2ab   :  { %11223 = vmatpush3.bf16.xpose.msra.mxu0 %v11222_v46  ;;  %v19428_v46 = vand.u32 4294901760, %v19427_v7  ;;  %v4486_v7 = vld [vmem:[%s17847_s0 + $0x480] sm:$0xff] }
 0x2ac   :  { %11225 = vmatprep.subr.bf16.mxu0 %v11224_v29  ;;  %v19432_v29 = vand.u32 4294901760, %v19431_v58 }
 0x2ad   :  { %11415 = vmatpush3.bf16.xpose.msra.mxu1 %v11414_v24  ;;  %v11234_v40 = vpack.c.bf16 %v19430_v63, %v19428_v46  ;;  %v19473_v46 = vld [vmem:[#allocation53_spill] sm:$0xff] }
 0x2ae   :  { %11417 = vmatprep.subr.bf16.mxu1 %v11416_v15  ;;  %v11236_v24 = vpack.c.bf16 %v19434_v62, %v19432_v29  ;;  %v19437_v15 = vld [vmem:[#allocation15_spill] sm:$0xff] }
 0x2af   :  { %v19438_v2 = vand.u32 4294901760, %v19437_v15  ;;  %v4471_v62 = vld [vmem:[%s17847_s0 + $0x408] sm:$0xff]  ;;  %v19476_v15 = vld [vmem:[#allocation57_spill] sm:$0xff] }
 0x2b1   :  { %v11426_v19 = vpack.c.bf16 %v19438_v2, %v19436_v42  ;;  %v4503_v42 = vld [vmem:[%s17847_s0 + $0x508] sm:$0xff] }
 0x2b2   :  { %v15155_v30 = vsel %vm83_vm0, %v4503_v42, 0 }
 0x2b3   :  { %11227 = vmatpush3.bf16.xpose.msra.mxu0 %v11226_v53  ;;  %v19440_v53 = vand.u32 4294901760, %v19439_v54  ;;  %v4488_v54 = vld [vmem:[%s17847_s0 + $0x490] sm:$0xff] }
 0x2b4   :  { %11229 = vmatprep.subr.bf16.mxu0 %v11228_v36  ;;  %v19444_v36 = vand.u32 4294901760, %v19443_v6  ;;  %v4589_v8 = vsel %vm83_vm0, %v4488_v54, 0 }
 0x2b5   :  { %11419 = vmatpush3.bf16.xpose.msra.mxu1 %v11418_v44  ;;  %v11428_v38 = vpack.c.bf16 %v19442_v21, %v19440_v53  ;;  %v19448_v44 = vand.u32 4294901760, %v19447_v34  ;;  %v4489_v53 = vld [vmem:[%s17847_s0 + $0x498] sm:$0xff]  ;;  %v15145_v21 = vsel %vm83_vm0, %v4471_v62, 0 }
 0x2b6   :  { %11421 = vmatprep.subr.bf16.mxu1 %v11420_v18  ;;  %v11238_v37 = vpack.c.bf16 %v19446_v1, %v19444_v36  ;;  %v19452_v18 = vld [vmem:[#allocation5_spill] sm:$0xff]  ;;  %v15152_v36 = vsel %vm83_vm0, %v4502_v3, 0  ;;  %v4520_v1 = vld [vmem:[%s17847_s0 + $0x590] sm:$0xff] }
 0x2b7   :  { %v11430_v57 = vpack.c.bf16 %v19450_v16, %v19448_v44  ;;  %v4592_v16 = vsel %vm83_vm0, %v4489_v53, 0 }
 0x2bb   :  { %11231 = vmatpush3.bf16.xpose.msra.mxu0 %v11230_v60  ;;  %v19457_v60 = vld [vmem:[#allocation69_spill] sm:$0xff] }
 0x2bc   :  { %11233 = vmatprep.subr.bf16.mxu0 %v11232_v25  ;;  %v19462_v25 = vld [vmem:[#allocation16_spill] sm:$0xff] }
 0x2bd   :  { %11423 = vmatpush3.bf16.xpose.msra.mxu1 %v11422_v51  ;;  %v19467_v51 = vld [vmem:[#allocation34_spill] sm:$0xff] }
 0x2be   :  { %11425 = vmatprep.subr.bf16.mxu1 %v11424_v32  ;;  %v19472_v32 = vld [vmem:[#allocation44_spill] sm:$0xff] }
 0x2c3   :  { %11235 = vmatpush3.bf16.xpose.msra.mxu0 %v11234_v40  ;;  %v19474_v40 = vld [vmem:[#allocation54_spill] sm:$0xff] }
 0x2c4   :  { %11237 = vmatprep.subr.bf16.mxu0 %v11236_v24  ;;  %v19475_v24 = vld [vmem:[#allocation56_spill] sm:$0xff] }
 0x2c5   :  { %11427 = vmatpush3.bf16.xpose.msra.mxu1 %v11426_v19 }
 0x2c6   :  { %11429 = vmatprep.subr.bf16.mxu1 %v11428_v38 }
 0x2cb   :  { %11239 = vmatpush3.bf16.xpose.msra.mxu0 %v11238_v37  ;;  %v4521_v37 = vld [vmem:[%s17847_s0 + $0x598] sm:$0xff] }
 0x2cc   :  { %11241 = vmatprep.subr.bf16.mxu0 %v19451_v27 }
 0x2cd   :  { %11431 = vmatpush3.bf16.xpose.msra.mxu1 %v11430_v57 }
 0x2ce   :  { %11433 = vmatprep.subr.bf16.mxu1 %v19452_v18  ;;  %v18315_v18 = vand.u32 4294901760, %v15142_v45 }
 0x2d2   :  { %9577 = vmatmul.mubr.msk.f32.vlgmr.msra.gmra.mrb[4].mxu0 %vm83_vm0, %v19215_v9 }
 0x2d3   :  { %11243 = vmatpush3.bf16.xpose.msra.mxu0 %v19453_v39  ;;  %9578 = vmatprep.mubr.msk.f32.mxu0 %vm83_vm0, %v19454_v43  ;;  %v18314_v39 = vand.u32 4294901760, %v15145_v21 }
 0x2d4   :  { %9793 = vmatmul.mubr.msk.f32.vlgmr.msra.gmra.mrb[4].mxu1 %vm83_vm0, %v19215_v9  ;;  %11245 = vmatprep.subr.bf16.mxu0 %v19455_v0  ;;  %v18313_v0 = vand.u32 4294901760, %v15152_v36 }
 0x2d5   :  { %11435 = vmatpush3.bf16.xpose.msra.mxu1 %v19456_v17  ;;  %9794 = vmatprep.mubr.msk.f32.mxu1 %vm83_vm0, %v19454_v43  ;;  %v18312_v17 = vand.u32 4294901760, %v15155_v30 }
 0x2d6   :  { %11437 = vmatprep.subr.bf16.mxu1 %v19457_v60  ;;  %9579 = vmatmul.mubr.msk.f32.gmra.mrb[6].mxu0 %vm83_vm0, %v19454_v43  ;;  %v4685_v60 = vsel %vm83_vm0, %v4520_v1, 0 }
 0x2d7   :  { %9612 = vmatprep.mubr.msk.f32.mxu0 %vm83_vm0, %v19215_v9 }
 0x2d8   :  { %9795 = vmatmul.mubr.msk.f32.gmra.mrb[6].mxu1 %vm83_vm0, %v19454_v43 }
 0x2d9   :  { %9828 = vmatprep.mubr.msk.f32.mxu1 %vm83_vm0, %v19215_v9 }
 0x2db   :  { %11247 = vmatpush3.bf16.xpose.msra.mxu0 %v19458_v28  ;;  %v4688_v28 = vsel %vm83_vm0, %v4521_v37, 0 }
 0x2dc   :  { %11249 = vmatprep.subr.bf16.mxu0 %v19459_v52  ;;  %v4781_v52 = vand.u32 4294901760, %v4589_v8 }
 0x2dd   :  { %11439 = vmatpush3.bf16.xpose.msra.mxu1 %v19460_v56  ;;  %v4784_v56 = vand.u32 4294901760, %v4592_v16 }
 0x2de   :  { %11441 = vmatprep.subr.bf16.mxu1 %v19461_v31  ;;  %v4472_v31 = vld [vmem:[%s17847_s0 + $0x410] sm:$0xff] }
 0x2e3   :  { %11251 = vmatpush3.bf16.xpose.msra.mxu0 %v19462_v25  ;;  %v4504_v25 = vld [vmem:[%s17847_s0 + $0x510] sm:$0xff] }
 0x2e4   :  { %11253 = vmatprep.subr.bf16.mxu0 %v19463_v14  ;;  %v4505_v14 = vld [vmem:[%s17847_s0 + $0x518] sm:$0xff] }
 0x2e5   :  { %11443 = vmatpush3.bf16.xpose.msra.mxu1 %v19464_v61  ;;  %v4495_v61 = vld [vmem:[%s17847_s0 + $0x4c8] sm:$0xff] }
 0x2e6   :  { %11445 = vmatprep.subr.bf16.mxu1 %v19465_v48 }
 0x2eb   :  { %11255 = vmatpush3.bf16.xpose.msra.mxu0 %v19466_v13  ;;  %v5685_v13 = vand.u32 4294901760, %v4685_v60 }
 0x2ec   :  { %11257 = vmatprep.subr.bf16.mxu0 %v19467_v51  ;;  %v5688_v51 = vand.u32 4294901760, %v4688_v28 }
 0x2ed   :  { %11447 = vmatpush3.bf16.xpose.msra.mxu1 %v19468_v10  ;;  %v4491_v10 = vld [vmem:[%s17847_s0 + $0x4a8] sm:$0xff] }
 0x2ee   :  { %11449 = vmatprep.subr.bf16.mxu1 %v19469_v12  ;;  %v15209_v12 = vpack.c.bf16 %v18314_v39, %v18315_v18 }
 0x2f0   :  { %19480 = vst [vmem:[#allocation55_spill] sm:$0xff] %v15209_v12 }
 0x2f3   :  { %11259 = vmatpush3.bf16.xpose.msra.mxu0 %v19331_v41  ;;  %v4487_v41 = vld [vmem:[%s17847_s0 + $0x488] sm:$0xff] }
 0x2f4   :  { %11261 = vmatprep.subr.bf16.mxu0 %v19332_v26  ;;  %v4518_v26 = vld [vmem:[%s17847_s0 + $0x580] sm:$0xff] }
 0x2f5   :  { %11451 = vmatpush3.bf16.xpose.msra.mxu1 %v19333_v59  ;;  %v4519_v59 = vld [vmem:[%s17847_s0 + $0x588] sm:$0xff]  ;;  %v4679_v50 = vsel %vm83_vm0, %v4518_v26, 0  ;;  %v15224_v26 = vsub.f32 %v4589_v8, %v4781_v52  ;;  %v4506_v8 = vld [vmem:[%s17847_s0 + $0x520] sm:$0xff] }
 0x2f6   :  { %11453 = vmatprep.subr.bf16.mxu1 %v19334_v22  ;;  %v4583_v22 = vsel %vm83_vm0, %v4486_v7, 0  ;;  %v4682_v63 = vsel %vm83_vm0, %v4519_v59, 0  ;;  %v5679_v2 = vand.u32 4294901760, %v4679_v50  ;;  %v4522_v7 = vld [vmem:[%s17847_s0 + $0x5a0] sm:$0xff]  ;;  %v15227_v59 = vsel %vm83_vm0, %v4504_v25, 0 }
 0x2f7   :  { %v4775_v58 = vand.u32 4294901760, %v4583_v22  ;;  %v5682_v19 = vand.u32 4294901760, %v4682_v63  ;;  %19483 = vst [vmem:[#allocation7_spill] sm:$0xff] %v15224_v26  ;;  %v4691_v62 = vsel %vm83_vm0, %v4522_v7, 0  ;;  %v18311_v3 = vand.u32 4294901760, %v15227_v59 }
 0x2f8   :  { %v15165_v44 = vsub.f32 %v4679_v50, %v5679_v2  ;;  %v15237_v50 = vsub.f32 %v4685_v60, %v5685_v13  ;;  %v5691_v60 = vand.u32 4294901760, %v4691_v62 }
 0x2f9   :  { %v15149_v6 = vsub.f32 %v4583_v22, %v4775_v58  ;;  %v15169_v57 = vpack.c.bf16 %v5682_v19, %v5679_v2  ;;  %v15171_v27 = vsub.f32 %v4682_v63, %v5682_v19  ;;  %v15230_v22 = vsel %vm83_vm0, %v4505_v14, 0  ;;  %v4474_v2 = vld [vmem:[%s17847_s0 + $0x420] sm:$0xff]  ;;  %v4475_v19 = vld [vmem:[%s17847_s0 + $0x428] sm:$0xff] }
 0x2fa   :  { %19485 = vst [vmem:[#allocation27_spill] sm:$0xff] %v15237_v50  ;;  %v18310_v42 = vand.u32 4294901760, %v15230_v22  ;;  %v4547_v25 = vsel %vm83_vm0, %v4474_v2, 0  ;;  %v4550_v14 = vsel %vm83_vm0, %v4475_v19, 0  ;;  %v4524_v2 = vld [vmem:[%s17847_s0 + $0x5b0] sm:$0xff]  ;;  %v4525_v19 = vld [vmem:[%s17847_s0 + $0x5b8] sm:$0xff] }
 0x2fb   :  { %11263 = vmatpush3.bf16.xpose.msra.mxu0 %v19336_v33  ;;  %v4586_v33 = vsel %vm83_vm0, %v4487_v41, 0  ;;  %19478 = vst [vmem:[#allocation59_spill] sm:$0xff] %v15149_v6  ;;  %19479 = vst [vmem:[#allocation64_spill] sm:$0xff] %v15169_v57  ;;  %v15222_v41 = vpack.c.bf16 %v4784_v56, %v4781_v52  ;;  %v4493_v52 = vld [vmem:[%s17847_s0 + $0x4b8] sm:$0xff] }
 0x2fc   :  { %11265 = vmatprep.subr.bf16.mxu0 %v19470_v49  ;;  %v4778_v29 = vand.u32 4294901760, %v4586_v33  ;;  %v15215_v49 = vpack.c.bf16 %v18312_v17, %v18313_v0  ;;  %v4526_v0 = vld [vmem:[%s17847_s0 + $0x5c0] sm:$0xff] }
 0x2fd   :  { %11455 = vmatpush3.bf16.xpose.msra.mxu1 %v19471_v11  ;;  %v4541_v11 = vsel %vm83_vm0, %v4472_v31, 0  ;;  %19482 = vst [vmem:[#allocation74_spill] sm:$0xff] %v15222_v41  ;;  %v4742_v31 = vand.u32 4294901760, %v4550_v14 }
 0x2fe   :  { %11457 = vmatprep.subr.bf16.mxu1 %v19472_v32  ;;  %v15147_v38 = vpack.c.bf16 %v4778_v29, %v4775_v58  ;;  %v15163_v34 = vsub.f32 %v4586_v33, %v4778_v29  ;;  %19481 = vst [vmem:[#allocation61_spill] sm:$0xff] %v15215_v49  ;;  %v4523_v33 = vld [vmem:[%s17847_s0 + $0x5a8] sm:$0xff]  ;;  %v15243_v58 = vpack.c.bf16 %v5688_v51, %v5685_v13  ;;  %v4733_v29 = vand.u32 4294901760, %v4541_v11 }
 0x2ff   :  { %v4739_v13 = vand.u32 4294901760, %v4547_v25 }
 0x300   :  { %19477 = vst [vmem:[#allocation52_spill] sm:$0xff] %v15147_v38  ;;  %19486 = vst [vmem:[#allocation28_spill] sm:$0xff] %v15243_v58  ;;  %v15263_v54 = vsub.f32 %v4541_v11, %v4733_v29 }
 0x303   :  { %11267 = vmatpush3.bf16.xpose.msra.mxu0 %v19473_v46  ;;  %v15235_v46 = vsub.f32 %v4592_v16, %v4784_v56  ;;  %v4507_v16 = vld [vmem:[%s17847_s0 + $0x528] sm:$0xff] }
 0x304   :  { %11269 = vmatprep.subr.bf16.mxu0 %v19474_v40  ;;  %v4598_v40 = vsel %vm83_vm0, %v4491_v10, 0  ;;  %v15302_v10 = vsel %vm83_vm0, %v4506_v8, 0  ;;  %v15305_v11 = vsel %vm83_vm0, %v4507_v16, 0  ;;  %v15324_v16 = vsub.f32 %v4691_v62, %v5691_v60 }
 0x305   :  { %11459 = vmatpush3.bf16.xpose.msra.mxu1 %v19475_v24  ;;  %19484 = vst [vmem:[#allocation26_spill] sm:$0xff] %v15235_v46  ;;  %v15249_v24 = vsub.f32 %v4688_v28, %v5688_v51  ;;  %v4790_v37 = vand.u32 4294901760, %v4598_v40  ;;  %v4492_v28 = vld [vmem:[%s17847_s0 + $0x4b0] sm:$0xff]  ;;  %v4700_v62 = vsel %vm83_vm0, %v4525_v19, 0  ;;  %v15351_v19 = vpack.c.bf16 %v4742_v31, %v4739_v13 }
 0x306   :  { %11461 = vmatprep.subr.bf16.mxu1 %v19476_v15  ;;  %v4694_v15 = vsel %vm83_vm0, %v4523_v33, 0  ;;  %v5700_v17 = vand.u32 4294901760, %v4700_v62 }
 0x307   :  { %v15322_v8 = vsub.f32 %v4598_v40, %v4790_v37  ;;  %v4697_v40 = vsel %vm83_vm0, %v4524_v2, 0  ;;  %v4508_v2 = vld [vmem:[%s17847_s0 + $0x530] sm:$0xff]  ;;  %19493 = vst [vmem:[#allocation67_spill] sm:$0xff] %v15351_v19 }
 0x308   :  { %v15388_v4 = vsel %vm83_vm0, %v4508_v2, 0 }
 0x30b   :  { %11271 = vmatpush3.bf16.xpose.msra.mxu0 %v19348_v55  ;;  %v4473_v55 = vld [vmem:[%s17847_s0 + $0x418] sm:$0xff] }
 0x30c   :  { %11465 = vmatprep.subr.bf16.mxu0 %v15147_v38  ;;  %v4544_v32 = vsel %vm83_vm0, %v4473_v55, 0  ;;  %v5694_v55 = vand.u32 4294901760, %v4694_v15 }
 0x30d   :  { %11463 = vmatpush3.bf16.xpose.msra.mxu1 %v19349_v35  ;;  %v4490_v35 = vld [vmem:[%s17847_s0 + $0x4a0] sm:$0xff]  ;;  %v4736_v20 = vand.u32 4294901760, %v4544_v32 }
 0x30e   :  { %11657 = vmatprep.subr.bf16.mxu1 %v15169_v57  ;;  %v4595_v63 = vsel %vm83_vm0, %v4490_v35, 0  ;;  %v15299_v35 = vpack.c.bf16 %v18310_v42, %v18311_v3  ;;  %v4527_v42 = vld [vmem:[%s17847_s0 + $0x5c8] sm:$0xff] }
 0x30f   :  { %v15265_v53 = vsub.f32 %v4544_v32, %v4736_v20  ;;  %v4787_v1 = vand.u32 4294901760, %v4595_v63  ;;  %v15293_v51 = vpack.c.bf16 %v4736_v20, %v4733_v29  ;;  %v19489_v32 = vld [vmem:[#allocation94_spill] sm:$0xff]  ;;  %v4601_v29 = vsel %vm83_vm0, %v4492_v28, 0 }
 0x310   :  { %19488 = vst [vmem:[#allocation50_spill] sm:$0xff] %v15299_v35  ;;  %v4604_v20 = vsel %vm83_vm0, %v4493_v52, 0  ;;  %v18317_v28 = vand.u32 4294901760, %v15302_v10  ;;  %v18316_v52 = vand.u32 4294901760, %v15305_v11  ;;  %v4793_v56 = vand.u32 4294901760, %v4601_v29 }
 0x311   :  { %19487 = vst [vmem:[#allocation42_spill] sm:$0xff] %v15293_v51  ;;  %v15310_v7 = vpack.c.bf16 %v4790_v37, %v4787_v1  ;;  %v15312_v33 = vsub.f32 %v4595_v63, %v4787_v1  ;;  %v15327_v63 = vpack.c.bf16 %v5694_v55, %v5691_v60  ;;  %v15329_v1 = vsub.f32 %v4694_v15, %v5694_v55  ;;  %v4476_v15 = vld [vmem:[%s17847_s0 + $0x430] sm:$0xff]  ;;  %v4477_v55 = vld [vmem:[%s17847_s0 + $0x438] sm:$0xff] }
 0x312   :  { %9613 = vmatmul.mubr.msk.f32.vlgmr.msra.gmra.mrb[4].mxu0 %vm83_vm0, %v19215_v9  ;;  %v4796_v48 = vand.u32 4294901760, %v4604_v20  ;;  %v15337_v37 = vsub.f32 %v4547_v25, %v4739_v13  ;;  %v15339_v60 = vsub.f32 %v4550_v14, %v4742_v31  ;;  %v4509_v25 = vld [vmem:[%s17847_s0 + $0x538] sm:$0xff]  ;;  %v4494_v14 = vld [vmem:[%s17847_s0 + $0x4c0] sm:$0xff]  ;;  %v15371_v31 = vpack.c.bf16 %v18316_v52, %v18317_v28 }
 0x313   :  { %11467 = vmatpush3.bf16.xpose.msra.mxu0 %v15209_v12  ;;  %9614 = vmatprep.mubr.msk.f32.mxu0 %vm83_vm0, %v19454_v43  ;;  %19490 = vst [vmem:[#allocation48_spill] sm:$0xff] %v15310_v7  ;;  %19491 = vst [vmem:[#allocation86_spill] sm:$0xff] %v15327_v63  ;;  %v5697_v13 = vand.u32 4294901760, %v4697_v40  ;;  %v15383_v18 = vsub.f32 %v4601_v29, %v4793_v56  ;;  %v4553_v52 = vsel %vm83_vm0, %v4476_v15, 0  ;;  %v4556_v28 = vsel %vm83_vm0, %v4477_v55, 0 }
 0x314   :  { %9829 = vmatmul.mubr.msk.f32.vlgmr.msra.gmra.mrb[4].mxu1 %vm83_vm0, %v19215_v9  ;;  %11469 = vmatprep.subr.bf16.mxu0 %v15222_v41  ;;  %19492 = vst [vmem:[#allocation80_spill] sm:$0xff] %v15337_v37  ;;  %19494 = vst [vmem:[#allocation8_spill] sm:$0xff] %v15371_v31  ;;  %v15381_v39 = vpack.c.bf16 %v4796_v48, %v4793_v56  ;;  %v15391_v47 = vsel %vm83_vm0, %v4509_v25, 0  ;;  %v4607_v23 = vsel %vm83_vm0, %v4494_v14, 0  ;;  %v4703_v56 = vsel %vm83_vm0, %v4526_v0, 0  ;;  %v4478_v0 = vld [vmem:[%s17847_s0 + $0x440] sm:$0xff] }
 0x315   :  { %11659 = vmatpush3.bf16.xpose.msra.mxu1 %v15215_v49  ;;  %9830 = vmatprep.mubr.msk.f32.mxu1 %vm83_vm0, %v19454_v43  ;;  %19496 = vst [vmem:[#allocation12_spill] sm:$0xff] %v15383_v18  ;;  %v15397_v3 = vsub.f32 %v4697_v40, %v5697_v13  ;;  %v4706_v29 = vsel %vm83_vm0, %v4527_v42, 0  ;;  %v15401_v15 = vpack.c.bf16 %v5700_v17, %v5697_v13  ;;  %v4745_v2 = vand.u32 4294901760, %v4553_v52  ;;  %v4479_v14 = vld [vmem:[%s17847_s0 + $0x448] sm:$0xff]  ;;  %v4497_v25 = vld [vmem:[%s17847_s0 + $0x4d8] sm:$0xff] }
 0x316   :  { %9615 = vmatmul.mubr.msk.f32.gmra.mrb[6].mxu0 %vm83_vm0, %v19454_v43  ;;  %11661 = vmatprep.subr.bf16.mxu1 %v15243_v58  ;;  %19495 = vst [vmem:[#allocation14_spill] sm:$0xff] %v15381_v39  ;;  %v15403_v55 = vsub.f32 %v4700_v62, %v5700_v17  ;;  %v5703_v40 = vand.u32 4294901760, %v4703_v56  ;;  %v5706_v62 = vand.u32 4294901760, %v4706_v29  ;;  %v19503_v13 = vand.u32 4294901760, %v15142_v45 }
 0x317   :  { %9864 = vmatprep.mubr.f32.mxu0 %v19489_v32  ;;  %19498 = vst [vmem:[#allocation58_spill] sm:$0xff] %v15397_v3  ;;  %19499 = vst [vmem:[#allocation75_spill] sm:$0xff] %v15401_v15  ;;  %v15412_v42 = vsub.f32 %v4553_v52, %v4745_v2  ;;  %v4510_v52 = vld [vmem:[%s17847_s0 + $0x540] sm:$0xff] }
 0x318   :  { %9831 = vmatmul.mubr.msk.f32.gmra.mrb[6].mxu1 %vm83_vm0, %v19454_v43  ;;  %19500 = vst [vmem:[#allocation18_spill] sm:$0xff] %v15403_v55  ;;  %v15471_v49 = vpack.c.bf16 %v5706_v62, %v5703_v40 }
 0x319   :  { %10080 = vmatprep.mubr.f32.mxu1 %v19489_v32  ;;  %19501 = vst [vmem:[#allocation10_spill] sm:$0xff] %v15412_v42 }
 0x31a   :  { %19512 = vst [vmem:[#allocation63_spill] sm:$0xff] %v15471_v49 }
 0x31b   :  { %11471 = vmatpush3.bf16.xpose.msra.mxu0 %v15293_v51  ;;  %v4562_v51 = vsel %vm83_vm0, %v4479_v14, 0 }
 0x31c   :  { %11473 = vmatprep.subr.bf16.mxu0 %v15310_v7  ;;  %v4748_v7 = vand.u32 4294901760, %v4556_v28 }
 0x31d   :  { %11663 = vmatpush3.bf16.xpose.msra.mxu1 %v15299_v35  ;;  %v15395_v35 = vsub.f32 %v4604_v20, %v4796_v48  ;;  %v4799_v48 = vand.u32 4294901760, %v4607_v23 }
 0x31e   :  { %11665 = vmatprep.subr.bf16.mxu1 %v15327_v63  ;;  %v4610_v63 = vsel %vm83_vm0, %v4495_v61, 0  ;;  %v15414_v17 = vsub.f32 %v4556_v28, %v4748_v7  ;;  %v15422_v61 = vsub.f32 %v15142_v45, %v19503_v13  ;;  %v15438_v45 = vpack.c.bf16 %v4748_v7, %v4745_v2  ;;  %v4496_v28 = vld [vmem:[%s17847_s0 + $0x4d0] sm:$0xff] }
 0x31f   :  { %19497 = vst [vmem:[#allocation29_spill] sm:$0xff] %v15395_v35  ;;  %v4802_v20 = vand.u32 4294901760, %v4610_v63  ;;  %v4559_v13 = vsel %vm83_vm0, %v4478_v0, 0  ;;  %v19507_v7 = vand.u32 4294901760, %v15391_v47 }
 0x320   :  { %19502 = vst [vmem:[#allocation20_spill] sm:$0xff] %v15414_v17  ;;  %19505 = vst [vmem:[#allocation21_spill] sm:$0xff] %v15438_v45  ;;  %v4751_v14 = vand.u32 4294901760, %v4559_v13 }
 0x321   :  { %v15458_v0 = vpack.c.bf16 %v4802_v20, %v4799_v48  ;;  %v15469_v58 = vsub.f32 %v4610_v63, %v4802_v20  ;;  %v4613_v63 = vsel %vm83_vm0, %v4496_v28, 0  ;;  %v15489_v20 = vsub.f32 %v4706_v29, %v5706_v62  ;;  %v4512_v28 = vld [vmem:[%s17847_s0 + $0x550] sm:$0xff] }
 0x322   :  { %v15494_v57 = vsub.f32 %v4559_v13, %v4751_v14  ;;  %v4805_v62 = vand.u32 4294901760, %v4613_v63  ;;  %v4513_v13 = vld [vmem:[%s17847_s0 + $0x558] sm:$0xff]  ;;  %v19519_v29 = vand.u32 4294901760, %v15152_v36 }
 0x323   :  { %11475 = vmatpush3.bf16.xpose.msra.mxu0 %v15351_v19  ;;  %19509 = vst [vmem:[#allocation24_spill] sm:$0xff] %v15458_v0  ;;  %19511 = vst [vmem:[#allocation46_spill] sm:$0xff] %v15469_v58 }
 0x324   :  { %11477 = vmatprep.subr.bf16.mxu0 %v15381_v39  ;;  %v19504_v39 = vand.u32 4294901760, %v15145_v21  ;;  %19516 = vst [vmem:[#allocation66_spill] sm:$0xff] %v15489_v20  ;;  %19517 = vst [vmem:[#allocation78_spill] sm:$0xff] %v15494_v57  ;;  %v15517_v38 = vsub.f32 %v15152_v36, %v19519_v29  ;;  %v19520_v20 = vand.u32 4294901760, %v15155_v30 }
 0x325   :  { %11667 = vmatpush3.bf16.xpose.msra.mxu1 %v15371_v31  ;;  %v4511_v31 = vld [vmem:[%s17847_s0 + $0x548] sm:$0xff] }
 0x326   :  { %v15435_v19 = vsub.f32 %v15145_v21, %v19504_v39  ;;  %11669 = vmatprep.subr.bf16.mxu1 %v15401_v15  ;;  %v19506_v39 = vand.u32 4294901760, %v15388_v4  ;;  %v15460_v15 = vsub.f32 %v4607_v23, %v4799_v48  ;;  %v4529_v21 = vld [vmem:[%s17847_s0 + $0x5d8] sm:$0xff]  ;;  %v4480_v23 = vld [vmem:[%s17847_s0 + $0x450] sm:$0xff]  ;;  %v15485_v41 = vsel %vm83_vm0, %v4511_v31, 0 }
 0x327   :  { %v4481_v48 = vld [vmem:[%s17847_s0 + $0x458] sm:$0xff]  ;;  %19515 = vst [vmem:[#allocation60_spill] sm:$0xff] %v15485_v41  ;;  %v4712_v12 = vsel %vm83_vm0, %v4529_v21, 0  ;;  %v4565_v31 = vsel %vm83_vm0, %v4480_v23, 0  ;;  %v15531_v36 = vsub.f32 %v15155_v30, %v19520_v20  ;;  %v4531_v20 = vld [vmem:[%s17847_s0 + $0x5e8] sm:$0xff] }
 0x328   :  { %v15456_v2 = vpack.c.bf16 %v19507_v7, %v19506_v39  ;;  %19510 = vst [vmem:[#allocation51_spill] sm:$0xff] %v15460_v15  ;;  %v15473_v39 = vsub.f32 %v4703_v56, %v5703_v40  ;;  %v15476_v7 = vsel %vm83_vm0, %v4510_v52, 0  ;;  %v4616_v56 = vsel %vm83_vm0, %v4497_v25, 0 }
 0x329   :  { %19514 = vst [vmem:[#allocation72_spill] sm:$0xff] %v15476_v7  ;;  %v4754_v40 = vand.u32 4294901760, %v4562_v51  ;;  %v4709_v52 = vsel %vm83_vm0, %v4528_v5, 0  ;;  %v4568_v43 = vsel %vm83_vm0, %v4481_v48, 0  ;;  %v4808_v5 = vand.u32 4294901760, %v4616_v56 }
 0x32a   :  { %19508 = vst [vmem:[#allocation23_spill] sm:$0xff] %v15456_v2  ;;  %19513 = vst [vmem:[#allocation70_spill] sm:$0xff] %v15473_v39  ;;  %v5709_v21 = vand.u32 4294901760, %v4709_v52  ;;  %v5712_v23 = vand.u32 4294901760, %v4712_v12  ;;  %v15539_v39 = vsel %vm83_vm0, %v4513_v13, 0  ;;  %v19524_v58 = vand.u32 4294901760, %v15476_v7 }
 0x32b   :  { %11479 = vmatpush3.bf16.xpose.msra.mxu0 %v15438_v45  ;;  %v15500_v25 = vsub.f32 %v4562_v51, %v4754_v40  ;;  %v4760_v45 = vand.u32 4294901760, %v4568_v43  ;;  %v4499_v51 = vld [vmem:[%s17847_s0 + $0x4e8] sm:$0xff]  ;;  %v15533_v29 = vpack.c.bf16 %v4754_v40, %v4751_v14  ;;  %19523 = vst [vmem:[#allocation82_spill] sm:$0xff] %v15539_v39  ;;  %v19525_v15 = vand.u32 4294901760, %v15485_v41  ;;  %v4530_v14 = vld [vmem:[%s17847_s0 + $0x5e0] sm:$0xff] }
 0x32c   :  { %11481 = vmatprep.subr.bf16.mxu0 %v15458_v0  ;;  %v4757_v0 = vand.u32 4294901760, %v4565_v31  ;;  %v15547_v48 = vpack.c.bf16 %v4808_v5, %v4805_v62  ;;  %v15551_v30 = vsub.f32 %v4616_v56, %v4808_v5  ;;  %v15559_v40 = vpack.c.bf16 %v5712_v23, %v5709_v21  ;;  %v4483_v56 = vld [vmem:[%s17847_s0 + $0x468] sm:$0xff] }
 0x32d   :  { %19518 = vst [vmem:[#allocation73_spill] sm:$0xff] %v15500_v25  ;;  %11671 = vmatpush3.bf16.xpose.msra.mxu1 %v15456_v2  ;;  %v4498_v2 = vld [vmem:[%s17847_s0 + $0x4e0] sm:$0xff]  ;;  %19521 = vst [vmem:[#allocation71_spill] sm:$0xff] %v15533_v29  ;;  %v15545_v17 = vpack.c.bf16 %v19525_v15, %v19524_v58  ;;  %v15549_v25 = vsub.f32 %v4613_v63, %v4805_v62  ;;  %v4622_v15 = vsel %vm83_vm0, %v4499_v51, 0  ;;  %v4718_v13 = vsel %vm83_vm0, %v4531_v20, 0 }
 0x32e   :  { %11673 = vmatprep.subr.bf16.mxu1 %v15471_v49  ;;  %v15536_v49 = vsel %vm83_vm0, %v4512_v28, 0  ;;  %19527 = vst [vmem:[#allocation79_spill] sm:$0xff] %v15547_v48  ;;  %19529 = vst [vmem:[#allocation89_spill] sm:$0xff] %v15551_v30  ;;  %v15561_v28 = vsub.f32 %v4709_v52, %v5709_v21  ;;  %v4619_v58 = vsel %vm83_vm0, %v4498_v2, 0  ;;  %v4482_v63 = vld [vmem:[%s17847_s0 + $0x460] sm:$0xff]  ;;  %v15571_v62 = vsub.f32 %v4712_v12, %v5712_v23  ;;  %v4515_v21 = vld [vmem:[%s17847_s0 + $0x568] sm:$0xff] }
 0x32f   :  { %19522 = vst [vmem:[#allocation76_spill] sm:$0xff] %v15536_v49  ;;  %19526 = vst [vmem:[#allocation88_spill] sm:$0xff] %v15545_v17  ;;  %v15573_v5 = vpack.c.bf16 %v4760_v45, %v4757_v0  ;;  %v4514_v2 = vld [vmem:[%s17847_s0 + $0x560] sm:$0xff]  ;;  %v15584_v51 = vsub.f32 %v4565_v31, %v4757_v0  ;;  %v15586_v12 = vsub.f32 %v4568_v43, %v4760_v45  ;;  %v4715_v23 = vsel %vm83_vm0, %v4530_v14, 0  ;;  %v4501_v43 = vld [vmem:[%s17847_s0 + $0x4f8] sm:$0xff] }
 0x330   :  { %19528 = vst [vmem:[#allocation85_spill] sm:$0xff] %v15549_v25  ;;  %19530 = vst [vmem:[#allocation90_spill] sm:$0xff] %v15559_v40  ;;  %v4811_v52 = vand.u32 4294901760, %v4619_v58  ;;  %v4814_v57 = vand.u32 4294901760, %v4622_v15  ;;  %v4571_v41 = vsel %vm83_vm0, %v4482_v63, 0  ;;  %v4574_v7 = vsel %vm83_vm0, %v4483_v56, 0 }
 0x331   :  { %19531 = vst [vmem:[#allocation31_spill] sm:$0xff] %v15561_v28  ;;  %19532 = vst [vmem:[#allocation9_spill] sm:$0xff] %v15571_v62  ;;  %v15601_v45 = vsel %vm83_vm0, %v4514_v2, 0  ;;  %v15604_v0 = vsel %vm83_vm0, %v4515_v21, 0  ;;  %v19537_v20 = vand.u32 4294901760, %v15536_v49  ;;  %v19538_v63 = vand.u32 4294901760, %v15539_v39 }
 0x332   :  { %19533 = vst [vmem:[#allocation30_spill] sm:$0xff] %v15573_v5  ;;  %19534 = vst [vmem:[#allocation39_spill] sm:$0xff] %v15584_v51  ;;  %v5718_v2 = vand.u32 4294901760, %v4718_v13  ;;  %v4532_v21 = vld [vmem:[%s17847_s0 + $0x5f0] sm:$0xff]  ;;  %v4533_v31 = vld [vmem:[%s17847_s0 + $0x5f8] sm:$0xff]  ;;  %v15629_v39 = vsub.f32 %v4619_v58, %v4811_v52  ;;  %v18406_v62 = vand.u32 4294901760, %v15601_v45  ;;  %v15633_v30 = vsub.f32 %v4622_v15, %v4814_v57 }
 0x333   :  { %11483 = vmatpush3.bf16.xpose.msra.mxu0 %v15533_v29  ;;  %19535 = vst [vmem:[#allocation91_spill] sm:$0xff] %v15586_v12  ;;  %v4500_v29 = vld [vmem:[%s17847_s0 + $0x4f0] sm:$0xff]  ;;  %19536 = vst [vmem:[#allocation15_spill] sm:$0xff] %v15604_v0  ;;  %v15615_v56 = vpack.c.bf16 %v19538_v63, %v19537_v20  ;;  %v4628_v20 = vsel %vm83_vm0, %v4501_v43, 0  ;;  %v15627_v63 = vpack.c.bf16 %v4814_v57, %v4811_v52  ;;  %v18405_v28 = vand.u32 4294901760, %v15604_v0 }
 0x334   :  { %11485 = vmatprep.subr.bf16.mxu0 %v15547_v48  ;;  %v4766_v48 = vand.u32 4294901760, %v4574_v7  ;;  %v4625_v49 = vsel %vm83_vm0, %v4500_v29, 0  ;;  %19541 = vst [vmem:[#allocation33_spill] sm:$0xff] %v15629_v39  ;;  %19542 = vst [vmem:[#allocation38_spill] sm:$0xff] %v15633_v30  ;;  %v4721_v14 = vsel %vm83_vm0, %v4532_v21, 0  ;;  %v4724_v12 = vsel %vm83_vm0, %v4533_v31, 0 }
 0x335   :  { %11675 = vmatpush3.bf16.xpose.msra.mxu1 %v15545_v17  ;;  %19539 = vst [vmem:[#allocation11_spill] sm:$0xff] %v15615_v56  ;;  %v5715_v17 = vand.u32 4294901760, %v4715_v23  ;;  %19540 = vst [vmem:[#allocation17_spill] sm:$0xff] %v15627_v63  ;;  %v15641_v29 = vsub.f32 %v4718_v13, %v5718_v2  ;;  %v4817_v43 = vand.u32 4294901760, %v4625_v49  ;;  %v4820_v42 = vand.u32 4294901760, %v4628_v20  ;;  %v4484_v58 = vld [vmem:[%s17847_s0 + $0x470] sm:$0xff] }
 0x336   :  { %11677 = vmatprep.subr.bf16.mxu1 %v15559_v40  ;;  %v4763_v40 = vand.u32 4294901760, %v4571_v41  ;;  %v15651_v52 = vsub.f32 %v4574_v7, %v4766_v48  ;;  %v5721_v31 = vand.u32 4294901760, %v4721_v14  ;;  %v4517_v7 = vld [vmem:[%s17847_s0 + $0x578] sm:$0xff]  ;;  %v19555_v0 = vand.u32 4294901760, %v15163_v34 }
 0x337   :  { %v15635_v25 = vsub.f32 %v4715_v23, %v5715_v17  ;;  %v15639_v51 = vpack.c.bf16 %v5718_v2, %v5715_v17  ;;  %19545 = vst [vmem:[#allocation87_spill] sm:$0xff] %v15641_v29  ;;  %v4485_v17 = vld [vmem:[%s17847_s0 + $0x478] sm:$0xff]  ;;  %v15662_v23 = vpack.c.bf16 %v18405_v28, %v18406_v62  ;;  %v5724_v2 = vand.u32 4294901760, %v4724_v12 }
 0x338   :  { %v15647_v57 = vpack.c.bf16 %v4766_v48, %v4763_v40  ;;  %v15649_v15 = vsub.f32 %v4571_v41, %v4763_v40  ;;  %19548 = vst [vmem:[#allocation65_spill] sm:$0xff] %v15651_v52  ;;  %v4516_v41 = vld [vmem:[%s17847_s0 + $0x570] sm:$0xff]  ;;  %v4577_v40 = vsel %vm83_vm0, %v4484_v58, 0  ;;  %v15679_v13 = vpack.c.bf16 %v4820_v42, %v4817_v43 }
 0x339   :  { %19543 = vst [vmem:[#allocation36_spill] sm:$0xff] %v15635_v25  ;;  %19544 = vst [vmem:[#allocation41_spill] sm:$0xff] %v15639_v51  ;;  %v15685_v58 = vsub.f32 %v4625_v49, %v4817_v43  ;;  %v15688_v21 = vsel %vm83_vm0, %v4516_v41, 0  ;;  %v15691_v28 = vsel %vm83_vm0, %v4517_v7, 0  ;;  %v19552_v62 = vand.u32 4294901760, %v15149_v6 }
 0x33a   :  { %19546 = vst [vmem:[#allocation5_spill] sm:$0xff] %v15647_v57  ;;  %19547 = vst [vmem:[#allocation62_spill] sm:$0xff] %v15649_v15  ;;  %v4769_v48 = vand.u32 4294901760, %v4577_v40  ;;  %v4968_v49 = vsub.f32 %v15163_v34, %v19555_v0  ;;  %v15703_v43 = vsub.f32 %v4721_v14, %v5721_v31  ;;  %v15705_v41 = vsub.f32 %v4724_v12, %v5724_v2 }
 0x33b   :  { %11487 = vmatpush3.bf16.xpose.msra.mxu0 %v15573_v5  ;;  %19549 = vst [vmem:[#allocation68_spill] sm:$0xff] %v15662_v23  ;;  %19550 = vst [vmem:[#allocation69_spill] sm:$0xff] %v15679_v13  ;;  %v15696_v5 = vsub.f32 %v4628_v20, %v4820_v42  ;;  %v19558_v7 = vand.u32 4294901760, %v15165_v44  ;;  %v19560_v20 = vand.u32 4294901760, %v15171_v27  ;;  %v18423_v14 = vand.u32 4294901760, %v15422_v61 }
 0x33c   :  { %11489 = vmatprep.subr.bf16.mxu0 %v15627_v63  ;;  %v4580_v63 = vsel %vm83_vm0, %v4485_v17, 0  ;;  %19551 = vst [vmem:[#allocation77_spill] sm:$0xff] %v15685_v58  ;;  %v15698_v17 = vpack.c.bf16 %v5724_v2, %v5721_v31  ;;  %19556 = vst [vmem:[#allocation13_spill] sm:$0xff] %v15703_v43  ;;  %v15710_v15 = vsub.f32 %v4577_v40, %v4769_v48  ;;  %v4969_v2 = vand.u32 4294901760, %v4968_v49 }
 0x33d   :  { %11679 = vmatpush3.bf16.xpose.msra.mxu1 %v15615_v56  ;;  %19553 = vst [vmem:[#allocation2_spill] sm:$0xff] %v15696_v5  ;;  %19557 = vst [vmem:[#allocation16_spill] sm:$0xff] %v15705_v41  ;;  %v4772_v56 = vand.u32 4294901760, %v4580_v63  ;;  %v5865_v52 = vsub.f32 %v15165_v44, %v19558_v7  ;;  %v19565_v7 = vand.u32 4294901760, %v15224_v26 }
 0x33e   :  { %11681 = vmatprep.subr.bf16.mxu1 %v15639_v51  ;;  %v4961_v51 = vsub.f32 %v15149_v6, %v19552_v62  ;;  %19554 = vst [vmem:[#allocation4_spill] sm:$0xff] %v15698_v17  ;;  %19559 = vst [vmem:[#allocation19_spill] sm:$0xff] %v15710_v15  ;;  %v5872_v6 = vsub.f32 %v15171_v27, %v19560_v20 }
 0x33f   :  { %v15718_v0 = vsub.f32 %v4580_v63, %v4772_v56  ;;  %v5866_v20 = vand.u32 4294901760, %v5865_v52  ;;  %v15737_v31 = vpack.c.bf16 %v4772_v56, %v4769_v48  ;;  %v4849_v52 = vsub.f32 %v15422_v61, %v18423_v14 }
 0x340   :  { %v4962_v12 = vand.u32 4294901760, %v4961_v51  ;;  %v5873_v49 = vand.u32 4294901760, %v5872_v6  ;;  %v19563_v51 = vand.u32 4294901760, %v15435_v19  ;;  %v19564_v63 = vand.u32 4294901760, %v15227_v59 }
 0x341   :  { %19561 = vst [vmem:[#allocation25_spill] sm:$0xff] %v15718_v0  ;;  %19562 = vst [vmem:[#allocation22_spill] sm:$0xff] %v15737_v31  ;;  %v4975_v62 = vsub.f32 %v15224_v26, %v19565_v7  ;;  %v19566_v56 = vand.u32 4294901760, %v15235_v46  ;;  %v19567_v14 = vand.u32 4294901760, %v15230_v22  ;;  %v19572_v7 = vand.u32 4294901760, %v15531_v36 }
 0x342   :  { %v4856_v42 = vsub.f32 %v15435_v19, %v19563_v51  ;;  %v15748_v6 = vsub.f32 %v15227_v59, %v19564_v63  ;;  %v11496_v40 = vpack.c.bf16 %v4969_v2, %v4962_v12  ;;  %v19568_v51 = vand.u32 4294901760, %v15688_v21 }
 0x343   :  { %11491 = vmatpush3.bf16.xpose.msra.mxu0 %v15647_v57  ;;  %v4982_v48 = vsub.f32 %v15235_v46, %v19566_v56  ;;  %v19571_v12 = vand.u32 4294901760, %v15517_v38  ;;  %v5760_v63 = vsub.f32 %v15531_v36, %v19572_v7  ;;  %v11688_v56 = vpack.c.bf16 %v5873_v49, %v5866_v20 }
 0x344   :  { %11493 = vmatprep.subr.bf16.mxu0 %v15679_v13  ;;  %v19573_v13 = vand.u32 4294901760, %v15237_v50  ;;  %v4976_v46 = vand.u32 4294901760, %v4975_v62  ;;  %v19576_v20 = vand.u32 4294901760, %v15265_v53 }
 0x345   :  { %11683 = vmatpush3.bf16.xpose.msra.mxu1 %v15662_v23  ;;  %v19569_v23 = vand.u32 4294901760, %v15691_v28  ;;  %v5753_v2 = vsub.f32 %v15517_v38, %v19571_v12  ;;  %v4983_v7 = vand.u32 4294901760, %v4982_v48  ;;  %v18441_v12 = vand.u32 4294901760, %v15324_v16 }
 0x346   :  { %11685 = vmatprep.subr.bf16.mxu1 %v15698_v17  ;;  %v15759_v17 = vsub.f32 %v15230_v22, %v19567_v14  ;;  %v5879_v22 = vsub.f32 %v15237_v50, %v19573_v13  ;;  %v19574_v14 = vand.u32 4294901760, %v15249_v24  ;;  %v5761_v50 = vand.u32 4294901760, %v5760_v63 }
 0x347   :  { %v15765_v59 = vpack.c.bf16 %v19569_v23, %v19568_v51  ;;  %v4850_v23 = vand.u32 4294901760, %v4849_v52  ;;  %v4857_v51 = vand.u32 4294901760, %v4856_v42  ;;  %v5754_v13 = vand.u32 4294901760, %v5753_v2 }
 0x348   :  { %v5886_v57 = vsub.f32 %v15249_v24, %v19574_v14  ;;  %v18438_v14 = vand.u32 4294901760, %v15748_v6  ;;  %v5880_v42 = vand.u32 4294901760, %v5879_v22  ;;  %v19575_v48 = vand.u32 4294901760, %v15263_v54 }
 0x349   :  { %19570 = vst [vmem:[#allocation37_spill] sm:$0xff] %v15765_v59  ;;  %v4870_v2 = vsub.f32 %v15265_v53, %v19576_v20  ;;  %v19577_v63 = vand.u32 4294901760, %v15302_v10  ;;  %v11690_v20 = vpack.c.bf16 %v5761_v50, %v5754_v13 }
 0x34a   :  { %v5887_v26 = vand.u32 4294901760, %v5886_v57  ;;  %v4863_v49 = vsub.f32 %v15263_v54, %v19575_v48  ;;  %v19578_v57 = vand.u32 4294901760, %v15312_v33  ;;  %v19580_v48 = vand.u32 4294901760, %v15305_v11 }
 0x34b   :  { %11495 = vmatpush3.bf16.xpose.msra.mxu0 %v15737_v31  ;;  %v15798_v52 = vsub.f32 %v15302_v10, %v19577_v63  ;;  %v5767_v10 = vsub.f32 %v15748_v6, %v18438_v14  ;;  %v4871_v13 = vand.u32 4294901760, %v4870_v2 }
 0x34c   :  { %11497 = vmatprep.subr.bf16.mxu0 %v11496_v40  ;;  %v11498_v40 = vpack.c.bf16 %v4857_v51, %v4850_v23  ;;  %v4989_v22 = vsub.f32 %v15312_v33, %v19578_v57  ;;  %v19579_v23 = vand.u32 4294901760, %v15322_v8  ;;  %v15809_v62 = vsub.f32 %v15305_v11, %v19580_v48 }
 0x34d   :  { %11687 = vmatpush3.bf16.xpose.msra.mxu1 %v15765_v59  ;;  %v11692_v63 = vpack.c.bf16 %v5887_v26, %v5880_v42  ;;  %v5893_v57 = vsub.f32 %v15324_v16, %v18441_v12  ;;  %v4864_v50 = vand.u32 4294901760, %v4863_v49  ;;  %v19583_v59 = vld [vmem:[#allocation3_spill] sm:$0xff]  ;;  %v18442_v12 = vand.u32 4294901760, %v15395_v35 }
 0x34e   :  { %11689 = vmatprep.subr.bf16.mxu1 %v11688_v56  ;;  %v11500_v56 = vpack.c.bf16 %v4983_v7, %v4976_v46  ;;  %v4996_v51 = vsub.f32 %v15322_v8, %v19579_v23  ;;  %v19581_v46 = vand.u32 4294901760, %v15759_v17  ;;  %v19582_v23 = vand.u32 4294901760, %v15329_v1 }
 0x34f   :  { %v4990_v26 = vand.u32 4294901760, %v4989_v22  ;;  %v18443_v49 = vand.u32 4294901760, %v15798_v52  ;;  %v5894_v14 = vand.u32 4294901760, %v5893_v57 }
 0x350   :  { %v5774_v7 = vsub.f32 %v15759_v17, %v19581_v46  ;;  %v5900_v11 = vsub.f32 %v15329_v1, %v19582_v23  ;;  %v4997_v42 = vand.u32 4294901760, %v4996_v51  ;;  %v18444_v46 = vand.u32 4294901760, %v15383_v18 }
 0x351   :  { %v5768_v23 = vand.u32 4294901760, %v5767_v10  ;;  %v11502_v51 = vpack.c.bf16 %v4871_v13, %v4864_v50  ;;  %v5010_v13 = vsub.f32 %v15395_v35, %v18442_v12 }
 0x352   :  { %9865 = vmatmul.mubr.f32.vlgmr.msra.gmra.mrb[8].mxu0 %v19489_v32  ;;  %v5901_v48 = vand.u32 4294901760, %v5900_v11  ;;  %v11504_v11 = vpack.c.bf16 %v4997_v42, %v4990_v26  ;;  %v5003_v50 = vsub.f32 %v15383_v18, %v18444_v46  ;;  %v19590_v26 = vand.u32 4294901760, %v15809_v62  ;;  %v19594_v18 = vld [vmem:[#allocation51_spill] sm:$0xff] }
 0x353   :  { %11499 = vmatpush3.bf16.xpose.msra.mxu0 %v11498_v40  ;;  %9866 = vmatprep.mubr.f32.mxu0 %v19583_v59  ;;  %v5775_v40 = vand.u32 4294901760, %v5774_v7  ;;  %v19585_v7 = vand.u32 4294901760, %v15339_v60  ;;  %v5011_v31 = vand.u32 4294901760, %v5010_v13 }
 0x354   :  { %10081 = vmatmul.mubr.f32.vlgmr.msra.gmra.mrb[8].mxu1 %v19489_v32  ;;  %11501 = vmatprep.subr.bf16.mxu0 %v11500_v56  ;;  %v18453_v56 = vand.u32 4294901760, %v15397_v3  ;;  %v5788_v42 = vsub.f32 %v15809_v62, %v19590_v26  ;;  %v5004_v26 = vand.u32 4294901760, %v5003_v50  ;;  %v19597_v32 = vld [vmem:[#allocation66_spill] sm:$0xff] }
 0x355   :  { %11691 = vmatpush3.bf16.xpose.msra.mxu1 %v11690_v20  ;;  %10082 = vmatprep.mubr.f32.mxu1 %v19583_v59  ;;  %v19584_v20 = vand.u32 4294901760, %v15337_v37  ;;  %v4884_v2 = vsub.f32 %v15339_v60, %v19585_v7  ;;  %v11694_v22 = vpack.c.bf16 %v5775_v40, %v5768_v23 }
 0x356   :  { %11693 = vmatprep.subr.bf16.mxu1 %v11692_v63  ;;  %9867 = vmatmul.mubr.f32.gmra.mrb[10].mxu0 %v19583_v59  ;;  %v19586_v63 = vand.u32 4294901760, %v15388_v4  ;;  %v5907_v12 = vsub.f32 %v15397_v3, %v18453_v56  ;;  %v5789_v3 = vand.u32 4294901760, %v5788_v42  ;;  %v19600_v42 = vld [vmem:[#allocation72_spill] sm:$0xff] }
 0x357   :  { %v4877_v10 = vsub.f32 %v15337_v37, %v19584_v20  ;;  %9900 = vmatprep.mubr.msk.f32.mxu0 %vm83_vm0, %v19215_v9  ;;  %v19588_v20 = vand.u32 4294901760, %v15391_v47  ;;  %v19601_v37 = vand.u32 4294901760, %v19600_v42 }
 0x358   :  { %v15847_v57 = vsub.f32 %v15388_v4, %v19586_v63  ;;  %10083 = vmatmul.mubr.f32.gmra.mrb[10].mxu1 %v19583_v59  ;;  %v5781_v4 = vsub.f32 %v15798_v52, %v18443_v49  ;;  %v11696_v63 = vpack.c.bf16 %v5901_v48, %v5894_v14  ;;  %v19592_v49 = vld [vmem:[#allocation10_spill] sm:$0xff]  ;;  %v19593_v59 = vld [vmem:[#allocation20_spill] sm:$0xff] }
 0x359   :  { %v15859_v7 = vsub.f32 %v15391_v47, %v19588_v20  ;;  %10116 = vmatprep.mubr.msk.f32.mxu1 %vm83_vm0, %v19215_v9  ;;  %v19591_v47 = vand.u32 4294901760, %v15403_v55  ;;  %v4878_v40 = vand.u32 4294901760, %v4877_v10  ;;  %v4885_v20 = vand.u32 4294901760, %v4884_v2  ;;  %v19595_v48 = vld [vmem:[#allocation46_spill] sm:$0xff] }
 0x35a   :  { %19587 = vst [vmem:[#allocation34_spill] sm:$0xff] %v15847_v57  ;;  %v18459_v35 = vand.u32 4294901760, %v19595_v48  ;;  %v5782_v56 = vand.u32 4294901760, %v5781_v4  ;;  %v5908_v2 = vand.u32 4294901760, %v5907_v12  ;;  %v19598_v13 = vand.u32 4294901760, %v19592_v49 }
 0x35b   :  { %19589 = vst [vmem:[#allocation40_spill] sm:$0xff] %v15859_v7  ;;  %v5914_v23 = vsub.f32 %v15403_v55, %v19591_v47  ;;  %11503 = vmatpush3.bf16.xpose.msra.mxu0 %v11502_v51  ;;  %v19596_v47 = vld [vmem:[#allocation70_spill] sm:$0xff]  ;;  %v11506_v50 = vpack.c.bf16 %v4885_v20, %v4878_v40  ;;  %v15892_v51 = vsub.f32 %v19600_v42, %v19601_v37  ;;  %v19604_v20 = vld [vmem:[#allocation60_spill] sm:$0xff]  ;;  %v19607_v46 = vand.u32 4294901760, %v15847_v57 }
 0x35c   :  { %11505 = vmatprep.subr.bf16.mxu0 %v11504_v11  ;;  %v4891_v14 = vsub.f32 %v19592_v49, %v19598_v13  ;;  %v11508_v12 = vpack.c.bf16 %v5011_v31, %v5004_v26  ;;  %v5024_v40 = vsub.f32 %v19595_v48, %v18459_v35  ;;  %v19605_v13 = vand.u32 4294901760, %v19604_v20  ;;  %v19612_v49 = vld [vmem:[#allocation73_spill] sm:$0xff] }
 0x35d   :  { %11695 = vmatpush3.bf16.xpose.msra.mxu1 %v11694_v22  ;;  %v5915_v10 = vand.u32 4294901760, %v5914_v23  ;;  %v19599_v22 = vand.u32 4294901760, %v19593_v59  ;;  %19602 = vst [vmem:[#allocation43_spill] sm:$0xff] %v15892_v51  ;;  %v5795_v37 = vsub.f32 %v15847_v57, %v19607_v46  ;;  %v19608_v31 = vand.u32 4294901760, %v15859_v7  ;;  %v19616_v46 = vld [vmem:[#allocation9_spill] sm:$0xff] }
 0x35e   :  { %11697 = vmatprep.subr.bf16.mxu1 %v11696_v63  ;;  %v19603_v63 = vand.u32 4294901760, %v19594_v18  ;;  %v15903_v11 = vsub.f32 %v19604_v20, %v19605_v13  ;;  %v19610_v35 = vand.u32 4294901760, %v19597_v32  ;;  %v4892_v20 = vand.u32 4294901760, %v4891_v14 }
 0x35f   :  { %v4898_v4 = vsub.f32 %v19593_v59, %v19599_v22  ;;  %v11698_v22 = vpack.c.bf16 %v5789_v3, %v5782_v56  ;;  %v5802_v26 = vsub.f32 %v15859_v7, %v19608_v31  ;;  %v11700_v42 = vpack.c.bf16 %v5915_v10, %v5908_v2  ;;  %v19611_v56 = vld [vmem:[#allocation78_spill] sm:$0xff]  ;;  %v19613_v31 = vld [vmem:[#allocation85_spill] sm:$0xff] }
 0x360   :  { %v5017_v23 = vsub.f32 %v19594_v18, %v19603_v63  ;;  %19606 = vst [vmem:[#allocation32_spill] sm:$0xff] %v15903_v11  ;;  %v19609_v63 = vand.u32 4294901760, %v19596_v47  ;;  %v5928_v48 = vsub.f32 %v19597_v32, %v19610_v35  ;;  %v5025_v57 = vand.u32 4294901760, %v5024_v40  ;;  %v19614_v10 = vld [vmem:[#allocation89_spill] sm:$0xff] }
 0x361   :  { %v4899_v3 = vand.u32 4294901760, %v4898_v4  ;;  %v18471_v7 = vand.u32 4294901760, %v19614_v10  ;;  %v19615_v4 = vld [vmem:[#allocation31_spill] sm:$0xff]  ;;  %v19617_v40 = vand.u32 4294901760, %v19611_v56  ;;  %v19626_v13 = vand.u32 4294901760, %v15892_v51 }
 0x362   :  { %v5921_v18 = vsub.f32 %v19596_v47, %v19609_v63  ;;  %v5018_v59 = vand.u32 4294901760, %v5017_v23  ;;  %v5796_v63 = vand.u32 4294901760, %v5795_v37  ;;  %v5803_v47 = vand.u32 4294901760, %v5802_v26  ;;  %v19619_v26 = vld [vmem:[#allocation76_spill] sm:$0xff] }
 0x363   :  { %11507 = vmatpush3.bf16.xpose.msra.mxu0 %v11506_v50  ;;  %v5929_v50 = vand.u32 4294901760, %v5928_v48  ;;  %v11510_v23 = vpack.c.bf16 %v4899_v3, %v4892_v20  ;;  %v4905_v2 = vsub.f32 %v19611_v56, %v19617_v40  ;;  %v19620_v55 = vand.u32 4294901760, %v19619_v26  ;;  %v19623_v3 = vld [vmem:[#allocation82_spill] sm:$0xff]  ;;  %v19631_v56 = vld [vmem:[#allocation91_spill] sm:$0xff] }
 0x364   :  { %11509 = vmatprep.subr.bf16.mxu0 %v11508_v12  ;;  %v5922_v14 = vand.u32 4294901760, %v5921_v18  ;;  %v11512_v18 = vpack.c.bf16 %v5025_v57, %v5018_v59  ;;  %v19622_v48 = vand.u32 4294901760, %v19613_v31  ;;  %v5038_v20 = vsub.f32 %v19614_v10, %v18471_v7 }
 0x365   :  { %11699 = vmatpush3.bf16.xpose.msra.mxu1 %v11698_v22  ;;  %v19618_v22 = vand.u32 4294901760, %v19612_v49  ;;  %v15934_v35 = vsub.f32 %v19619_v26, %v19620_v55  ;;  %v19624_v40 = vand.u32 4294901760, %v19623_v3  ;;  %v5809_v55 = vsub.f32 %v15892_v51, %v19626_v13 }
 0x366   :  { %11701 = vmatprep.subr.bf16.mxu1 %v11700_v42  ;;  %v5031_v42 = vsub.f32 %v19613_v31, %v19622_v48  ;;  %v19627_v59 = vand.u32 4294901760, %v15903_v11  ;;  %v11704_v26 = vpack.c.bf16 %v5929_v50, %v5922_v14  ;;  %v19628_v48 = vand.u32 4294901760, %v19615_v4 }
 0x367   :  { %v4912_v37 = vsub.f32 %v19612_v49, %v19618_v22  ;;  %19621 = vst [vmem:[#allocation35_spill] sm:$0xff] %v15934_v35  ;;  %v15945_v12 = vsub.f32 %v19623_v3, %v19624_v40  ;;  %v11702_v22 = vpack.c.bf16 %v5803_v47, %v5796_v63  ;;  %v19629_v7 = vand.u32 4294901760, %v19616_v46  ;;  %v19630_v63 = vld [vmem:[#allocation39_spill] sm:$0xff] }
 0x368   :  { %v5816_v57 = vsub.f32 %v15903_v11, %v19627_v59  ;;  %v5935_v31 = vsub.f32 %v19615_v4, %v19628_v48  ;;  %v4906_v3 = vand.u32 4294901760, %v4905_v2  ;;  %v18478_v40 = vand.u32 4294901760, %v19630_v63 }
 0x369   :  { %19625 = vst [vmem:[#allocation44_spill] sm:$0xff] %v15945_v12  ;;  %v5942_v10 = vsub.f32 %v19616_v46, %v19629_v7  ;;  %v4913_v47 = vand.u32 4294901760, %v4912_v37  ;;  %v18479_v13 = vand.u32 4294901760, %v19631_v56  ;;  %v5032_v49 = vand.u32 4294901760, %v5031_v42 }
 0x36a   :  { %v5039_v51 = vand.u32 4294901760, %v5038_v20  ;;  %v18481_v14 = vand.u32 4294901760, %v15629_v39  ;;  %v18480_v50 = vand.u32 4294901760, %v15633_v30  ;;  %v5810_v59 = vand.u32 4294901760, %v5809_v55 }
 0x36b   :  { %11511 = vmatpush3.bf16.xpose.msra.mxu0 %v11510_v23  ;;  %v5817_v48 = vand.u32 4294901760, %v5816_v57  ;;  %v18482_v4 = vand.u32 4294901760, %v15934_v35  ;;  %v18488_v7 = vand.u32 4294901760, %v15945_v12  ;;  %v5936_v2 = vand.u32 4294901760, %v5935_v31 }
 0x36c   :  { %11513 = vmatprep.subr.bf16.mxu0 %v11512_v18  ;;  %v5943_v23 = vand.u32 4294901760, %v5942_v10  ;;  %v18487_v37 = vand.u32 4294901760, %v15635_v25  ;;  %v18491_v18 = vand.u32 4294901760, %v15641_v29  ;;  %v11514_v42 = vpack.c.bf16 %v4913_v47, %v4906_v3  ;;  %v19634_v3 = vld [vmem:[#allocation15_spill] sm:$0xff] }
 0x36d   :  { %11703 = vmatpush3.bf16.xpose.msra.mxu1 %v11702_v22  ;;  %v4919_v20 = vsub.f32 %v19630_v63, %v18478_v40  ;;  %v4926_v22 = vsub.f32 %v19631_v56, %v18479_v13  ;;  %v19632_v55 = vand.u32 4294901760, %v15601_v45  ;;  %v11516_v31 = vpack.c.bf16 %v5039_v51, %v5032_v49 }
 0x36e   :  { %11705 = vmatprep.subr.bf16.mxu1 %v11704_v26  ;;  %v5045_v10 = vsub.f32 %v15629_v39, %v18481_v14  ;;  %v5052_v26 = vsub.f32 %v15633_v30, %v18480_v50  ;;  %v19635_v47 = vand.u32 4294901760, %v19634_v3  ;;  %v11706_v13 = vpack.c.bf16 %v5817_v48, %v5810_v59  ;;  %v19637_v48 = vld [vmem:[#allocation62_spill] sm:$0xff]  ;;  %v19638_v14 = vld [vmem:[#allocation65_spill] sm:$0xff] }
 0x36f   :  { %v15976_v57 = vsub.f32 %v15601_v45, %v19632_v55  ;;  %v5823_v45 = vsub.f32 %v15934_v35, %v18482_v4  ;;  %v5830_v49 = vsub.f32 %v15945_v12, %v18488_v7  ;;  %v11708_v51 = vpack.c.bf16 %v5943_v23, %v5936_v2 }
 0x370   :  { %v15987_v40 = vsub.f32 %v19634_v3, %v19635_v47  ;;  %v5949_v55 = vsub.f32 %v15635_v25, %v18487_v37  ;;  %v5956_v50 = vsub.f32 %v15641_v29, %v18491_v18  ;;  %v4920_v3 = vand.u32 4294901760, %v4919_v20 }
 0x371   :  { %19633 = vst [vmem:[#allocation53_spill] sm:$0xff] %v15976_v57  ;;  %v4927_v59 = vand.u32 4294901760, %v4926_v22  ;;  %v18498_v47 = vand.u32 4294901760, %v19637_v48  ;;  %v18492_v4 = vand.u32 4294901760, %v19638_v14  ;;  %v5046_v39 = vand.u32 4294901760, %v5045_v10 }
 0x372   :  { %19636 = vst [vmem:[#allocation54_spill] sm:$0xff] %v15987_v40  ;;  %v5053_v30 = vand.u32 4294901760, %v5052_v26  ;;  %v18495_v2 = vand.u32 4294901760, %v15685_v58  ;;  %v18493_v23 = vand.u32 4294901760, %v15696_v5  ;;  %v5824_v37 = vand.u32 4294901760, %v5823_v45 }
 0x373   :  { %11515 = vmatpush3.bf16.xpose.msra.mxu0 %v11514_v42  ;;  %v5831_v7 = vand.u32 4294901760, %v5830_v49  ;;  %v18494_v25 = vand.u32 4294901760, %v15976_v57  ;;  %v18496_v42 = vand.u32 4294901760, %v15987_v40  ;;  %v5950_v20 = vand.u32 4294901760, %v5949_v55 }
 0x374   :  { %11517 = vmatprep.subr.bf16.mxu0 %v11516_v31  ;;  %v5957_v22 = vand.u32 4294901760, %v5956_v50  ;;  %v18497_v18 = vand.u32 4294901760, %v15703_v43  ;;  %v18499_v31 = vand.u32 4294901760, %v15705_v41  ;;  %v11518_v10 = vpack.c.bf16 %v4927_v59, %v4920_v3 }
 0x375   :  { %11707 = vmatpush3.bf16.xpose.msra.mxu1 %v11706_v13  ;;  %v4933_v26 = vsub.f32 %v19637_v48, %v18498_v47  ;;  %v4940_v13 = vsub.f32 %v19638_v14, %v18492_v4  ;;  %v19639_v45 = vand.u32 4294901760, %v15688_v21  ;;  %v5059_v50 = vsub.f32 %v15685_v58, %v18495_v2 }
 0x376   :  { %11709 = vmatprep.subr.bf16.mxu1 %v11708_v51  ;;  %v11520_v51 = vpack.c.bf16 %v5053_v30, %v5046_v39  ;;  %v5066_v55 = vsub.f32 %v15696_v5, %v18493_v23  ;;  %v19641_v3 = vand.u32 4294901760, %v15691_v28  ;;  %v11710_v4 = vpack.c.bf16 %v5831_v7, %v5824_v37 }
 0x377   :  { %v16018_v49 = vsub.f32 %v15688_v21, %v19639_v45  ;;  %v5837_v21 = vsub.f32 %v15976_v57, %v18494_v25  ;;  %v5844_v39 = vsub.f32 %v15987_v40, %v18496_v42  ;;  %v11712_v30 = vpack.c.bf16 %v5957_v22, %v5950_v20 }
 0x378   :  { %v16029_v59 = vsub.f32 %v15691_v28, %v19641_v3  ;;  %v5963_v45 = vsub.f32 %v15703_v43, %v18497_v18  ;;  %v5970_v23 = vsub.f32 %v15705_v41, %v18499_v31  ;;  %v4934_v28 = vand.u32 4294901760, %v4933_v26 }
 0x379   :  { %19640 = vst [vmem:[#allocation56_spill] sm:$0xff] %v16018_v49  ;;  %v4941_v7 = vand.u32 4294901760, %v4940_v13  ;;  %v18503_v37 = vand.u32 4294901760, %v15710_v15  ;;  %v18502_v3 = vand.u32 4294901760, %v15718_v0  ;;  %v5060_v25 = vand.u32 4294901760, %v5059_v50 }
 0x37a   :  { %19642 = vst [vmem:[#allocation57_spill] sm:$0xff] %v16029_v59  ;;  %v5067_v2 = vand.u32 4294901760, %v5066_v55  ;;  %v5838_v20 = vand.u32 4294901760, %v5837_v21  ;;  %v5845_v22 = vand.u32 4294901760, %v5844_v39  ;;  %v18501_v42 = vand.u32 4294901760, %v16018_v49 }
 0x37b   :  { %11519 = vmatpush3.bf16.xpose.msra.mxu0 %v11518_v10  ;;  %v18500_v18 = vand.u32 4294901760, %v16029_v59  ;;  %v5964_v47 = vand.u32 4294901760, %v5963_v45  ;;  %v5971_v31 = vand.u32 4294901760, %v5970_v23  ;;  %v11522_v10 = vpack.c.bf16 %v4941_v7, %v4934_v28 }
 0x37c   :  { %11521 = vmatprep.subr.bf16.mxu0 %v11520_v51  ;;  %v4947_v26 = vsub.f32 %v15710_v15, %v18503_v37  ;;  %v4954_v13 = vsub.f32 %v15718_v0, %v18502_v3  ;;  %v11524_v51 = vpack.c.bf16 %v5067_v2, %v5060_v25  ;;  %v5851_v50 = vsub.f32 %v16018_v49, %v18501_v42  ;;  %v19643_v2 = vld [vmem:[#allocation59_spill] sm:$0xff]  ;;  %v19669_v42 = vld [vmem:[#allocation46_spill] sm:$0xff] }
 0x37d   :  { %11711 = vmatpush3.bf16.xpose.msra.mxu1 %v11710_v4  ;;  %v11714_v4 = vpack.c.bf16 %v5845_v22, %v5838_v20  ;;  %v5858_v55 = vsub.f32 %v16029_v59, %v18500_v18  ;;  %v11716_v23 = vpack.c.bf16 %v5971_v31, %v5964_v47  ;;  %v19644_v7 = vpack.c.bf16 %v15163_v34, %v19643_v2  ;;  %v19646_v22 = vld [vmem:[#allocation81_spill] sm:$0xff]  ;;  %v19670_v3 = vld [vmem:[#allocation51_spill] sm:$0xff] }
 0x37e   :  { %11713 = vmatprep.subr.bf16.mxu1 %v11712_v30  ;;  %v4948_v21 = vand.u32 4294901760, %v4947_v26  ;;  %v4955_v39 = vand.u32 4294901760, %v4954_v13  ;;  %v5852_v30 = vand.u32 4294901760, %v5851_v50  ;;  %v19645_v20 = vpack.c.bf16 %v15171_v27, %v15165_v44  ;;  %v19648_v26 = vld [vmem:[#allocation7_spill] sm:$0xff]  ;;  %v19652_v50 = vld [vmem:[#allocation92_spill] sm:$0xff] }
 0x37f   :  { %v5859_v45 = vand.u32 4294901760, %v5858_v55  ;;  %v11530_v47 = vpack.c.bf16 %v15435_v19, %v15422_v61  ;;  %v11722_v31 = vpack.c.bf16 %v15531_v36, %v15517_v38  ;;  %v11726_v55 = vpack.c.bf16 %v15759_v17, %v15748_v6 }
 0x380   :  { %v11526_v28 = vpack.c.bf16 %v4955_v39, %v4948_v21  ;;  %v19654_v21 = vpack.c.bf16 %v15322_v8, %v15312_v33  ;;  %v19655_v39 = vpack.c.bf16 %v15329_v1, %v15324_v16  ;;  %v19671_v37 = vpack.c.bf16 %v19669_v42, %v19670_v3 }
 0x381   :  { %v11718_v25 = vpack.c.bf16 %v5859_v45, %v5852_v30  ;;  %v11730_v30 = vpack.c.bf16 %v15809_v62, %v15798_v52  ;;  %v19656_v45 = vld [vmem:[#allocation80_spill] sm:$0xff] }
 0x383   :  { %11523 = vmatpush3.bf16.xpose.msra.mxu0 %v11522_v10  ;;  %v19647_v10 = vld [vmem:[#allocation26_spill] sm:$0xff] }
 0x384   :  { %11525 = vmatprep.subr.bf16.mxu0 %v11524_v51  ;;  %v19649_v13 = vpack.c.bf16 %v19647_v10, %v19648_v26  ;;  %v19650_v51 = vld [vmem:[#allocation27_spill] sm:$0xff] }
 0x385   :  { %11715 = vmatpush3.bf16.xpose.msra.mxu1 %v11714_v4  ;;  %v19651_v4 = vpack.c.bf16 %v15249_v24, %v19650_v51 }
 0x386   :  { %11717 = vmatprep.subr.bf16.mxu1 %v11716_v23  ;;  %v19653_v23 = vpack.c.bf16 %v15265_v53, %v15263_v54 }
 0x38b   :  { %11527 = vmatpush3.bf16.xpose.msra.mxu0 %v11526_v28  ;;  %v19657_v28 = vpack.c.bf16 %v15339_v60, %v19656_v45 }
 0x38c   :  { %11529 = vmatprep.subr.bf16.mxu0 %v19644_v7  ;;  %v19659_v7 = vld [vmem:[#allocation12_spill] sm:$0xff] }
 0x38d   :  { %11719 = vmatpush3.bf16.xpose.msra.mxu1 %v11718_v25  ;;  %v19658_v25 = vld [vmem:[#allocation29_spill] sm:$0xff] }
 0x38e   :  { %11721 = vmatprep.subr.bf16.mxu1 %v19645_v20  ;;  %v19660_v20 = vpack.c.bf16 %v19658_v25, %v19659_v7 }
 0x392   :  { %9901 = vmatmul.mubr.msk.f32.vlgmr.msra.gmra.mrb[8].mxu0 %vm83_vm0, %v19215_v9 }
 0x393   :  { %11531 = vmatpush3.bf16.xpose.msra.mxu0 %v11530_v47  ;;  %9902 = vmatprep.mubr.msk.f32.mxu0 %vm83_vm0, %v19646_v22  ;;  %v19661_v47 = vld [vmem:[#allocation18_spill] sm:$0xff] }
 0x394   :  { %10117 = vmatmul.mubr.msk.f32.vlgmr.msra.gmra.mrb[8].mxu1 %vm83_vm0, %v19215_v9  ;;  %11533 = vmatprep.subr.bf16.mxu0 %v19649_v13 }
 0x395   :  { %11723 = vmatpush3.bf16.xpose.msra.mxu1 %v11722_v31  ;;  %10118 = vmatprep.mubr.msk.f32.mxu1 %vm83_vm0, %v19646_v22  ;;  %v19662_v31 = vld [vmem:[#allocation58_spill] sm:$0xff] }
 0x396   :  { %11725 = vmatprep.subr.bf16.mxu1 %v19651_v4  ;;  %9903 = vmatmul.mubr.msk.f32.gmra.mrb[10].mxu0 %vm83_vm0, %v19646_v22  ;;  %v19663_v13 = vpack.c.bf16 %v19661_v47, %v19662_v31  ;;  %v19664_v4 = vld [vmem:[#allocation34_spill] sm:$0xff] }
 0x397   :  { %9936 = vmatprep.mubr.f32.mxu0 %v19652_v50  ;;  %v19676_v47 = vld [vmem:[#allocation78_spill] sm:$0xff] }
 0x398   :  { %10119 = vmatmul.mubr.msk.f32.gmra.mrb[10].mxu1 %vm83_vm0, %v19646_v22 }
 0x399   :  { %10152 = vmatprep.mubr.f32.mxu1 %v19652_v50 }
 0x39b   :  { %11535 = vmatpush3.bf16.xpose.msra.mxu0 %v19653_v23 }
 0x39c   :  { %11537 = vmatprep.subr.bf16.mxu0 %v19654_v21  ;;  %v19666_v21 = vld [vmem:[#allocation20_spill] sm:$0xff] }
 0x39d   :  { %11727 = vmatpush3.bf16.xpose.msra.mxu1 %v11726_v55  ;;  %v19665_v55 = vld [vmem:[#allocation40_spill] sm:$0xff] }
 0x39e   :  { %11729 = vmatprep.subr.bf16.mxu1 %v19655_v39  ;;  %v11734_v23 = vpack.c.bf16 %v19665_v55, %v19664_v4  ;;  %v19667_v39 = vld [vmem:[#allocation10_spill] sm:$0xff]  ;;  %v19678_v55 = vld [vmem:[#allocation89_spill] sm:$0xff] }
 0x39f   :  { %v19668_v18 = vpack.c.bf16 %v19666_v21, %v19667_v39  ;;  %v19679_v4 = vld [vmem:[#allocation85_spill] sm:$0xff] }
 0x3a0   :  { %v19680_v21 = vpack.c.bf16 %v19678_v55, %v19679_v4 }
 0x3a3   :  { %11539 = vmatpush3.bf16.xpose.msra.mxu0 %v19657_v28  ;;  %v19672_v28 = vld [vmem:[#allocation70_spill] sm:$0xff] }
 0x3a4   :  { %11541 = vmatprep.subr.bf16.mxu0 %v19660_v20  ;;  %v19673_v20 = vpack.c.bf16 %v19597_v32, %v19672_v28  ;;  %v19714_v32 = vld [vmem:[#allocation79_spill] sm:$0xff] }
 0x3a5   :  { %11731 = vmatpush3.bf16.xpose.msra.mxu1 %v11730_v30  ;;  %v19674_v30 = vld [vmem:[#allocation43_spill] sm:$0xff] }
 0x3a6   :  { %11733 = vmatprep.subr.bf16.mxu1 %v19663_v13  ;;  %v11738_v22 = vpack.c.bf16 %v15903_v11, %v19674_v30  ;;  %v19675_v13 = vld [vmem:[#allocation73_spill] sm:$0xff]  ;;  %v19684_v11 = vld [vmem:[#allocation38_spill] sm:$0xff] }
 0x3a7   :  { %v19677_v31 = vpack.c.bf16 %v19675_v13, %v19676_v47  ;;  %v19685_v30 = vld [vmem:[#allocation33_spill] sm:$0xff] }
 0x3a8   :  { %v19686_v13 = vpack.c.bf16 %v19684_v11, %v19685_v30  ;;  %v19712_v11 = vld [vmem:[#allocation63_spill] sm:$0xff] }
 0x3ab   :  { %11543 = vmatpush3.bf16.xpose.msra.mxu0 %v19668_v18  ;;  %v19681_v18 = vld [vmem:[#allocation31_spill] sm:$0xff] }
 0x3ac   :  { %11545 = vmatprep.subr.bf16.mxu0 %v19671_v37  ;;  %v19682_v37 = vpack.c.bf16 %v19616_v46, %v19681_v18 }
 0x3ad   :  { %11735 = vmatpush3.bf16.xpose.msra.mxu1 %v11734_v23  ;;  %v11742_v23 = vpack.c.bf16 %v15945_v12, %v15934_v35  ;;  %v19690_v12 = vpack.c.bf16 %v15696_v5, %v15685_v58 }
 0x3ae   :  { %11737 = vmatprep.subr.bf16.mxu1 %v19673_v20  ;;  %v19683_v20 = vpack.c.bf16 %v19631_v56, %v19630_v63 }
 0x3b3   :  { %11547 = vmatpush3.bf16.xpose.msra.mxu0 %v19677_v31  ;;  %v19687_v31 = vld [vmem:[#allocation36_spill] sm:$0xff] }
 0x3b4   :  { %11549 = vmatprep.subr.bf16.mxu0 %v19680_v21  ;;  %v19688_v21 = vpack.c.bf16 %v15641_v29, %v19687_v31  ;;  %v19711_v31 = vld [vmem:[#allocation23_spill] sm:$0xff] }
 0x3b5   :  { %11739 = vmatpush3.bf16.xpose.msra.mxu1 %v11738_v22  ;;  %v11746_v22 = vpack.c.bf16 %v15987_v40, %v15976_v57 }
 0x3b6   :  { %11741 = vmatprep.subr.bf16.mxu1 %v19682_v37  ;;  %v19689_v37 = vpack.c.bf16 %v19638_v14, %v19637_v48  ;;  %v19710_v14 = vld [vmem:[#allocation24_spill] sm:$0xff] }
 0x3bb   :  { %11551 = vmatpush3.bf16.xpose.msra.mxu0 %v19683_v20  ;;  %v19692_v20 = vpack.c.bf16 %v15718_v0, %v15710_v15 }
 0x3bc   :  { %11553 = vmatprep.subr.bf16.mxu0 %v19686_v13  ;;  %v19691_v13 = vpack.c.bf16 %v15705_v41, %v15703_v43  ;;  %v19709_v43 = vld [vmem:[#allocation21_spill] sm:$0xff] }
 0x3bd   :  { %11743 = vmatpush3.bf16.xpose.msra.mxu1 %v11742_v23  ;;  %v11750_v23 = vpack.c.bf16 %v16029_v59, %v16018_v49  ;;  %v19698_v59 = vld [vmem:[#allocation61_spill] sm:$0xff] }
 0x3be   :  { %11745 = vmatprep.subr.bf16.mxu1 %v19688_v21  ;;  %v19693_v21 = vld [vmem:[#allocation52_spill] sm:$0xff] }
 0x3c3   :  { %11555 = vmatpush3.bf16.xpose.msra.mxu0 %v19689_v37  ;;  %v19694_v37 = vld [vmem:[#allocation64_spill] sm:$0xff] }
 0x3c4   :  { %11557 = vmatprep.subr.bf16.mxu0 %v19690_v12  ;;  %v19695_v12 = vld [vmem:[#allocation55_spill] sm:$0xff] }
 0x3c5   :  { %11747 = vmatpush3.bf16.xpose.msra.mxu1 %v11746_v22  ;;  %v19696_v22 = vld [vmem:[#allocation83_spill] sm:$0xff] }
 0x3c6   :  { %11749 = vmatprep.subr.bf16.mxu1 %v19691_v13  ;;  %v19697_v13 = vld [vmem:[#allocation74_spill] sm:$0xff] }
 0x3cb   :  { %11559 = vmatpush3.bf16.xpose.msra.mxu0 %v19692_v20  ;;  %v19699_v20 = vld [vmem:[#allocation28_spill] sm:$0xff] }
 0x3cc   :  { %11561 = vmatprep.subr.bf16.mxu0 %v19693_v21  ;;  %v19706_v21 = vld [vmem:[#allocation14_spill] sm:$0xff] }
 0x3cd   :  { %11751 = vmatpush3.bf16.xpose.msra.mxu1 %v11750_v23  ;;  %v19700_v23 = vld [vmem:[#allocation93_spill] sm:$0xff] }
 0x3ce   :  { %11753 = vmatprep.subr.bf16.mxu1 %v19694_v37  ;;  %v19702_v37 = vld [vmem:[#allocation48_spill] sm:$0xff] }
 0x3d2   :  { %9937 = vmatmul.mubr.f32.vlgmr.msra.gmra.mrb[8].mxu0 %v19652_v50 }
 0x3d3   :  { %11563 = vmatpush3.bf16.xpose.msra.mxu0 %v19695_v12  ;;  %9938 = vmatprep.mubr.f32.mxu0 %v19696_v22  ;;  %v19701_v12 = vld [vmem:[#allocation42_spill] sm:$0xff] }
 0x3d4   :  { %10153 = vmatmul.mubr.f32.vlgmr.msra.gmra.mrb[8].mxu1 %v19652_v50  ;;  %11565 = vmatprep.subr.bf16.mxu0 %v19697_v13  ;;  %v19703_v50 = vld [vmem:[#allocation50_spill] sm:$0xff] }
 0x3d5   :  { %11755 = vmatpush3.bf16.xpose.msra.mxu1 %v19698_v59  ;;  %10154 = vmatprep.mubr.f32.mxu1 %v19696_v22  ;;  %v19704_v13 = vld [vmem:[#allocation86_spill] sm:$0xff]  ;;  %v19705_v59 = vld [vmem:[#allocation67_spill] sm:$0xff] }
 0x3d6   :  { %11757 = vmatprep.subr.bf16.mxu1 %v19699_v20  ;;  %9939 = vmatmul.mubr.f32.gmra.mrb[10].mxu0 %v19696_v22  ;;  %v19707_v20 = vld [vmem:[#allocation8_spill] sm:$0xff] }
 0x3d7   :  { %9972 = vmatprep.mubr.f32.mxu0 %v19700_v23 }
 0x3d8   :  { %10155 = vmatmul.mubr.f32.gmra.mrb[10].mxu1 %v19696_v22  ;;  %v19708_v22 = vld [vmem:[#allocation75_spill] sm:$0xff] }
 0x3d9   :  { %10188 = vmatprep.mubr.f32.mxu1 %v19700_v23 }
 0x3db   :  { %11567 = vmatpush3.bf16.xpose.msra.mxu0 %v19701_v12 }
 0x3dc   :  { %11569 = vmatprep.subr.bf16.mxu0 %v19702_v37 }
 0x3dd   :  { %11759 = vmatpush3.bf16.xpose.msra.mxu1 %v19703_v50 }
 0x3de   :  { %11761 = vmatprep.subr.bf16.mxu1 %v19704_v13 }
 0x3e3   :  { %11571 = vmatpush3.bf16.xpose.msra.mxu0 %v19705_v59 }
 0x3e4   :  { %11573 = vmatprep.subr.bf16.mxu0 %v19706_v21 }
 0x3e5   :  { %11763 = vmatpush3.bf16.xpose.msra.mxu1 %v19707_v20  ;;  %v16181_v49 = vpop.f32.mrb[4].mxu0 }
 0x3e6   :  { %v16183_v0 = vpop.f32.mrb[5].mxu0  ;;  %11765 = vmatprep.subr.bf16.mxu1 %v19708_v22  ;;  %v4332_v13 = vsel %vm2102_vm3, %v16181_v49, -inf }
 0x3e7   :  { %v16186_v15 = vpop.f32.mrb[4].mxu1  ;;  %v4341_v20 = vsel %vm2102_vm3, %v16183_v0, -inf }
 0x3e8   :  { %v16188_v12 = vpop.f32.mrb[5].mxu1  ;;  %v4350_v40 = vsel %vm2102_vm3, %v16186_v15, -inf }
 0x3e9   :  { %v3411_v37 = vpop.f32.mrb[6].mxu0  ;;  %v4359_v48 = vsel %vm2102_vm3, %v16188_v12, -inf }
 0x3ea   :  { %v4333_v59 = vsel %vm2104_vm4, %v3411_v37, -inf  ;;  %v16193_v50 = vpop.f32.mrb[7].mxu0 }
 0x3eb   :  { %v4334_v21 = vmax.f32 %v4332_v13, %v4333_v59  ;;  %v4315_v41 = vpop.f32.mrb[6].mxu1  ;;  %v4342_v22 = vsel %vm2104_vm4, %v16193_v50, -inf  ;;  %11575 = vmatpush3.bf16.xpose.msra.mxu0 %v19709_v43 }
 0x3ec   :  { %v4351_v57 = vsel %vm2104_vm4, %v4315_v41, -inf  ;;  %v4343_v5 = vmax.f32 %v4341_v20, %v4342_v22  ;;  %v16203_v58 = vpop.f32.mrb[7].mxu1  ;;  %11577 = vmatprep.subr.bf16.mxu0 %v19710_v14 }
 0x3ed   :  { %v4335_v59 = vrot.slane %v4334_v21, 4  ;;  %v4352_v13 = vmax.f32 %v4350_v40, %v4351_v57  ;;  %v4360_v29 = vsel %vm2104_vm4, %v16203_v58, -inf  ;;  %11767 = vmatpush3.bf16.xpose.msra.mxu1 %v19711_v31  ;;  %v19713_v40 = vld [vmem:[#allocation71_spill] sm:$0xff] }
 0x3ee   :  { %v4344_v43 = vrot.slane %v4343_v5, 4  ;;  %v4361_v35 = vmax.f32 %v4359_v48, %v4360_v29  ;;  %11769 = vmatprep.subr.bf16.mxu1 %v19712_v11  ;;  %v19715_v48 = vld [vmem:[#allocation88_spill] sm:$0xff] }
 0x3ef   :  { %v4336_v30 = vmax.f32 %v4334_v21, %v4335_v59  ;;  %v4353_v22 = vrot.slane %v4352_v13, 4 }
 0x3f0   :  { %v4345_v20 = vmax.f32 %v4343_v5, %v4344_v43  ;;  %v4362_v56 = vrot.slane %v4361_v35, 4  ;;  %v19716_v5 = vld [vmem:[#allocation90_spill] sm:$0xff] }
 0x3f1   :  { %v4337_v63 = vrot.slane %v4336_v30, 2  ;;  %v4354_v14 = vmax.f32 %v4352_v13, %v4353_v22 }
 0x3f2   :  { %v4346_v46 = vrot.slane %v4345_v20, 2  ;;  %v4363_v18 = vmax.f32 %v4361_v35, %v4362_v56 }
 0x3f3   :  { %v4338_v55 = vmax.f32 %v4336_v30, %v4337_v63  ;;  %v4355_v4 = vrot.slane %v4354_v14, 2  ;;  %11579 = vmatpush3.bf16.xpose.msra.mxu0 %v19713_v40  ;;  %v19718_v30 = vld [vmem:[#allocation49_spill] sm:$0xff] }
 0x3f4   :  { %v4347_v57 = vmax.f32 %v4345_v20, %v4346_v46  ;;  %v4364_v47 = vrot.slane %v4363_v18, 2  ;;  %11581 = vmatprep.subr.bf16.mxu0 %v19714_v32  ;;  %v19717_v46 = vld [vmem:[#allocation45_spill] sm:$0xff] }
 0x3f5   :  { %v4339_v31 = vrot.slane %v4338_v55, 1  ;;  %v4356_v29 = vmax.f32 %v4354_v14, %v4355_v4  ;;  %11771 = vmatpush3.bf16.xpose.msra.mxu1 %v19715_v48  ;;  %v19719_v4 = vld [vmem:[#allocation30_spill] sm:$0xff] }
 0x3f6   :  { %v4348_v21 = vrot.slane %v4347_v57, 1  ;;  %v4365_v59 = vmax.f32 %v4363_v18, %v4364_v47  ;;  %11773 = vmatprep.subr.bf16.mxu1 %v19716_v5 }
 0x3f7   :  { %v4340_v43 = vmax.f32 %v4338_v55, %v4339_v31  ;;  %v4357_v13 = vrot.slane %v4356_v29, 1 }
 0x3f8   :  { %v4349_v22 = vmax.f32 %v4347_v57, %v4348_v21  ;;  %v4366_v35 = vrot.slane %v4365_v59, 1  ;;  %v19720_v57 = vld [vmem:[#allocation17_spill] sm:$0xff] }
 0x3f9   :  { %vm4368_vm15 = vcmp.eq.f32.partialorder %v16181_v49, %v4340_v43  ;;  %vm4372_vm1 = vcmp.eq.f32.partialorder %v3411_v37, %v4340_v43  ;;  %v4358_v56 = vmax.f32 %v4356_v29, %v4357_v13 }
 0x3fa   :  { %v4376_v63 = vsel %vm4368_vm15, %v19717_v46, 10.0  ;;  %v4380_v20 = vsel %vm4372_vm1, %v19718_v30, 10.0  ;;  %vm4369_vm2 = vcmp.eq.f32.partialorder %v16183_v0, %v4349_v22  ;;  %vm4373_vm5 = vcmp.eq.f32.partialorder %v16193_v50, %v4349_v22 }
 0x3fb   :  { %v4384_v14 = vsel %vm2102_vm3, %v4376_v63, inf  ;;  %v4385_v47 = vsel %vm2104_vm4, %v4380_v20, inf  ;;  %vm4370_vm6 = vcmp.eq.f32.partialorder %v16186_v15, %v4358_v56  ;;  %vm4374_vm7 = vcmp.eq.f32.partialorder %v4315_v41, %v4358_v56  ;;  %11583 = vmatpush3.bf16.xpose.msra.mxu0 %v19719_v4  ;;  %v19721_v41 = vld [vmem:[#allocation11_spill] sm:$0xff]  ;;  %v19722_v20 = vld [vmem:[#allocation41_spill] sm:$0xff] }
 0x3fc   :  { %v4386_v55 = vmin.f32 %v4384_v14, %v4385_v47  ;;  %v4378_v18 = vsel %vm4370_vm6, %v19717_v46, 10.0  ;;  %v4382_v31 = vsel %vm4374_vm7, %v19718_v30, 10.0  ;;  %v4377_v37 = vsel %vm4369_vm2, %v19717_v46, 10.0  ;;  %11585 = vmatprep.subr.bf16.mxu0 %v19720_v57 }
 0x3fd   :  { %v4402_v50 = vsel %vm2102_vm3, %v4378_v18, inf  ;;  %v4403_v29 = vsel %vm2104_vm4, %v4382_v31, inf  ;;  %v4381_v21 = vsel %vm4373_vm5, %v19718_v30, 10.0  ;;  %v4393_v43 = vsel %vm2102_vm3, %v4377_v37, inf  ;;  %11775 = vmatpush3.bf16.xpose.msra.mxu1 %v19721_v41 }
 0x3fe   :  { %v4387_v13 = vrot.slane %v4386_v55, 4  ;;  %v4404_v22 = vmin.f32 %v4402_v50, %v4403_v29  ;;  %v4394_v56 = vsel %vm2104_vm4, %v4381_v21, inf  ;;  %v4367_v63 = vmax.f32 %v4365_v59, %v4366_v35  ;;  %11777 = vmatprep.subr.bf16.mxu1 %v19722_v20  ;;  %v19723_v21 = vld [vmem:[#allocation5_spill] sm:$0xff] }
 0x3ff   :  { %v4395_v14 = vmin.f32 %v4393_v43, %v4394_v56 }
 0x400   :  { %v4388_v47 = vmin.f32 %v4386_v55, %v4387_v13  ;;  %v4405_v57 = vrot.slane %v4404_v22, 4  ;;  %vm4371_vm8 = vcmp.eq.f32.partialorder %v16188_v12, %v4367_v63  ;;  %vm4375_vm9 = vcmp.eq.f32.partialorder %v16203_v58, %v4367_v63  ;;  %v19724_v58 = vld [vmem:[#allocation69_spill] sm:$0xff] }
 0x401   :  { %v4396_v18 = vrot.slane %v4395_v14, 4  ;;  %v4379_v31 = vsel %vm4371_vm8, %v19717_v46, 10.0  ;;  %v4383_v37 = vsel %vm4375_vm9, %v19718_v30, 10.0  ;;  %v4320_v55 = vmul.f32 2.0, %v16181_v49  ;;  %v19725_v46 = vld [vmem:[#allocation68_spill] sm:$0xff] }
 0x402   :  { %v4389_v41 = vrot.slane %v4388_v47, 2  ;;  %v4406_v4 = vmin.f32 %v4404_v22, %v4405_v57  ;;  %v4411_v50 = vsel %vm2102_vm3, %v4379_v31, inf  ;;  %v4412_v59 = vsel %vm2104_vm4, %v4383_v37, inf  ;;  %v19726_v30 = vld [vmem:[#allocation4_spill] sm:$0xff] }
 0x403   :  { %v4397_v35 = vmin.f32 %v4395_v14, %v4396_v18  ;;  %v4413_v29 = vmin.f32 %v4411_v50, %v4412_v59  ;;  %11587 = vmatpush3.bf16.xpose.msra.mxu0 %v19723_v21  ;;  %v4322_v57 = vmul.f32 2.0, %v16186_v15  ;;  %v4321_v14 = vmul.f32 2.0, %v16183_v0 }
 0x404   :  { %v4390_v43 = vmin.f32 %v4388_v47, %v4389_v41  ;;  %v4407_v13 = vrot.slane %v4406_v4, 2  ;;  %11589 = vmatprep.subr.bf16.mxu0 %v19724_v58  ;;  %v8932_v50 = vadd.f32 -1.0, %v4320_v55  ;;  %v19727_v47 = vand.u32 4294901760, %v19643_v2 }
 0x405   :  { %v4398_v56 = vrot.slane %v4397_v35, 2  ;;  %v4414_v63 = vrot.slane %v4413_v29, 4  ;;  %11779 = vmatpush3.bf16.xpose.msra.mxu1 %v19725_v46  ;;  %v19728_v59 = vand.u32 4294901760, %v15163_v34  ;;  %v19729_v15 = vand.u32 4294901760, %v15165_v44  ;;  %v19732_v44 = vld [vmem:[#allocation37_spill] sm:$0xff] }
 0x406   :  { %v4391_v22 = vrot.slane %v4390_v43, 1  ;;  %v4408_v31 = vmin.f32 %v4406_v4, %v4407_v13  ;;  %11781 = vmatprep.subr.bf16.mxu1 %v19726_v30  ;;  %v19730_v4 = vand.u32 4294901760, %v15171_v27  ;;  %v8934_v30 = vadd.f32 -1.0, %v4322_v57 }
 0x407   :  { %v4399_v18 = vmin.f32 %v4397_v35, %v4398_v56  ;;  %v4415_v37 = vmin.f32 %v4413_v29, %v4414_v63  ;;  %v11592_v58 = vpack.c.bf16 %v19728_v59, %v19727_v47  ;;  %v4323_v0 = vmul.f32 2.0, %v16188_v12  ;;  %v19731_v63 = vld [vmem:[#allocation22_spill] sm:$0xff] }
 0x408   :  { %v4392_v49 = vmin.f32 %v4390_v43, %v4391_v22  ;;  %v4409_v41 = vrot.slane %v4408_v31, 1  ;;  %v11784_v13 = vpack.c.bf16 %v19730_v4, %v19729_v15  ;;  %v8933_v55 = vadd.f32 -1.0, %v4321_v14 }
 0x409   :  { %v4400_v21 = vrot.slane %v4399_v18, 1  ;;  %v4416_v46 = vrot.slane %v4415_v37, 2  ;;  %v4328_v2 = vmul.f32 0.1, %v8932_v50  ;;  %v4330_v27 = vmul.f32 0.1, %v8934_v30 }
 0x40a   :  { %v4420_v35 = vmul.f32 0.1, %v4392_v49  ;;  %v4410_v29 = vmin.f32 %v4408_v31, %v4409_v41  ;;  %v8935_v15 = vadd.f32 -1.0, %v4323_v0  ;;  %v4329_v12 = vmul.f32 0.1, %v8933_v55 }
 0x40b   :  { %v4401_v43 = vmin.f32 %v4399_v18, %v4400_v21  ;;  %v4417_v56 = vmin.f32 %v4415_v37, %v4416_v46  ;;  %11591 = vmatpush3.bf16.xpose.msra.mxu0 %v19731_v63  ;;  %v19733_v46 = vand.u32 4294901760, %v15422_v61  ;;  %v19734_v21 = vand.u32 4294901760, %v15435_v19 }
 0x40c   :  { %v4424_v34 = vadd.f32 0.05, %v4420_v35  ;;  %v4422_v22 = vmul.f32 0.1, %v4410_v29  ;;  %11593 = vmatprep.subr.bf16.mxu0 %v11592_v58  ;;  %v19735_v58 = vand.u32 4294901760, %v19648_v26  ;;  %v19736_v49 = vand.u32 4294901760, %v19647_v10 }
 0x40d   :  { %v4421_v47 = vmul.f32 0.1, %v4401_v43  ;;  %v4418_v59 = vrot.slane %v4417_v56, 1  ;;  %11783 = vmatpush3.bf16.xpose.msra.mxu1 %v19732_v44  ;;  %v11594_v18 = vpack.c.bf16 %v19734_v21, %v19733_v46  ;;  %v19737_v35 = vand.u32 4294901760, %v15517_v38 }
 0x40e   :  { %v4428_v57 = vadd.f32 %v4424_v34, %v4328_v2  ;;  %v4426_v4 = vadd.f32 0.05, %v4422_v22  ;;  %11785 = vmatprep.subr.bf16.mxu1 %v11784_v13  ;;  %v11596_v41 = vpack.c.bf16 %v19736_v49, %v19735_v58  ;;  %v19738_v13 = vand.u32 4294901760, %v15531_v36  ;;  %v19741_v34 = vld [vmem:[#allocation84_spill] sm:$0xff] }
 0x40f   :  { %v4425_v31 = vadd.f32 0.05, %v4421_v47  ;;  %v4419_v14 = vmin.f32 %v4417_v56, %v4418_v59  ;;  %v4331_v55 = vmul.f32 0.1, %v8935_v15  ;;  %v19739_v19 = vand.u32 4294901760, %v19650_v51 }
 0x410   :  { %v4432_v37 = vmax.f32 %v4428_v57, 0.0  ;;  %v4430_v50 = vadd.f32 %v4426_v4, %v4330_v27  ;;  %v11786_v29 = vpack.c.bf16 %v19738_v13, %v19737_v35  ;;  %v19740_v61 = vand.u32 4294901760, %v15249_v24  ;;  %v19757_v13 = vld [vmem:[#allocation58_spill] sm:$0xff] }
 0x411   :  { %v4429_v30 = vadd.f32 %v4425_v31, %v4329_v12  ;;  %v4423_v0 = vmul.f32 0.1, %v4419_v14  ;;  %v19742_v47 = vand.u32 4294901760, %v15263_v54  ;;  %v19743_v59 = vand.u32 4294901760, %v15265_v53 }
 0x412   :  { %9973 = vmatmul.mubr.f32.vlgmr.msra.gmra.mrb[8].mxu0 %v19700_v23  ;;  %v11788_v43 = vpack.c.bf16 %v19740_v61, %v19739_v19  ;;  %v4436_v56 = vmin.f32 %v4432_v37, 1.0  ;;  %v4434_v26 = vmax.f32 %v4430_v50, 0.0  ;;  %v19744_v15 = vand.u32 4294901760, %v15312_v33  ;;  %v19750_v33 = vld [vmem:[#allocation47_spill] sm:$0xff] }
 0x413   :  { %v4433_v2 = vmax.f32 %v4429_v30, 0.0  ;;  %v4427_v10 = vadd.f32 0.05, %v4423_v0  ;;  %11595 = vmatpush3.bf16.xpose.msra.mxu0 %v11594_v18  ;;  %9974 = vmatprep.mubr.f32.mxu0 %v19741_v34  ;;  %v11598_v27 = vpack.c.bf16 %v19743_v59, %v19742_v47  ;;  %v19745_v57 = vand.u32 4294901760, %v15322_v8 }
 0x414   :  { %10189 = vmatmul.mubr.f32.vlgmr.msra.gmra.mrb[8].mxu1 %v19700_v23  ;;  %11597 = vmatprep.subr.bf16.mxu0 %v11596_v41  ;;  %v4438_v24 = vmin.f32 %v4434_v26, 1.0  ;;  %v19746_v31 = vand.u32 4294901760, %v15748_v6  ;;  %v19747_v14 = vand.u32 4294901760, %v15759_v17  ;;  %v19748_v54 = vand.u32 4294901760, %v15324_v16  ;;  %v19767_v26 = vld [vmem:[#allocation34_spill] sm:$0xff]  ;;  %v6742_v23 = vld [vmem:[%s17847_s0 + $0x7d0] sm:$0xff] }
 0x415   :  { %v4437_v38 = vmin.f32 %v4433_v2, 1.0  ;;  %v4431_v36 = vadd.f32 %v4427_v10, %v4331_v55  ;;  %11787 = vmatpush3.bf16.xpose.msra.mxu1 %v11786_v29  ;;  %10190 = vmatprep.mubr.f32.mxu1 %v19741_v34  ;;  %v11600_v4 = vpack.c.bf16 %v19745_v57, %v19744_v15  ;;  %v19749_v53 = vand.u32 4294901760, %v15329_v1  ;;  %v19759_v55 = vld [vmem:[#allocation18_spill] sm:$0xff]  ;;  %v19769_v10 = vld [vmem:[#allocation40_spill] sm:$0xff]  ;;  %v19778_v15 = vld [vmem:[#allocation85_spill] sm:$0xff] }
 0x416   :  { %11789 = vmatprep.subr.bf16.mxu1 %v11788_v43  ;;  %9975 = vmatmul.mubr.f32.gmra.mrb[10].mxu0 %v19741_v34  ;;  %v11790_v46 = vpack.c.bf16 %v19747_v14, %v19746_v31  ;;  %v19751_v17 = vand.u32 4294901760, %v19656_v45  ;;  %v19752_v50 = vand.u32 4294901760, %v15339_v60  ;;  %v19753_v16 = vand.u32 4294901760, %v19659_v7  ;;  %v19782_v14 = vld [vmem:[#allocation43_spill] sm:$0xff] }
 0x417   :  { %v4444_v51 = vcombine.low %v4436_v56, %v4437_v38  ;;  %v4435_v22 = vmax.f32 %v4431_v36, 0.0  ;;  %10008 = vmatprep.mubr.msk.f32.mxu0 %vm83_vm0, %v19215_v9  ;;  %v11792_v21 = vpack.c.bf16 %v19749_v53, %v19748_v54  ;;  %v19754_v1 = vand.u32 4294901760, %v19658_v25 }
 0x418   :  { %10191 = vmatmul.mubr.f32.gmra.mrb[10].mxu1 %v19741_v34  ;;  %v11602_v58 = vpack.c.bf16 %v19752_v50, %v19751_v17  ;;  %v19755_v30 = vand.u32 4294901760, %v15798_v52  ;;  %v19756_v0 = vand.u32 4294901760, %v15809_v62  ;;  %v19758_v29 = vand.u32 4294901760, %v19757_v13  ;;  %v19763_v52 = vld [vmem:[#allocation20_spill] sm:$0xff]  ;;  %v19790_v17 = vld [vmem:[#allocation39_spill] sm:$0xff] }
 0x419   :  { %v4439_v12 = vmin.f32 %v4435_v22, 1.0  ;;  %10224 = vmatprep.mubr.msk.f32.mxu1 %vm83_vm0, %v19215_v9  ;;  %v4452_v18 = vrot.slane %v4444_v51, %v19750_v33  ;;  %v11604_v49 = vpack.c.bf16 %v19754_v1, %v19753_v16  ;;  %v19760_v19 = vand.u32 4294901760, %v19759_v55  ;;  %v19772_v51 = vld [vmem:[#allocation66_spill] sm:$0xff]  ;;  %v19798_v13 = vld [vmem:[#allocation35_spill] sm:$0xff]  ;;  %v19800_v55 = vld [vmem:[#allocation44_spill] sm:$0xff] }
 0x41a   :  { %v11794_v35 = vpack.c.bf16 %v19756_v0, %v19755_v30  ;;  %v19762_v60 = vand.u32 4294901760, %v19667_v39  ;;  %v19764_v62 = vand.u32 4294901760, %v19763_v52  ;;  %v19765_v7 = vand.u32 4294901760, %v19670_v3  ;;  %v19774_v39 = vld [vmem:[#allocation78_spill] sm:$0xff]  ;;  %v19776_v3 = vld [vmem:[#allocation73_spill] sm:$0xff] }
 0x41b   :  { %v4445_v8 = vcombine.low %v4438_v24, %v4439_v12  ;;  %11599 = vmatpush3.bf16.xpose.msra.mxu0 %v11598_v27  ;;  %v11796_v45 = vpack.c.bf16 %v19760_v19, %v19758_v29  ;;  %v19766_v43 = vand.u32 4294901760, %v19669_v42  ;;  %v19768_v2 = vand.u32 4294901760, %v19767_v26  ;;  %v19796_v30 = vld [vmem:[#allocation38_spill] sm:$0xff]  ;;  %v19808_v26 = vld [vmem:[#allocation65_spill] sm:$0xff] }
 0x41c   :  { %11601 = vmatprep.subr.bf16.mxu0 %v11600_v4  ;;  %v11606_v25 = vpack.c.bf16 %v19764_v62, %v19762_v60  ;;  %v19770_v38 = vand.u32 4294901760, %v19769_v10  ;;  %v19771_v24 = vand.u32 4294901760, %v19672_v28  ;;  %v19773_v22 = vand.u32 4294901760, %v19772_v51  ;;  %v19780_v4 = vld [vmem:[#allocation89_spill] sm:$0xff]  ;;  %v19784_v28 = vld [vmem:[#allocation32_spill] sm:$0xff]  ;;  %v19804_v62 = vld [vmem:[#allocation87_spill] sm:$0xff] }
 0x41d   :  { %v4459_v37 = vrot.slane %v4445_v8, %v19750_v33  ;;  %11791 = vmatpush3.bf16.xpose.msra.mxu1 %v11790_v46  ;;  %v11608_v56 = vpack.c.bf16 %v19766_v43, %v19765_v7  ;;  %v19775_v59 = vand.u32 4294901760, %v19774_v39  ;;  %v19777_v27 = vand.u32 4294901760, %v19776_v3  ;;  %v19788_v8 = vld [vmem:[#allocation9_spill] sm:$0xff]  ;;  %v19802_v60 = vld [vmem:[#allocation36_spill] sm:$0xff]  ;;  %v19806_v43 = vld [vmem:[#allocation62_spill] sm:$0xff] }
 0x41e   :  { %11793 = vmatprep.subr.bf16.mxu1 %v11792_v21  ;;  %v11798_v36 = vpack.c.bf16 %v19770_v38, %v19768_v2  ;;  %v11800_v47 = vpack.c.bf16 %v19773_v22, %v19771_v24  ;;  %v19779_v57 = vand.u32 4294901760, %v19778_v15  ;;  %v19781_v12 = vand.u32 4294901760, %v19780_v4  ;;  %v19786_v21 = vld [vmem:[#allocation31_spill] sm:$0xff]  ;;  %v19810_v38 = vld [vmem:[#allocation77_spill] sm:$0xff]  ;;  %v19812_v24 = vld [vmem:[#allocation2_spill] sm:$0xff] }
 0x41f   :  { %v4460_v6 = vcombine.low %v4452_v18, %v4459_v37  ;;  %v11610_v42 = vpack.c.bf16 %v19777_v27, %v19775_v59  ;;  %v19783_v46 = vand.u32 4294901760, %v19782_v14  ;;  %v19785_v54 = vand.u32 4294901760, %v19784_v28  ;;  %v19816_v59 = vld [vmem:[#allocation54_spill] sm:$0xff] }
 0x420   :  { %v11612_v31 = vpack.c.bf16 %v19781_v12, %v19779_v57  ;;  %v19787_v18 = vand.u32 4294901760, %v19786_v21  ;;  %v19789_v37 = vand.u32 4294901760, %v19788_v8  ;;  %v19791_v50 = vand.u32 4294901760, %v19790_v17  ;;  %v19820_v57 = vld [vmem:[#allocation16_spill] sm:$0xff] }
 0x421   :  { %v4467_v41 = vrot.slane %v4460_v6, %v19750_v33  ;;  %v11802_v53 = vpack.c.bf16 %v19785_v54, %v19783_v46  ;;  %v19797_v0 = vand.u32 4294901760, %v19796_v30  ;;  %v19799_v29 = vand.u32 4294901760, %v19798_v13  ;;  %v19824_v46 = vld [vmem:[#allocation25_spill] sm:$0xff]  ;;  %v19831_v17 = vld [vmem:[#allocation64_spill] sm:$0xff]  ;;  %v19841_v13 = vld [vmem:[#allocation67_spill] sm:$0xff] }
 0x422   :  { %v11804_v6 = vpack.c.bf16 %v19789_v37, %v19787_v18  ;;  %v19801_v19 = vand.u32 4294901760, %v19800_v55  ;;  %v19803_v52 = vand.u32 4294901760, %v19802_v60  ;;  %v19809_v2 = vand.u32 4294901760, %v19808_v26  ;;  %v19828_v18 = vld [vmem:[#allocation57_spill] sm:$0xff]  ;;  %v19838_v30 = vld [vmem:[#allocation48_spill] sm:$0xff] }
 0x423   :  { %4469 = vst.msk [vmem:[%s17848_s1 + $0x4] sm:$0xf] %vm14967_vm14, %v4467_v41  ;;  %11603 = vmatpush3.bf16.xpose.msra.mxu0 %v11602_v58  ;;  %v19792_v58 = vld [vmem:[#allocation91_spill] sm:$0xff]  ;;  %v19813_v51 = vand.u32 4294901760, %v19812_v24  ;;  %v19817_v3 = vand.u32 4294901760, %v19816_v59  ;;  %v19821_v4 = vand.u32 4294901760, %v19820_v57 }
 0x424   :  { %11605 = vmatprep.subr.bf16.mxu0 %v11604_v49  ;;  %v19793_v16 = vand.u32 4294901760, %v19792_v58  ;;  %v19794_v49 = vld [vmem:[#allocation33_spill] sm:$0xff]  ;;  %v19825_v28 = vand.u32 4294901760, %v19824_v46  ;;  %v19829_v8 = vand.u32 4294901760, %v19828_v18  ;;  %v19843_v55 = vld [vmem:[#allocation8_spill] sm:$0xff]  ;;  %v6685_v24 = vld [vmem:[%s17847_s0 + $0x608] sm:$0xff] }
 0x425   :  { %11795 = vmatpush3.bf16.xpose.msra.mxu1 %v11794_v35  ;;  %v19795_v41 = vand.u32 4294901760, %v19794_v49  ;;  %v19833_v58 = vld [vmem:[#allocation81_spill] sm:$0xff]  ;;  %v19836_v49 = vld [vmem:[#allocation28_spill] sm:$0xff]  ;;  %v16482_v57 = vsel %vm83_vm0, %v6685_v24, 0 }
 0x426   :  { %11797 = vmatprep.subr.bf16.mxu1 %v11796_v45  ;;  %v11614_v1 = vpack.c.bf16 %v19793_v16, %v19791_v50  ;;  %v11806_v45 = vpack.c.bf16 %v19801_v19, %v19799_v29  ;;  %v19832_v50 = vld [vmem:[#allocation55_spill] sm:$0xff]  ;;  %v19834_v16 = vld [vmem:[#allocation74_spill] sm:$0xff]  ;;  %v19846_v60 = vld [vmem:[#allocation24_spill] sm:$0xff] }
 0x427   :  { %v11616_v35 = vpack.c.bf16 %v19797_v0, %v19795_v41  ;;  %v19837_v41 = vld [vmem:[#allocation42_spill] sm:$0xff]  ;;  %v19844_v19 = vld [vmem:[#allocation75_spill] sm:$0xff]  ;;  %v6734_v46 = vld [vmem:[%s17847_s0 + $0x790] sm:$0xff] }
 0x428   :  { %v19839_v0 = vld [vmem:[#allocation50_spill] sm:$0xff] }
 0x429   :  { %v19842_v29 = vld [vmem:[#allocation14_spill] sm:$0xff] }
 0x42b   :  { %11607 = vmatpush3.bf16.xpose.msra.mxu0 %v11606_v25  ;;  %v19805_v25 = vand.u32 4294901760, %v19804_v62  ;;  %v19848_v62 = vld [vmem:[#allocation30_spill] sm:$0xff] }
 0x42c   :  { %11609 = vmatprep.subr.bf16.mxu0 %v11608_v56  ;;  %v19807_v56 = vand.u32 4294901760, %v19806_v43  ;;  %v19851_v43 = vld [vmem:[#allocation5_spill] sm:$0xff] }
 0x42d   :  { %11799 = vmatpush3.bf16.xpose.msra.mxu1 %v11798_v36  ;;  %v11808_v7 = vpack.c.bf16 %v19805_v25, %v19803_v52  ;;  %v19811_v36 = vand.u32 4294901760, %v19810_v38  ;;  %v19847_v52 = vld [vmem:[#allocation23_spill] sm:$0xff]  ;;  %v19849_v25 = vld [vmem:[#allocation17_spill] sm:$0xff] }
 0x42e   :  { %11801 = vmatprep.subr.bf16.mxu1 %v11800_v47  ;;  %v11618_v10 = vpack.c.bf16 %v19809_v2, %v19807_v56  ;;  %v19814_v47 = vld [vmem:[#allocation53_spill] sm:$0xff] }
 0x42f   :  { %v11620_v22 = vpack.c.bf16 %v19813_v51, %v19811_v36  ;;  %v19815_v39 = vand.u32 4294901760, %v19814_v47  ;;  %v19852_v2 = vld [vmem:[#allocation69_spill] sm:$0xff]  ;;  %v6684_v36 = vld [vmem:[%s17847_s0 + $0x600] sm:$0xff]  ;;  %v19853_v51 = vld [vmem:[#allocation68_spill] sm:$0xff] }
 0x430   :  { %v6717_v47 = vld [vmem:[%s17847_s0 + $0x708] sm:$0xff] }
 0x431   :  { %v11810_v27 = vpack.c.bf16 %v19817_v3, %v19815_v39  ;;  %v19854_v39 = vld [vmem:[#allocation4_spill] sm:$0xff] }
 0x433   :  { %11611 = vmatpush3.bf16.xpose.msra.mxu0 %v11610_v42  ;;  %v19818_v42 = vld [vmem:[#allocation13_spill] sm:$0xff] }
 0x434   :  { %11613 = vmatprep.subr.bf16.mxu0 %v11612_v31  ;;  %v19819_v15 = vand.u32 4294901760, %v19818_v42  ;;  %v19822_v31 = vld [vmem:[#allocation19_spill] sm:$0xff]  ;;  %v6703_v42 = vld [vmem:[%s17847_s0 + $0x698] sm:$0xff] }
 0x435   :  { %11803 = vmatpush3.bf16.xpose.msra.mxu1 %v11802_v53  ;;  %v19823_v14 = vand.u32 4294901760, %v19822_v31  ;;  %v19826_v53 = vld [vmem:[#allocation56_spill] sm:$0xff]  ;;  %v6806_v18 = vsel %vm83_vm0, %v6703_v42, 0 }
 0x436   :  { %11805 = vmatprep.subr.bf16.mxu1 %v11804_v6  ;;  %v11812_v12 = vpack.c.bf16 %v19821_v4, %v19819_v15  ;;  %v19827_v21 = vand.u32 4294901760, %v19826_v53  ;;  %v19830_v6 = vld [vmem:[#allocation52_spill] sm:$0xff]  ;;  %v16479_v15 = vsel %vm83_vm0, %v6684_v36, 0 }
 0x437   :  { %v11622_v54 = vpack.c.bf16 %v19825_v28, %v19823_v14  ;;  %v16492_v14 = vsel %vm83_vm0, %v6717_v47, 0  ;;  %v6735_v28 = vld [vmem:[%s17847_s0 + $0x798] sm:$0xff] }
 0x438   :  { %v11814_v37 = vpack.c.bf16 %v19829_v8, %v19827_v21 }
 0x43b   :  { %11615 = vmatpush3.bf16.xpose.msra.mxu0 %v11614_v1  ;;  %v19835_v1 = vld [vmem:[#allocation61_spill] sm:$0xff] }
 0x43c   :  { %11617 = vmatprep.subr.bf16.mxu0 %v11616_v35  ;;  %v19840_v35 = vld [vmem:[#allocation86_spill] sm:$0xff] }
 0x43d   :  { %11807 = vmatpush3.bf16.xpose.msra.mxu1 %v11806_v45  ;;  %v19845_v45 = vld [vmem:[#allocation21_spill] sm:$0xff] }
 0x43e   :  { %11809 = vmatprep.subr.bf16.mxu1 %v11808_v7  ;;  %v19850_v7 = vld [vmem:[#allocation11_spill] sm:$0xff] }
 0x443   :  { %11619 = vmatpush3.bf16.xpose.msra.mxu0 %v11618_v10 }
 0x444   :  { %11621 = vmatprep.subr.bf16.mxu0 %v11620_v22  ;;  %v6716_v22 = vld [vmem:[%s17847_s0 + $0x700] sm:$0xff] }
 0x445   :  { %11811 = vmatpush3.bf16.xpose.msra.mxu1 %v11810_v27  ;;  %v6702_v27 = vld [vmem:[%s17847_s0 + $0x690] sm:$0xff]  ;;  %v16489_v31 = vsel %vm83_vm0, %v6716_v22, 0 }
 0x446   :  { %11813 = vmatprep.subr.bf16.mxu1 %v11812_v12  ;;  %v6803_v21 = vsel %vm83_vm0, %v6702_v27, 0 }
 0x44b   :  { %11623 = vmatpush3.bf16.xpose.msra.mxu0 %v11622_v54 }
 0x44c   :  { %11625 = vmatprep.subr.bf16.mxu0 %v19830_v6  ;;  %v18534_v6 = vand.u32 4294901760, %v16479_v15 }
 0x44d   :  { %11815 = vmatpush3.bf16.xpose.msra.mxu1 %v11814_v37 }
 0x44e   :  { %11817 = vmatprep.subr.bf16.mxu1 %v19831_v17  ;;  %v18533_v17 = vand.u32 4294901760, %v16482_v57 }
 0x452   :  { %10009 = vmatmul.mubr.msk.f32.vlgmr.msra.gmra.mrb[8].mxu0 %vm83_vm0, %v19215_v9 }
 0x453   :  { %11627 = vmatpush3.bf16.xpose.msra.mxu0 %v19832_v50  ;;  %10010 = vmatprep.mubr.msk.f32.mxu0 %vm83_vm0, %v19833_v58  ;;  %v18532_v50 = vand.u32 4294901760, %v16489_v31 }
 0x454   :  { %10225 = vmatmul.mubr.msk.f32.vlgmr.msra.gmra.mrb[8].mxu1 %vm83_vm0, %v19215_v9  ;;  %11629 = vmatprep.subr.bf16.mxu0 %v19834_v16  ;;  %v18531_v16 = vand.u32 4294901760, %v16492_v14 }
 0x455   :  { %11819 = vmatpush3.bf16.xpose.msra.mxu1 %v19835_v1  ;;  %10226 = vmatprep.mubr.msk.f32.mxu1 %vm83_vm0, %v19833_v58  ;;  %v6899_v1 = vsel %vm83_vm0, %v6734_v46, 0 }
 0x456   :  { %11821 = vmatprep.subr.bf16.mxu1 %v19836_v49  ;;  %10011 = vmatmul.mubr.msk.f32.gmra.mrb[10].mxu0 %vm83_vm0, %v19833_v58  ;;  %v6902_v49 = vsel %vm83_vm0, %v6735_v28, 0 }
 0x457   :  { %10044 = vmatprep.mubr.msk.f32.mxu0 %vm83_vm0, %v19215_v9 }
 0x458   :  { %10227 = vmatmul.mubr.msk.f32.gmra.mrb[10].mxu1 %vm83_vm0, %v19833_v58 }
 0x459   :  { %10260 = vmatprep.mubr.msk.f32.mxu1 %vm83_vm0, %v19215_v9 }
 0x45b   :  { %11631 = vmatpush3.bf16.xpose.msra.mxu0 %v19837_v41  ;;  %v6995_v41 = vand.u32 4294901760, %v6803_v21 }
 0x45c   :  { %11633 = vmatprep.subr.bf16.mxu0 %v19838_v30  ;;  %v6998_v30 = vand.u32 4294901760, %v6806_v18 }
 0x45d   :  { %11823 = vmatpush3.bf16.xpose.msra.mxu1 %v19839_v0  ;;  %v6686_v0 = vld [vmem:[%s17847_s0 + $0x610] sm:$0xff] }
 0x45e   :  { %11825 = vmatprep.subr.bf16.mxu1 %v19840_v35  ;;  %v6718_v35 = vld [vmem:[%s17847_s0 + $0x710] sm:$0xff] }
 0x463   :  { %11635 = vmatpush3.bf16.xpose.msra.mxu0 %v19841_v13  ;;  %v6719_v13 = vld [vmem:[%s17847_s0 + $0x718] sm:$0xff] }
 0x464   :  { %11637 = vmatprep.subr.bf16.mxu0 %v19842_v29  ;;  %v6709_v29 = vld [vmem:[%s17847_s0 + $0x6c8] sm:$0xff] }
 0x465   :  { %11827 = vmatpush3.bf16.xpose.msra.mxu1 %v19843_v55 }
 0x466   :  { %11829 = vmatprep.subr.bf16.mxu1 %v19844_v19  ;;  %v7899_v19 = vand.u32 4294901760, %v6899_v1 }
 0x46b   :  { %11639 = vmatpush3.bf16.xpose.msra.mxu0 %v19845_v45  ;;  %v7902_v45 = vand.u32 4294901760, %v6902_v49 }
 0x46c   :  { %11641 = vmatprep.subr.bf16.mxu0 %v19846_v60  ;;  %v6705_v60 = vld [vmem:[%s17847_s0 + $0x6a8] sm:$0xff] }
 0x46d   :  { %11831 = vmatpush3.bf16.xpose.msra.mxu1 %v19847_v52  ;;  %v16546_v52 = vpack.c.bf16 %v18533_v17, %v18534_v6 }
 0x46e   :  { %11833 = vmatprep.subr.bf16.mxu1 %v19712_v11  ;;  %v6700_v11 = vld [vmem:[%s17847_s0 + $0x680] sm:$0xff] }
 0x46f   :  { %19858 = vst [vmem:[#allocation82_spill] sm:$0xff] %v16546_v52 }
 0x473   :  { %11643 = vmatpush3.bf16.xpose.msra.mxu0 %v19713_v40  ;;  %v6732_v40 = vld [vmem:[%s17847_s0 + $0x780] sm:$0xff] }
 0x474   :  { %11645 = vmatprep.subr.bf16.mxu0 %v19714_v32  ;;  %v6701_v32 = vld [vmem:[%s17847_s0 + $0x688] sm:$0xff]  ;;  %v6893_v56 = vsel %vm83_vm0, %v6732_v40, 0  ;;  %v16561_v40 = vsub.f32 %v6803_v21, %v6995_v41  ;;  %v6720_v21 = vld [vmem:[%s17847_s0 + $0x720] sm:$0xff] }
 0x475   :  { %11835 = vmatpush3.bf16.xpose.msra.mxu1 %v19715_v48  ;;  %v6733_v48 = vld [vmem:[%s17847_s0 + $0x788] sm:$0xff]  ;;  %v7893_v59 = vand.u32 4294901760, %v6893_v56 }
 0x476   :  { %11837 = vmatprep.subr.bf16.mxu1 %v19716_v5  ;;  %v6797_v5 = vsel %vm83_vm0, %v6700_v11, 0  ;;  %v6896_v26 = vsel %vm83_vm0, %v6733_v48, 0  ;;  %v6736_v11 = vld [vmem:[%s17847_s0 + $0x7a0] sm:$0xff]  ;;  %19861 = vst [vmem:[#allocation26_spill] sm:$0xff] %v16561_v40  ;;  %v16564_v48 = vsel %vm83_vm0, %v6718_v35, 0 }
 0x477   :  { %v6989_v10 = vand.u32 4294901760, %v6797_v5  ;;  %v7896_v3 = vand.u32 4294901760, %v6896_v26  ;;  %v16502_v53 = vsub.f32 %v6893_v56, %v7893_v59  ;;  %v16574_v56 = vsub.f32 %v6899_v1, %v7899_v19 }
 0x478   :  { %v6905_v24 = vsel %vm83_vm0, %v6736_v11, 0  ;;  %v18530_v22 = vand.u32 4294901760, %v16564_v48 }
 0x479   :  { %v16486_v12 = vsub.f32 %v6797_v5, %v6989_v10  ;;  %v16506_v8 = vpack.c.bf16 %v7896_v3, %v7893_v59  ;;  %v16508_v37 = vsub.f32 %v6896_v26, %v7896_v3  ;;  %v16567_v5 = vsel %vm83_vm0, %v6719_v13, 0  ;;  %19863 = vst [vmem:[#allocation27_spill] sm:$0xff] %v16574_v56  ;;  %v6688_v59 = vld [vmem:[%s17847_s0 + $0x620] sm:$0xff]  ;;  %v6689_v3 = vld [vmem:[%s17847_s0 + $0x628] sm:$0xff] }
 0x47a   :  { %v18529_v47 = vand.u32 4294901760, %v16567_v5  ;;  %v7905_v1 = vand.u32 4294901760, %v6905_v24  ;;  %v6761_v35 = vsel %vm83_vm0, %v6688_v59, 0  ;;  %v6764_v13 = vsel %vm83_vm0, %v6689_v3, 0  ;;  %v6738_v59 = vld [vmem:[%s17847_s0 + $0x7b0] sm:$0xff]  ;;  %v6739_v3 = vld [vmem:[%s17847_s0 + $0x7b8] sm:$0xff] }
 0x47b   :  { %11647 = vmatpush3.bf16.xpose.msra.mxu0 %v19848_v62  ;;  %19856 = vst [vmem:[#allocation60_spill] sm:$0xff] %v16486_v12  ;;  %19857 = vst [vmem:[#allocation76_spill] sm:$0xff] %v16506_v8  ;;  %v16552_v62 = vpack.c.bf16 %v18531_v16, %v18532_v50  ;;  %v6740_v50 = vld [vmem:[%s17847_s0 + $0x7c0] sm:$0xff] }
 0x47c   :  { %11649 = vmatprep.subr.bf16.mxu0 %v19849_v25  ;;  %v6755_v25 = vsel %vm83_vm0, %v6686_v0, 0  ;;  %v6956_v0 = vand.u32 4294901760, %v6764_v13 }
 0x47d   :  { %11839 = vmatpush3.bf16.xpose.msra.mxu1 %v19850_v7  ;;  %19859 = vst [vmem:[#allocation15_spill] sm:$0xff] %v16552_v62 }
 0x47e   :  { %11841 = vmatprep.subr.bf16.mxu1 %v19722_v20  ;;  %v6800_v20 = vsel %vm83_vm0, %v6701_v32, 0  ;;  %v16559_v32 = vpack.c.bf16 %v6998_v30, %v6995_v41  ;;  %v6707_v41 = vld [vmem:[%s17847_s0 + $0x6b8] sm:$0xff] }
 0x47f   :  { %v6992_v38 = vand.u32 4294901760, %v6800_v20 }
 0x480   :  { %19860 = vst [vmem:[#allocation59_spill] sm:$0xff] %v16559_v32 }
 0x481   :  { %v16484_v4 = vpack.c.bf16 %v6992_v38, %v6989_v10  ;;  %v16500_v54 = vsub.f32 %v6800_v20, %v6992_v38  ;;  %v6737_v20 = vld [vmem:[%s17847_s0 + $0x7a8] sm:$0xff]  ;;  %v16580_v10 = vpack.c.bf16 %v7902_v45, %v7899_v19  ;;  %v6947_v38 = vand.u32 4294901760, %v6755_v25 }
 0x482   :  { %v6953_v19 = vand.u32 4294901760, %v6761_v35 }
 0x483   :  { %11651 = vmatpush3.bf16.xpose.msra.mxu0 %v19851_v43  ;;  %19855 = vst [vmem:[#allocation72_spill] sm:$0xff] %v16484_v4  ;;  %v16572_v43 = vsub.f32 %v6806_v18, %v6998_v30  ;;  %19864 = vst [vmem:[#allocation80_spill] sm:$0xff] %v16580_v10  ;;  %v16600_v27 = vsub.f32 %v6755_v25, %v6947_v38  ;;  %v6721_v18 = vld [vmem:[%s17847_s0 + $0x728] sm:$0xff] }
 0x484   :  { %11653 = vmatprep.subr.bf16.mxu0 %v19852_v2  ;;  %v6812_v2 = vsel %vm83_vm0, %v6705_v60, 0  ;;  %v16639_v60 = vsel %vm83_vm0, %v6720_v21, 0  ;;  %v16642_v25 = vsel %vm83_vm0, %v6721_v18, 0  ;;  %v16661_v18 = vsub.f32 %v6905_v24, %v7905_v1 }
 0x485   :  { %11843 = vmatpush3.bf16.xpose.msra.mxu1 %v19853_v51  ;;  %19862 = vst [vmem:[#allocation7_spill] sm:$0xff] %v16572_v43  ;;  %v16586_v51 = vsub.f32 %v6902_v49, %v7902_v45  ;;  %v7004_v28 = vand.u32 4294901760, %v6812_v2  ;;  %v6706_v49 = vld [vmem:[%s17847_s0 + $0x6b0] sm:$0xff]  ;;  %v6914_v24 = vsel %vm83_vm0, %v6739_v3, 0  ;;  %v16688_v3 = vpack.c.bf16 %v6956_v0, %v6953_v19 }
 0x486   :  { %11845 = vmatprep.subr.bf16.mxu1 %v19854_v39  ;;  %v6908_v39 = vsel %vm83_vm0, %v6737_v20, 0  ;;  %v7914_v16 = vand.u32 4294901760, %v6914_v24 }
 0x487   :  { %v16659_v21 = vsub.f32 %v6812_v2, %v7004_v28  ;;  %v6911_v2 = vsel %vm83_vm0, %v6738_v59, 0  ;;  %v6722_v59 = vld [vmem:[%s17847_s0 + $0x730] sm:$0xff]  ;;  %19871 = vst [vmem:[#allocation70_spill] sm:$0xff] %v16688_v3 }
 0x488   :  { %v16725_v61 = vsel %vm83_vm0, %v6722_v59, 0 }
 0x48b   :  { %11655 = vmatpush3.bf16.xpose.msra.mxu0 %v19731_v63  ;;  %v6687_v63 = vld [vmem:[%s17847_s0 + $0x618] sm:$0xff] }
 0x48c   :  { %11849 = vmatprep.subr.bf16.mxu0 %v16484_v4  ;;  %v6758_v7 = vsel %vm83_vm0, %v6687_v63, 0  ;;  %v7908_v63 = vand.u32 4294901760, %v6908_v39 }
 0x48d   :  { %11847 = vmatpush3.bf16.xpose.msra.mxu1 %v19732_v44  ;;  %v6704_v44 = vld [vmem:[%s17847_s0 + $0x6a0] sm:$0xff]  ;;  %v6950_v36 = vand.u32 4294901760, %v6758_v7 }
 0x48e   :  { %12041 = vmatprep.subr.bf16.mxu1 %v16506_v8  ;;  %v6809_v26 = vsel %vm83_vm0, %v6704_v44, 0  ;;  %v16636_v44 = vpack.c.bf16 %v18529_v47, %v18530_v22  ;;  %v6741_v47 = vld [vmem:[%s17847_s0 + $0x7c8] sm:$0xff] }
 0x48f   :  { %v16602_v42 = vsub.f32 %v6758_v7, %v6950_v36  ;;  %v7001_v46 = vand.u32 4294901760, %v6809_v26  ;;  %v16630_v45 = vpack.c.bf16 %v6950_v36, %v6947_v38  ;;  %v19867_v7 = vld [vmem:[#allocation94_spill] sm:$0xff]  ;;  %v6815_v38 = vsel %vm83_vm0, %v6706_v49, 0 }
 0x490   :  { %19866 = vst [vmem:[#allocation12_spill] sm:$0xff] %v16636_v44  ;;  %v6818_v36 = vsel %vm83_vm0, %v6707_v41, 0  ;;  %v18536_v49 = vand.u32 4294901760, %v16639_v60  ;;  %v18535_v41 = vand.u32 4294901760, %v16642_v25  ;;  %v7007_v30 = vand.u32 4294901760, %v6815_v38 }
 0x491   :  { %19865 = vst [vmem:[#allocation29_spill] sm:$0xff] %v16630_v45  ;;  %v16647_v11 = vpack.c.bf16 %v7004_v28, %v7001_v46  ;;  %v16649_v20 = vsub.f32 %v6809_v26, %v7001_v46  ;;  %v16664_v26 = vpack.c.bf16 %v7908_v63, %v7905_v1  ;;  %v16666_v46 = vsub.f32 %v6908_v39, %v7908_v63  ;;  %v6690_v39 = vld [vmem:[%s17847_s0 + $0x630] sm:$0xff]  ;;  %v6691_v63 = vld [vmem:[%s17847_s0 + $0x638] sm:$0xff] }
 0x492   :  { %10045 = vmatmul.mubr.msk.f32.vlgmr.msra.gmra.mrb[8].mxu0 %vm83_vm0, %v19215_v9  ;;  %v7010_v55 = vand.u32 4294901760, %v6818_v36  ;;  %v16674_v28 = vsub.f32 %v6761_v35, %v6953_v19  ;;  %v16676_v1 = vsub.f32 %v6764_v13, %v6956_v0  ;;  %v6723_v35 = vld [vmem:[%s17847_s0 + $0x738] sm:$0xff]  ;;  %v6708_v13 = vld [vmem:[%s17847_s0 + $0x6c0] sm:$0xff]  ;;  %v16708_v0 = vpack.c.bf16 %v18535_v41, %v18536_v49 }
 0x493   :  { %11851 = vmatpush3.bf16.xpose.msra.mxu0 %v16546_v52  ;;  %10046 = vmatprep.mubr.msk.f32.mxu0 %vm83_vm0, %v19833_v58  ;;  %19868 = vst [vmem:[#allocation10_spill] sm:$0xff] %v16647_v11  ;;  %19869 = vst [vmem:[#allocation46_spill] sm:$0xff] %v16664_v26  ;;  %v7911_v19 = vand.u32 4294901760, %v6911_v2  ;;  %v16720_v6 = vsub.f32 %v6815_v38, %v7007_v30  ;;  %v6767_v41 = vsel %vm83_vm0, %v6690_v39, 0  ;;  %v6770_v49 = vsel %vm83_vm0, %v6691_v63, 0 }
 0x494   :  { %10261 = vmatmul.mubr.msk.f32.vlgmr.msra.gmra.mrb[8].mxu1 %vm83_vm0, %v19215_v9  ;;  %11853 = vmatprep.subr.bf16.mxu0 %v16559_v32  ;;  %19870 = vst [vmem:[#allocation51_spill] sm:$0xff] %v16674_v28  ;;  %19872 = vst [vmem:[#allocation63_spill] sm:$0xff] %v16708_v0  ;;  %v16718_v17 = vpack.c.bf16 %v7010_v55, %v7007_v30  ;;  %v16728_v33 = vsel %vm83_vm0, %v6723_v35, 0  ;;  %v6821_v34 = vsel %vm83_vm0, %v6708_v13, 0  ;;  %v6917_v30 = vsel %vm83_vm0, %v6740_v50, 0  ;;  %v6692_v50 = vld [vmem:[%s17847_s0 + $0x640] sm:$0xff] }
 0x495   :  { %12043 = vmatpush3.bf16.xpose.msra.mxu1 %v16552_v62  ;;  %10262 = vmatprep.mubr.msk.f32.mxu1 %vm83_vm0, %v19833_v58  ;;  %19874 = vst [vmem:[#allocation79_spill] sm:$0xff] %v16720_v6  ;;  %v16734_v22 = vsub.f32 %v6911_v2, %v7911_v19  ;;  %v6920_v38 = vsel %vm83_vm0, %v6741_v47, 0  ;;  %v16738_v39 = vpack.c.bf16 %v7914_v16, %v7911_v19  ;;  %v6959_v59 = vand.u32 4294901760, %v6767_v41  ;;  %v6693_v13 = vld [vmem:[%s17847_s0 + $0x648] sm:$0xff]  ;;  %v6711_v35 = vld [vmem:[%s17847_s0 + $0x6d8] sm:$0xff] }
 0x496   :  { %10047 = vmatmul.mubr.msk.f32.gmra.mrb[10].mxu0 %vm83_vm0, %v19833_v58  ;;  %12045 = vmatprep.subr.bf16.mxu1 %v16580_v10  ;;  %19873 = vst [vmem:[#allocation71_spill] sm:$0xff] %v16718_v17  ;;  %v16740_v63 = vsub.f32 %v6914_v24, %v7914_v16  ;;  %v7917_v2 = vand.u32 4294901760, %v6917_v30  ;;  %v7920_v24 = vand.u32 4294901760, %v6920_v38  ;;  %v19881_v19 = vand.u32 4294901760, %v16479_v15 }
 0x497   :  { %10296 = vmatprep.mubr.f32.mxu0 %v19867_v7  ;;  %19876 = vst [vmem:[#allocation90_spill] sm:$0xff] %v16734_v22  ;;  %19877 = vst [vmem:[#allocation41_spill] sm:$0xff] %v16738_v39  ;;  %v16749_v47 = vsub.f32 %v6767_v41, %v6959_v59  ;;  %v6724_v41 = vld [vmem:[%s17847_s0 + $0x740] sm:$0xff] }
 0x498   :  { %10263 = vmatmul.mubr.msk.f32.gmra.mrb[10].mxu1 %vm83_vm0, %v19833_v58  ;;  %19878 = vst [vmem:[#allocation22_spill] sm:$0xff] %v16740_v63  ;;  %v16808_v62 = vpack.c.bf16 %v7920_v24, %v7917_v2 }
 0x499   :  { %10512 = vmatprep.mubr.f32.mxu1 %v19867_v7  ;;  %19879 = vst [vmem:[#allocation37_spill] sm:$0xff] %v16749_v47 }
 0x49a   :  { %19890 = vst [vmem:[#allocation78_spill] sm:$0xff] %v16808_v62 }
 0x49b   :  { %11855 = vmatpush3.bf16.xpose.msra.mxu0 %v16630_v45  ;;  %v6776_v45 = vsel %vm83_vm0, %v6693_v13, 0 }
 0x49c   :  { %11857 = vmatprep.subr.bf16.mxu0 %v16647_v11  ;;  %v6962_v11 = vand.u32 4294901760, %v6770_v49 }
 0x49d   :  { %12047 = vmatpush3.bf16.xpose.msra.mxu1 %v16636_v44  ;;  %v16732_v44 = vsub.f32 %v6818_v36, %v7010_v55  ;;  %v7013_v55 = vand.u32 4294901760, %v6821_v34 }
 0x49e   :  { %12049 = vmatprep.subr.bf16.mxu1 %v16664_v26  ;;  %v6824_v26 = vsel %vm83_vm0, %v6709_v29, 0  ;;  %v16751_v16 = vsub.f32 %v6770_v49, %v6962_v11  ;;  %v16759_v29 = vsub.f32 %v16479_v15, %v19881_v19  ;;  %v16775_v15 = vpack.c.bf16 %v6962_v11, %v6959_v59  ;;  %v6710_v49 = vld [vmem:[%s17847_s0 + $0x6d0] sm:$0xff] }
 0x49f   :  { %19875 = vst [vmem:[#allocation88_spill] sm:$0xff] %v16732_v44  ;;  %v7016_v36 = vand.u32 4294901760, %v6824_v26  ;;  %v6773_v19 = vsel %vm83_vm0, %v6692_v50, 0  ;;  %v19885_v11 = vand.u32 4294901760, %v16728_v33 }
 0x4a0   :  { %19880 = vst [vmem:[#allocation58_spill] sm:$0xff] %v16751_v16  ;;  %19883 = vst [vmem:[#allocation18_spill] sm:$0xff] %v16775_v15  ;;  %v6965_v13 = vand.u32 4294901760, %v6773_v19 }
 0x4a1   :  { %v16795_v50 = vpack.c.bf16 %v7016_v36, %v7013_v55  ;;  %v16806_v10 = vsub.f32 %v6824_v26, %v7016_v36  ;;  %v6827_v26 = vsel %vm83_vm0, %v6710_v49, 0  ;;  %v16826_v36 = vsub.f32 %v6920_v38, %v7920_v24  ;;  %v6726_v49 = vld [vmem:[%s17847_s0 + $0x750] sm:$0xff] }
 0x4a2   :  { %v16831_v8 = vsub.f32 %v6773_v19, %v6965_v13  ;;  %v7019_v24 = vand.u32 4294901760, %v6827_v26  ;;  %v6727_v19 = vld [vmem:[%s17847_s0 + $0x758] sm:$0xff]  ;;  %v19897_v38 = vand.u32 4294901760, %v16489_v31 }
 0x4a3   :  { %11859 = vmatpush3.bf16.xpose.msra.mxu0 %v16688_v3  ;;  %19887 = vst [vmem:[#allocation34_spill] sm:$0xff] %v16795_v50  ;;  %19889 = vst [vmem:[#allocation66_spill] sm:$0xff] %v16806_v10 }
 0x4a4   :  { %11861 = vmatprep.subr.bf16.mxu0 %v16718_v17  ;;  %v19882_v17 = vand.u32 4294901760, %v16482_v57  ;;  %19894 = vst [vmem:[#allocation43_spill] sm:$0xff] %v16826_v36  ;;  %19895 = vst [vmem:[#allocation32_spill] sm:$0xff] %v16831_v8  ;;  %v16854_v4 = vsub.f32 %v16489_v31, %v19897_v38  ;;  %v19898_v36 = vand.u32 4294901760, %v16492_v14 }
 0x4a5   :  { %12051 = vmatpush3.bf16.xpose.msra.mxu1 %v16708_v0  ;;  %v6725_v0 = vld [vmem:[%s17847_s0 + $0x748] sm:$0xff] }
 0x4a6   :  { %v16772_v3 = vsub.f32 %v16482_v57, %v19882_v17  ;;  %12053 = vmatprep.subr.bf16.mxu1 %v16738_v39  ;;  %v19884_v17 = vand.u32 4294901760, %v16725_v61  ;;  %v16797_v39 = vsub.f32 %v6821_v34, %v7013_v55  ;;  %v6743_v57 = vld [vmem:[%s17847_s0 + $0x7d8] sm:$0xff]  ;;  %v6694_v34 = vld [vmem:[%s17847_s0 + $0x650] sm:$0xff]  ;;  %v16822_v32 = vsel %vm83_vm0, %v6725_v0, 0 }
 0x4a7   :  { %v6695_v55 = vld [vmem:[%s17847_s0 + $0x658] sm:$0xff]  ;;  %19893 = vst [vmem:[#allocation89_spill] sm:$0xff] %v16822_v32  ;;  %v6926_v52 = vsel %vm83_vm0, %v6743_v57, 0  ;;  %v6779_v0 = vsel %vm83_vm0, %v6694_v34, 0  ;;  %v16868_v31 = vsub.f32 %v16492_v14, %v19898_v36  ;;  %v6745_v36 = vld [vmem:[%s17847_s0 + $0x7e8] sm:$0xff] }
 0x4a8   :  { %v16793_v59 = vpack.c.bf16 %v19885_v11, %v19884_v17  ;;  %19888 = vst [vmem:[#allocation40_spill] sm:$0xff] %v16797_v39  ;;  %v16810_v17 = vsub.f32 %v6917_v30, %v7917_v2  ;;  %v16813_v11 = vsel %vm83_vm0, %v6724_v41, 0  ;;  %v6830_v30 = vsel %vm83_vm0, %v6711_v35, 0 }
 0x4a9   :  { %19892 = vst [vmem:[#allocation85_spill] sm:$0xff] %v16813_v11  ;;  %v6968_v2 = vand.u32 4294901760, %v6776_v45  ;;  %v6923_v41 = vsel %vm83_vm0, %v6742_v23, 0  ;;  %v6782_v58 = vsel %vm83_vm0, %v6695_v55, 0  ;;  %v7022_v23 = vand.u32 4294901760, %v6830_v30 }
 0x4aa   :  { %19886 = vst [vmem:[#allocation20_spill] sm:$0xff] %v16793_v59  ;;  %19891 = vst [vmem:[#allocation73_spill] sm:$0xff] %v16810_v17  ;;  %v7923_v57 = vand.u32 4294901760, %v6923_v41  ;;  %v7926_v34 = vand.u32 4294901760, %v6926_v52  ;;  %v16876_v17 = vsel %vm83_vm0, %v6727_v19, 0  ;;  %v19902_v10 = vand.u32 4294901760, %v16813_v11 }
 0x4ab   :  { %11863 = vmatpush3.bf16.xpose.msra.mxu0 %v16775_v15  ;;  %v16837_v35 = vsub.f32 %v6776_v45, %v6968_v2  ;;  %v6974_v15 = vand.u32 4294901760, %v6782_v58  ;;  %v6713_v45 = vld [vmem:[%s17847_s0 + $0x6e8] sm:$0xff]  ;;  %v16870_v38 = vpack.c.bf16 %v6968_v2, %v6965_v13  ;;  %19901 = vst [vmem:[#allocation91_spill] sm:$0xff] %v16876_v17  ;;  %v19903_v39 = vand.u32 4294901760, %v16822_v32  ;;  %v6744_v13 = vld [vmem:[%s17847_s0 + $0x7e0] sm:$0xff] }
 0x4ac   :  { %11865 = vmatprep.subr.bf16.mxu0 %v16795_v50  ;;  %v6971_v50 = vand.u32 4294901760, %v6779_v0  ;;  %v16884_v55 = vpack.c.bf16 %v7022_v23, %v7019_v24  ;;  %v16888_v14 = vsub.f32 %v6830_v30, %v7022_v23  ;;  %v16896_v2 = vpack.c.bf16 %v7926_v34, %v7923_v57  ;;  %v6697_v30 = vld [vmem:[%s17847_s0 + $0x668] sm:$0xff] }
 0x4ad   :  { %19896 = vst [vmem:[#allocation31_spill] sm:$0xff] %v16837_v35  ;;  %12055 = vmatpush3.bf16.xpose.msra.mxu1 %v16793_v59  ;;  %v6712_v59 = vld [vmem:[%s17847_s0 + $0x6e0] sm:$0xff]  ;;  %19899 = vst [vmem:[#allocation9_spill] sm:$0xff] %v16870_v38  ;;  %v16882_v16 = vpack.c.bf16 %v19903_v39, %v19902_v10  ;;  %v16886_v35 = vsub.f32 %v6827_v26, %v7019_v24  ;;  %v6836_v39 = vsel %vm83_vm0, %v6713_v45, 0  ;;  %v6932_v19 = vsel %vm83_vm0, %v6745_v36, 0 }
 0x4ae   :  { %12057 = vmatprep.subr.bf16.mxu1 %v16808_v62  ;;  %v16873_v62 = vsel %vm83_vm0, %v6726_v49, 0  ;;  %19905 = vst [vmem:[#allocation38_spill] sm:$0xff] %v16884_v55  ;;  %19907 = vst [vmem:[#allocation44_spill] sm:$0xff] %v16888_v14  ;;  %v16898_v49 = vsub.f32 %v6923_v41, %v7923_v57  ;;  %v6833_v10 = vsel %vm83_vm0, %v6712_v59, 0  ;;  %v6696_v26 = vld [vmem:[%s17847_s0 + $0x660] sm:$0xff]  ;;  %v16908_v24 = vsub.f32 %v6926_v52, %v7926_v34  ;;  %v6729_v57 = vld [vmem:[%s17847_s0 + $0x768] sm:$0xff] }
 0x4af   :  { %19900 = vst [vmem:[#allocation39_spill] sm:$0xff] %v16873_v62  ;;  %19904 = vst [vmem:[#allocation33_spill] sm:$0xff] %v16882_v16  ;;  %v16910_v23 = vpack.c.bf16 %v6974_v15, %v6971_v50  ;;  %v6728_v59 = vld [vmem:[%s17847_s0 + $0x760] sm:$0xff]  ;;  %v16921_v45 = vsub.f32 %v6779_v0, %v6971_v50  ;;  %v16923_v52 = vsub.f32 %v6782_v58, %v6974_v15  ;;  %v6929_v34 = vsel %vm83_vm0, %v6744_v13, 0  ;;  %v6715_v58 = vld [vmem:[%s17847_s0 + $0x6f8] sm:$0xff] }
 0x4b0   :  { %19906 = vst [vmem:[#allocation35_spill] sm:$0xff] %v16886_v35  ;;  %19908 = vst [vmem:[#allocation36_spill] sm:$0xff] %v16896_v2  ;;  %v7025_v41 = vand.u32 4294901760, %v6833_v10  ;;  %v7028_v8 = vand.u32 4294901760, %v6836_v39  ;;  %v6785_v32 = vsel %vm83_vm0, %v6696_v26, 0  ;;  %v6788_v11 = vsel %vm83_vm0, %v6697_v30, 0 }
 0x4b1   :  { %19909 = vst [vmem:[#allocation87_spill] sm:$0xff] %v16898_v49  ;;  %19910 = vst [vmem:[#allocation62_spill] sm:$0xff] %v16908_v24  ;;  %v16938_v15 = vsel %vm83_vm0, %v6728_v59, 0  ;;  %v16941_v50 = vsel %vm83_vm0, %v6729_v57, 0  ;;  %v19915_v36 = vand.u32 4294901760, %v16873_v62  ;;  %v19916_v26 = vand.u32 4294901760, %v16876_v17 }
 0x4b2   :  { %19911 = vst [vmem:[#allocation65_spill] sm:$0xff] %v16910_v23  ;;  %19912 = vst [vmem:[#allocation77_spill] sm:$0xff] %v16921_v45  ;;  %v7932_v59 = vand.u32 4294901760, %v6932_v19  ;;  %v6746_v57 = vld [vmem:[%s17847_s0 + $0x7f0] sm:$0xff]  ;;  %v6747_v0 = vld [vmem:[%s17847_s0 + $0x7f8] sm:$0xff]  ;;  %v16966_v17 = vsub.f32 %v6833_v10, %v7025_v41  ;;  %v18622_v24 = vand.u32 4294901760, %v16938_v15  ;;  %v16970_v14 = vsub.f32 %v6836_v39, %v7028_v8 }
 0x4b3   :  { %11867 = vmatpush3.bf16.xpose.msra.mxu0 %v16870_v38  ;;  %19913 = vst [vmem:[#allocation2_spill] sm:$0xff] %v16923_v52  ;;  %v6714_v38 = vld [vmem:[%s17847_s0 + $0x6f0] sm:$0xff]  ;;  %19914 = vst [vmem:[#allocation53_spill] sm:$0xff] %v16941_v50  ;;  %v16952_v30 = vpack.c.bf16 %v19916_v26, %v19915_v36  ;;  %v6842_v36 = vsel %vm83_vm0, %v6715_v58, 0  ;;  %v16964_v26 = vpack.c.bf16 %v7028_v8, %v7025_v41  ;;  %v18621_v49 = vand.u32 4294901760, %v16941_v50 }
 0x4b4   :  { %11869 = vmatprep.subr.bf16.mxu0 %v16884_v55  ;;  %v6980_v55 = vand.u32 4294901760, %v6788_v11  ;;  %v6839_v62 = vsel %vm83_vm0, %v6714_v38, 0  ;;  %19919 = vst [vmem:[#allocation16_spill] sm:$0xff] %v16966_v17  ;;  %19920 = vst [vmem:[#allocation19_spill] sm:$0xff] %v16970_v14  ;;  %v6935_v13 = vsel %vm83_vm0, %v6746_v57, 0  ;;  %v6938_v52 = vsel %vm83_vm0, %v6747_v0, 0 }
 0x4b5   :  { %12059 = vmatpush3.bf16.xpose.msra.mxu1 %v16882_v16  ;;  %19917 = vst [vmem:[#allocation54_spill] sm:$0xff] %v16952_v30  ;;  %v7929_v16 = vand.u32 4294901760, %v6929_v34  ;;  %19918 = vst [vmem:[#allocation13_spill] sm:$0xff] %v16964_v26  ;;  %v16978_v38 = vsub.f32 %v6932_v19, %v7932_v59  ;;  %v7031_v58 = vand.u32 4294901760, %v6839_v62  ;;  %v7034_v47 = vand.u32 4294901760, %v6842_v36  ;;  %v6698_v10 = vld [vmem:[%s17847_s0 + $0x670] sm:$0xff] }
 0x4b6   :  { %12061 = vmatprep.subr.bf16.mxu1 %v16896_v2  ;;  %v6977_v2 = vand.u32 4294901760, %v6785_v32  ;;  %v16988_v41 = vsub.f32 %v6788_v11, %v6980_v55  ;;  %v7935_v0 = vand.u32 4294901760, %v6935_v13  ;;  %v6731_v11 = vld [vmem:[%s17847_s0 + $0x778] sm:$0xff]  ;;  %v19933_v50 = vand.u32 4294901760, %v16500_v54 }
 0x4b7   :  { %v16972_v35 = vsub.f32 %v6929_v34, %v7929_v16  ;;  %v16976_v45 = vpack.c.bf16 %v7932_v59, %v7929_v16  ;;  %19923 = vst [vmem:[#allocation57_spill] sm:$0xff] %v16978_v38  ;;  %v6699_v16 = vld [vmem:[%s17847_s0 + $0x678] sm:$0xff]  ;;  %v16999_v34 = vpack.c.bf16 %v18621_v49, %v18622_v24  ;;  %v7938_v59 = vand.u32 4294901760, %v6938_v52 }
 0x4b8   :  { %v16984_v8 = vpack.c.bf16 %v6980_v55, %v6977_v2  ;;  %v16986_v39 = vsub.f32 %v6785_v32, %v6977_v2  ;;  %19926 = vst [vmem:[#allocation55_spill] sm:$0xff] %v16988_v41  ;;  %v6730_v32 = vld [vmem:[%s17847_s0 + $0x770] sm:$0xff]  ;;  %v6791_v2 = vsel %vm83_vm0, %v6698_v10, 0  ;;  %v17016_v19 = vpack.c.bf16 %v7034_v47, %v7031_v58 }
 0x4b9   :  { %19921 = vst [vmem:[#allocation25_spill] sm:$0xff] %v16972_v35  ;;  %19922 = vst [vmem:[#allocation56_spill] sm:$0xff] %v16976_v45  ;;  %v17022_v10 = vsub.f32 %v6839_v62, %v7031_v58  ;;  %v17025_v57 = vsel %vm83_vm0, %v6730_v32, 0  ;;  %v17028_v49 = vsel %vm83_vm0, %v6731_v11, 0  ;;  %v19930_v24 = vand.u32 4294901760, %v16486_v12 }
 0x4ba   :  { %19924 = vst [vmem:[#allocation52_spill] sm:$0xff] %v16984_v8  ;;  %19925 = vst [vmem:[#allocation64_spill] sm:$0xff] %v16986_v39  ;;  %v6983_v55 = vand.u32 4294901760, %v6791_v2  ;;  %v7182_v62 = vsub.f32 %v16500_v54, %v19933_v50  ;;  %v17040_v58 = vsub.f32 %v6935_v13, %v7935_v0  ;;  %v17042_v32 = vsub.f32 %v6938_v52, %v7938_v59 }
 0x4bb   :  { %11871 = vmatpush3.bf16.xpose.msra.mxu0 %v16910_v23  ;;  %19927 = vst [vmem:[#allocation74_spill] sm:$0xff] %v16999_v34  ;;  %19928 = vst [vmem:[#allocation61_spill] sm:$0xff] %v17016_v19  ;;  %v17033_v23 = vsub.f32 %v6842_v36, %v7034_v47  ;;  %v19936_v11 = vand.u32 4294901760, %v16502_v53  ;;  %v19938_v36 = vand.u32 4294901760, %v16508_v37  ;;  %v18639_v13 = vand.u32 4294901760, %v16759_v29 }
 0x4bc   :  { %11873 = vmatprep.subr.bf16.mxu0 %v16964_v26  ;;  %v6794_v26 = vsel %vm83_vm0, %v6699_v16, 0  ;;  %19929 = vst [vmem:[#allocation28_spill] sm:$0xff] %v17022_v10  ;;  %v17035_v16 = vpack.c.bf16 %v7938_v59, %v7935_v0  ;;  %19934 = vst [vmem:[#allocation50_spill] sm:$0xff] %v17040_v58  ;;  %v17047_v39 = vsub.f32 %v6791_v2, %v6983_v55  ;;  %v7183_v59 = vand.u32 4294901760, %v7182_v62 }
 0x4bd   :  { %12063 = vmatpush3.bf16.xpose.msra.mxu1 %v16952_v30  ;;  %19931 = vst [vmem:[#allocation42_spill] sm:$0xff] %v17033_v23  ;;  %19935 = vst [vmem:[#allocation86_spill] sm:$0xff] %v17042_v32  ;;  %v6986_v30 = vand.u32 4294901760, %v6794_v26  ;;  %v8079_v41 = vsub.f32 %v16502_v53, %v19936_v11  ;;  %v19943_v11 = vand.u32 4294901760, %v16561_v40 }
 0x4be   :  { %12065 = vmatprep.subr.bf16.mxu1 %v16976_v45  ;;  %v7175_v45 = vsub.f32 %v16486_v12, %v19930_v24  ;;  %19932 = vst [vmem:[#allocation48_spill] sm:$0xff] %v17035_v16  ;;  %19937 = vst [vmem:[#allocation67_spill] sm:$0xff] %v17047_v39  ;;  %v8086_v12 = vsub.f32 %v16508_v37, %v19938_v36 }
 0x4bf   :  { %v17055_v50 = vsub.f32 %v6794_v26, %v6986_v30  ;;  %v8080_v36 = vand.u32 4294901760, %v8079_v41  ;;  %v17074_v0 = vpack.c.bf16 %v6986_v30, %v6983_v55  ;;  %v7063_v41 = vsub.f32 %v16759_v29, %v18639_v13 }
 0x4c0   :  { %v7176_v52 = vand.u32 4294901760, %v7175_v45  ;;  %v8087_v62 = vand.u32 4294901760, %v8086_v12  ;;  %v19941_v45 = vand.u32 4294901760, %v16772_v3  ;;  %v19942_v26 = vand.u32 4294901760, %v16564_v48 }
 0x4c1   :  { %19939 = vst [vmem:[#allocation14_spill] sm:$0xff] %v17055_v50  ;;  %19940 = vst [vmem:[#allocation8_spill] sm:$0xff] %v17074_v0  ;;  %v7189_v24 = vsub.f32 %v16561_v40, %v19943_v11  ;;  %v19944_v30 = vand.u32 4294901760, %v16572_v43  ;;  %v19945_v13 = vand.u32 4294901760, %v16567_v5  ;;  %v19950_v11 = vand.u32 4294901760, %v16868_v31 }
 0x4c2   :  { %v7070_v47 = vsub.f32 %v16772_v3, %v19941_v45  ;;  %v17085_v12 = vsub.f32 %v16564_v48, %v19942_v26  ;;  %v11880_v2 = vpack.c.bf16 %v7183_v59, %v7176_v52  ;;  %v19946_v45 = vand.u32 4294901760, %v17025_v57 }
 0x4c3   :  { %11875 = vmatpush3.bf16.xpose.msra.mxu0 %v16984_v8  ;;  %v7196_v55 = vsub.f32 %v16572_v43, %v19944_v30  ;;  %v19949_v52 = vand.u32 4294901760, %v16854_v4  ;;  %v7974_v26 = vsub.f32 %v16868_v31, %v19950_v11  ;;  %v12072_v30 = vpack.c.bf16 %v8087_v62, %v8080_v36 }
 0x4c4   :  { %11877 = vmatprep.subr.bf16.mxu0 %v17016_v19  ;;  %v19951_v19 = vand.u32 4294901760, %v16574_v56  ;;  %v7190_v43 = vand.u32 4294901760, %v7189_v24  ;;  %v19954_v36 = vand.u32 4294901760, %v16602_v42 }
 0x4c5   :  { %12067 = vmatpush3.bf16.xpose.msra.mxu1 %v16999_v34  ;;  %v19947_v34 = vand.u32 4294901760, %v17028_v49  ;;  %v7967_v59 = vsub.f32 %v16854_v4, %v19949_v52  ;;  %v7197_v11 = vand.u32 4294901760, %v7196_v55  ;;  %v18657_v52 = vand.u32 4294901760, %v16661_v18 }
 0x4c6   :  { %12069 = vmatprep.subr.bf16.mxu1 %v17035_v16  ;;  %v17096_v16 = vsub.f32 %v16567_v5, %v19945_v13  ;;  %v8093_v5 = vsub.f32 %v16574_v56, %v19951_v19  ;;  %v19952_v13 = vand.u32 4294901760, %v16586_v51  ;;  %v7975_v56 = vand.u32 4294901760, %v7974_v26 }
 0x4c7   :  { %v17102_v48 = vpack.c.bf16 %v19947_v34, %v19946_v45  ;;  %v7064_v34 = vand.u32 4294901760, %v7063_v41  ;;  %v7071_v45 = vand.u32 4294901760, %v7070_v47  ;;  %v7968_v19 = vand.u32 4294901760, %v7967_v59 }
 0x4c8   :  { %v8100_v8 = vsub.f32 %v16586_v51, %v19952_v13  ;;  %v18654_v13 = vand.u32 4294901760, %v17085_v12  ;;  %v8094_v47 = vand.u32 4294901760, %v8093_v5  ;;  %v19953_v55 = vand.u32 4294901760, %v16600_v27 }
 0x4c9   :  { %19948 = vst [vmem:[#allocation75_spill] sm:$0xff] %v17102_v48  ;;  %v7084_v59 = vsub.f32 %v16602_v42, %v19954_v36  ;;  %v19955_v26 = vand.u32 4294901760, %v16639_v60  ;;  %v12074_v36 = vpack.c.bf16 %v7975_v56, %v7968_v19 }
 0x4ca   :  { %v8101_v40 = vand.u32 4294901760, %v8100_v8  ;;  %v7077_v62 = vsub.f32 %v16600_v27, %v19953_v55  ;;  %v19956_v8 = vand.u32 4294901760, %v16649_v20  ;;  %v19958_v55 = vand.u32 4294901760, %v16642_v25 }
 0x4cb   :  { %11879 = vmatpush3.bf16.xpose.msra.mxu0 %v17074_v0  ;;  %v17135_v41 = vsub.f32 %v16639_v60, %v19955_v26  ;;  %v7981_v60 = vsub.f32 %v17085_v12, %v18654_v13  ;;  %v7085_v19 = vand.u32 4294901760, %v7084_v59 }
 0x4cc   :  { %11881 = vmatprep.subr.bf16.mxu0 %v11880_v2  ;;  %v11882_v2 = vpack.c.bf16 %v7071_v45, %v7064_v34  ;;  %v7203_v5 = vsub.f32 %v16649_v20, %v19956_v8  ;;  %v19957_v34 = vand.u32 4294901760, %v16659_v21  ;;  %v17146_v24 = vsub.f32 %v16642_v25, %v19958_v55 }
 0x4cd   :  { %12071 = vmatpush3.bf16.xpose.msra.mxu1 %v17102_v48  ;;  %v12076_v26 = vpack.c.bf16 %v8101_v40, %v8094_v47  ;;  %v8107_v8 = vsub.f32 %v16661_v18, %v18657_v52  ;;  %v7078_v56 = vand.u32 4294901760, %v7077_v62  ;;  %v19961_v48 = vld [vmem:[#allocation3_spill] sm:$0xff]  ;;  %v18659_v52 = vand.u32 4294901760, %v16732_v44 }
 0x4ce   :  { %12073 = vmatprep.subr.bf16.mxu1 %v12072_v30  ;;  %v11884_v30 = vpack.c.bf16 %v7197_v11, %v7190_v43  ;;  %v7210_v45 = vsub.f32 %v16659_v21, %v19957_v34  ;;  %v19959_v43 = vand.u32 4294901760, %v17096_v16  ;;  %v19960_v34 = vand.u32 4294901760, %v16666_v46 }
 0x4cf   :  { %v7204_v40 = vand.u32 4294901760, %v7203_v5  ;;  %v18658_v62 = vand.u32 4294901760, %v17135_v41  ;;  %v18661_v59 = vand.u32 4294901760, %v17146_v24  ;;  %v8108_v13 = vand.u32 4294901760, %v8107_v8 }
 0x4d0   :  { %v7988_v11 = vsub.f32 %v17096_v16, %v19959_v43  ;;  %v8114_v25 = vsub.f32 %v16666_v46, %v19960_v34  ;;  %v7211_v47 = vand.u32 4294901760, %v7210_v45  ;;  %v18660_v43 = vand.u32 4294901760, %v16720_v6 }
 0x4d1   :  { %v7982_v34 = vand.u32 4294901760, %v7981_v60  ;;  %v11886_v5 = vpack.c.bf16 %v7085_v19, %v7078_v56  ;;  %v19962_v45 = vand.u32 4294901760, %v16674_v28  ;;  %v19963_v60 = vand.u32 4294901760, %v16676_v1 }
 0x4d2   :  { %10297 = vmatmul.mubr.f32.vlgmr.msra.gmra.mrb[12].mxu0 %v19867_v7  ;;  %v8115_v55 = vand.u32 4294901760, %v8114_v25  ;;  %v11888_v25 = vpack.c.bf16 %v7211_v47, %v7204_v40  ;;  %v7217_v56 = vsub.f32 %v16720_v6, %v18660_v43  ;;  %v7224_v19 = vsub.f32 %v16732_v44, %v18659_v52  ;;  %v19970_v52 = vld [vmem:[#allocation58_spill] sm:$0xff]  ;;  %v19971_v6 = vld [vmem:[#allocation40_spill] sm:$0xff]  ;;  %v19974_v43 = vld [vmem:[#allocation43_spill] sm:$0xff] }
 0x4d3   :  { %11883 = vmatpush3.bf16.xpose.msra.mxu0 %v11882_v2  ;;  %10298 = vmatprep.mubr.f32.mxu0 %v19961_v48  ;;  %v7989_v2 = vand.u32 4294901760, %v7988_v11  ;;  %v7098_v11 = vsub.f32 %v16676_v1, %v19963_v60  ;;  %v8002_v40 = vsub.f32 %v17146_v24, %v18661_v59 }
 0x4d4   :  { %10513 = vmatmul.mubr.f32.vlgmr.msra.gmra.mrb[12].mxu1 %v19867_v7  ;;  %11885 = vmatprep.subr.bf16.mxu0 %v11884_v30  ;;  %v18668_v7 = vand.u32 4294901760, %v16734_v22  ;;  %v12080_v47 = vpack.c.bf16 %v8115_v55, %v8108_v13  ;;  %v7218_v59 = vand.u32 4294901760, %v7217_v56  ;;  %v7225_v0 = vand.u32 4294901760, %v7224_v19  ;;  %v19972_v55 = vld [vmem:[#allocation66_spill] sm:$0xff] }
 0x4d5   :  { %12075 = vmatpush3.bf16.xpose.msra.mxu1 %v12074_v36  ;;  %10514 = vmatprep.mubr.f32.mxu1 %v19961_v48  ;;  %v7091_v36 = vsub.f32 %v16674_v28, %v19962_v45  ;;  %v19966_v45 = vand.u32 4294901760, %v16728_v33  ;;  %v12078_v30 = vpack.c.bf16 %v7989_v2, %v7982_v34  ;;  %v18674_v44 = vand.u32 4294901760, %v19972_v55 }
 0x4d6   :  { %12077 = vmatprep.subr.bf16.mxu1 %v12076_v26  ;;  %10299 = vmatmul.mubr.f32.gmra.mrb[14].mxu0 %v19961_v48  ;;  %v19964_v26 = vand.u32 4294901760, %v16725_v61 }
 0x4d7   :  { %10332 = vmatprep.mubr.msk.f32.mxu0 %vm83_vm0, %v19215_v9  ;;  %v17196_v60 = vsub.f32 %v16728_v33, %v19966_v45  ;;  %v19968_v33 = vand.u32 4294901760, %v16740_v63  ;;  %v7092_v2 = vand.u32 4294901760, %v7091_v36  ;;  %v19969_v45 = vld [vmem:[#allocation37_spill] sm:$0xff] }
 0x4d8   :  { %v17184_v8 = vsub.f32 %v16725_v61, %v19964_v26  ;;  %10515 = vmatmul.mubr.f32.gmra.mrb[14].mxu1 %v19961_v48  ;;  %v7995_v61 = vsub.f32 %v17135_v41, %v18658_v62  ;;  %v8121_v48 = vsub.f32 %v16734_v22, %v18668_v7  ;;  %v7099_v26 = vand.u32 4294901760, %v7098_v11 }
 0x4d9   :  { %19967 = vst [vmem:[#allocation24_spill] sm:$0xff] %v17196_v60  ;;  %10548 = vmatprep.mubr.msk.f32.mxu1 %vm83_vm0, %v19215_v9  ;;  %v8128_v34 = vsub.f32 %v16740_v63, %v19968_v33  ;;  %v8003_v22 = vand.u32 4294901760, %v8002_v40  ;;  %v19973_v33 = vld [vmem:[#allocation73_spill] sm:$0xff]  ;;  %v19975_v19 = vand.u32 4294901760, %v19969_v45 }
 0x4da   :  { %19965 = vst [vmem:[#allocation21_spill] sm:$0xff] %v17184_v8  ;;  %v7996_v7 = vand.u32 4294901760, %v7995_v61  ;;  %v8122_v36 = vand.u32 4294901760, %v8121_v48  ;;  %v11890_v56 = vpack.c.bf16 %v7099_v26, %v7092_v2  ;;  %v19977_v40 = vld [vmem:[#allocation85_spill] sm:$0xff]  ;;  %v19980_v48 = vand.u32 4294901760, %v19971_v6 }
 0x4db   :  { %11887 = vmatpush3.bf16.xpose.msra.mxu0 %v11886_v5  ;;  %v8129_v11 = vand.u32 4294901760, %v8128_v34  ;;  %v7105_v13 = vsub.f32 %v19969_v45, %v19975_v19  ;;  %v19978_v28 = vand.u32 4294901760, %v19977_v40  ;;  %v7238_v2 = vsub.f32 %v19972_v55, %v18674_v44  ;;  %v19981_v26 = vld [vmem:[#allocation89_spill] sm:$0xff]  ;;  %v19989_v45 = vld [vmem:[#allocation31_spill] sm:$0xff] }
 0x4dc   :  { %11889 = vmatprep.subr.bf16.mxu0 %v11888_v25  ;;  %v7231_v34 = vsub.f32 %v19971_v6, %v19980_v48  ;;  %v19982_v19 = vand.u32 4294901760, %v19981_v26  ;;  %v19984_v62 = vand.u32 4294901760, %v17184_v8  ;;  %v19986_v48 = vand.u32 4294901760, %v19973_v33 }
 0x4dd   :  { %12079 = vmatpush3.bf16.xpose.msra.mxu1 %v12078_v30  ;;  %v19976_v30 = vand.u32 4294901760, %v19970_v52  ;;  %v17229_v5 = vsub.f32 %v19977_v40, %v19978_v28  ;;  %v12084_v40 = vpack.c.bf16 %v8129_v11, %v8122_v36  ;;  %v19987_v44 = vand.u32 4294901760, %v19974_v43  ;;  %v19991_v11 = vld [vmem:[#allocation44_spill] sm:$0xff] }
 0x4de   :  { %12081 = vmatprep.subr.bf16.mxu1 %v12080_v47  ;;  %v11892_v47 = vpack.c.bf16 %v7225_v0, %v7218_v59  ;;  %v17240_v25 = vsub.f32 %v19981_v26, %v19982_v19  ;;  %v8009_v28 = vsub.f32 %v17184_v8, %v19984_v62  ;;  %v19985_v0 = vand.u32 4294901760, %v17196_v60  ;;  %v19993_v62 = vld [vmem:[#allocation62_spill] sm:$0xff] }
 0x4df   :  { %v7112_v61 = vsub.f32 %v19970_v52, %v19976_v30  ;;  %19979 = vst [vmem:[#allocation23_spill] sm:$0xff] %v17229_v5  ;;  %v12082_v30 = vpack.c.bf16 %v8003_v22, %v7996_v7  ;;  %v8135_v6 = vsub.f32 %v19973_v33, %v19986_v48  ;;  %v8142_v55 = vsub.f32 %v19974_v43, %v19987_v44  ;;  %v19988_v7 = vld [vmem:[#allocation32_spill] sm:$0xff] }
 0x4e0   :  { %19983 = vst [vmem:[#allocation30_spill] sm:$0xff] %v17240_v25  ;;  %v8016_v59 = vsub.f32 %v17196_v60, %v19985_v0  ;;  %v7106_v26 = vand.u32 4294901760, %v7105_v13  ;;  %v7232_v52 = vand.u32 4294901760, %v7231_v34  ;;  %v7239_v8 = vand.u32 4294901760, %v7238_v2  ;;  %v19990_v0 = vld [vmem:[#allocation35_spill] sm:$0xff] }
 0x4e1   :  { %v7113_v22 = vand.u32 4294901760, %v7112_v61  ;;  %v18686_v60 = vand.u32 4294901760, %v19991_v11  ;;  %v8010_v48 = vand.u32 4294901760, %v8009_v28  ;;  %v8136_v13 = vand.u32 4294901760, %v8135_v6  ;;  %v19992_v61 = vld [vmem:[#allocation87_spill] sm:$0xff] }
 0x4e2   :  { %v8017_v33 = vand.u32 4294901760, %v8016_v59  ;;  %v19994_v2 = vand.u32 4294901760, %v19988_v7  ;;  %v19996_v59 = vld [vmem:[#allocation39_spill] sm:$0xff]  ;;  %v11896_v6 = vpack.c.bf16 %v7239_v8, %v7232_v52  ;;  %v20003_v19 = vand.u32 4294901760, %v17229_v5 }
 0x4e3   :  { %11891 = vmatpush3.bf16.xpose.msra.mxu0 %v11890_v56  ;;  %v8143_v56 = vand.u32 4294901760, %v8142_v55  ;;  %v11894_v34 = vpack.c.bf16 %v7113_v22, %v7106_v26  ;;  %v19997_v63 = vand.u32 4294901760, %v19996_v59  ;;  %v19999_v55 = vand.u32 4294901760, %v19990_v0  ;;  %v20000_v22 = vld [vmem:[#allocation91_spill] sm:$0xff] }
 0x4e4   :  { %11893 = vmatprep.subr.bf16.mxu0 %v11892_v47  ;;  %v7119_v36 = vsub.f32 %v19988_v7, %v19994_v2  ;;  %v7252_v26 = vsub.f32 %v19991_v11, %v18686_v60  ;;  %v20001_v2 = vand.u32 4294901760, %v20000_v22  ;;  %v20004_v52 = vand.u32 4294901760, %v17240_v25  ;;  %v20008_v7 = vld [vmem:[#allocation2_spill] sm:$0xff] }
 0x4e5   :  { %12083 = vmatpush3.bf16.xpose.msra.mxu1 %v12082_v30  ;;  %v19995_v30 = vand.u32 4294901760, %v19989_v45  ;;  %v17271_v44 = vsub.f32 %v19996_v59, %v19997_v63  ;;  %v8023_v63 = vsub.f32 %v17229_v5, %v20003_v19  ;;  %v12088_v59 = vpack.c.bf16 %v8143_v56, %v8136_v13 }
 0x4e6   :  { %12085 = vmatprep.subr.bf16.mxu1 %v12084_v40  ;;  %v7245_v40 = vsub.f32 %v19990_v0, %v19999_v55  ;;  %v17282_v47 = vsub.f32 %v20000_v22, %v20001_v2  ;;  %v8030_v8 = vsub.f32 %v17240_v25, %v20004_v52  ;;  %v20005_v55 = vand.u32 4294901760, %v19992_v61 }
 0x4e7   :  { %v7126_v28 = vsub.f32 %v19989_v45, %v19995_v30  ;;  %19998 = vst [vmem:[#allocation17_spill] sm:$0xff] %v17271_v44  ;;  %v12086_v30 = vpack.c.bf16 %v8017_v33, %v8010_v48  ;;  %v20006_v60 = vand.u32 4294901760, %v19993_v62  ;;  %v7120_v22 = vand.u32 4294901760, %v7119_v36  ;;  %v20007_v48 = vld [vmem:[#allocation77_spill] sm:$0xff] }
 0x4e8   :  { %20002 = vst [vmem:[#allocation11_spill] sm:$0xff] %v17282_v47  ;;  %v8149_v0 = vsub.f32 %v19992_v61, %v20005_v55  ;;  %v18693_v2 = vand.u32 4294901760, %v20007_v48  ;;  %v18694_v19 = vand.u32 4294901760, %v20008_v7  ;;  %v7246_v45 = vand.u32 4294901760, %v7245_v40 }
 0x4e9   :  { %v8156_v11 = vsub.f32 %v19993_v62, %v20006_v60  ;;  %v7127_v33 = vand.u32 4294901760, %v7126_v28  ;;  %v7253_v5 = vand.u32 4294901760, %v7252_v26  ;;  %v18696_v13 = vand.u32 4294901760, %v16966_v17 }
 0x4ea   :  { %v18695_v56 = vand.u32 4294901760, %v16970_v14  ;;  %v8024_v52 = vand.u32 4294901760, %v8023_v63  ;;  %v8031_v55 = vand.u32 4294901760, %v8030_v8  ;;  %v18697_v61 = vand.u32 4294901760, %v17271_v44 }
 0x4eb   :  { %11895 = vmatpush3.bf16.xpose.msra.mxu0 %v11894_v34  ;;  %v18703_v60 = vand.u32 4294901760, %v17282_v47  ;;  %v8150_v36 = vand.u32 4294901760, %v8149_v0  ;;  %v8157_v34 = vand.u32 4294901760, %v8156_v11  ;;  %v18702_v28 = vand.u32 4294901760, %v16972_v35 }
 0x4ec   :  { %11897 = vmatprep.subr.bf16.mxu0 %v11896_v6  ;;  %v18706_v6 = vand.u32 4294901760, %v16978_v38  ;;  %v11898_v40 = vpack.c.bf16 %v7127_v33, %v7120_v22  ;;  %v7133_v26 = vsub.f32 %v20007_v48, %v18693_v2  ;;  %v20009_v63 = vand.u32 4294901760, %v16938_v15  ;;  %v20011_v22 = vld [vmem:[#allocation53_spill] sm:$0xff] }
 0x4ed   :  { %12087 = vmatpush3.bf16.xpose.msra.mxu1 %v12086_v30  ;;  %v7140_v30 = vsub.f32 %v20008_v7, %v18694_v19  ;;  %v11900_v0 = vpack.c.bf16 %v7253_v5, %v7246_v45  ;;  %v7259_v11 = vsub.f32 %v16966_v17, %v18696_v13  ;;  %v20012_v33 = vand.u32 4294901760, %v20011_v22  ;;  %v20015_v13 = vld [vmem:[#allocation55_spill] sm:$0xff] }
 0x4ee   :  { %12089 = vmatprep.subr.bf16.mxu1 %v12088_v59  ;;  %v17313_v8 = vsub.f32 %v16938_v15, %v20009_v63  ;;  %v7266_v59 = vsub.f32 %v16970_v14, %v18695_v56  ;;  %v12090_v19 = vpack.c.bf16 %v8031_v55, %v8024_v52  ;;  %v8037_v15 = vsub.f32 %v17271_v44, %v18697_v61  ;;  %v20014_v55 = vld [vmem:[#allocation64_spill] sm:$0xff] }
 0x4ef   :  { %v17324_v2 = vsub.f32 %v20011_v22, %v20012_v33  ;;  %v8044_v45 = vsub.f32 %v17282_v47, %v18703_v60  ;;  %v12092_v5 = vpack.c.bf16 %v8157_v34, %v8150_v36  ;;  %v8163_v63 = vsub.f32 %v16972_v35, %v18702_v28 }
 0x4f0   :  { %20010 = vst [vmem:[#allocation5_spill] sm:$0xff] %v17313_v8  ;;  %v8170_v56 = vsub.f32 %v16978_v38, %v18706_v6  ;;  %v7134_v22 = vand.u32 4294901760, %v7133_v26  ;;  %v7141_v52 = vand.u32 4294901760, %v7140_v30  ;;  %v18713_v33 = vand.u32 4294901760, %v20014_v55 }
 0x4f1   :  { %20013 = vst [vmem:[#allocation69_spill] sm:$0xff] %v17324_v2  ;;  %v18707_v61 = vand.u32 4294901760, %v20015_v13  ;;  %v7260_v17 = vand.u32 4294901760, %v7259_v11  ;;  %v7267_v14 = vand.u32 4294901760, %v7266_v59  ;;  %v18710_v36 = vand.u32 4294901760, %v17022_v10 }
 0x4f2   :  { %v18708_v34 = vand.u32 4294901760, %v17033_v23  ;;  %v8038_v28 = vand.u32 4294901760, %v8037_v15  ;;  %v8045_v60 = vand.u32 4294901760, %v8044_v45  ;;  %v18709_v35 = vand.u32 4294901760, %v17313_v8 }
 0x4f3   :  { %11899 = vmatpush3.bf16.xpose.msra.mxu0 %v11898_v40  ;;  %v18711_v40 = vand.u32 4294901760, %v17324_v2  ;;  %v8164_v26 = vand.u32 4294901760, %v8163_v63  ;;  %v8171_v30 = vand.u32 4294901760, %v8170_v56  ;;  %v18712_v6 = vand.u32 4294901760, %v17040_v58 }
 0x4f4   :  { %11901 = vmatprep.subr.bf16.mxu0 %v11900_v0  ;;  %v18714_v0 = vand.u32 4294901760, %v17042_v32  ;;  %v11902_v11 = vpack.c.bf16 %v7141_v52, %v7134_v22  ;;  %v7147_v59 = vsub.f32 %v20014_v55, %v18713_v33  ;;  %v20016_v15 = vand.u32 4294901760, %v17025_v57 }
 0x4f5   :  { %12091 = vmatpush3.bf16.xpose.msra.mxu1 %v12090_v19  ;;  %v7154_v19 = vsub.f32 %v20015_v13, %v18707_v61  ;;  %v7273_v56 = vsub.f32 %v17022_v10, %v18710_v36  ;;  %v7280_v63 = vsub.f32 %v17033_v23, %v18708_v34  ;;  %v20018_v22 = vand.u32 4294901760, %v17028_v49 }
 0x4f6   :  { %12093 = vmatprep.subr.bf16.mxu1 %v12092_v5  ;;  %v17355_v45 = vsub.f32 %v17025_v57, %v20016_v15  ;;  %v11904_v5 = vpack.c.bf16 %v7267_v14, %v7260_v17  ;;  %v12094_v61 = vpack.c.bf16 %v8045_v60, %v8038_v28  ;;  %v8051_v57 = vsub.f32 %v17313_v8, %v18709_v35 }
 0x4f7   :  { %v17366_v52 = vsub.f32 %v17028_v49, %v20018_v22  ;;  %v8058_v17 = vsub.f32 %v17324_v2, %v18711_v40  ;;  %v12096_v14 = vpack.c.bf16 %v8171_v30, %v8164_v26  ;;  %v8177_v15 = vsub.f32 %v17040_v58, %v18712_v6 }
 0x4f8   :  { %20017 = vst [vmem:[#allocation68_spill] sm:$0xff] %v17355_v45  ;;  %v8184_v34 = vsub.f32 %v17042_v32, %v18714_v0  ;;  %v7148_v49 = vand.u32 4294901760, %v7147_v59  ;;  %v7155_v60 = vand.u32 4294901760, %v7154_v19  ;;  %v18718_v28 = vand.u32 4294901760, %v17047_v39 }
 0x4f9   :  { %20019 = vst [vmem:[#allocation4_spill] sm:$0xff] %v17366_v52  ;;  %v18717_v22 = vand.u32 4294901760, %v17055_v50  ;;  %v7274_v35 = vand.u32 4294901760, %v7273_v56  ;;  %v7281_v36 = vand.u32 4294901760, %v7280_v63  ;;  %v8052_v26 = vand.u32 4294901760, %v8051_v57 }
 0x4fa   :  { %v8059_v30 = vand.u32 4294901760, %v8058_v17  ;;  %v18716_v40 = vand.u32 4294901760, %v17355_v45  ;;  %v18715_v6 = vand.u32 4294901760, %v17366_v52  ;;  %v8178_v33 = vand.u32 4294901760, %v8177_v15 }
 0x4fb   :  { %11903 = vmatpush3.bf16.xpose.msra.mxu0 %v11902_v11  ;;  %v8185_v0 = vand.u32 4294901760, %v8184_v34  ;;  %v11906_v11 = vpack.c.bf16 %v7155_v60, %v7148_v49  ;;  %v7161_v59 = vsub.f32 %v17047_v39, %v18718_v28  ;;  %v7168_v19 = vsub.f32 %v17055_v50, %v18717_v22  ;;  %v20047_v22 = vld [vmem:[#allocation40_spill] sm:$0xff] }
 0x4fc   :  { %11905 = vmatprep.subr.bf16.mxu0 %v11904_v5  ;;  %v11908_v5 = vpack.c.bf16 %v7281_v36, %v7274_v35  ;;  %v8065_v56 = vsub.f32 %v17355_v45, %v18716_v40  ;;  %v8072_v63 = vsub.f32 %v17366_v52, %v18715_v6  ;;  %v20020_v36 = vld [vmem:[#allocation60_spill] sm:$0xff]  ;;  %v20046_v40 = vld [vmem:[#allocation66_spill] sm:$0xff] }
 0x4fd   :  { %12095 = vmatpush3.bf16.xpose.msra.mxu1 %v12094_v61  ;;  %v12098_v61 = vpack.c.bf16 %v8059_v30, %v8052_v26  ;;  %v12100_v34 = vpack.c.bf16 %v8185_v0, %v8178_v33  ;;  %v7162_v57 = vand.u32 4294901760, %v7161_v59  ;;  %v7169_v17 = vand.u32 4294901760, %v7168_v19  ;;  %v20023_v30 = vld [vmem:[#allocation81_spill] sm:$0xff]  ;;  %v20025_v59 = vld [vmem:[#allocation26_spill] sm:$0xff] }
 0x4fe   :  { %12097 = vmatprep.subr.bf16.mxu1 %v12096_v14  ;;  %v8066_v14 = vand.u32 4294901760, %v8065_v56  ;;  %v8073_v15 = vand.u32 4294901760, %v8072_v63  ;;  %v20021_v60 = vpack.c.bf16 %v16500_v54, %v20020_v36  ;;  %v20022_v26 = vpack.c.bf16 %v16508_v37, %v16502_v53  ;;  %v20029_v56 = vld [vmem:[#allocation92_spill] sm:$0xff] }
 0x4ff   :  { %v11910_v49 = vpack.c.bf16 %v7169_v17, %v7162_v57  ;;  %v11914_v33 = vpack.c.bf16 %v16772_v3, %v16759_v29  ;;  %v12106_v0 = vpack.c.bf16 %v16868_v31, %v16854_v4  ;;  %v12110_v63 = vpack.c.bf16 %v17096_v16, %v17085_v12 }
 0x500   :  { %v12102_v35 = vpack.c.bf16 %v8073_v15, %v8066_v14  ;;  %v20031_v57 = vpack.c.bf16 %v16659_v21, %v16649_v20  ;;  %v20032_v17 = vpack.c.bf16 %v16666_v46, %v16661_v18  ;;  %v12114_v14 = vpack.c.bf16 %v17146_v24, %v17135_v41  ;;  %v20033_v15 = vld [vmem:[#allocation51_spill] sm:$0xff] }
 0x501   :  { %v20048_v28 = vpack.c.bf16 %v20046_v40, %v20047_v22 }
 0x503   :  { %11907 = vmatpush3.bf16.xpose.msra.mxu0 %v11906_v11  ;;  %v20024_v11 = vld [vmem:[#allocation7_spill] sm:$0xff] }
 0x504   :  { %11909 = vmatprep.subr.bf16.mxu0 %v11908_v5  ;;  %v20026_v19 = vpack.c.bf16 %v20024_v11, %v20025_v59  ;;  %v20027_v5 = vld [vmem:[#allocation27_spill] sm:$0xff] }
 0x505   :  { %12099 = vmatpush3.bf16.xpose.msra.mxu1 %v12098_v61  ;;  %v20028_v61 = vpack.c.bf16 %v16586_v51, %v20027_v5 }
 0x506   :  { %12101 = vmatprep.subr.bf16.mxu1 %v12100_v34  ;;  %v20030_v34 = vpack.c.bf16 %v16602_v42, %v16600_v27 }
 0x50b   :  { %11911 = vmatpush3.bf16.xpose.msra.mxu0 %v11910_v49  ;;  %v20034_v49 = vpack.c.bf16 %v16676_v1, %v20033_v15 }
 0x50c   :  { %11913 = vmatprep.subr.bf16.mxu0 %v20021_v60  ;;  %v20036_v60 = vld [vmem:[#allocation79_spill] sm:$0xff] }
 0x50d   :  { %12103 = vmatpush3.bf16.xpose.msra.mxu1 %v12102_v35  ;;  %v20035_v35 = vld [vmem:[#allocation88_spill] sm:$0xff] }
 0x50e   :  { %12105 = vmatprep.subr.bf16.mxu1 %v20022_v26  ;;  %v20037_v26 = vpack.c.bf16 %v20035_v35, %v20036_v60 }
 0x512   :  { %10333 = vmatmul.mubr.msk.f32.vlgmr.msra.gmra.mrb[12].mxu0 %vm83_vm0, %v19215_v9 }
 0x513   :  { %11915 = vmatpush3.bf16.xpose.msra.mxu0 %v11914_v33  ;;  %10334 = vmatprep.mubr.msk.f32.mxu0 %vm83_vm0, %v20023_v30  ;;  %v20038_v33 = vld [vmem:[#allocation22_spill] sm:$0xff] }
 0x514   :  { %10549 = vmatmul.mubr.msk.f32.vlgmr.msra.gmra.mrb[12].mxu1 %vm83_vm0, %v19215_v9  ;;  %11917 = vmatprep.subr.bf16.mxu0 %v20026_v19 }
 0x515   :  { %12107 = vmatpush3.bf16.xpose.msra.mxu1 %v12106_v0  ;;  %10550 = vmatprep.mubr.msk.f32.mxu1 %vm83_vm0, %v20023_v30  ;;  %v20039_v0 = vld [vmem:[#allocation90_spill] sm:$0xff] }
 0x516   :  { %12109 = vmatprep.subr.bf16.mxu1 %v20028_v61  ;;  %10335 = vmatmul.mubr.msk.f32.gmra.mrb[14].mxu0 %vm83_vm0, %v20023_v30  ;;  %v20040_v19 = vpack.c.bf16 %v20038_v33, %v20039_v0  ;;  %v20041_v61 = vld [vmem:[#allocation21_spill] sm:$0xff]  ;;  %v20053_v33 = vld [vmem:[#allocation32_spill] sm:$0xff] }
 0x517   :  { %10368 = vmatprep.mubr.f32.mxu0 %v20029_v56 }
 0x518   :  { %10551 = vmatmul.mubr.msk.f32.gmra.mrb[14].mxu1 %vm83_vm0, %v20023_v30 }
 0x519   :  { %10584 = vmatprep.mubr.f32.mxu1 %v20029_v56 }
 0x51b   :  { %11919 = vmatpush3.bf16.xpose.msra.mxu0 %v20030_v34 }
 0x51c   :  { %11921 = vmatprep.subr.bf16.mxu0 %v20031_v57  ;;  %v20043_v57 = vld [vmem:[#allocation58_spill] sm:$0xff] }
 0x51d   :  { %12111 = vmatpush3.bf16.xpose.msra.mxu1 %v12110_v63  ;;  %v20042_v63 = vld [vmem:[#allocation24_spill] sm:$0xff] }
 0x51e   :  { %12113 = vmatprep.subr.bf16.mxu1 %v20032_v17  ;;  %v12118_v34 = vpack.c.bf16 %v20042_v63, %v20041_v61  ;;  %v20044_v17 = vld [vmem:[#allocation37_spill] sm:$0xff]  ;;  %v20055_v63 = vld [vmem:[#allocation44_spill] sm:$0xff]  ;;  %v20056_v61 = vld [vmem:[#allocation35_spill] sm:$0xff] }
 0x51f   :  { %v20045_v6 = vpack.c.bf16 %v20043_v57, %v20044_v17  ;;  %v20057_v57 = vpack.c.bf16 %v20055_v63, %v20056_v61 }
 0x523   :  { %11923 = vmatpush3.bf16.xpose.msra.mxu0 %v20034_v49  ;;  %v20049_v49 = vld [vmem:[#allocation73_spill] sm:$0xff] }
 0x524   :  { %11925 = vmatprep.subr.bf16.mxu0 %v20037_v26  ;;  %v20050_v26 = vpack.c.bf16 %v19974_v43, %v20049_v49  ;;  %v20091_v43 = vld [vmem:[#allocation38_spill] sm:$0xff] }
 0x525   :  { %12115 = vmatpush3.bf16.xpose.msra.mxu1 %v12114_v14  ;;  %v20051_v14 = vld [vmem:[#allocation23_spill] sm:$0xff] }
 0x526   :  { %12117 = vmatprep.subr.bf16.mxu1 %v20040_v19  ;;  %v12122_v30 = vpack.c.bf16 %v17240_v25, %v20051_v14  ;;  %v20052_v19 = vld [vmem:[#allocation31_spill] sm:$0xff]  ;;  %v20062_v14 = vld [vmem:[#allocation16_spill] sm:$0xff] }
 0x527   :  { %v20054_v0 = vpack.c.bf16 %v20052_v19, %v20053_v33  ;;  %v20061_v25 = vld [vmem:[#allocation19_spill] sm:$0xff] }
 0x528   :  { %v20063_v19 = vpack.c.bf16 %v20061_v25, %v20062_v14  ;;  %v20089_v25 = vld [vmem:[#allocation78_spill] sm:$0xff] }
 0x52b   :  { %11927 = vmatpush3.bf16.xpose.msra.mxu0 %v20045_v6  ;;  %v20058_v6 = vld [vmem:[#allocation87_spill] sm:$0xff] }
 0x52c   :  { %11929 = vmatprep.subr.bf16.mxu0 %v20048_v28  ;;  %v20059_v28 = vpack.c.bf16 %v19993_v62, %v20058_v6 }
 0x52d   :  { %12119 = vmatpush3.bf16.xpose.msra.mxu1 %v12118_v34  ;;  %v12126_v34 = vpack.c.bf16 %v17282_v47, %v17271_v44  ;;  %v20067_v47 = vpack.c.bf16 %v17033_v23, %v17022_v10 }
 0x52e   :  { %12121 = vmatprep.subr.bf16.mxu1 %v20050_v26  ;;  %v20060_v26 = vpack.c.bf16 %v20008_v7, %v20007_v48 }
 0x533   :  { %11931 = vmatpush3.bf16.xpose.msra.mxu0 %v20054_v0  ;;  %v20064_v0 = vld [vmem:[#allocation25_spill] sm:$0xff] }
 0x534   :  { %11933 = vmatprep.subr.bf16.mxu0 %v20057_v57  ;;  %v20065_v57 = vpack.c.bf16 %v16978_v38, %v20064_v0  ;;  %v20088_v0 = vld [vmem:[#allocation20_spill] sm:$0xff] }
 0x535   :  { %12123 = vmatpush3.bf16.xpose.msra.mxu1 %v12122_v30  ;;  %v12130_v30 = vpack.c.bf16 %v17324_v2, %v17313_v8 }
 0x536   :  { %12125 = vmatprep.subr.bf16.mxu1 %v20059_v28  ;;  %v20066_v28 = vpack.c.bf16 %v20015_v13, %v20014_v55  ;;  %v20087_v13 = vld [vmem:[#allocation34_spill] sm:$0xff] }
 0x53b   :  { %11935 = vmatpush3.bf16.xpose.msra.mxu0 %v20060_v26  ;;  %v20069_v26 = vpack.c.bf16 %v17055_v50, %v17047_v39 }
 0x53c   :  { %11937 = vmatprep.subr.bf16.mxu0 %v20063_v19  ;;  %v20068_v19 = vpack.c.bf16 %v17042_v32, %v17040_v58  ;;  %v20086_v58 = vld [vmem:[#allocation18_spill] sm:$0xff] }
 0x53d   :  { %12127 = vmatpush3.bf16.xpose.msra.mxu1 %v12126_v34  ;;  %v12134_v34 = vpack.c.bf16 %v17366_v52, %v17355_v45  ;;  %v20075_v52 = vld [vmem:[#allocation15_spill] sm:$0xff] }
 0x53e   :  { %12129 = vmatprep.subr.bf16.mxu1 %v20065_v57  ;;  %v20070_v57 = vld [vmem:[#allocation72_spill] sm:$0xff] }
 0x543   :  { %11939 = vmatpush3.bf16.xpose.msra.mxu0 %v20066_v28  ;;  %v20071_v28 = vld [vmem:[#allocation76_spill] sm:$0xff] }
 0x544   :  { %11941 = vmatprep.subr.bf16.mxu0 %v20067_v47  ;;  %v20072_v47 = vld [vmem:[#allocation82_spill] sm:$0xff] }
 0x545   :  { %12131 = vmatpush3.bf16.xpose.msra.mxu1 %v12130_v30  ;;  %v20073_v30 = vld [vmem:[#allocation83_spill] sm:$0xff] }
 0x546   :  { %12133 = vmatprep.subr.bf16.mxu1 %v20068_v19  ;;  %v20074_v19 = vld [vmem:[#allocation59_spill] sm:$0xff] }
 0x54b   :  { %11943 = vmatpush3.bf16.xpose.msra.mxu0 %v20069_v26  ;;  %v20076_v26 = vld [vmem:[#allocation80_spill] sm:$0xff] }
 0x54c   :  { %11945 = vmatprep.subr.bf16.mxu0 %v20070_v57  ;;  %v20083_v57 = vld [vmem:[#allocation71_spill] sm:$0xff] }
 0x54d   :  { %12135 = vmatpush3.bf16.xpose.msra.mxu1 %v12134_v34  ;;  %v20077_v34 = vld [vmem:[#allocation93_spill] sm:$0xff] }
 0x54e   :  { %12137 = vmatprep.subr.bf16.mxu1 %v20071_v28  ;;  %v20079_v28 = vld [vmem:[#allocation10_spill] sm:$0xff] }
 0x552   :  { %10369 = vmatmul.mubr.f32.vlgmr.msra.gmra.mrb[12].mxu0 %v20029_v56 }
 0x553   :  { %11947 = vmatpush3.bf16.xpose.msra.mxu0 %v20072_v47  ;;  %10370 = vmatprep.mubr.f32.mxu0 %v20073_v30  ;;  %v20078_v47 = vld [vmem:[#allocation29_spill] sm:$0xff] }
 0x554   :  { %10585 = vmatmul.mubr.f32.vlgmr.msra.gmra.mrb[12].mxu1 %v20029_v56  ;;  %11949 = vmatprep.subr.bf16.mxu0 %v20074_v19  ;;  %v20080_v56 = vld [vmem:[#allocation12_spill] sm:$0xff]  ;;  %v20081_v19 = vld [vmem:[#allocation46_spill] sm:$0xff] }
 0x555   :  { %12139 = vmatpush3.bf16.xpose.msra.mxu1 %v20075_v52  ;;  %10586 = vmatprep.mubr.f32.mxu1 %v20073_v30  ;;  %v20082_v52 = vld [vmem:[#allocation70_spill] sm:$0xff] }
 0x556   :  { %12141 = vmatprep.subr.bf16.mxu1 %v20076_v26  ;;  %10371 = vmatmul.mubr.f32.gmra.mrb[14].mxu0 %v20073_v30  ;;  %v20084_v26 = vld [vmem:[#allocation63_spill] sm:$0xff] }
 0x557   :  { %10404 = vmatprep.mubr.f32.mxu0 %v20077_v34 }
 0x558   :  { %10587 = vmatmul.mubr.f32.gmra.mrb[14].mxu1 %v20073_v30  ;;  %v20085_v30 = vld [vmem:[#allocation41_spill] sm:$0xff] }
 0x559   :  { %10620 = vmatprep.mubr.f32.mxu1 %v20077_v34 }
 0x55b   :  { %11951 = vmatpush3.bf16.xpose.msra.mxu0 %v20078_v47 }
 0x55c   :  { %11953 = vmatprep.subr.bf16.mxu0 %v20079_v28 }
 0x55d   :  { %12143 = vmatpush3.bf16.xpose.msra.mxu1 %v20080_v56 }
 0x55e   :  { %12145 = vmatprep.subr.bf16.mxu1 %v20081_v19 }
 0x563   :  { %11955 = vmatpush3.bf16.xpose.msra.mxu0 %v20082_v52 }
 0x564   :  { %11957 = vmatprep.subr.bf16.mxu0 %v20083_v57 }
 0x565   :  { %12147 = vmatpush3.bf16.xpose.msra.mxu1 %v20084_v26  ;;  %v17518_v45 = vpop.f32.mrb[8].mxu0 }
 0x566   :  { %v17520_v50 = vpop.f32.mrb[9].mxu0  ;;  %12149 = vmatprep.subr.bf16.mxu1 %v20085_v30  ;;  %v6546_v19 = vsel %vm2102_vm3, %v17518_v45, -inf }
 0x567   :  { %v17523_v39 = vpop.f32.mrb[8].mxu1  ;;  %v6555_v26 = vsel %vm2102_vm3, %v17520_v50, -inf }
 0x568   :  { %v17525_v47 = vpop.f32.mrb[9].mxu1  ;;  %v6564_v2 = vsel %vm2102_vm3, %v17523_v39, -inf }
 0x569   :  { %v5625_v28 = vpop.f32.mrb[10].mxu0  ;;  %v6573_v55 = vsel %vm2102_vm3, %v17525_v47, -inf }
 0x56a   :  { %v6547_v52 = vsel %vm2104_vm4, %v5625_v28, -inf  ;;  %v17530_v56 = vpop.f32.mrb[11].mxu0 }
 0x56b   :  { %v6548_v57 = vmax.f32 %v6546_v19, %v6547_v52  ;;  %v6529_v32 = vpop.f32.mrb[10].mxu1  ;;  %v6556_v30 = vsel %vm2104_vm4, %v17530_v56, -inf  ;;  %11959 = vmatpush3.bf16.xpose.msra.mxu0 %v20086_v58 }
 0x56c   :  { %v6565_v8 = vsel %vm2104_vm4, %v6529_v32, -inf  ;;  %v6557_v23 = vmax.f32 %v6555_v26, %v6556_v30  ;;  %v17540_v10 = vpop.f32.mrb[11].mxu1  ;;  %11961 = vmatprep.subr.bf16.mxu0 %v20087_v13 }
 0x56d   :  { %v6549_v52 = vrot.slane %v6548_v57, 4  ;;  %v6566_v19 = vmax.f32 %v6564_v2, %v6565_v8  ;;  %v6574_v38 = vsel %vm2104_vm4, %v17540_v10, -inf  ;;  %12151 = vmatpush3.bf16.xpose.msra.mxu1 %v20088_v0  ;;  %v20090_v2 = vld [vmem:[#allocation9_spill] sm:$0xff] }
 0x56e   :  { %v6558_v58 = vrot.slane %v6557_v23, 4  ;;  %v6575_v44 = vmax.f32 %v6573_v55, %v6574_v38  ;;  %12153 = vmatprep.subr.bf16.mxu1 %v20089_v25  ;;  %v20092_v55 = vld [vmem:[#allocation33_spill] sm:$0xff] }
 0x56f   :  { %v6550_v14 = vmax.f32 %v6548_v57, %v6549_v52  ;;  %v6567_v26 = vrot.slane %v6566_v19, 4 }
 0x570   :  { %v6559_v30 = vmax.f32 %v6557_v23, %v6558_v58  ;;  %v6576_v7 = vrot.slane %v6575_v44, 4  ;;  %v20093_v23 = vld [vmem:[#allocation36_spill] sm:$0xff] }
 0x571   :  { %v6551_v48 = vrot.slane %v6550_v14, 2  ;;  %v6568_v13 = vmax.f32 %v6566_v19, %v6567_v26 }
 0x572   :  { %v6560_v62 = vrot.slane %v6559_v30, 2  ;;  %v6577_v6 = vmax.f32 %v6575_v44, %v6576_v7 }
 0x573   :  { %v6552_v63 = vmax.f32 %v6550_v14, %v6551_v48  ;;  %v6569_v61 = vrot.slane %v6568_v13, 2  ;;  %11963 = vmatpush3.bf16.xpose.msra.mxu0 %v20090_v2  ;;  %v20095_v14 = vld [vmem:[#allocation49_spill] sm:$0xff] }
 0x574   :  { %v6561_v8 = vmax.f32 %v6559_v30, %v6560_v62  ;;  %v6578_v33 = vrot.slane %v6577_v6, 2  ;;  %11965 = vmatprep.subr.bf16.mxu0 %v20091_v43  ;;  %v20094_v62 = vld [vmem:[#allocation45_spill] sm:$0xff] }
 0x575   :  { %v6553_v0 = vrot.slane %v6552_v63, 1  ;;  %v6570_v38 = vmax.f32 %v6568_v13, %v6569_v61  ;;  %12155 = vmatpush3.bf16.xpose.msra.mxu1 %v20092_v55  ;;  %v20096_v61 = vld [vmem:[#allocation65_spill] sm:$0xff] }
 0x576   :  { %v6562_v57 = vrot.slane %v6561_v8, 1  ;;  %v6579_v52 = vmax.f32 %v6577_v6, %v6578_v33  ;;  %12157 = vmatprep.subr.bf16.mxu1 %v20093_v23 }
 0x577   :  { %v6554_v58 = vmax.f32 %v6552_v63, %v6553_v0  ;;  %v6571_v19 = vrot.slane %v6570_v38, 1 }
 0x578   :  { %v6563_v26 = vmax.f32 %v6561_v8, %v6562_v57  ;;  %v6580_v44 = vrot.slane %v6579_v52, 1  ;;  %v20097_v8 = vld [vmem:[#allocation13_spill] sm:$0xff] }
 0x579   :  { %vm6582_vm10 = vcmp.eq.f32.partialorder %v17518_v45, %v6554_v58  ;;  %vm6586_vm11 = vcmp.eq.f32.partialorder %v5625_v28, %v6554_v58  ;;  %v6572_v7 = vmax.f32 %v6570_v38, %v6571_v19 }
 0x57a   :  { %v6590_v48 = vsel %vm6582_vm10, %v20094_v62, 10.0  ;;  %v6594_v30 = vsel %vm6586_vm11, %v20095_v14, 10.0  ;;  %vm6583_vm12 = vcmp.eq.f32.partialorder %v17520_v50, %v6563_v26  ;;  %vm6587_vm13 = vcmp.eq.f32.partialorder %v17530_v56, %v6563_v26 }
 0x57b   :  { %v6598_v13 = vsel %vm2102_vm3, %v6590_v48, inf  ;;  %v6599_v33 = vsel %vm2104_vm4, %v6594_v30, inf  ;;  %vm6584_vm15 = vcmp.eq.f32.partialorder %v17523_v39, %v6572_v7  ;;  %vm6588_vm1 = vcmp.eq.f32.partialorder %v6529_v32, %v6572_v7  ;;  %11967 = vmatpush3.bf16.xpose.msra.mxu0 %v20096_v61  ;;  %v20098_v32 = vld [vmem:[#allocation54_spill] sm:$0xff]  ;;  %v20099_v30 = vld [vmem:[#allocation56_spill] sm:$0xff] }
 0x57c   :  { %v6600_v63 = vmin.f32 %v6598_v13, %v6599_v33  ;;  %v6592_v6 = vsel %vm6584_vm15, %v20094_v62, 10.0  ;;  %v6596_v0 = vsel %vm6588_vm1, %v20095_v14, 10.0  ;;  %v6591_v28 = vsel %vm6583_vm12, %v20094_v62, 10.0  ;;  %11969 = vmatprep.subr.bf16.mxu0 %v20097_v8 }
 0x57d   :  { %v6616_v56 = vsel %vm2102_vm3, %v6592_v6, inf  ;;  %v6617_v38 = vsel %vm2104_vm4, %v6596_v0, inf  ;;  %v6595_v57 = vsel %vm6587_vm13, %v20095_v14, 10.0  ;;  %v6607_v58 = vsel %vm2102_vm3, %v6591_v28, inf  ;;  %12159 = vmatpush3.bf16.xpose.msra.mxu1 %v20098_v32 }
 0x57e   :  { %v6601_v19 = vrot.slane %v6600_v63, 4  ;;  %v6618_v26 = vmin.f32 %v6616_v56, %v6617_v38  ;;  %v6608_v7 = vsel %vm2104_vm4, %v6595_v57, inf  ;;  %v6581_v48 = vmax.f32 %v6579_v52, %v6580_v44  ;;  %12161 = vmatprep.subr.bf16.mxu1 %v20099_v30  ;;  %v20100_v57 = vld [vmem:[#allocation52_spill] sm:$0xff] }
 0x57f   :  { %v6609_v13 = vmin.f32 %v6607_v58, %v6608_v7 }
 0x580   :  { %v6602_v33 = vmin.f32 %v6600_v63, %v6601_v19  ;;  %v6619_v8 = vrot.slane %v6618_v26, 4  ;;  %vm6585_vm2 = vcmp.eq.f32.partialorder %v17525_v47, %v6581_v48  ;;  %vm6589_vm5 = vcmp.eq.f32.partialorder %v17540_v10, %v6581_v48  ;;  %v20101_v10 = vld [vmem:[#allocation61_spill] sm:$0xff] }
 0x581   :  { %v6610_v6 = vrot.slane %v6609_v13, 4  ;;  %v6593_v0 = vsel %vm6585_vm2, %v20094_v62, 10.0  ;;  %v6597_v28 = vsel %vm6589_vm5, %v20095_v14, 10.0  ;;  %v6534_v63 = vmul.f32 2.0, %v17518_v45  ;;  %v20102_v62 = vld [vmem:[#allocation74_spill] sm:$0xff]  ;;  %v20103_v14 = vld [vmem:[#allocation48_spill] sm:$0xff] }
 0x582   :  { %v6603_v32 = vrot.slane %v6602_v33, 2  ;;  %v6620_v61 = vmin.f32 %v6618_v26, %v6619_v8  ;;  %v6625_v56 = vsel %vm2102_vm3, %v6593_v0, inf  ;;  %v6626_v52 = vsel %vm2104_vm4, %v6597_v28, inf }
 0x583   :  { %v6611_v44 = vmin.f32 %v6609_v13, %v6610_v6  ;;  %v6627_v38 = vmin.f32 %v6625_v56, %v6626_v52  ;;  %11971 = vmatpush3.bf16.xpose.msra.mxu0 %v20100_v57  ;;  %v6536_v8 = vmul.f32 2.0, %v17523_v39  ;;  %v6535_v13 = vmul.f32 2.0, %v17520_v50 }
 0x584   :  { %v6604_v58 = vmin.f32 %v6602_v33, %v6603_v32  ;;  %v6621_v19 = vrot.slane %v6620_v61, 2  ;;  %11973 = vmatprep.subr.bf16.mxu0 %v20101_v10  ;;  %v8948_v56 = vadd.f32 -1.0, %v6534_v63  ;;  %v20104_v33 = vand.u32 4294901760, %v20020_v36 }
 0x585   :  { %v6612_v7 = vrot.slane %v6611_v44, 2  ;;  %v6628_v48 = vrot.slane %v6627_v38, 4  ;;  %12163 = vmatpush3.bf16.xpose.msra.mxu1 %v20102_v62  ;;  %v20105_v52 = vand.u32 4294901760, %v16500_v54  ;;  %v20106_v39 = vand.u32 4294901760, %v16502_v53  ;;  %v20109_v53 = vld [vmem:[#allocation75_spill] sm:$0xff] }
 0x586   :  { %v6605_v26 = vrot.slane %v6604_v58, 1  ;;  %v6622_v0 = vmin.f32 %v6620_v61, %v6621_v19  ;;  %12165 = vmatprep.subr.bf16.mxu1 %v20103_v14  ;;  %v20107_v61 = vand.u32 4294901760, %v16508_v37  ;;  %v8950_v14 = vadd.f32 -1.0, %v6536_v8 }
 0x587   :  { %v6613_v6 = vmin.f32 %v6611_v44, %v6612_v7  ;;  %v6629_v28 = vmin.f32 %v6627_v38, %v6628_v48  ;;  %v11976_v10 = vpack.c.bf16 %v20105_v52, %v20104_v33  ;;  %v6537_v50 = vmul.f32 2.0, %v17525_v47  ;;  %v20108_v48 = vld [vmem:[#allocation8_spill] sm:$0xff] }
 0x588   :  { %v6606_v45 = vmin.f32 %v6604_v58, %v6605_v26  ;;  %v6623_v32 = vrot.slane %v6622_v0, 1  ;;  %v12168_v19 = vpack.c.bf16 %v20107_v61, %v20106_v39  ;;  %v8949_v63 = vadd.f32 -1.0, %v6535_v13 }
 0x589   :  { %v6614_v57 = vrot.slane %v6613_v6, 1  ;;  %v6630_v62 = vrot.slane %v6629_v28, 2  ;;  %v6542_v36 = vmul.f32 0.1, %v8948_v56  ;;  %v6544_v37 = vmul.f32 0.1, %v8950_v14 }
 0x58a   :  { %v6634_v44 = vmul.f32 0.1, %v6606_v45  ;;  %v6624_v38 = vmin.f32 %v6622_v0, %v6623_v32  ;;  %v8951_v39 = vadd.f32 -1.0, %v6537_v50  ;;  %v6543_v47 = vmul.f32 0.1, %v8949_v63 }
 0x58b   :  { %v6615_v58 = vmin.f32 %v6613_v6, %v6614_v57  ;;  %v6631_v7 = vmin.f32 %v6629_v28, %v6630_v62  ;;  %11975 = vmatpush3.bf16.xpose.msra.mxu0 %v20108_v48  ;;  %v20110_v62 = vand.u32 4294901760, %v16759_v29  ;;  %v20111_v57 = vand.u32 4294901760, %v16772_v3 }
 0x58c   :  { %v6638_v54 = vadd.f32 0.05, %v6634_v44  ;;  %v6636_v26 = vmul.f32 0.1, %v6624_v38  ;;  %11977 = vmatprep.subr.bf16.mxu0 %v11976_v10  ;;  %v20112_v10 = vand.u32 4294901760, %v20025_v59  ;;  %v20113_v45 = vand.u32 4294901760, %v20024_v11 }
 0x58d   :  { %v6635_v33 = vmul.f32 0.1, %v6615_v58  ;;  %v6632_v52 = vrot.slane %v6631_v7, 1  ;;  %12167 = vmatpush3.bf16.xpose.msra.mxu1 %v20109_v53  ;;  %v11978_v6 = vpack.c.bf16 %v20111_v57, %v20110_v62  ;;  %v20114_v44 = vand.u32 4294901760, %v16854_v4 }
 0x58e   :  { %v6642_v8 = vadd.f32 %v6638_v54, %v6542_v36  ;;  %v6640_v61 = vadd.f32 0.05, %v6636_v26  ;;  %12169 = vmatprep.subr.bf16.mxu1 %v12168_v19  ;;  %v11980_v32 = vpack.c.bf16 %v20113_v45, %v20112_v10  ;;  %v20115_v19 = vand.u32 4294901760, %v16868_v31  ;;  %v20118_v54 = vld [vmem:[#allocation84_spill] sm:$0xff] }
 0x58f   :  { %v6639_v0 = vadd.f32 0.05, %v6635_v33  ;;  %v6633_v13 = vmin.f32 %v6631_v7, %v6632_v52  ;;  %v6545_v63 = vmul.f32 0.1, %v8951_v39  ;;  %v20116_v3 = vand.u32 4294901760, %v20027_v5 }
 0x590   :  { %v6646_v28 = vmax.f32 %v6642_v8, 0.0  ;;  %v6644_v56 = vadd.f32 %v6640_v61, %v6544_v37  ;;  %v12170_v38 = vpack.c.bf16 %v20115_v19, %v20114_v44  ;;  %v20117_v29 = vand.u32 4294901760, %v16586_v51  ;;  %v20134_v44 = vld [vmem:[#allocation90_spill] sm:$0xff] }
 0x591   :  { %v6643_v14 = vadd.f32 %v6639_v0, %v6543_v47  ;;  %v6637_v50 = vmul.f32 0.1, %v6633_v13  ;;  %v20119_v33 = vand.u32 4294901760, %v16600_v27  ;;  %v20120_v52 = vand.u32 4294901760, %v16602_v42 }
 0x592   :  { %10405 = vmatmul.mubr.f32.vlgmr.msra.gmra.mrb[12].mxu0 %v20077_v34  ;;  %v12172_v58 = vpack.c.bf16 %v20117_v29, %v20116_v3  ;;  %v6650_v7 = vmin.f32 %v6646_v28, 1.0  ;;  %v6648_v59 = vmax.f32 %v6644_v56, 0.0  ;;  %v20122_v39 = vand.u32 4294901760, %v16659_v21 }
 0x593   :  { %v6647_v36 = vmax.f32 %v6643_v14, 0.0  ;;  %v6641_v11 = vadd.f32 0.05, %v6637_v50  ;;  %11979 = vmatpush3.bf16.xpose.msra.mxu0 %v11978_v6  ;;  %10406 = vmatprep.mubr.f32.mxu0 %v20118_v54  ;;  %v11982_v37 = vpack.c.bf16 %v20120_v52, %v20119_v33  ;;  %v20123_v47 = vand.u32 4294901760, %v17085_v12  ;;  %v20155_v52 = vld [vmem:[#allocation35_spill] sm:$0xff] }
 0x594   :  { %10621 = vmatmul.mubr.f32.vlgmr.msra.gmra.mrb[12].mxu1 %v20077_v34  ;;  %11981 = vmatprep.subr.bf16.mxu0 %v11980_v32  ;;  %v6652_v51 = vmin.f32 %v6648_v59, 1.0  ;;  %v20121_v34 = vand.u32 4294901760, %v16649_v20  ;;  %v20124_v0 = vand.u32 4294901760, %v17096_v16  ;;  %v20125_v27 = vand.u32 4294901760, %v16661_v18  ;;  %v20127_v20 = vld [vmem:[#allocation47_spill] sm:$0xff] }
 0x595   :  { %v6651_v4 = vmin.f32 %v6647_v36, 1.0  ;;  %v6645_v31 = vadd.f32 %v6641_v11, %v6545_v63  ;;  %12171 = vmatpush3.bf16.xpose.msra.mxu1 %v12170_v38  ;;  %10622 = vmatprep.mubr.f32.mxu1 %v20118_v54  ;;  %v20126_v42 = vand.u32 4294901760, %v16666_v46  ;;  %v20128_v16 = vand.u32 4294901760, %v20033_v15  ;;  %v20136_v38 = vld [vmem:[#allocation22_spill] sm:$0xff]  ;;  %v20146_v36 = vld [vmem:[#allocation24_spill] sm:$0xff] }
 0x596   :  { %12173 = vmatprep.subr.bf16.mxu1 %v12172_v58  ;;  %10407 = vmatmul.mubr.f32.gmra.mrb[14].mxu0 %v20118_v54  ;;  %v11984_v8 = vpack.c.bf16 %v20122_v39, %v20121_v34  ;;  %v12174_v13 = vpack.c.bf16 %v20124_v0, %v20123_v47  ;;  %v20129_v28 = vand.u32 4294901760, %v16676_v1  ;;  %v20130_v18 = vand.u32 4294901760, %v20036_v60  ;;  %v20157_v34 = vld [vmem:[#allocation44_spill] sm:$0xff] }
 0x597   :  { %v6658_v5 = vcombine.low %v6650_v7, %v6651_v4  ;;  %v6649_v26 = vmax.f32 %v6645_v31, 0.0  ;;  %10440 = vmatprep.mubr.msk.f32.mxu0 %vm83_vm0, %v19215_v9  ;;  %v12176_v62 = vpack.c.bf16 %v20126_v42, %v20125_v27  ;;  %v20131_v46 = vand.u32 4294901760, %v20035_v35  ;;  %v20144_v7 = vld [vmem:[#allocation21_spill] sm:$0xff]  ;;  %v20149_v31 = vld [vmem:[#allocation43_spill] sm:$0xff] }
 0x598   :  { %10623 = vmatmul.mubr.f32.gmra.mrb[14].mxu1 %v20118_v54  ;;  %v11986_v56 = vpack.c.bf16 %v20129_v28, %v20128_v16  ;;  %v20132_v32 = vand.u32 4294901760, %v17135_v41  ;;  %v20133_v14 = vand.u32 4294901760, %v17146_v24  ;;  %v20135_v19 = vand.u32 4294901760, %v20134_v44  ;;  %v20140_v41 = vld [vmem:[#allocation58_spill] sm:$0xff]  ;;  %v20163_v27 = vld [vmem:[#allocation87_spill] sm:$0xff] }
 0x599   :  { %v6653_v61 = vmin.f32 %v6649_v26, 1.0  ;;  %10656 = vmatprep.mubr.msk.f32.mxu1 %vm83_vm0, %v19215_v9  ;;  %v6666_v57 = vrot.slane %v6658_v5, %v20127_v20  ;;  %v11988_v10 = vpack.c.bf16 %v20131_v46, %v20130_v18  ;;  %v20137_v63 = vand.u32 4294901760, %v20136_v38  ;;  %v20169_v16 = vld [vmem:[#allocation2_spill] sm:$0xff]  ;;  %v20171_v18 = vld [vmem:[#allocation16_spill] sm:$0xff]  ;;  %v20177_v44 = vld [vmem:[#allocation11_spill] sm:$0xff] }
 0x59a   :  { %v12178_v50 = vpack.c.bf16 %v20133_v14, %v20132_v32  ;;  %v20139_v1 = vand.u32 4294901760, %v20044_v17  ;;  %v20141_v24 = vand.u32 4294901760, %v20140_v41  ;;  %v20142_v60 = vand.u32 4294901760, %v20047_v22  ;;  %v20151_v17 = vld [vmem:[#allocation32_spill] sm:$0xff]  ;;  %v20153_v22 = vld [vmem:[#allocation31_spill] sm:$0xff]  ;;  %v20175_v14 = vld [vmem:[#allocation17_spill] sm:$0xff] }
 0x59b   :  { %v6659_v21 = vcombine.low %v6652_v51, %v6653_v61  ;;  %11983 = vmatpush3.bf16.xpose.msra.mxu0 %v11982_v37  ;;  %v12180_v15 = vpack.c.bf16 %v20137_v63, %v20135_v19  ;;  %v20143_v29 = vand.u32 4294901760, %v20046_v40  ;;  %v20145_v59 = vand.u32 4294901760, %v20144_v7  ;;  %v20159_v61 = vld [vmem:[#allocation23_spill] sm:$0xff]  ;;  %v20179_v63 = vld [vmem:[#allocation25_spill] sm:$0xff] }
 0x59c   :  { %11985 = vmatprep.subr.bf16.mxu0 %v11984_v8  ;;  %v11990_v35 = vpack.c.bf16 %v20141_v24, %v20139_v1  ;;  %v20147_v11 = vand.u32 4294901760, %v20146_v36  ;;  %v20148_v4 = vand.u32 4294901760, %v20049_v49  ;;  %v20150_v51 = vand.u32 4294901760, %v20149_v31  ;;  %v20161_v49 = vld [vmem:[#allocation30_spill] sm:$0xff]  ;;  %v20181_v1 = vld [vmem:[#allocation57_spill] sm:$0xff] }
 0x59d   :  { %v6673_v6 = vrot.slane %v6659_v21, %v20127_v20  ;;  %12175 = vmatpush3.bf16.xpose.msra.mxu1 %v12174_v13  ;;  %v11992_v58 = vpack.c.bf16 %v20143_v29, %v20142_v60  ;;  %v20152_v26 = vand.u32 4294901760, %v20151_v17  ;;  %v20154_v33 = vand.u32 4294901760, %v20153_v22  ;;  %v20185_v29 = vld [vmem:[#allocation55_spill] sm:$0xff]  ;;  %v20191_v31 = vld [vmem:[#allocation5_spill] sm:$0xff]  ;;  %v20195_v22 = vld [vmem:[#allocation50_spill] sm:$0xff] }
 0x59e   :  { %12177 = vmatprep.subr.bf16.mxu1 %v12176_v62  ;;  %v12182_v54 = vpack.c.bf16 %v20147_v11, %v20145_v59  ;;  %v12184_v5 = vpack.c.bf16 %v20150_v51, %v20148_v4  ;;  %v20156_v37 = vand.u32 4294901760, %v20155_v52  ;;  %v20158_v39 = vand.u32 4294901760, %v20157_v34  ;;  %v20165_v62 = vld [vmem:[#allocation62_spill] sm:$0xff]  ;;  %v20187_v59 = vld [vmem:[#allocation28_spill] sm:$0xff]  ;;  %v20199_v34 = vld [vmem:[#allocation67_spill] sm:$0xff] }
 0x59f   :  { %v6674_v12 = vcombine.low %v6666_v57, %v6673_v6  ;;  %v11994_v40 = vpack.c.bf16 %v20154_v33, %v20152_v26  ;;  %v20160_v47 = vand.u32 4294901760, %v20159_v61  ;;  %v20162_v0 = vand.u32 4294901760, %v20161_v49  ;;  %v20167_v6 = vld [vmem:[#allocation77_spill] sm:$0xff]  ;;  %v20189_v11 = vld [vmem:[#allocation42_spill] sm:$0xff]  ;;  %v20203_v49 = vld [vmem:[#allocation68_spill] sm:$0xff] }
 0x5a0   :  { %v11996_v8 = vpack.c.bf16 %v20158_v39, %v20156_v37  ;;  %v20164_v42 = vand.u32 4294901760, %v20163_v27  ;;  %v20166_v57 = vand.u32 4294901760, %v20165_v62  ;;  %v20170_v28 = vand.u32 4294901760, %v20169_v16  ;;  %v20207_v62 = vld [vmem:[#allocation72_spill] sm:$0xff]  ;;  %v20212_v16 = vld [vmem:[#allocation15_spill] sm:$0xff] }
 0x5a1   :  { %v6681_v45 = vrot.slane %v6674_v12, %v20127_v20  ;;  %v12186_v13 = vpack.c.bf16 %v20162_v0, %v20160_v47  ;;  %v20168_v12 = vand.u32 4294901760, %v20167_v6  ;;  %v20172_v46 = vand.u32 4294901760, %v20171_v18  ;;  %v20210_v6 = vld [vmem:[#allocation81_spill] sm:$0xff]  ;;  %v20215_v18 = vld [vmem:[#allocation10_spill] sm:$0xff] }
 0x5a2   :  { %v12188_v21 = vpack.c.bf16 %v20166_v57, %v20164_v42  ;;  %v20178_v19 = vand.u32 4294901760, %v20177_v44  ;;  %v20182_v41 = vand.u32 4294901760, %v20181_v1  ;;  %v20188_v36 = vand.u32 4294901760, %v20187_v59  ;;  %v20208_v57 = vld [vmem:[#allocation76_spill] sm:$0xff]  ;;  %v20222_v44 = vld [vmem:[#allocation18_spill] sm:$0xff] }
 0x5a3   :  { %6683 = vst.msk [vmem:[%s17848_s1 + $0x8] sm:$0xf] %vm14967_vm14, %v6681_v45  ;;  %11987 = vmatpush3.bf16.xpose.msra.mxu0 %v11986_v56  ;;  %v11998_v56 = vpack.c.bf16 %v20170_v28, %v20168_v12  ;;  %v20192_v51 = vand.u32 4294901760, %v20191_v31  ;;  %v20196_v33 = vand.u32 4294901760, %v20195_v22  ;;  %v20200_v39 = vand.u32 4294901760, %v20199_v34  ;;  %v20211_v12 = vld [vmem:[#allocation59_spill] sm:$0xff] }
 0x5a4   :  { %11989 = vmatprep.subr.bf16.mxu0 %v11988_v10  ;;  %v20173_v10 = vld [vmem:[#allocation19_spill] sm:$0xff]  ;;  %v20204_v0 = vand.u32 4294901760, %v20203_v49  ;;  %v20213_v28 = vld [vmem:[#allocation80_spill] sm:$0xff]  ;;  %v20227_v1 = vld [vmem:[#allocation54_spill] sm:$0xff] }
 0x5a5   :  { %12179 = vmatpush3.bf16.xpose.msra.mxu1 %v12178_v50  ;;  %v20174_v45 = vand.u32 4294901760, %v20173_v10  ;;  %v20176_v50 = vand.u32 4294901760, %v20175_v14  ;;  %v20217_v10 = vld [vmem:[#allocation46_spill] sm:$0xff]  ;;  %v20220_v14 = vld [vmem:[#allocation63_spill] sm:$0xff] }
 0x5a6   :  { %12181 = vmatprep.subr.bf16.mxu1 %v12180_v15  ;;  %v20180_v15 = vand.u32 4294901760, %v20179_v63  ;;  %v20225_v63 = vld [vmem:[#allocation65_spill] sm:$0xff] }
 0x5a7   :  { %v12000_v32 = vpack.c.bf16 %v20174_v45, %v20172_v46  ;;  %v12190_v38 = vpack.c.bf16 %v20178_v19, %v20176_v50  ;;  %v20216_v46 = vld [vmem:[#allocation12_spill] sm:$0xff]  ;;  %v20218_v45 = vld [vmem:[#allocation70_spill] sm:$0xff]  ;;  %v20221_v50 = vld [vmem:[#allocation41_spill] sm:$0xff] }
 0x5a8   :  { %v12192_v24 = vpack.c.bf16 %v20182_v41, %v20180_v15  ;;  %v20223_v19 = vld [vmem:[#allocation34_spill] sm:$0xff]  ;;  %v20226_v15 = vld [vmem:[#allocation13_spill] sm:$0xff]  ;;  %v20228_v41 = vld [vmem:[#allocation52_spill] sm:$0xff] }
 0x5ab   :  { %11991 = vmatpush3.bf16.xpose.msra.mxu0 %v11990_v35  ;;  %v20183_v35 = vld [vmem:[#allocation64_spill] sm:$0xff] }
 0x5ac   :  { %11993 = vmatprep.subr.bf16.mxu0 %v11992_v58  ;;  %v20184_v60 = vand.u32 4294901760, %v20183_v35  ;;  %v20186_v58 = vand.u32 4294901760, %v20185_v29 }
 0x5ad   :  { %12183 = vmatpush3.bf16.xpose.msra.mxu1 %v12182_v54  ;;  %v20190_v54 = vand.u32 4294901760, %v20189_v11 }
 0x5ae   :  { %12185 = vmatprep.subr.bf16.mxu1 %v12184_v5  ;;  %v12002_v7 = vpack.c.bf16 %v20186_v58, %v20184_v60  ;;  %v20193_v5 = vld [vmem:[#allocation69_spill] sm:$0xff] }
 0x5af   :  { %v12004_v4 = vpack.c.bf16 %v20190_v54, %v20188_v36  ;;  %v20194_v17 = vand.u32 4294901760, %v20193_v5 }
 0x5b1   :  { %v12194_v26 = vpack.c.bf16 %v20194_v17, %v20192_v51 }
 0x5b3   :  { %11995 = vmatpush3.bf16.xpose.msra.mxu0 %v11994_v40  ;;  %v20197_v40 = vld [vmem:[#allocation86_spill] sm:$0xff] }
 0x5b4   :  { %11997 = vmatprep.subr.bf16.mxu0 %v11996_v8  ;;  %v20198_v52 = vand.u32 4294901760, %v20197_v40  ;;  %v20201_v8 = vld [vmem:[#allocation14_spill] sm:$0xff] }
 0x5b5   :  { %12187 = vmatpush3.bf16.xpose.msra.mxu1 %v12186_v13  ;;  %v20202_v61 = vand.u32 4294901760, %v20201_v8  ;;  %v20205_v13 = vld [vmem:[#allocation4_spill] sm:$0xff] }
 0x5b6   :  { %12189 = vmatprep.subr.bf16.mxu1 %v12188_v21  ;;  %v12196_v37 = vpack.c.bf16 %v20198_v52, %v20196_v33  ;;  %v20206_v27 = vand.u32 4294901760, %v20205_v13  ;;  %v20209_v21 = vld [vmem:[#allocation82_spill] sm:$0xff] }
 0x5b7   :  { %v12006_v47 = vpack.c.bf16 %v20202_v61, %v20200_v39 }
 0x5b8   :  { %v12198_v42 = vpack.c.bf16 %v20206_v27, %v20204_v0 }
 0x5bb   :  { %11999 = vmatpush3.bf16.xpose.msra.mxu0 %v11998_v56  ;;  %v20214_v56 = vld [vmem:[#allocation29_spill] sm:$0xff] }
 0x5bc   :  { %12001 = vmatprep.subr.bf16.mxu0 %v12000_v32  ;;  %v20219_v32 = vld [vmem:[#allocation71_spill] sm:$0xff] }
 0x5bd   :  { %12191 = vmatpush3.bf16.xpose.msra.mxu1 %v12190_v38  ;;  %v20224_v38 = vld [vmem:[#allocation20_spill] sm:$0xff] }
 0x5be   :  { %12193 = vmatprep.subr.bf16.mxu1 %v12192_v24  ;;  %v20229_v24 = vld [vmem:[#allocation61_spill] sm:$0xff] }
 0x5c3   :  { %12003 = vmatpush3.bf16.xpose.msra.mxu0 %v12002_v7 }
 0x5c4   :  { %12005 = vmatprep.subr.bf16.mxu0 %v12004_v4 }
 0x5c5   :  { %12195 = vmatpush3.bf16.xpose.msra.mxu1 %v12194_v26 }
 0x5c6   :  { %12197 = vmatprep.subr.bf16.mxu1 %v12196_v37 }
 0x5cb   :  { %12007 = vmatpush3.bf16.xpose.msra.mxu0 %v12006_v47 }
 0x5cc   :  { %12009 = vmatprep.subr.bf16.mxu0 %v20207_v62 }
 0x5cd   :  { %12199 = vmatpush3.bf16.xpose.msra.mxu1 %v12198_v42 }
 0x5ce   :  { %12201 = vmatprep.subr.bf16.mxu1 %v20208_v57 }
 0x5d2   :  { %10441 = vmatmul.mubr.msk.f32.vlgmr.msra.gmra.mrb[12].mxu0 %vm83_vm0, %v19215_v9 }
 0x5d3   :  { %12011 = vmatpush3.bf16.xpose.msra.mxu0 %v20209_v21  ;;  %10442 = vmatprep.mubr.msk.f32.mxu0 %vm83_vm0, %v20210_v6 }
 0x5d4   :  { %10657 = vmatmul.mubr.msk.f32.vlgmr.msra.gmra.mrb[12].mxu1 %vm83_vm0, %v19215_v9  ;;  %12013 = vmatprep.subr.bf16.mxu0 %v20211_v12 }
 0x5d5   :  { %12203 = vmatpush3.bf16.xpose.msra.mxu1 %v20212_v16  ;;  %10658 = vmatprep.mubr.msk.f32.mxu1 %vm83_vm0, %v20210_v6 }
 0x5d6   :  { %12205 = vmatprep.subr.bf16.mxu1 %v20213_v28  ;;  %10443 = vmatmul.mubr.msk.f32.gmra.mrb[14].mxu0 %vm83_vm0, %v20210_v6  ;;  %v20232_v28 = vld [vmem:[#allocation45_spill] sm:$0xff] }
 0x5d7   :  { %10476 = vmatprep.mubr.msk.f32.mxu0 %vm83_vm0, %v19215_v9 }
 0x5d8   :  { %10659 = vmatmul.mubr.msk.f32.gmra.mrb[14].mxu1 %vm83_vm0, %v20210_v6 }
 0x5d9   :  { %10692 = vmatprep.mubr.msk.f32.mxu1 %vm83_vm0, %v19215_v9 }
 0x5db   :  { %12015 = vmatpush3.bf16.xpose.msra.mxu0 %v20214_v56 }
 0x5dc   :  { %12017 = vmatprep.subr.bf16.mxu0 %v20215_v18  ;;  %v20233_v18 = vld [vmem:[#allocation49_spill] sm:$0xff] }
 0x5dd   :  { %12207 = vmatpush3.bf16.xpose.msra.mxu1 %v20216_v46 }
 0x5de   :  { %12209 = vmatprep.subr.bf16.mxu1 %v20217_v10 }
 0x5e3   :  { %12019 = vmatpush3.bf16.xpose.msra.mxu0 %v20218_v45 }
 0x5e4   :  { %12021 = vmatprep.subr.bf16.mxu0 %v20219_v32 }
 0x5e5   :  { %12211 = vmatpush3.bf16.xpose.msra.mxu1 %v20220_v14 }
 0x5e6   :  { %12213 = vmatprep.subr.bf16.mxu1 %v20221_v50 }
 0x5eb   :  { %12023 = vmatpush3.bf16.xpose.msra.mxu0 %v20222_v44 }
 0x5ec   :  { %12025 = vmatprep.subr.bf16.mxu0 %v20223_v19 }
 0x5ed   :  { %12215 = vmatpush3.bf16.xpose.msra.mxu1 %v20224_v38 }
 0x5ee   :  { %12217 = vmatprep.subr.bf16.mxu1 %v20089_v25  ;;  %v20230_v25 = vld [vmem:[#allocation74_spill] sm:$0xff] }
 0x5f3   :  { %12027 = vmatpush3.bf16.xpose.msra.mxu0 %v20090_v2  ;;  %v20231_v2 = vld [vmem:[#allocation48_spill] sm:$0xff] }
 0x5f4   :  { %12029 = vmatprep.subr.bf16.mxu0 %v20091_v43 }
 0x5f5   :  { %12219 = vmatpush3.bf16.xpose.msra.mxu1 %v20092_v55 }
 0x5f6   :  { %12221 = vmatprep.subr.bf16.mxu1 %v20093_v23 }
 0x5fb   :  { %12031 = vmatpush3.bf16.xpose.msra.mxu0 %v20225_v63 }
 0x5fc   :  { %12033 = vmatprep.subr.bf16.mxu0 %v20226_v15 }
 0x5fd   :  { %12223 = vmatpush3.bf16.xpose.msra.mxu1 %v20227_v1 }
 0x5fe   :  { %12225 = vmatprep.subr.bf16.mxu1 %v20099_v30 }
 0x603   :  { %12035 = vmatpush3.bf16.xpose.msra.mxu0 %v20228_v41 }
 0x604   :  { %12037 = vmatprep.subr.bf16.mxu0 %v20229_v24 }
 0x605   :  { %12227 = vmatpush3.bf16.xpose.msra.mxu1 %v20230_v25 }
 0x606   :  { %12229 = vmatprep.subr.bf16.mxu1 %v20231_v2 }
 0x60b   :  { %12039 = vmatpush3.bf16.xpose.msra.mxu0 %v20108_v48 }
 0x60d   :  { %12231 = vmatpush3.bf16.xpose.msra.mxu1 %v20109_v53 }
 0x612   :  { %10477 = vmatmul.mubr.msk.f32.vlgmr.msra.gmra.mrb[12].mxu0 %vm83_vm0, %v19215_v9 }
 0x613   :  { %10478 = vmatprep.mubr.msk.f32.mxu0 %vm83_vm0, %v20210_v6 }
 0x614   :  { %10693 = vmatmul.mubr.msk.f32.vlgmr.msra.gmra.mrb[12].mxu1 %vm83_vm0, %v19215_v9 }
 0x615   :  { %10694 = vmatprep.mubr.msk.f32.mxu1 %vm83_vm0, %v20210_v6 }
 0x616   :  { %10479 = vmatmul.mubr.msk.f32.gmra.mrb[14].mxu0 %vm83_vm0, %v20210_v6 }
 0x618   :  { %10695 = vmatmul.mubr.msk.f32.gmra.mrb[14].mxu1 %vm83_vm0, %v20210_v6 }
 0x6e5   :  { %v17795_v43 = vpop.f32.mrb[12].mxu0 }
 0x6e6   :  { %v17797_v55 = vpop.f32.mrb[13].mxu0  ;;  %v8760_v9 = vsel %vm2102_vm3, %v17795_v43, -inf }
 0x6e7   :  { %v17799_v23 = vpop.f32.mrb[12].mxu1  ;;  %v8769_v58 = vsel %vm2102_vm3, %v17797_v55, -inf }
 0x6e8   :  { %v17801_v30 = vpop.f32.mrb[13].mxu1  ;;  %v8778_v59 = vsel %vm2102_vm3, %v17799_v23, -inf }
 0x6e9   :  { %v7839_v48 = vpop.f32.mrb[14].mxu0  ;;  %v8787_v51 = vsel %vm2102_vm3, %v17801_v30, -inf }
 0x6ea   :  { %v8761_v53 = vsel %vm2104_vm4, %v7839_v48, -inf  ;;  %v7841_v35 = vpop.f32.mrb[15].mxu0 }
 0x6eb   :  { %v8762_v60 = vmax.f32 %v8760_v9, %v8761_v53  ;;  %v8743_v29 = vpop.f32.mrb[14].mxu1  ;;  %v8770_v7 = vsel %vm2104_vm4, %v7841_v35, -inf }
 0x6ec   :  { %v8779_v36 = vsel %vm2104_vm4, %v8743_v29, -inf  ;;  %v8771_v11 = vmax.f32 %v8769_v58, %v8770_v7  ;;  %v8745_v54 = vpop.f32.mrb[15].mxu1 }
 0x6ed   :  { %v8763_v4 = vrot.slane %v8762_v60, 4  ;;  %v8780_v31 = vmax.f32 %v8778_v59, %v8779_v36  ;;  %v8788_v5 = vsel %vm2104_vm4, %v8745_v54, -inf }
 0x6ee   :  { %v8772_v17 = vrot.slane %v8771_v11, 4  ;;  %v8789_v26 = vmax.f32 %v8787_v51, %v8788_v5 }
 0x6ef   :  { %v8764_v22 = vmax.f32 %v8762_v60, %v8763_v4  ;;  %v8781_v33 = vrot.slane %v8780_v31, 4  ;;  %v8748_v4 = vmul.f32 2.0, %v17795_v43 }
 0x6f0   :  { %v8773_v40 = vmax.f32 %v8771_v11, %v8772_v17  ;;  %v8790_v52 = vrot.slane %v8789_v26, 4 }
 0x6f1   :  { %v8765_v37 = vrot.slane %v8764_v22, 2  ;;  %v8782_v34 = vmax.f32 %v8780_v31, %v8781_v33  ;;  %v8749_v33 = vmul.f32 2.0, %v17797_v55 }
 0x6f2   :  { %v8774_v39 = vrot.slane %v8773_v40, 2  ;;  %v8791_v8 = vmax.f32 %v8789_v26, %v8790_v52 }
 0x6f3   :  { %v8766_v61 = vmax.f32 %v8764_v22, %v8765_v37  ;;  %v8783_v47 = vrot.slane %v8782_v34, 2  ;;  %v8964_v37 = vadd.f32 -1.0, %v8748_v4 }
 0x6f4   :  { %v8775_v49 = vmax.f32 %v8773_v40, %v8774_v39  ;;  %v8792_v0 = vrot.slane %v8791_v8, 2 }
 0x6f5   :  { %v8767_v13 = vrot.slane %v8766_v61, 1  ;;  %v8784_v27 = vmax.f32 %v8782_v34, %v8783_v47 }
 0x6f6   :  { %v8776_v42 = vrot.slane %v8775_v49, 1  ;;  %v8793_v62 = vmax.f32 %v8791_v8, %v8792_v0 }
 0x6f7   :  { %v8768_v57 = vmax.f32 %v8766_v61, %v8767_v13  ;;  %v8785_v21 = vrot.slane %v8784_v27, 1  ;;  %v8965_v13 = vadd.f32 -1.0, %v8749_v33 }
 0x6f8   :  { %v8777_v6 = vmax.f32 %v8775_v49, %v8776_v42  ;;  %v8794_v16 = vrot.slane %v8793_v62, 1 }
 0x6f9   :  { %vm8796_vm0 = vcmp.eq.f32.partialorder %v17795_v43, %v8768_v57  ;;  %vm8800_vm6 = vcmp.eq.f32.partialorder %v7839_v48, %v8768_v57  ;;  %v8786_v12 = vmax.f32 %v8784_v27, %v8785_v21  ;;  %v8751_v43 = vmul.f32 2.0, %v17801_v30 }
 0x6fa   :  { %v8804_v56 = vsel %vm8796_vm0, %v20232_v28, 10.0  ;;  %v8808_v46 = vsel %vm8800_vm6, %v20233_v18, 10.0  ;;  %vm8797_vm7 = vcmp.eq.f32.partialorder %v17797_v55, %v8777_v6  ;;  %vm8801_vm8 = vcmp.eq.f32.partialorder %v7841_v35, %v8777_v6 }
 0x6fb   :  { %v8812_v10 = vsel %vm2102_vm3, %v8804_v56, inf  ;;  %v8813_v45 = vsel %vm2104_vm4, %v8808_v46, inf  ;;  %vm8798_vm9 = vcmp.eq.f32.partialorder %v17799_v23, %v8786_v12  ;;  %vm8802_vm10 = vcmp.eq.f32.partialorder %v8743_v29, %v8786_v12 }
 0x6fc   :  { %v8814_v32 = vmin.f32 %v8812_v10, %v8813_v45  ;;  %v8806_v14 = vsel %vm8798_vm9, %v20232_v28, 10.0  ;;  %v8810_v50 = vsel %vm8802_vm10, %v20233_v18, 10.0  ;;  %v8805_v44 = vsel %vm8797_vm7, %v20232_v28, 10.0 }
 0x6fd   :  { %v8830_v19 = vsel %vm2102_vm3, %v8806_v14, inf  ;;  %v8831_v38 = vsel %vm2104_vm4, %v8810_v50, inf  ;;  %v8809_v63 = vsel %vm8801_vm8, %v20233_v18, 10.0  ;;  %v8821_v15 = vsel %vm2102_vm3, %v8805_v44, inf }
 0x6fe   :  { %v8815_v1 = vrot.slane %v8814_v32, 4  ;;  %v8832_v41 = vmin.f32 %v8830_v19, %v8831_v38  ;;  %v8822_v24 = vsel %vm2104_vm4, %v8809_v63, inf  ;;  %v8795_v25 = vmax.f32 %v8793_v62, %v8794_v16 }
 0x6ff   :  { %v8823_v2 = vmin.f32 %v8821_v15, %v8822_v24  ;;  %v8967_v12 = vadd.f32 -1.0, %v8751_v43  ;;  %v8757_v56 = vmul.f32 0.1, %v8965_v13 }
 0x700   :  { %v8816_v48 = vmin.f32 %v8814_v32, %v8815_v1  ;;  %v8833_v9 = vrot.slane %v8832_v41, 4  ;;  %vm8799_vm11 = vcmp.eq.f32.partialorder %v17801_v30, %v8795_v25  ;;  %vm8803_vm12 = vcmp.eq.f32.partialorder %v8745_v54, %v8795_v25 }
 0x701   :  { %v8824_v53 = vrot.slane %v8823_v2, 4  ;;  %v8807_v35 = vsel %vm8799_vm11, %v20232_v28, 10.0  ;;  %v8811_v60 = vsel %vm8803_vm12, %v20233_v18, 10.0  ;;  %v8750_v54 = vmul.f32 2.0, %v17799_v23 }
 0x702   :  { %v8817_v29 = vrot.slane %v8816_v48, 2  ;;  %v8834_v58 = vmin.f32 %v8832_v41, %v8833_v9  ;;  %v8839_v7 = vsel %vm2102_vm3, %v8807_v35, inf  ;;  %v8840_v59 = vsel %vm2104_vm4, %v8811_v60, inf }
 0x703   :  { %v8825_v36 = vmin.f32 %v8823_v2, %v8824_v53  ;;  %v8841_v11 = vmin.f32 %v8839_v7, %v8840_v59  ;;  %v8966_v47 = vadd.f32 -1.0, %v8750_v54  ;;  %v8756_v23 = vmul.f32 0.1, %v8964_v37 }
 0x704   :  { %v8818_v31 = vmin.f32 %v8816_v48, %v8817_v29  ;;  %v8835_v51 = vrot.slane %v8834_v58, 2  ;;  %v8759_v14 = vmul.f32 0.1, %v8967_v12 }
 0x705   :  { %v8826_v5 = vrot.slane %v8825_v36, 2  ;;  %v8842_v17 = vrot.slane %v8841_v11, 4  ;;  %v8758_v6 = vmul.f32 0.1, %v8966_v47 }
 0x706   :  { %v8819_v26 = vrot.slane %v8818_v31, 1  ;;  %v8836_v22 = vmin.f32 %v8834_v58, %v8835_v51 }
 0x707   :  { %v8827_v40 = vmin.f32 %v8825_v36, %v8826_v5  ;;  %v8843_v52 = vmin.f32 %v8841_v11, %v8842_v17 }
 0x708   :  { %v8820_v34 = vmin.f32 %v8818_v31, %v8819_v26  ;;  %v8837_v39 = vrot.slane %v8836_v22, 1 }
 0x709   :  { %v8828_v8 = vrot.slane %v8827_v40, 1  ;;  %v8844_v61 = vrot.slane %v8843_v52, 2 }
 0x70a   :  { %v8848_v49 = vmul.f32 0.1, %v8820_v34  ;;  %v8838_v0 = vmin.f32 %v8836_v22, %v8837_v39 }
 0x70b   :  { %v8829_v27 = vmin.f32 %v8827_v40, %v8828_v8  ;;  %v8845_v42 = vmin.f32 %v8843_v52, %v8844_v61 }
 0x70c   :  { %v8852_v62 = vadd.f32 0.05, %v8848_v49  ;;  %v8850_v57 = vmul.f32 0.1, %v8838_v0 }
 0x70d   :  { %v8849_v21 = vmul.f32 0.1, %v8829_v27  ;;  %v8846_v55 = vrot.slane %v8845_v42, 1 }
 0x70e   :  { %v8856_v16 = vadd.f32 %v8852_v62, %v8756_v23  ;;  %v8854_v28 = vadd.f32 0.05, %v8850_v57 }
 0x70f   :  { %v8853_v18 = vadd.f32 0.05, %v8849_v21  ;;  %v8847_v46 = vmin.f32 %v8845_v42, %v8846_v55 }
 0x710   :  { %v8860_v10 = vmax.f32 %v8856_v16, 0.0  ;;  %v8858_v45 = vadd.f32 %v8854_v28, %v8758_v6 }
 0x711   :  { %v8857_v30 = vadd.f32 %v8853_v18, %v8757_v56  ;;  %v8851_v32 = vmul.f32 0.1, %v8847_v46 }
 0x712   :  { %v8864_v50 = vmin.f32 %v8860_v10, 1.0  ;;  %v8862_v44 = vmax.f32 %v8858_v45, 0.0 }
 0x713   :  { %v8861_v19 = vmax.f32 %v8857_v30, 0.0  ;;  %v8855_v38 = vadd.f32 0.05, %v8851_v32 }
 0x714   :  { %v8866_v1 = vmin.f32 %v8862_v44, 1.0 }
 0x715   :  { %v8865_v63 = vmin.f32 %v8861_v19, 1.0  ;;  %v8859_v15 = vadd.f32 %v8855_v38, %v8759_v14 }
 0x717   :  { %v8872_v41 = vcombine.low %v8864_v50, %v8865_v63  ;;  %v8863_v24 = vmax.f32 %v8859_v15, 0.0 }
 0x719   :  { %v8867_v25 = vmin.f32 %v8863_v24, 1.0  ;;  %v8880_v2 = vrot.slane %v8872_v41, %v20127_v20 }
 0x71b   :  { %v8873_v48 = vcombine.low %v8866_v1, %v8867_v25 }
 0x71d   :  { %v8887_v9 = vrot.slane %v8873_v48, %v20127_v20 }
 0x71f   :  { %v8888_v53 = vcombine.low %v8880_v2, %v8887_v9 }
 0x721   :  { %v8895_v35 = vrot.slane %v8888_v53, %v20127_v20 }
 0x723   :  { %8897 = vst.msk [vmem:[%s17848_s1 + $0xc] sm:$0xf] %vm14967_vm14, %v8895_v35 }

</bundles_post_ra>
